<compile_context>
chip_gen: v5e
topology: v5e:2x2
jax: 0.10.0
libtpu: 0.0.40
codegen_flags: <defaults>
</compile_context>

<pallas_src>
import math

import jax
import jax.numpy as jnp
import numpy as np
from jax.experimental import pallas as pl
from jax.experimental.pallas import tpu as pltpu


# ----------------------------- Pallas kernel ---------------------------------
def _autoreg_forward_kernel(x_ref, we_ref, be_ref, wih_ref, whh_ref, b_ref,
                            wp_ref, bp_ref, h0_ref, c0_ref,
                            logit_ref, hout_ref, cout_ref,
                            seq_scr, gx_scr):
    """All operands resident in VMEM (shapes are tiny); bp lives in SMEM.

    x_ref    : (T*B, 1)       time-major flattened tokens (n_classes = 1)
    we_ref   : (1, H)         embed weight (transposed);  be_ref: (1, H) embed bias
    wih_ref  : (L, H, 4H)     input->gates weights (transposed), gate order i,f,g,o
    whh_ref  : (L, 4, H, H)   hidden->gates weights, pre-split per gate (in, out)
    b_ref    : (L, 1, 4H)     combined bias (b_ih + b_hh)
    wp_ref   : (H, 1)         proj weight (transposed);   bp_ref: (1, 1) SMEM scalar
    h0_ref   : (B, L, H), c0_ref: (B, L, H)   incoming state
    logit_ref: (B, T)         logits in final layout (T on lanes)
    hout_ref : (B, L, H), cout_ref: (B, L, H) final state in final layout
    seq_scr  : (T*B, H) VMEM  running layer-output sequence (time-major rows)
    gx_scr   : (4, T*B, H)    hoisted per-gate input projections for current layer
    """
    TB = x_ref.shape[0]
    L = wih_ref.shape[0]
    H = whh_ref.shape[2]
    B = h0_ref.shape[0]
    T = TB // B
    cdt = wih_ref.dtype                  # matmul operand dtype (f32 or bf16)

    # ---- embed: Linear(1 -> H), fully vectorized (one store) -------------------
    seq_scr[...] = x_ref[...] * we_ref[...] + be_ref[...]        # (T*B,1)*(1,H)+(1,H)

    # ---- multi-layer LSTM (PyTorch gate order i, f, g, o) ----------------------
    for l in range(L):
        # Hoisted input->gate projection for the whole sequence: one matmul per
        # layer, off the serial recurrence chain.  Bias folded in here.
        gx_all = (jnp.dot(seq_scr[...].astype(cdt), wih_ref[l],
                          preferred_element_type=jnp.float32)
                  + b_ref[l])                                    # (T*B, 4H)
        # Split per gate once per layer (outside the time loop).
        gx_scr[0] = gx_all[:, 0:H]
        gx_scr[1] = gx_all[:, H:2 * H]
        gx_scr[2] = gx_all[:, 2 * H:3 * H]
        gx_scr[3] = gx_all[:, 3 * H:4 * H]

        h = h0_ref[:, l, :]                                      # (B, H), f32
        c = c0_ref[:, l, :]                                      # (B, H), f32
        for t in range(T):
            r0 = t * B
            hc = h.astype(cdt)
            # Four gate-split matmuls: no lane slicing of a (B, 4H) vreg needed.
            gh_i = jnp.dot(hc, whh_ref[l, 0], preferred_element_type=jnp.float32)
            gh_f = jnp.dot(hc, whh_ref[l, 1], preferred_element_type=jnp.float32)
            gh_g = jnp.dot(hc, whh_ref[l, 2], preferred_element_type=jnp.float32)
            gh_o = jnp.dot(hc, whh_ref[l, 3], preferred_element_type=jnp.float32)
            i_g = jax.nn.sigmoid(gx_scr[0, r0:r0 + B, :] + gh_i)
            f_g = jax.nn.sigmoid(gx_scr[1, r0:r0 + B, :] + gh_f)
            g_g = jnp.tanh(gx_scr[2, r0:r0 + B, :] + gh_g)
            o_g = jax.nn.sigmoid(gx_scr[3, r0:r0 + B, :] + gh_o)
            c = f_g * c + i_g * g_g
            h = o_g * jnp.tanh(c)
            seq_scr[r0:r0 + B, :] = h        # overwrite with this layer's output
        # Final state written directly in (B, L, H) layout (no wrapper transpose).
        hout_ref[:, l, :] = h
        cout_ref[:, l, :] = c

    # ---- proj: Linear(H -> 1), one matmul over the whole sequence ---------------
    lg = (jnp.dot(seq_scr[...].astype(cdt), wp_ref[...],
                  preferred_element_type=jnp.float32)
          + bp_ref[0, 0])                                        # (T*B, 1)
    # Scatter into the (B, T) output (final layout, T on lanes).
    for t in range(T):
        logit_ref[:, t:t + 1] = lg[t * B:t * B + B, :]


# ----------------------------- wrapper ---------------------------------------
def autoreg_forward(x, state, kernel_params):
    """Equivalent of AutoregressiveBase.forward(inputs, state).

    x      : (B, T, 1) float32
    state  : (h, c), each (B, L, H) float32
    returns: logits (B, T, 1), (h_out, c_out) each (B, L, H)
    """
    h0, c0 = state
    we, be, wih, whh, b, wp, bp = kernel_params
    B, T, _ = x.shape
    L = wih.shape[0]
    H = whh.shape[2]

    # Time-major flatten of the (tiny) input so the kernel sees (T*B, 1); this is
    # the only layout op left in the wrapper (outputs come back in final layout).
    x_flat = jnp.transpose(x, (1, 0, 2)).reshape(T * B, 1)

    vmem = pl.BlockSpec(memory_space=pltpu.MemorySpace.VMEM)
    smem = pl.BlockSpec(memory_space=pltpu.MemorySpace.SMEM)
    out_shapes = (
        jax.ShapeDtypeStruct((B, T), jnp.float32),
        jax.ShapeDtypeStruct((B, L, H), jnp.float32),
        jax.ShapeDtypeStruct((B, L, H), jnp.float32),
    )
    lg, h_out, c_out = pl.pallas_call(
        _autoreg_forward_kernel,
        out_shape=out_shapes,
        in_specs=[vmem, vmem, vmem, vmem, vmem, vmem, vmem, smem, vmem, vmem],
        out_specs=(vmem, vmem, vmem),
        scratch_shapes=[
            pltpu.VMEM((T * B, H), jnp.float32),      # running layer outputs
            pltpu.VMEM((4, T * B, H), jnp.float32),   # hoisted per-gate x-projections
        ],
        compiler_params=pltpu.CompilerParams(vmem_limit_bytes=32 * 1024 * 1024),
    )(x_flat, we, be, wih, whh, b, wp, bp, h0, c0)

    logits = lg[:, :, None]                           # (B, T, 1) — cheap reshape only
    return logits, (h_out, c_out)


# ----------------------------- parameter prep --------------------------------
def prepare_params(torch_params, compute_dtype=jnp.float32):
    """One-time conversion from PyTorch-style parameters to kernel layout.

    torch_params = (w_embed (H,1), b_embed (H,), w_ih (L,4H,H), w_hh (L,4H,H),
                    b_ih (L,4H), b_hh (L,4H), w_proj (1,H), b_proj (1,))
    compute_dtype: dtype of matmul operands (use jnp.bfloat16 on v5e).
    """
    w_embed, b_embed, w_ih, w_hh, b_ih, b_hh, w_proj, b_proj = torch_params
    L, H4, H = w_ih.shape
    we = w_embed.T.astype(jnp.float32)                              # (1, H)
    be = b_embed[None, :].astype(jnp.float32)                       # (1, H)
    wih = jnp.transpose(w_ih, (0, 2, 1)).astype(compute_dtype)      # (L, H, 4H)
    whh = (jnp.transpose(w_hh, (0, 2, 1))                           # (L, H, 4H)
           .reshape(L, H, 4, H)
           .transpose(0, 2, 1, 3)                                   # (L, 4, H_in, H_out)
           .astype(compute_dtype))
    b = (b_ih + b_hh)[:, None, :].astype(jnp.float32)               # (L, 1, 4H)
    wp = w_proj.T.astype(compute_dtype)                             # (H, 1)
    bp = b_proj.reshape(1, 1).astype(jnp.float32)                   # (1, 1) SMEM scalar
    return (we, be, wih, whh, b, wp, bp)


# ----------------------------- pure-JAX reference ------------------------------
def autoreg_forward_ref(x, state, torch_params):
    w_embed, b_embed, w_ih, w_hh, b_ih, b_hh, w_proj, b_proj = torch_params
    h0, c0 = state
    B, T, _ = x.shape
    L, H4, H = w_ih.shape
    seq = x @ w_embed.T + b_embed                                   # (B, T, H)
    hs, cs = [], []
    for l in range(L):
        h = h0[:, l]
        c = c0[:, l]
        outs = []
        for t in range(T):
            gates = seq[:, t] @ w_ih[l].T + b_ih[l] + h @ w_hh[l].T + b_hh[l]
            i_g = jax.nn.sigmoid(gates[:, 0:H])
            f_g = jax.nn.sigmoid(gates[:, H:2 * H])
            g_g = jnp.tanh(gates[:, 2 * H:3 * H])
            o_g = jax.nn.sigmoid(gates[:, 3 * H:4 * H])
            c = f_g * c + i_g * g_g
            h = o_g * jnp.tanh(c)
            outs.append(h)
        seq = jnp.stack(outs, axis=1)
        hs.append(h)
        cs.append(c)
    logits = seq @ w_proj.T + b_proj
    return logits, (jnp.stack(hs, axis=1), jnp.stack(cs, axis=1))


# ----------------------------- main -------------------------------------------
if __name__ == "__main__":
    # Small shapes consistent with the module: B=2, T=8 steps, hidden=32, 3 layers.
    B, T, H, L = 2, 8, 32, 3
    bound = 1.0 / math.sqrt(H)

    key = jax.random.PRNGKey(0)
    ks = jax.random.split(key, 12)

    # PyTorch-style synthetic parameters (nn.Linear / nn.LSTM layouts).
    w_embed = jax.random.uniform(ks[0], (H, 1), minval=-1.0, maxval=1.0, dtype=jnp.float32)
    b_embed = jax.random.uniform(ks[1], (H,), minval=-1.0, maxval=1.0, dtype=jnp.float32)
    w_ih = jax.random.uniform(ks[2], (L, 4 * H, H), minval=-bound, maxval=bound, dtype=jnp.float32)
    w_hh = jax.random.uniform(ks[3], (L, 4 * H, H), minval=-bound, maxval=bound, dtype=jnp.float32)
    b_ih = jax.random.uniform(ks[4], (L, 4 * H), minval=-bound, maxval=bound, dtype=jnp.float32)
    b_hh = jax.random.uniform(ks[5], (L, 4 * H), minval=-bound, maxval=bound, dtype=jnp.float32)
    w_proj = jax.random.uniform(ks[6], (1, H), minval=-bound, maxval=bound, dtype=jnp.float32)
    b_proj = jax.random.uniform(ks[7], (1,), minval=-bound, maxval=bound, dtype=jnp.float32)
    h0 = 0.001 * jax.random.normal(ks[8], (1, L, H), dtype=jnp.float32)
    c0 = 0.001 * jax.random.normal(ks[9], (1, L, H), dtype=jnp.float32)
    torch_params = (w_embed, b_embed, w_ih, w_hh, b_ih, b_hh, w_proj, b_proj)

    # Example inputs: binary "samples" fed back autoregressively + initial state.
    x = jax.random.bernoulli(ks[10], 0.5, (B, T, 1)).astype(jnp.float32)
    state = (jnp.broadcast_to(h0, (B, L, H)), jnp.broadcast_to(c0, (B, L, H)))

    # --- f32 path (v6e/v7x default) ------------------------------------------
    kparams = prepare_params(torch_params, compute_dtype=jnp.float32)
    fwd = jax.jit(autoreg_forward)
    logits, (h_out, c_out) = fwd(x, state, kparams)
    jax.block_until_ready((logits, h_out, c_out))

    ref_logits, (ref_h, ref_c) = autoreg_forward_ref(x, state, torch_params)
    assert logits.shape == (B, T, 1) and h_out.shape == (B, L, H) and c_out.shape == (B, L, H)
    np.testing.assert_allclose(np.asarray(logits), np.asarray(ref_logits), atol=1e-4, rtol=1e-4)
    np.testing.assert_allclose(np.asarray(h_out), np.asarray(ref_h), atol=1e-4, rtol=1e-4)
    np.testing.assert_allclose(np.asarray(c_out), np.asarray(ref_c), atol=1e-4, rtol=1e-4)

    # --- bf16-matmul path (v5e MXU is bf16-native); f32 accumulation & state.
    # Tight tolerances don't apply to a bf16 recurrence, so only check it runs,
    # has the right shapes, and is finite.
    kparams_bf16 = prepare_params(torch_params, compute_dtype=jnp.bfloat16)
    lg16, (h16, c16) = fwd(x, state, kparams_bf16)
    jax.block_until_ready((lg16, h16, c16))
    assert lg16.shape == (B, T, 1) and h16.shape == (B, L, H) and c16.shape == (B, L, H)
    assert bool(jnp.all(jnp.isfinite(lg16))) and bool(jnp.all(jnp.isfinite(h16))) \
        and bool(jnp.all(jnp.isfinite(c16)))

    print("KERNEL_OK")
</pallas_src>

<mosaic_0001>
module attributes {stable_mosaic.version = 11 : i64} {
  func.func @_autoreg_forward_kernel(%arg0: memref<16x1xf32, #tpu.memory_space<vmem>>, %arg1: memref<1x32xf32, #tpu.memory_space<vmem>>, %arg2: memref<1x32xf32, #tpu.memory_space<vmem>>, %arg3: memref<3x32x128xf32, #tpu.memory_space<vmem>>, %arg4: memref<3x4x32x32xf32, #tpu.memory_space<vmem>>, %arg5: memref<3x1x128xf32, #tpu.memory_space<vmem>>, %arg6: memref<32x1xf32, #tpu.memory_space<vmem>>, %arg7: memref<1x1xf32, #tpu.memory_space<smem>>, %arg8: memref<2x3x32xf32, #tpu.memory_space<vmem>>, %arg9: memref<2x3x32xf32, #tpu.memory_space<vmem>>, %arg10: memref<2x8xf32, #tpu.memory_space<vmem>>, %arg11: memref<2x3x32xf32, #tpu.memory_space<vmem>>, %arg12: memref<2x3x32xf32, #tpu.memory_space<vmem>>, %arg13: memref<16x32xf32, #tpu.memory_space<vmem>>, %arg14: memref<4x16x32xf32, #tpu.memory_space<vmem>>) attributes {dimension_semantics = [], scalar_prefetch = 0 : i64, scratch_operands = 2 : i64, tpu.core_type = #tpu.core_type<tc>} {
    %c0 = arith.constant 0 : index
    %c0_0 = arith.constant 0 : index
    %0 = vector.load %arg0[%c0, %c0_0] : memref<16x1xf32, #tpu.memory_space<vmem>>, vector<16x1xf32>
    %c0_1 = arith.constant 0 : index
    %c0_2 = arith.constant 0 : index
    %1 = vector.load %arg1[%c0_1, %c0_2] : memref<1x32xf32, #tpu.memory_space<vmem>>, vector<1x32xf32>
    %2 = vector.broadcast %0 : vector<16x1xf32> to vector<16x32xf32>
    %3 = vector.broadcast %1 : vector<1x32xf32> to vector<16x32xf32>
    %4 = arith.mulf %2, %3 : vector<16x32xf32>
    %c0_3 = arith.constant 0 : index
    %c0_4 = arith.constant 0 : index
    %5 = vector.load %arg2[%c0_3, %c0_4] : memref<1x32xf32, #tpu.memory_space<vmem>>, vector<1x32xf32>
    %6 = vector.broadcast %5 : vector<1x32xf32> to vector<16x32xf32>
    %7 = arith.addf %4, %6 : vector<16x32xf32>
    %c0_5 = arith.constant 0 : index
    %c0_6 = arith.constant 0 : index
    %8 = vector.load %arg13[%c0_5, %c0_6] : memref<16x32xf32, #tpu.memory_space<vmem>>, vector<16x32xf32>
    tpu.vector_store %arg13[%c0_5, %c0_6], %7 {strides = array<i32>} : memref<16x32xf32, #tpu.memory_space<vmem>>, vector<16x32xf32>,
    %c0_7 = arith.constant 0 : index
    %c0_8 = arith.constant 0 : index
    %9 = vector.load %arg13[%c0_7, %c0_8] : memref<16x32xf32, #tpu.memory_space<vmem>>, vector<16x32xf32>
    %c0_9 = arith.constant 0 : index
    %c0_10 = arith.constant 0 : index
    %c0_11 = arith.constant 0 : index
    %10 = vector.load %arg3[%c0_9, %c0_10, %c0_11] : memref<3x32x128xf32, #tpu.memory_space<vmem>>, vector<1x32x128xf32>
    %11 = vector.shape_cast %10 : vector<1x32x128xf32> to vector<32x128xf32>
    %cst = arith.constant dense<0.000000e+00> : vector<16x128xf32>
    %12 = tpu.matmul %9, %11, %cst {dimension_numbers = #tpu.dot_dimension_numbers<[1], [0], [0], [1], [0, 0, 1, 1], [], []>} : vector<16x32xf32>, vector<32x128xf32>, vector<16x128xf32> -> vector<16x128xf32>
    %c0_12 = arith.constant 0 : index
    %c0_13 = arith.constant 0 : index
    %c0_14 = arith.constant 0 : index
    %13 = vector.load %arg5[%c0_12, %c0_13, %c0_14] : memref<3x1x128xf32, #tpu.memory_space<vmem>>, vector<1x1x128xf32>
    %14 = vector.shape_cast %13 : vector<1x1x128xf32> to vector<1x128xf32>
    %15 = vector.broadcast %14 : vector<1x128xf32> to vector<16x128xf32>
    %16 = arith.addf %12, %15 : vector<16x128xf32>
    %17 = vector.extract_strided_slice %16 {offsets = [0, 0], sizes = [16, 32], strides = [1, 1]} : vector<16x128xf32> to vector<16x32xf32>
    %c0_15 = arith.constant 0 : index
    %c0_16 = arith.constant 0 : index
    %c0_17 = arith.constant 0 : index
    %18 = vector.load %arg14[%c0_15, %c0_16, %c0_17] : memref<4x16x32xf32, #tpu.memory_space<vmem>>, vector<1x16x32xf32>
    %19 = vector.shape_cast %18 : vector<1x16x32xf32> to vector<16x32xf32>
    %20 = vector.shape_cast %17 : vector<16x32xf32> to vector<1x16x32xf32>
    tpu.vector_store %arg14[%c0_15, %c0_16, %c0_17], %20 {strides = array<i32>} : memref<4x16x32xf32, #tpu.memory_space<vmem>>, vector<1x16x32xf32>,
    %21 = vector.extract_strided_slice %16 {offsets = [0, 32], sizes = [16, 32], strides = [1, 1]} : vector<16x128xf32> to vector<16x32xf32>
    %c1 = arith.constant 1 : index
    %c0_18 = arith.constant 0 : index
    %c0_19 = arith.constant 0 : index
    %22 = vector.load %arg14[%c1, %c0_18, %c0_19] : memref<4x16x32xf32, #tpu.memory_space<vmem>>, vector<1x16x32xf32>
    %23 = vector.shape_cast %22 : vector<1x16x32xf32> to vector<16x32xf32>
    %24 = vector.shape_cast %21 : vector<16x32xf32> to vector<1x16x32xf32>
    tpu.vector_store %arg14[%c1, %c0_18, %c0_19], %24 {strides = array<i32>} : memref<4x16x32xf32, #tpu.memory_space<vmem>>, vector<1x16x32xf32>,
    %25 = vector.extract_strided_slice %16 {offsets = [0, 64], sizes = [16, 32], strides = [1, 1]} : vector<16x128xf32> to vector<16x32xf32>
    %c2 = arith.constant 2 : index
    %c0_20 = arith.constant 0 : index
    %c0_21 = arith.constant 0 : index
    %26 = vector.load %arg14[%c2, %c0_20, %c0_21] : memref<4x16x32xf32, #tpu.memory_space<vmem>>, vector<1x16x32xf32>
    %27 = vector.shape_cast %26 : vector<1x16x32xf32> to vector<16x32xf32>
    %28 = vector.shape_cast %25 : vector<16x32xf32> to vector<1x16x32xf32>
    tpu.vector_store %arg14[%c2, %c0_20, %c0_21], %28 {strides = array<i32>} : memref<4x16x32xf32, #tpu.memory_space<vmem>>, vector<1x16x32xf32>,
    %29 = vector.extract_strided_slice %16 {offsets = [0, 96], sizes = [16, 32], strides = [1, 1]} : vector<16x128xf32> to vector<16x32xf32>
    %c3 = arith.constant 3 : index
    %c0_22 = arith.constant 0 : index
    %c0_23 = arith.constant 0 : index
    %30 = vector.load %arg14[%c3, %c0_22, %c0_23] : memref<4x16x32xf32, #tpu.memory_space<vmem>>, vector<1x16x32xf32>
    %31 = vector.shape_cast %30 : vector<1x16x32xf32> to vector<16x32xf32>
    %32 = vector.shape_cast %29 : vector<16x32xf32> to vector<1x16x32xf32>
    tpu.vector_store %arg14[%c3, %c0_22, %c0_23], %32 {strides = array<i32>} : memref<4x16x32xf32, #tpu.memory_space<vmem>>, vector<1x16x32xf32>,
    %c0_24 = arith.constant 0 : index
    %c0_25 = arith.constant 0 : index
    %c0_26 = arith.constant 0 : index
    %33 = vector.load %arg8[%c0_24, %c0_25, %c0_26] : memref<2x3x32xf32, #tpu.memory_space<vmem>>, vector<2x1x32xf32>
    %34 = vector.shape_cast %33 : vector<2x1x32xf32> to vector<2x32xf32>
    %c0_27 = arith.constant 0 : index
    %c0_28 = arith.constant 0 : index
    %c0_29 = arith.constant 0 : index
    %35 = vector.load %arg9[%c0_27, %c0_28, %c0_29] : memref<2x3x32xf32, #tpu.memory_space<vmem>>, vector<2x1x32xf32>
    %36 = vector.shape_cast %35 : vector<2x1x32xf32> to vector<2x32xf32>
    %c0_30 = arith.constant 0 : index
    %c0_31 = arith.constant 0 : index
    %c0_32 = arith.constant 0 : index
    %c0_33 = arith.constant 0 : index
    %37 = vector.load %arg4[%c0_30, %c0_31, %c0_32, %c0_33] : memref<3x4x32x32xf32, #tpu.memory_space<vmem>>, vector<1x1x32x32xf32>
    %38 = vector.shape_cast %37 : vector<1x1x32x32xf32> to vector<32x32xf32>
    %cst_34 = arith.constant dense<0.000000e+00> : vector<2x32xf32>
    %39 = tpu.matmul %34, %38, %cst_34 {dimension_numbers = #tpu.dot_dimension_numbers<[1], [0], [0], [1], [0, 0, 1, 1], [], []>} : vector<2x32xf32>, vector<32x32xf32>, vector<2x32xf32> -> vector<2x32xf32>
    %c0_35 = arith.constant 0 : index
    %c1_36 = arith.constant 1 : index
    %c0_37 = arith.constant 0 : index
    %c0_38 = arith.constant 0 : index
    %40 = vector.load %arg4[%c0_35, %c1_36, %c0_37, %c0_38] : memref<3x4x32x32xf32, #tpu.memory_space<vmem>>, vector<1x1x32x32xf32>
    %41 = vector.shape_cast %40 : vector<1x1x32x32xf32> to vector<32x32xf32>
    %cst_39 = arith.constant dense<0.000000e+00> : vector<2x32xf32>
    %42 = tpu.matmul %34, %41, %cst_39 {dimension_numbers = #tpu.dot_dimension_numbers<[1], [0], [0], [1], [0, 0, 1, 1], [], []>} : vector<2x32xf32>, vector<32x32xf32>, vector<2x32xf32> -> vector<2x32xf32>
    %c0_40 = arith.constant 0 : index
    %c2_41 = arith.constant 2 : index
    %c0_42 = arith.constant 0 : index
    %c0_43 = arith.constant 0 : index
    %43 = vector.load %arg4[%c0_40, %c2_41, %c0_42, %c0_43] : memref<3x4x32x32xf32, #tpu.memory_space<vmem>>, vector<1x1x32x32xf32>
    %44 = vector.shape_cast %43 : vector<1x1x32x32xf32> to vector<32x32xf32>
    %cst_44 = arith.constant dense<0.000000e+00> : vector<2x32xf32>
    %45 = tpu.matmul %34, %44, %cst_44 {dimension_numbers = #tpu.dot_dimension_numbers<[1], [0], [0], [1], [0, 0, 1, 1], [], []>} : vector<2x32xf32>, vector<32x32xf32>, vector<2x32xf32> -> vector<2x32xf32>
    %c0_45 = arith.constant 0 : index
    %c3_46 = arith.constant 3 : index
    %c0_47 = arith.constant 0 : index
    %c0_48 = arith.constant 0 : index
    %46 = vector.load %arg4[%c0_45, %c3_46, %c0_47, %c0_48] : memref<3x4x32x32xf32, #tpu.memory_space<vmem>>, vector<1x1x32x32xf32>
    %47 = vector.shape_cast %46 : vector<1x1x32x32xf32> to vector<32x32xf32>
    %cst_49 = arith.constant dense<0.000000e+00> : vector<2x32xf32>
    %48 = tpu.matmul %34, %47, %cst_49 {dimension_numbers = #tpu.dot_dimension_numbers<[1], [0], [0], [1], [0, 0, 1, 1], [], []>} : vector<2x32xf32>, vector<32x32xf32>, vector<2x32xf32> -> vector<2x32xf32>
    %c0_50 = arith.constant 0 : index
    %c0_51 = arith.constant 0 : index
    %c0_52 = arith.constant 0 : index
    %49 = vector.load %arg14[%c0_50, %c0_51, %c0_52] : memref<4x16x32xf32, #tpu.memory_space<vmem>>, vector<1x2x32xf32>
    %50 = vector.shape_cast %49 : vector<1x2x32xf32> to vector<2x32xf32>
    %51 = arith.addf %50, %39 : vector<2x32xf32>
    %52 = arith.negf %51 : vector<2x32xf32>
    %53 = math.exp %52 : vector<2x32xf32>
    %cst_53 = arith.constant 1.000000e+00 : f32
    %54 = vector.broadcast %cst_53 : f32 to vector<2x32xf32>
    %55 = arith.addf %54, %53 : vector<2x32xf32>
    %56 = arith.divf %54, %55 : vector<2x32xf32>
    %c1_54 = arith.constant 1 : index
    %c0_55 = arith.constant 0 : index
    %c0_56 = arith.constant 0 : index
    %57 = vector.load %arg14[%c1_54, %c0_55, %c0_56] : memref<4x16x32xf32, #tpu.memory_space<vmem>>, vector<1x2x32xf32>
    %58 = vector.shape_cast %57 : vector<1x2x32xf32> to vector<2x32xf32>
    %59 = arith.addf %58, %42 : vector<2x32xf32>
    %60 = arith.negf %59 : vector<2x32xf32>
    %61 = math.exp %60 : vector<2x32xf32>
    %cst_57 = arith.constant 1.000000e+00 : f32
    %62 = vector.broadcast %cst_57 : f32 to vector<2x32xf32>
    %63 = arith.addf %62, %61 : vector<2x32xf32>
    %64 = arith.divf %62, %63 : vector<2x32xf32>
    %c2_58 = arith.constant 2 : index
    %c0_59 = arith.constant 0 : index
    %c0_60 = arith.constant 0 : index
    %65 = vector.load %arg14[%c2_58, %c0_59, %c0_60] : memref<4x16x32xf32, #tpu.memory_space<vmem>>, vector<1x2x32xf32>
    %66 = vector.shape_cast %65 : vector<1x2x32xf32> to vector<2x32xf32>
    %67 = arith.addf %66, %45 : vector<2x32xf32>
    %68 = math.tanh %67 : vector<2x32xf32>
    %c3_61 = arith.constant 3 : index
    %c0_62 = arith.constant 0 : index
    %c0_63 = arith.constant 0 : index
    %69 = vector.load %arg14[%c3_61, %c0_62, %c0_63] : memref<4x16x32xf32, #tpu.memory_space<vmem>>, vector<1x2x32xf32>
    %70 = vector.shape_cast %69 : vector<1x2x32xf32> to vector<2x32xf32>
    %71 = arith.addf %70, %48 : vector<2x32xf32>
    %72 = arith.negf %71 : vector<2x32xf32>
    %73 = math.exp %72 : vector<2x32xf32>
    %cst_64 = arith.constant 1.000000e+00 : f32
    %74 = vector.broadcast %cst_64 : f32 to vector<2x32xf32>
    %75 = arith.addf %74, %73 : vector<2x32xf32>
    %76 = arith.divf %74, %75 : vector<2x32xf32>
    %77 = arith.mulf %64, %36 : vector<2x32xf32>
    %78 = arith.mulf %56, %68 : vector<2x32xf32>
    %79 = arith.addf %77, %78 : vector<2x32xf32>
    %80 = math.tanh %79 : vector<2x32xf32>
    %81 = arith.mulf %76, %80 : vector<2x32xf32>
    %c0_65 = arith.constant 0 : index
    %c0_66 = arith.constant 0 : index
    %82 = vector.load %arg13[%c0_65, %c0_66] : memref<16x32xf32, #tpu.memory_space<vmem>>, vector<2x32xf32>
    tpu.vector_store %arg13[%c0_65, %c0_66], %81 {strides = array<i32>} : memref<16x32xf32, #tpu.memory_space<vmem>>, vector<2x32xf32>,
    %c0_67 = arith.constant 0 : index
    %c0_68 = arith.constant 0 : index
    %c0_69 = arith.constant 0 : index
    %c0_70 = arith.constant 0 : index
    %83 = vector.load %arg4[%c0_67, %c0_68, %c0_69, %c0_70] : memref<3x4x32x32xf32, #tpu.memory_space<vmem>>, vector<1x1x32x32xf32>
    %84 = vector.shape_cast %83 : vector<1x1x32x32xf32> to vector<32x32xf32>
    %cst_71 = arith.constant dense<0.000000e+00> : vector<2x32xf32>
    %85 = tpu.matmul %81, %84, %cst_71 {dimension_numbers = #tpu.dot_dimension_numbers<[1], [0], [0], [1], [0, 0, 1, 1], [], []>} : vector<2x32xf32>, vector<32x32xf32>, vector<2x32xf32> -> vector<2x32xf32>
    %c0_72 = arith.constant 0 : index
    %c1_73 = arith.constant 1 : index
    %c0_74 = arith.constant 0 : index
    %c0_75 = arith.constant 0 : index
    %86 = vector.load %arg4[%c0_72, %c1_73, %c0_74, %c0_75] : memref<3x4x32x32xf32, #tpu.memory_space<vmem>>, vector<1x1x32x32xf32>
    %87 = vector.shape_cast %86 : vector<1x1x32x32xf32> to vector<32x32xf32>
    %cst_76 = arith.constant dense<0.000000e+00> : vector<2x32xf32>
    %88 = tpu.matmul %81, %87, %cst_76 {dimension_numbers = #tpu.dot_dimension_numbers<[1], [0], [0], [1], [0, 0, 1, 1], [], []>} : vector<2x32xf32>, vector<32x32xf32>, vector<2x32xf32> -> vector<2x32xf32>
    %c0_77 = arith.constant 0 : index
    %c2_78 = arith.constant 2 : index
    %c0_79 = arith.constant 0 : index
    %c0_80 = arith.constant 0 : index
    %89 = vector.load %arg4[%c0_77, %c2_78, %c0_79, %c0_80] : memref<3x4x32x32xf32, #tpu.memory_space<vmem>>, vector<1x1x32x32xf32>
    %90 = vector.shape_cast %89 : vector<1x1x32x32xf32> to vector<32x32xf32>
    %cst_81 = arith.constant dense<0.000000e+00> : vector<2x32xf32>
    %91 = tpu.matmul %81, %90, %cst_81 {dimension_numbers = #tpu.dot_dimension_numbers<[1], [0], [0], [1], [0, 0, 1, 1], [], []>} : vector<2x32xf32>, vector<32x32xf32>, vector<2x32xf32> -> vector<2x32xf32>
    %c0_82 = arith.constant 0 : index
    %c3_83 = arith.constant 3 : index
    %c0_84 = arith.constant 0 : index
    %c0_85 = arith.constant 0 : index
    %92 = vector.load %arg4[%c0_82, %c3_83, %c0_84, %c0_85] : memref<3x4x32x32xf32, #tpu.memory_space<vmem>>, vector<1x1x32x32xf32>
    %93 = vector.shape_cast %92 : vector<1x1x32x32xf32> to vector<32x32xf32>
    %cst_86 = arith.constant dense<0.000000e+00> : vector<2x32xf32>
    %94 = tpu.matmul %81, %93, %cst_86 {dimension_numbers = #tpu.dot_dimension_numbers<[1], [0], [0], [1], [0, 0, 1, 1], [], []>} : vector<2x32xf32>, vector<32x32xf32>, vector<2x32xf32> -> vector<2x32xf32>
    %c0_87 = arith.constant 0 : index
    %c2_88 = arith.constant 2 : index
    %c0_89 = arith.constant 0 : index
    %95 = vector.load %arg14[%c0_87, %c2_88, %c0_89] : memref<4x16x32xf32, #tpu.memory_space<vmem>>, vector<1x2x32xf32>
    %96 = vector.shape_cast %95 : vector<1x2x32xf32> to vector<2x32xf32>
    %97 = arith.addf %96, %85 : vector<2x32xf32>
    %98 = arith.negf %97 : vector<2x32xf32>
    %99 = math.exp %98 : vector<2x32xf32>
    %cst_90 = arith.constant 1.000000e+00 : f32
    %100 = vector.broadcast %cst_90 : f32 to vector<2x32xf32>
    %101 = arith.addf %100, %99 : vector<2x32xf32>
    %102 = arith.divf %100, %101 : vector<2x32xf32>
    %c1_91 = arith.constant 1 : index
    %c2_92 = arith.constant 2 : index
    %c0_93 = arith.constant 0 : index
    %103 = vector.load %arg14[%c1_91, %c2_92, %c0_93] : memref<4x16x32xf32, #tpu.memory_space<vmem>>, vector<1x2x32xf32>
    %104 = vector.shape_cast %103 : vector<1x2x32xf32> to vector<2x32xf32>
    %105 = arith.addf %104, %88 : vector<2x32xf32>
    %106 = arith.negf %105 : vector<2x32xf32>
    %107 = math.exp %106 : vector<2x32xf32>
    %cst_94 = arith.constant 1.000000e+00 : f32
    %108 = vector.broadcast %cst_94 : f32 to vector<2x32xf32>
    %109 = arith.addf %108, %107 : vector<2x32xf32>
    %110 = arith.divf %108, %109 : vector<2x32xf32>
    %c2_95 = arith.constant 2 : index
    %c2_96 = arith.constant 2 : index
    %c0_97 = arith.constant 0 : index
    %111 = vector.load %arg14[%c2_95, %c2_96, %c0_97] : memref<4x16x32xf32, #tpu.memory_space<vmem>>, vector<1x2x32xf32>
    %112 = vector.shape_cast %111 : vector<1x2x32xf32> to vector<2x32xf32>
    %113 = arith.addf %112, %91 : vector<2x32xf32>
    %114 = math.tanh %113 : vector<2x32xf32>
    %c3_98 = arith.constant 3 : index
    %c2_99 = arith.constant 2 : index
    %c0_100 = arith.constant 0 : index
    %115 = vector.load %arg14[%c3_98, %c2_99, %c0_100] : memref<4x16x32xf32, #tpu.memory_space<vmem>>, vector<1x2x32xf32>
    %116 = vector.shape_cast %115 : vector<1x2x32xf32> to vector<2x32xf32>
    %117 = arith.addf %116, %94 : vector<2x32xf32>
    %118 = arith.negf %117 : vector<2x32xf32>
    %119 = math.exp %118 : vector<2x32xf32>
    %cst_101 = arith.constant 1.000000e+00 : f32
    %120 = vector.broadcast %cst_101 : f32 to vector<2x32xf32>
    %121 = arith.addf %120, %119 : vector<2x32xf32>
    %122 = arith.divf %120, %121 : vector<2x32xf32>
    %123 = arith.mulf %110, %79 : vector<2x32xf32>
    %124 = arith.mulf %102, %114 : vector<2x32xf32>
    %125 = arith.addf %123, %124 : vector<2x32xf32>
    %126 = math.tanh %125 : vector<2x32xf32>
    %127 = arith.mulf %122, %126 : vector<2x32xf32>
    %c2_102 = arith.constant 2 : index
    %c0_103 = arith.constant 0 : index
    %128 = vector.load %arg13[%c2_102, %c0_103] : memref<16x32xf32, #tpu.memory_space<vmem>>, vector<2x32xf32>
    tpu.vector_store %arg13[%c2_102, %c0_103], %127 {strides = array<i32>} : memref<16x32xf32, #tpu.memory_space<vmem>>, vector<2x32xf32>,
    %c0_104 = arith.constant 0 : index
    %c0_105 = arith.constant 0 : index
    %c0_106 = arith.constant 0 : index
    %c0_107 = arith.constant 0 : index
    %129 = vector.load %arg4[%c0_104, %c0_105, %c0_106, %c0_107] : memref<3x4x32x32xf32, #tpu.memory_space<vmem>>, vector<1x1x32x32xf32>
    %130 = vector.shape_cast %129 : vector<1x1x32x32xf32> to vector<32x32xf32>
    %cst_108 = arith.constant dense<0.000000e+00> : vector<2x32xf32>
    %131 = tpu.matmul %127, %130, %cst_108 {dimension_numbers = #tpu.dot_dimension_numbers<[1], [0], [0], [1], [0, 0, 1, 1], [], []>} : vector<2x32xf32>, vector<32x32xf32>, vector<2x32xf32> -> vector<2x32xf32>
    %c0_109 = arith.constant 0 : index
    %c1_110 = arith.constant 1 : index
    %c0_111 = arith.constant 0 : index
    %c0_112 = arith.constant 0 : index
    %132 = vector.load %arg4[%c0_109, %c1_110, %c0_111, %c0_112] : memref<3x4x32x32xf32, #tpu.memory_space<vmem>>, vector<1x1x32x32xf32>
    %133 = vector.shape_cast %132 : vector<1x1x32x32xf32> to vector<32x32xf32>
    %cst_113 = arith.constant dense<0.000000e+00> : vector<2x32xf32>
    %134 = tpu.matmul %127, %133, %cst_113 {dimension_numbers = #tpu.dot_dimension_numbers<[1], [0], [0], [1], [0, 0, 1, 1], [], []>} : vector<2x32xf32>, vector<32x32xf32>, vector<2x32xf32> -> vector<2x32xf32>
    %c0_114 = arith.constant 0 : index
    %c2_115 = arith.constant 2 : index
    %c0_116 = arith.constant 0 : index
    %c0_117 = arith.constant 0 : index
    %135 = vector.load %arg4[%c0_114, %c2_115, %c0_116, %c0_117] : memref<3x4x32x32xf32, #tpu.memory_space<vmem>>, vector<1x1x32x32xf32>
    %136 = vector.shape_cast %135 : vector<1x1x32x32xf32> to vector<32x32xf32>
    %cst_118 = arith.constant dense<0.000000e+00> : vector<2x32xf32>
    %137 = tpu.matmul %127, %136, %cst_118 {dimension_numbers = #tpu.dot_dimension_numbers<[1], [0], [0], [1], [0, 0, 1, 1], [], []>} : vector<2x32xf32>, vector<32x32xf32>, vector<2x32xf32> -> vector<2x32xf32>
    %c0_119 = arith.constant 0 : index
    %c3_120 = arith.constant 3 : index
    %c0_121 = arith.constant 0 : index
    %c0_122 = arith.constant 0 : index
    %138 = vector.load %arg4[%c0_119, %c3_120, %c0_121, %c0_122] : memref<3x4x32x32xf32, #tpu.memory_space<vmem>>, vector<1x1x32x32xf32>
    %139 = vector.shape_cast %138 : vector<1x1x32x32xf32> to vector<32x32xf32>
    %cst_123 = arith.constant dense<0.000000e+00> : vector<2x32xf32>
    %140 = tpu.matmul %127, %139, %cst_123 {dimension_numbers = #tpu.dot_dimension_numbers<[1], [0], [0], [1], [0, 0, 1, 1], [], []>} : vector<2x32xf32>, vector<32x32xf32>, vector<2x32xf32> -> vector<2x32xf32>
    %c0_124 = arith.constant 0 : index
    %c4 = arith.constant 4 : index
    %c0_125 = arith.constant 0 : index
    %141 = vector.load %arg14[%c0_124, %c4, %c0_125] : memref<4x16x32xf32, #tpu.memory_space<vmem>>, vector<1x2x32xf32>
    %142 = vector.shape_cast %141 : vector<1x2x32xf32> to vector<2x32xf32>
    %143 = arith.addf %142, %131 : vector<2x32xf32>
    %144 = arith.negf %143 : vector<2x32xf32>
    %145 = math.exp %144 : vector<2x32xf32>
    %cst_126 = arith.constant 1.000000e+00 : f32
    %146 = vector.broadcast %cst_126 : f32 to vector<2x32xf32>
    %147 = arith.addf %146, %145 : vector<2x32xf32>
    %148 = arith.divf %146, %147 : vector<2x32xf32>
    %c1_127 = arith.constant 1 : index
    %c4_128 = arith.constant 4 : index
    %c0_129 = arith.constant 0 : index
    %149 = vector.load %arg14[%c1_127, %c4_128, %c0_129] : memref<4x16x32xf32, #tpu.memory_space<vmem>>, vector<1x2x32xf32>
    %150 = vector.shape_cast %149 : vector<1x2x32xf32> to vector<2x32xf32>
    %151 = arith.addf %150, %134 : vector<2x32xf32>
    %152 = arith.negf %151 : vector<2x32xf32>
    %153 = math.exp %152 : vector<2x32xf32>
    %cst_130 = arith.constant 1.000000e+00 : f32
    %154 = vector.broadcast %cst_130 : f32 to vector<2x32xf32>
    %155 = arith.addf %154, %153 : vector<2x32xf32>
    %156 = arith.divf %154, %155 : vector<2x32xf32>
    %c2_131 = arith.constant 2 : index
    %c4_132 = arith.constant 4 : index
    %c0_133 = arith.constant 0 : index
    %157 = vector.load %arg14[%c2_131, %c4_132, %c0_133] : memref<4x16x32xf32, #tpu.memory_space<vmem>>, vector<1x2x32xf32>
    %158 = vector.shape_cast %157 : vector<1x2x32xf32> to vector<2x32xf32>
    %159 = arith.addf %158, %137 : vector<2x32xf32>
    %160 = math.tanh %159 : vector<2x32xf32>
    %c3_134 = arith.constant 3 : index
    %c4_135 = arith.constant 4 : index
    %c0_136 = arith.constant 0 : index
    %161 = vector.load %arg14[%c3_134, %c4_135, %c0_136] : memref<4x16x32xf32, #tpu.memory_space<vmem>>, vector<1x2x32xf32>
    %162 = vector.shape_cast %161 : vector<1x2x32xf32> to vector<2x32xf32>
    %163 = arith.addf %162, %140 : vector<2x32xf32>
    %164 = arith.negf %163 : vector<2x32xf32>
    %165 = math.exp %164 : vector<2x32xf32>
    %cst_137 = arith.constant 1.000000e+00 : f32
    %166 = vector.broadcast %cst_137 : f32 to vector<2x32xf32>
    %167 = arith.addf %166, %165 : vector<2x32xf32>
    %168 = arith.divf %166, %167 : vector<2x32xf32>
    %169 = arith.mulf %156, %125 : vector<2x32xf32>
    %170 = arith.mulf %148, %160 : vector<2x32xf32>
    %171 = arith.addf %169, %170 : vector<2x32xf32>
    %172 = math.tanh %171 : vector<2x32xf32>
    %173 = arith.mulf %168, %172 : vector<2x32xf32>
    %c4_138 = arith.constant 4 : index
    %c0_139 = arith.constant 0 : index
    %174 = vector.load %arg13[%c4_138, %c0_139] : memref<16x32xf32, #tpu.memory_space<vmem>>, vector<2x32xf32>
    tpu.vector_store %arg13[%c4_138, %c0_139], %173 {strides = array<i32>} : memref<16x32xf32, #tpu.memory_space<vmem>>, vector<2x32xf32>,
    %c0_140 = arith.constant 0 : index
    %c0_141 = arith.constant 0 : index
    %c0_142 = arith.constant 0 : index
    %c0_143 = arith.constant 0 : index
    %175 = vector.load %arg4[%c0_140, %c0_141, %c0_142, %c0_143] : memref<3x4x32x32xf32, #tpu.memory_space<vmem>>, vector<1x1x32x32xf32>
    %176 = vector.shape_cast %175 : vector<1x1x32x32xf32> to vector<32x32xf32>
    %cst_144 = arith.constant dense<0.000000e+00> : vector<2x32xf32>
    %177 = tpu.matmul %173, %176, %cst_144 {dimension_numbers = #tpu.dot_dimension_numbers<[1], [0], [0], [1], [0, 0, 1, 1], [], []>} : vector<2x32xf32>, vector<32x32xf32>, vector<2x32xf32> -> vector<2x32xf32>
    %c0_145 = arith.constant 0 : index
    %c1_146 = arith.constant 1 : index
    %c0_147 = arith.constant 0 : index
    %c0_148 = arith.constant 0 : index
    %178 = vector.load %arg4[%c0_145, %c1_146, %c0_147, %c0_148] : memref<3x4x32x32xf32, #tpu.memory_space<vmem>>, vector<1x1x32x32xf32>
    %179 = vector.shape_cast %178 : vector<1x1x32x32xf32> to vector<32x32xf32>
    %cst_149 = arith.constant dense<0.000000e+00> : vector<2x32xf32>
    %180 = tpu.matmul %173, %179, %cst_149 {dimension_numbers = #tpu.dot_dimension_numbers<[1], [0], [0], [1], [0, 0, 1, 1], [], []>} : vector<2x32xf32>, vector<32x32xf32>, vector<2x32xf32> -> vector<2x32xf32>
    %c0_150 = arith.constant 0 : index
    %c2_151 = arith.constant 2 : index
    %c0_152 = arith.constant 0 : index
    %c0_153 = arith.constant 0 : index
    %181 = vector.load %arg4[%c0_150, %c2_151, %c0_152, %c0_153] : memref<3x4x32x32xf32, #tpu.memory_space<vmem>>, vector<1x1x32x32xf32>
    %182 = vector.shape_cast %181 : vector<1x1x32x32xf32> to vector<32x32xf32>
    %cst_154 = arith.constant dense<0.000000e+00> : vector<2x32xf32>
    %183 = tpu.matmul %173, %182, %cst_154 {dimension_numbers = #tpu.dot_dimension_numbers<[1], [0], [0], [1], [0, 0, 1, 1], [], []>} : vector<2x32xf32>, vector<32x32xf32>, vector<2x32xf32> -> vector<2x32xf32>
    %c0_155 = arith.constant 0 : index
    %c3_156 = arith.constant 3 : index
    %c0_157 = arith.constant 0 : index
    %c0_158 = arith.constant 0 : index
    %184 = vector.load %arg4[%c0_155, %c3_156, %c0_157, %c0_158] : memref<3x4x32x32xf32, #tpu.memory_space<vmem>>, vector<1x1x32x32xf32>
    %185 = vector.shape_cast %184 : vector<1x1x32x32xf32> to vector<32x32xf32>
    %cst_159 = arith.constant dense<0.000000e+00> : vector<2x32xf32>
    %186 = tpu.matmul %173, %185, %cst_159 {dimension_numbers = #tpu.dot_dimension_numbers<[1], [0], [0], [1], [0, 0, 1, 1], [], []>} : vector<2x32xf32>, vector<32x32xf32>, vector<2x32xf32> -> vector<2x32xf32>
    %c0_160 = arith.constant 0 : index
    %c6 = arith.constant 6 : index
    %c0_161 = arith.constant 0 : index
    %187 = vector.load %arg14[%c0_160, %c6, %c0_161] : memref<4x16x32xf32, #tpu.memory_space<vmem>>, vector<1x2x32xf32>
    %188 = vector.shape_cast %187 : vector<1x2x32xf32> to vector<2x32xf32>
    %189 = arith.addf %188, %177 : vector<2x32xf32>
    %190 = arith.negf %189 : vector<2x32xf32>
    %191 = math.exp %190 : vector<2x32xf32>
    %cst_162 = arith.constant 1.000000e+00 : f32
    %192 = vector.broadcast %cst_162 : f32 to vector<2x32xf32>
    %193 = arith.addf %192, %191 : vector<2x32xf32>
    %194 = arith.divf %192, %193 : vector<2x32xf32>
    %c1_163 = arith.constant 1 : index
    %c6_164 = arith.constant 6 : index
    %c0_165 = arith.constant 0 : index
    %195 = vector.load %arg14[%c1_163, %c6_164, %c0_165] : memref<4x16x32xf32, #tpu.memory_space<vmem>>, vector<1x2x32xf32>
    %196 = vector.shape_cast %195 : vector<1x2x32xf32> to vector<2x32xf32>
    %197 = arith.addf %196, %180 : vector<2x32xf32>
    %198 = arith.negf %197 : vector<2x32xf32>
    %199 = math.exp %198 : vector<2x32xf32>
    %cst_166 = arith.constant 1.000000e+00 : f32
    %200 = vector.broadcast %cst_166 : f32 to vector<2x32xf32>
    %201 = arith.addf %200, %199 : vector<2x32xf32>
    %202 = arith.divf %200, %201 : vector<2x32xf32>
    %c2_167 = arith.constant 2 : index
    %c6_168 = arith.constant 6 : index
    %c0_169 = arith.constant 0 : index
    %203 = vector.load %arg14[%c2_167, %c6_168, %c0_169] : memref<4x16x32xf32, #tpu.memory_space<vmem>>, vector<1x2x32xf32>
    %204 = vector.shape_cast %203 : vector<1x2x32xf32> to vector<2x32xf32>
    %205 = arith.addf %204, %183 : vector<2x32xf32>
    %206 = math.tanh %205 : vector<2x32xf32>
    %c3_170 = arith.constant 3 : index
    %c6_171 = arith.constant 6 : index
    %c0_172 = arith.constant 0 : index
    %207 = vector.load %arg14[%c3_170, %c6_171, %c0_172] : memref<4x16x32xf32, #tpu.memory_space<vmem>>, vector<1x2x32xf32>
    %208 = vector.shape_cast %207 : vector<1x2x32xf32> to vector<2x32xf32>
    %209 = arith.addf %208, %186 : vector<2x32xf32>
    %210 = arith.negf %209 : vector<2x32xf32>
    %211 = math.exp %210 : vector<2x32xf32>
    %cst_173 = arith.constant 1.000000e+00 : f32
    %212 = vector.broadcast %cst_173 : f32 to vector<2x32xf32>
    %213 = arith.addf %212, %211 : vector<2x32xf32>
    %214 = arith.divf %212, %213 : vector<2x32xf32>
    %215 = arith.mulf %202, %171 : vector<2x32xf32>
    %216 = arith.mulf %194, %206 : vector<2x32xf32>
    %217 = arith.addf %215, %216 : vector<2x32xf32>
    %218 = math.tanh %217 : vector<2x32xf32>
    %219 = arith.mulf %214, %218 : vector<2x32xf32>
    %c6_174 = arith.constant 6 : index
    %c0_175 = arith.constant 0 : index
    %220 = vector.load %arg13[%c6_174, %c0_175] : memref<16x32xf32, #tpu.memory_space<vmem>>, vector<2x32xf32>
    tpu.vector_store %arg13[%c6_174, %c0_175], %219 {strides = array<i32>} : memref<16x32xf32, #tpu.memory_space<vmem>>, vector<2x32xf32>,
    %c0_176 = arith.constant 0 : index
    %c0_177 = arith.constant 0 : index
    %c0_178 = arith.constant 0 : index
    %c0_179 = arith.constant 0 : index
    %221 = vector.load %arg4[%c0_176, %c0_177, %c0_178, %c0_179] : memref<3x4x32x32xf32, #tpu.memory_space<vmem>>, vector<1x1x32x32xf32>
    %222 = vector.shape_cast %221 : vector<1x1x32x32xf32> to vector<32x32xf32>
    %cst_180 = arith.constant dense<0.000000e+00> : vector<2x32xf32>
    %223 = tpu.matmul %219, %222, %cst_180 {dimension_numbers = #tpu.dot_dimension_numbers<[1], [0], [0], [1], [0, 0, 1, 1], [], []>} : vector<2x32xf32>, vector<32x32xf32>, vector<2x32xf32> -> vector<2x32xf32>
    %c0_181 = arith.constant 0 : index
    %c1_182 = arith.constant 1 : index
    %c0_183 = arith.constant 0 : index
    %c0_184 = arith.constant 0 : index
    %224 = vector.load %arg4[%c0_181, %c1_182, %c0_183, %c0_184] : memref<3x4x32x32xf32, #tpu.memory_space<vmem>>, vector<1x1x32x32xf32>
    %225 = vector.shape_cast %224 : vector<1x1x32x32xf32> to vector<32x32xf32>
    %cst_185 = arith.constant dense<0.000000e+00> : vector<2x32xf32>
    %226 = tpu.matmul %219, %225, %cst_185 {dimension_numbers = #tpu.dot_dimension_numbers<[1], [0], [0], [1], [0, 0, 1, 1], [], []>} : vector<2x32xf32>, vector<32x32xf32>, vector<2x32xf32> -> vector<2x32xf32>
    %c0_186 = arith.constant 0 : index
    %c2_187 = arith.constant 2 : index
    %c0_188 = arith.constant 0 : index
    %c0_189 = arith.constant 0 : index
    %227 = vector.load %arg4[%c0_186, %c2_187, %c0_188, %c0_189] : memref<3x4x32x32xf32, #tpu.memory_space<vmem>>, vector<1x1x32x32xf32>
    %228 = vector.shape_cast %227 : vector<1x1x32x32xf32> to vector<32x32xf32>
    %cst_190 = arith.constant dense<0.000000e+00> : vector<2x32xf32>
    %229 = tpu.matmul %219, %228, %cst_190 {dimension_numbers = #tpu.dot_dimension_numbers<[1], [0], [0], [1], [0, 0, 1, 1], [], []>} : vector<2x32xf32>, vector<32x32xf32>, vector<2x32xf32> -> vector<2x32xf32>
    %c0_191 = arith.constant 0 : index
    %c3_192 = arith.constant 3 : index
    %c0_193 = arith.constant 0 : index
    %c0_194 = arith.constant 0 : index
    %230 = vector.load %arg4[%c0_191, %c3_192, %c0_193, %c0_194] : memref<3x4x32x32xf32, #tpu.memory_space<vmem>>, vector<1x1x32x32xf32>
    %231 = vector.shape_cast %230 : vector<1x1x32x32xf32> to vector<32x32xf32>
    %cst_195 = arith.constant dense<0.000000e+00> : vector<2x32xf32>
    %232 = tpu.matmul %219, %231, %cst_195 {dimension_numbers = #tpu.dot_dimension_numbers<[1], [0], [0], [1], [0, 0, 1, 1], [], []>} : vector<2x32xf32>, vector<32x32xf32>, vector<2x32xf32> -> vector<2x32xf32>
    %c0_196 = arith.constant 0 : index
    %c8 = arith.constant 8 : index
    %c0_197 = arith.constant 0 : index
    %233 = vector.load %arg14[%c0_196, %c8, %c0_197] : memref<4x16x32xf32, #tpu.memory_space<vmem>>, vector<1x2x32xf32>
    %234 = vector.shape_cast %233 : vector<1x2x32xf32> to vector<2x32xf32>
    %235 = arith.addf %234, %223 : vector<2x32xf32>
    %236 = arith.negf %235 : vector<2x32xf32>
    %237 = math.exp %236 : vector<2x32xf32>
    %cst_198 = arith.constant 1.000000e+00 : f32
    %238 = vector.broadcast %cst_198 : f32 to vector<2x32xf32>
    %239 = arith.addf %238, %237 : vector<2x32xf32>
    %240 = arith.divf %238, %239 : vector<2x32xf32>
    %c1_199 = arith.constant 1 : index
    %c8_200 = arith.constant 8 : index
    %c0_201 = arith.constant 0 : index
    %241 = vector.load %arg14[%c1_199, %c8_200, %c0_201] : memref<4x16x32xf32, #tpu.memory_space<vmem>>, vector<1x2x32xf32>
    %242 = vector.shape_cast %241 : vector<1x2x32xf32> to vector<2x32xf32>
    %243 = arith.addf %242, %226 : vector<2x32xf32>
    %244 = arith.negf %243 : vector<2x32xf32>
    %245 = math.exp %244 : vector<2x32xf32>
    %cst_202 = arith.constant 1.000000e+00 : f32
    %246 = vector.broadcast %cst_202 : f32 to vector<2x32xf32>
    %247 = arith.addf %246, %245 : vector<2x32xf32>
    %248 = arith.divf %246, %247 : vector<2x32xf32>
    %c2_203 = arith.constant 2 : index
    %c8_204 = arith.constant 8 : index
    %c0_205 = arith.constant 0 : index
    %249 = vector.load %arg14[%c2_203, %c8_204, %c0_205] : memref<4x16x32xf32, #tpu.memory_space<vmem>>, vector<1x2x32xf32>
    %250 = vector.shape_cast %249 : vector<1x2x32xf32> to vector<2x32xf32>
    %251 = arith.addf %250, %229 : vector<2x32xf32>
    %252 = math.tanh %251 : vector<2x32xf32>
    %c3_206 = arith.constant 3 : index
    %c8_207 = arith.constant 8 : index
    %c0_208 = arith.constant 0 : index
    %253 = vector.load %arg14[%c3_206, %c8_207, %c0_208] : memref<4x16x32xf32, #tpu.memory_space<vmem>>, vector<1x2x32xf32>
    %254 = vector.shape_cast %253 : vector<1x2x32xf32> to vector<2x32xf32>
    %255 = arith.addf %254, %232 : vector<2x32xf32>
    %256 = arith.negf %255 : vector<2x32xf32>
    %257 = math.exp %256 : vector<2x32xf32>
    %cst_209 = arith.constant 1.000000e+00 : f32
    %258 = vector.broadcast %cst_209 : f32 to vector<2x32xf32>
    %259 = arith.addf %258, %257 : vector<2x32xf32>
    %260 = arith.divf %258, %259 : vector<2x32xf32>
    %261 = arith.mulf %248, %217 : vector<2x32xf32>
    %262 = arith.mulf %240, %252 : vector<2x32xf32>
    %263 = arith.addf %261, %262 : vector<2x32xf32>
    %264 = math.tanh %263 : vector<2x32xf32>
    %265 = arith.mulf %260, %264 : vector<2x32xf32>
    %c8_210 = arith.constant 8 : index
    %c0_211 = arith.constant 0 : index
    %266 = vector.load %arg13[%c8_210, %c0_211] : memref<16x32xf32, #tpu.memory_space<vmem>>, vector<2x32xf32>
    tpu.vector_store %arg13[%c8_210, %c0_211], %265 {strides = array<i32>} : memref<16x32xf32, #tpu.memory_space<vmem>>, vector<2x32xf32>,
    %c0_212 = arith.constant 0 : index
    %c0_213 = arith.constant 0 : index
    %c0_214 = arith.constant 0 : index
    %c0_215 = arith.constant 0 : index
    %267 = vector.load %arg4[%c0_212, %c0_213, %c0_214, %c0_215] : memref<3x4x32x32xf32, #tpu.memory_space<vmem>>, vector<1x1x32x32xf32>
    %268 = vector.shape_cast %267 : vector<1x1x32x32xf32> to vector<32x32xf32>
    %cst_216 = arith.constant dense<0.000000e+00> : vector<2x32xf32>
    %269 = tpu.matmul %265, %268, %cst_216 {dimension_numbers = #tpu.dot_dimension_numbers<[1], [0], [0], [1], [0, 0, 1, 1], [], []>} : vector<2x32xf32>, vector<32x32xf32>, vector<2x32xf32> -> vector<2x32xf32>
    %c0_217 = arith.constant 0 : index
    %c1_218 = arith.constant 1 : index
    %c0_219 = arith.constant 0 : index
    %c0_220 = arith.constant 0 : index
    %270 = vector.load %arg4[%c0_217, %c1_218, %c0_219, %c0_220] : memref<3x4x32x32xf32, #tpu.memory_space<vmem>>, vector<1x1x32x32xf32>
    %271 = vector.shape_cast %270 : vector<1x1x32x32xf32> to vector<32x32xf32>
    %cst_221 = arith.constant dense<0.000000e+00> : vector<2x32xf32>
    %272 = tpu.matmul %265, %271, %cst_221 {dimension_numbers = #tpu.dot_dimension_numbers<[1], [0], [0], [1], [0, 0, 1, 1], [], []>} : vector<2x32xf32>, vector<32x32xf32>, vector<2x32xf32> -> vector<2x32xf32>
    %c0_222 = arith.constant 0 : index
    %c2_223 = arith.constant 2 : index
    %c0_224 = arith.constant 0 : index
    %c0_225 = arith.constant 0 : index
    %273 = vector.load %arg4[%c0_222, %c2_223, %c0_224, %c0_225] : memref<3x4x32x32xf32, #tpu.memory_space<vmem>>, vector<1x1x32x32xf32>
    %274 = vector.shape_cast %273 : vector<1x1x32x32xf32> to vector<32x32xf32>
    %cst_226 = arith.constant dense<0.000000e+00> : vector<2x32xf32>
    %275 = tpu.matmul %265, %274, %cst_226 {dimension_numbers = #tpu.dot_dimension_numbers<[1], [0], [0], [1], [0, 0, 1, 1], [], []>} : vector<2x32xf32>, vector<32x32xf32>, vector<2x32xf32> -> vector<2x32xf32>
    %c0_227 = arith.constant 0 : index
    %c3_228 = arith.constant 3 : index
    %c0_229 = arith.constant 0 : index
    %c0_230 = arith.constant 0 : index
    %276 = vector.load %arg4[%c0_227, %c3_228, %c0_229, %c0_230] : memref<3x4x32x32xf32, #tpu.memory_space<vmem>>, vector<1x1x32x32xf32>
    %277 = vector.shape_cast %276 : vector<1x1x32x32xf32> to vector<32x32xf32>
    %cst_231 = arith.constant dense<0.000000e+00> : vector<2x32xf32>
    %278 = tpu.matmul %265, %277, %cst_231 {dimension_numbers = #tpu.dot_dimension_numbers<[1], [0], [0], [1], [0, 0, 1, 1], [], []>} : vector<2x32xf32>, vector<32x32xf32>, vector<2x32xf32> -> vector<2x32xf32>
    %c0_232 = arith.constant 0 : index
    %c10 = arith.constant 10 : index
    %c0_233 = arith.constant 0 : index
    %279 = vector.load %arg14[%c0_232, %c10, %c0_233] : memref<4x16x32xf32, #tpu.memory_space<vmem>>, vector<1x2x32xf32>
    %280 = vector.shape_cast %279 : vector<1x2x32xf32> to vector<2x32xf32>
    %281 = arith.addf %280, %269 : vector<2x32xf32>
    %282 = arith.negf %281 : vector<2x32xf32>
    %283 = math.exp %282 : vector<2x32xf32>
    %cst_234 = arith.constant 1.000000e+00 : f32
    %284 = vector.broadcast %cst_234 : f32 to vector<2x32xf32>
    %285 = arith.addf %284, %283 : vector<2x32xf32>
    %286 = arith.divf %284, %285 : vector<2x32xf32>
    %c1_235 = arith.constant 1 : index
    %c10_236 = arith.constant 10 : index
    %c0_237 = arith.constant 0 : index
    %287 = vector.load %arg14[%c1_235, %c10_236, %c0_237] : memref<4x16x32xf32, #tpu.memory_space<vmem>>, vector<1x2x32xf32>
    %288 = vector.shape_cast %287 : vector<1x2x32xf32> to vector<2x32xf32>
    %289 = arith.addf %288, %272 : vector<2x32xf32>
    %290 = arith.negf %289 : vector<2x32xf32>
    %291 = math.exp %290 : vector<2x32xf32>
    %cst_238 = arith.constant 1.000000e+00 : f32
    %292 = vector.broadcast %cst_238 : f32 to vector<2x32xf32>
    %293 = arith.addf %292, %291 : vector<2x32xf32>
    %294 = arith.divf %292, %293 : vector<2x32xf32>
    %c2_239 = arith.constant 2 : index
    %c10_240 = arith.constant 10 : index
    %c0_241 = arith.constant 0 : index
    %295 = vector.load %arg14[%c2_239, %c10_240, %c0_241] : memref<4x16x32xf32, #tpu.memory_space<vmem>>, vector<1x2x32xf32>
    %296 = vector.shape_cast %295 : vector<1x2x32xf32> to vector<2x32xf32>
    %297 = arith.addf %296, %275 : vector<2x32xf32>
    %298 = math.tanh %297 : vector<2x32xf32>
    %c3_242 = arith.constant 3 : index
    %c10_243 = arith.constant 10 : index
    %c0_244 = arith.constant 0 : index
    %299 = vector.load %arg14[%c3_242, %c10_243, %c0_244] : memref<4x16x32xf32, #tpu.memory_space<vmem>>, vector<1x2x32xf32>
    %300 = vector.shape_cast %299 : vector<1x2x32xf32> to vector<2x32xf32>
    %301 = arith.addf %300, %278 : vector<2x32xf32>
    %302 = arith.negf %301 : vector<2x32xf32>
    %303 = math.exp %302 : vector<2x32xf32>
    %cst_245 = arith.constant 1.000000e+00 : f32
    %304 = vector.broadcast %cst_245 : f32 to vector<2x32xf32>
    %305 = arith.addf %304, %303 : vector<2x32xf32>
    %306 = arith.divf %304, %305 : vector<2x32xf32>
    %307 = arith.mulf %294, %263 : vector<2x32xf32>
    %308 = arith.mulf %286, %298 : vector<2x32xf32>
    %309 = arith.addf %307, %308 : vector<2x32xf32>
    %310 = math.tanh %309 : vector<2x32xf32>
    %311 = arith.mulf %306, %310 : vector<2x32xf32>
    %c10_246 = arith.constant 10 : index
    %c0_247 = arith.constant 0 : index
    %312 = vector.load %arg13[%c10_246, %c0_247] : memref<16x32xf32, #tpu.memory_space<vmem>>, vector<2x32xf32>
    tpu.vector_store %arg13[%c10_246, %c0_247], %311 {strides = array<i32>} : memref<16x32xf32, #tpu.memory_space<vmem>>, vector<2x32xf32>,
    %c0_248 = arith.constant 0 : index
    %c0_249 = arith.constant 0 : index
    %c0_250 = arith.constant 0 : index
    %c0_251 = arith.constant 0 : index
    %313 = vector.load %arg4[%c0_248, %c0_249, %c0_250, %c0_251] : memref<3x4x32x32xf32, #tpu.memory_space<vmem>>, vector<1x1x32x32xf32>
    %314 = vector.shape_cast %313 : vector<1x1x32x32xf32> to vector<32x32xf32>
    %cst_252 = arith.constant dense<0.000000e+00> : vector<2x32xf32>
    %315 = tpu.matmul %311, %314, %cst_252 {dimension_numbers = #tpu.dot_dimension_numbers<[1], [0], [0], [1], [0, 0, 1, 1], [], []>} : vector<2x32xf32>, vector<32x32xf32>, vector<2x32xf32> -> vector<2x32xf32>
    %c0_253 = arith.constant 0 : index
    %c1_254 = arith.constant 1 : index
    %c0_255 = arith.constant 0 : index
    %c0_256 = arith.constant 0 : index
    %316 = vector.load %arg4[%c0_253, %c1_254, %c0_255, %c0_256] : memref<3x4x32x32xf32, #tpu.memory_space<vmem>>, vector<1x1x32x32xf32>
    %317 = vector.shape_cast %316 : vector<1x1x32x32xf32> to vector<32x32xf32>
    %cst_257 = arith.constant dense<0.000000e+00> : vector<2x32xf32>
    %318 = tpu.matmul %311, %317, %cst_257 {dimension_numbers = #tpu.dot_dimension_numbers<[1], [0], [0], [1], [0, 0, 1, 1], [], []>} : vector<2x32xf32>, vector<32x32xf32>, vector<2x32xf32> -> vector<2x32xf32>
    %c0_258 = arith.constant 0 : index
    %c2_259 = arith.constant 2 : index
    %c0_260 = arith.constant 0 : index
    %c0_261 = arith.constant 0 : index
    %319 = vector.load %arg4[%c0_258, %c2_259, %c0_260, %c0_261] : memref<3x4x32x32xf32, #tpu.memory_space<vmem>>, vector<1x1x32x32xf32>
    %320 = vector.shape_cast %319 : vector<1x1x32x32xf32> to vector<32x32xf32>
    %cst_262 = arith.constant dense<0.000000e+00> : vector<2x32xf32>
    %321 = tpu.matmul %311, %320, %cst_262 {dimension_numbers = #tpu.dot_dimension_numbers<[1], [0], [0], [1], [0, 0, 1, 1], [], []>} : vector<2x32xf32>, vector<32x32xf32>, vector<2x32xf32> -> vector<2x32xf32>
    %c0_263 = arith.constant 0 : index
    %c3_264 = arith.constant 3 : index
    %c0_265 = arith.constant 0 : index
    %c0_266 = arith.constant 0 : index
    %322 = vector.load %arg4[%c0_263, %c3_264, %c0_265, %c0_266] : memref<3x4x32x32xf32, #tpu.memory_space<vmem>>, vector<1x1x32x32xf32>
    %323 = vector.shape_cast %322 : vector<1x1x32x32xf32> to vector<32x32xf32>
    %cst_267 = arith.constant dense<0.000000e+00> : vector<2x32xf32>
    %324 = tpu.matmul %311, %323, %cst_267 {dimension_numbers = #tpu.dot_dimension_numbers<[1], [0], [0], [1], [0, 0, 1, 1], [], []>} : vector<2x32xf32>, vector<32x32xf32>, vector<2x32xf32> -> vector<2x32xf32>
    %c0_268 = arith.constant 0 : index
    %c12 = arith.constant 12 : index
    %c0_269 = arith.constant 0 : index
    %325 = vector.load %arg14[%c0_268, %c12, %c0_269] : memref<4x16x32xf32, #tpu.memory_space<vmem>>, vector<1x2x32xf32>
    %326 = vector.shape_cast %325 : vector<1x2x32xf32> to vector<2x32xf32>
    %327 = arith.addf %326, %315 : vector<2x32xf32>
    %328 = arith.negf %327 : vector<2x32xf32>
    %329 = math.exp %328 : vector<2x32xf32>
    %cst_270 = arith.constant 1.000000e+00 : f32
    %330 = vector.broadcast %cst_270 : f32 to vector<2x32xf32>
    %331 = arith.addf %330, %329 : vector<2x32xf32>
    %332 = arith.divf %330, %331 : vector<2x32xf32>
    %c1_271 = arith.constant 1 : index
    %c12_272 = arith.constant 12 : index
    %c0_273 = arith.constant 0 : index
    %333 = vector.load %arg14[%c1_271, %c12_272, %c0_273] : memref<4x16x32xf32, #tpu.memory_space<vmem>>, vector<1x2x32xf32>
    %334 = vector.shape_cast %333 : vector<1x2x32xf32> to vector<2x32xf32>
    %335 = arith.addf %334, %318 : vector<2x32xf32>
    %336 = arith.negf %335 : vector<2x32xf32>
    %337 = math.exp %336 : vector<2x32xf32>
    %cst_274 = arith.constant 1.000000e+00 : f32
    %338 = vector.broadcast %cst_274 : f32 to vector<2x32xf32>
    %339 = arith.addf %338, %337 : vector<2x32xf32>
    %340 = arith.divf %338, %339 : vector<2x32xf32>
    %c2_275 = arith.constant 2 : index
    %c12_276 = arith.constant 12 : index
    %c0_277 = arith.constant 0 : index
    %341 = vector.load %arg14[%c2_275, %c12_276, %c0_277] : memref<4x16x32xf32, #tpu.memory_space<vmem>>, vector<1x2x32xf32>
    %342 = vector.shape_cast %341 : vector<1x2x32xf32> to vector<2x32xf32>
    %343 = arith.addf %342, %321 : vector<2x32xf32>
    %344 = math.tanh %343 : vector<2x32xf32>
    %c3_278 = arith.constant 3 : index
    %c12_279 = arith.constant 12 : index
    %c0_280 = arith.constant 0 : index
    %345 = vector.load %arg14[%c3_278, %c12_279, %c0_280] : memref<4x16x32xf32, #tpu.memory_space<vmem>>, vector<1x2x32xf32>
    %346 = vector.shape_cast %345 : vector<1x2x32xf32> to vector<2x32xf32>
    %347 = arith.addf %346, %324 : vector<2x32xf32>
    %348 = arith.negf %347 : vector<2x32xf32>
    %349 = math.exp %348 : vector<2x32xf32>
    %cst_281 = arith.constant 1.000000e+00 : f32
    %350 = vector.broadcast %cst_281 : f32 to vector<2x32xf32>
    %351 = arith.addf %350, %349 : vector<2x32xf32>
    %352 = arith.divf %350, %351 : vector<2x32xf32>
    %353 = arith.mulf %340, %309 : vector<2x32xf32>
    %354 = arith.mulf %332, %344 : vector<2x32xf32>
    %355 = arith.addf %353, %354 : vector<2x32xf32>
    %356 = math.tanh %355 : vector<2x32xf32>
    %357 = arith.mulf %352, %356 : vector<2x32xf32>
    %c12_282 = arith.constant 12 : index
    %c0_283 = arith.constant 0 : index
    %358 = vector.load %arg13[%c12_282, %c0_283] : memref<16x32xf32, #tpu.memory_space<vmem>>, vector<2x32xf32>
    tpu.vector_store %arg13[%c12_282, %c0_283], %357 {strides = array<i32>} : memref<16x32xf32, #tpu.memory_space<vmem>>, vector<2x32xf32>,
    %c0_284 = arith.constant 0 : index
    %c0_285 = arith.constant 0 : index
    %c0_286 = arith.constant 0 : index
    %c0_287 = arith.constant 0 : index
    %359 = vector.load %arg4[%c0_284, %c0_285, %c0_286, %c0_287] : memref<3x4x32x32xf32, #tpu.memory_space<vmem>>, vector<1x1x32x32xf32>
    %360 = vector.shape_cast %359 : vector<1x1x32x32xf32> to vector<32x32xf32>
    %cst_288 = arith.constant dense<0.000000e+00> : vector<2x32xf32>
    %361 = tpu.matmul %357, %360, %cst_288 {dimension_numbers = #tpu.dot_dimension_numbers<[1], [0], [0], [1], [0, 0, 1, 1], [], []>} : vector<2x32xf32>, vector<32x32xf32>, vector<2x32xf32> -> vector<2x32xf32>
    %c0_289 = arith.constant 0 : index
    %c1_290 = arith.constant 1 : index
    %c0_291 = arith.constant 0 : index
    %c0_292 = arith.constant 0 : index
    %362 = vector.load %arg4[%c0_289, %c1_290, %c0_291, %c0_292] : memref<3x4x32x32xf32, #tpu.memory_space<vmem>>, vector<1x1x32x32xf32>
    %363 = vector.shape_cast %362 : vector<1x1x32x32xf32> to vector<32x32xf32>
    %cst_293 = arith.constant dense<0.000000e+00> : vector<2x32xf32>
    %364 = tpu.matmul %357, %363, %cst_293 {dimension_numbers = #tpu.dot_dimension_numbers<[1], [0], [0], [1], [0, 0, 1, 1], [], []>} : vector<2x32xf32>, vector<32x32xf32>, vector<2x32xf32> -> vector<2x32xf32>
    %c0_294 = arith.constant 0 : index
    %c2_295 = arith.constant 2 : index
    %c0_296 = arith.constant 0 : index
    %c0_297 = arith.constant 0 : index
    %365 = vector.load %arg4[%c0_294, %c2_295, %c0_296, %c0_297] : memref<3x4x32x32xf32, #tpu.memory_space<vmem>>, vector<1x1x32x32xf32>
    %366 = vector.shape_cast %365 : vector<1x1x32x32xf32> to vector<32x32xf32>
    %cst_298 = arith.constant dense<0.000000e+00> : vector<2x32xf32>
    %367 = tpu.matmul %357, %366, %cst_298 {dimension_numbers = #tpu.dot_dimension_numbers<[1], [0], [0], [1], [0, 0, 1, 1], [], []>} : vector<2x32xf32>, vector<32x32xf32>, vector<2x32xf32> -> vector<2x32xf32>
    %c0_299 = arith.constant 0 : index
    %c3_300 = arith.constant 3 : index
    %c0_301 = arith.constant 0 : index
    %c0_302 = arith.constant 0 : index
    %368 = vector.load %arg4[%c0_299, %c3_300, %c0_301, %c0_302] : memref<3x4x32x32xf32, #tpu.memory_space<vmem>>, vector<1x1x32x32xf32>
    %369 = vector.shape_cast %368 : vector<1x1x32x32xf32> to vector<32x32xf32>
    %cst_303 = arith.constant dense<0.000000e+00> : vector<2x32xf32>
    %370 = tpu.matmul %357, %369, %cst_303 {dimension_numbers = #tpu.dot_dimension_numbers<[1], [0], [0], [1], [0, 0, 1, 1], [], []>} : vector<2x32xf32>, vector<32x32xf32>, vector<2x32xf32> -> vector<2x32xf32>
    %c0_304 = arith.constant 0 : index
    %c14 = arith.constant 14 : index
    %c0_305 = arith.constant 0 : index
    %371 = vector.load %arg14[%c0_304, %c14, %c0_305] : memref<4x16x32xf32, #tpu.memory_space<vmem>>, vector<1x2x32xf32>
    %372 = vector.shape_cast %371 : vector<1x2x32xf32> to vector<2x32xf32>
    %373 = arith.addf %372, %361 : vector<2x32xf32>
    %374 = arith.negf %373 : vector<2x32xf32>
    %375 = math.exp %374 : vector<2x32xf32>
    %cst_306 = arith.constant 1.000000e+00 : f32
    %376 = vector.broadcast %cst_306 : f32 to vector<2x32xf32>
    %377 = arith.addf %376, %375 : vector<2x32xf32>
    %378 = arith.divf %376, %377 : vector<2x32xf32>
    %c1_307 = arith.constant 1 : index
    %c14_308 = arith.constant 14 : index
    %c0_309 = arith.constant 0 : index
    %379 = vector.load %arg14[%c1_307, %c14_308, %c0_309] : memref<4x16x32xf32, #tpu.memory_space<vmem>>, vector<1x2x32xf32>
    %380 = vector.shape_cast %379 : vector<1x2x32xf32> to vector<2x32xf32>
    %381 = arith.addf %380, %364 : vector<2x32xf32>
    %382 = arith.negf %381 : vector<2x32xf32>
    %383 = math.exp %382 : vector<2x32xf32>
    %cst_310 = arith.constant 1.000000e+00 : f32
    %384 = vector.broadcast %cst_310 : f32 to vector<2x32xf32>
    %385 = arith.addf %384, %383 : vector<2x32xf32>
    %386 = arith.divf %384, %385 : vector<2x32xf32>
    %c2_311 = arith.constant 2 : index
    %c14_312 = arith.constant 14 : index
    %c0_313 = arith.constant 0 : index
    %387 = vector.load %arg14[%c2_311, %c14_312, %c0_313] : memref<4x16x32xf32, #tpu.memory_space<vmem>>, vector<1x2x32xf32>
    %388 = vector.shape_cast %387 : vector<1x2x32xf32> to vector<2x32xf32>
    %389 = arith.addf %388, %367 : vector<2x32xf32>
    %390 = math.tanh %389 : vector<2x32xf32>
    %c3_314 = arith.constant 3 : index
    %c14_315 = arith.constant 14 : index
    %c0_316 = arith.constant 0 : index
    %391 = vector.load %arg14[%c3_314, %c14_315, %c0_316] : memref<4x16x32xf32, #tpu.memory_space<vmem>>, vector<1x2x32xf32>
    %392 = vector.shape_cast %391 : vector<1x2x32xf32> to vector<2x32xf32>
    %393 = arith.addf %392, %370 : vector<2x32xf32>
    %394 = arith.negf %393 : vector<2x32xf32>
    %395 = math.exp %394 : vector<2x32xf32>
    %cst_317 = arith.constant 1.000000e+00 : f32
    %396 = vector.broadcast %cst_317 : f32 to vector<2x32xf32>
    %397 = arith.addf %396, %395 : vector<2x32xf32>
    %398 = arith.divf %396, %397 : vector<2x32xf32>
    %399 = arith.mulf %386, %355 : vector<2x32xf32>
    %400 = arith.mulf %378, %390 : vector<2x32xf32>
    %401 = arith.addf %399, %400 : vector<2x32xf32>
    %402 = math.tanh %401 : vector<2x32xf32>
    %403 = arith.mulf %398, %402 : vector<2x32xf32>
    %c14_318 = arith.constant 14 : index
    %c0_319 = arith.constant 0 : index
    %404 = vector.load %arg13[%c14_318, %c0_319] : memref<16x32xf32, #tpu.memory_space<vmem>>, vector<2x32xf32>
    tpu.vector_store %arg13[%c14_318, %c0_319], %403 {strides = array<i32>} : memref<16x32xf32, #tpu.memory_space<vmem>>, vector<2x32xf32>,
    %c0_320 = arith.constant 0 : index
    %c0_321 = arith.constant 0 : index
    %c0_322 = arith.constant 0 : index
    %405 = vector.load %arg11[%c0_320, %c0_321, %c0_322] : memref<2x3x32xf32, #tpu.memory_space<vmem>>, vector<2x1x32xf32>
    %406 = vector.shape_cast %405 : vector<2x1x32xf32> to vector<2x32xf32>
    %407 = vector.shape_cast %403 : vector<2x32xf32> to vector<2x1x32xf32>
    tpu.vector_store %arg11[%c0_320, %c0_321, %c0_322], %407 {strides = array<i32>} : memref<2x3x32xf32, #tpu.memory_space<vmem>>, vector<2x1x32xf32>,
    %c0_323 = arith.constant 0 : index
    %c0_324 = arith.constant 0 : index
    %c0_325 = arith.constant 0 : index
    %408 = vector.load %arg12[%c0_323, %c0_324, %c0_325] : memref<2x3x32xf32, #tpu.memory_space<vmem>>, vector<2x1x32xf32>
    %409 = vector.shape_cast %408 : vector<2x1x32xf32> to vector<2x32xf32>
    %410 = vector.shape_cast %401 : vector<2x32xf32> to vector<2x1x32xf32>
    tpu.vector_store %arg12[%c0_323, %c0_324, %c0_325], %410 {strides = array<i32>} : memref<2x3x32xf32, #tpu.memory_space<vmem>>, vector<2x1x32xf32>,
    %c0_326 = arith.constant 0 : index
    %c0_327 = arith.constant 0 : index
    %411 = vector.load %arg13[%c0_326, %c0_327] : memref<16x32xf32, #tpu.memory_space<vmem>>, vector<16x32xf32>
    %c1_328 = arith.constant 1 : index
    %c0_329 = arith.constant 0 : index
    %c0_330 = arith.constant 0 : index
    %412 = vector.load %arg3[%c1_328, %c0_329, %c0_330] : memref<3x32x128xf32, #tpu.memory_space<vmem>>, vector<1x32x128xf32>
    %413 = vector.shape_cast %412 : vector<1x32x128xf32> to vector<32x128xf32>
    %cst_331 = arith.constant dense<0.000000e+00> : vector<16x128xf32>
    %414 = tpu.matmul %411, %413, %cst_331 {dimension_numbers = #tpu.dot_dimension_numbers<[1], [0], [0], [1], [0, 0, 1, 1], [], []>} : vector<16x32xf32>, vector<32x128xf32>, vector<16x128xf32> -> vector<16x128xf32>
    %c1_332 = arith.constant 1 : index
    %c0_333 = arith.constant 0 : index
    %c0_334 = arith.constant 0 : index
    %415 = vector.load %arg5[%c1_332, %c0_333, %c0_334] : memref<3x1x128xf32, #tpu.memory_space<vmem>>, vector<1x1x128xf32>
    %416 = vector.shape_cast %415 : vector<1x1x128xf32> to vector<1x128xf32>
    %417 = vector.broadcast %416 : vector<1x128xf32> to vector<16x128xf32>
    %418 = arith.addf %414, %417 : vector<16x128xf32>
    %419 = vector.extract_strided_slice %418 {offsets = [0, 0], sizes = [16, 32], strides = [1, 1]} : vector<16x128xf32> to vector<16x32xf32>
    %c0_335 = arith.constant 0 : index
    %c0_336 = arith.constant 0 : index
    %c0_337 = arith.constant 0 : index
    %420 = vector.load %arg14[%c0_335, %c0_336, %c0_337] : memref<4x16x32xf32, #tpu.memory_space<vmem>>, vector<1x16x32xf32>
    %421 = vector.shape_cast %420 : vector<1x16x32xf32> to vector<16x32xf32>
    %422 = vector.shape_cast %419 : vector<16x32xf32> to vector<1x16x32xf32>
    tpu.vector_store %arg14[%c0_335, %c0_336, %c0_337], %422 {strides = array<i32>} : memref<4x16x32xf32, #tpu.memory_space<vmem>>, vector<1x16x32xf32>,
    %423 = vector.extract_strided_slice %418 {offsets = [0, 32], sizes = [16, 32], strides = [1, 1]} : vector<16x128xf32> to vector<16x32xf32>
    %c1_338 = arith.constant 1 : index
    %c0_339 = arith.constant 0 : index
    %c0_340 = arith.constant 0 : index
    %424 = vector.load %arg14[%c1_338, %c0_339, %c0_340] : memref<4x16x32xf32, #tpu.memory_space<vmem>>, vector<1x16x32xf32>
    %425 = vector.shape_cast %424 : vector<1x16x32xf32> to vector<16x32xf32>
    %426 = vector.shape_cast %423 : vector<16x32xf32> to vector<1x16x32xf32>
    tpu.vector_store %arg14[%c1_338, %c0_339, %c0_340], %426 {strides = array<i32>} : memref<4x16x32xf32, #tpu.memory_space<vmem>>, vector<1x16x32xf32>,
    %427 = vector.extract_strided_slice %418 {offsets = [0, 64], sizes = [16, 32], strides = [1, 1]} : vector<16x128xf32> to vector<16x32xf32>
    %c2_341 = arith.constant 2 : index
    %c0_342 = arith.constant 0 : index
    %c0_343 = arith.constant 0 : index
    %428 = vector.load %arg14[%c2_341, %c0_342, %c0_343] : memref<4x16x32xf32, #tpu.memory_space<vmem>>, vector<1x16x32xf32>
    %429 = vector.shape_cast %428 : vector<1x16x32xf32> to vector<16x32xf32>
    %430 = vector.shape_cast %427 : vector<16x32xf32> to vector<1x16x32xf32>
    tpu.vector_store %arg14[%c2_341, %c0_342, %c0_343], %430 {strides = array<i32>} : memref<4x16x32xf32, #tpu.memory_space<vmem>>, vector<1x16x32xf32>,
    %431 = vector.extract_strided_slice %418 {offsets = [0, 96], sizes = [16, 32], strides = [1, 1]} : vector<16x128xf32> to vector<16x32xf32>
    %c3_344 = arith.constant 3 : index
    %c0_345 = arith.constant 0 : index
    %c0_346 = arith.constant 0 : index
    %432 = vector.load %arg14[%c3_344, %c0_345, %c0_346] : memref<4x16x32xf32, #tpu.memory_space<vmem>>, vector<1x16x32xf32>
    %433 = vector.shape_cast %432 : vector<1x16x32xf32> to vector<16x32xf32>
    %434 = vector.shape_cast %431 : vector<16x32xf32> to vector<1x16x32xf32>
    tpu.vector_store %arg14[%c3_344, %c0_345, %c0_346], %434 {strides = array<i32>} : memref<4x16x32xf32, #tpu.memory_space<vmem>>, vector<1x16x32xf32>,
    %c0_347 = arith.constant 0 : index
    %c1_348 = arith.constant 1 : index
    %c0_349 = arith.constant 0 : index
    %435 = vector.load %arg8[%c0_347, %c1_348, %c0_349] : memref<2x3x32xf32, #tpu.memory_space<vmem>>, vector<2x1x32xf32>
    %436 = vector.shape_cast %435 : vector<2x1x32xf32> to vector<2x32xf32>
    %c0_350 = arith.constant 0 : index
    %c1_351 = arith.constant 1 : index
    %c0_352 = arith.constant 0 : index
    %437 = vector.load %arg9[%c0_350, %c1_351, %c0_352] : memref<2x3x32xf32, #tpu.memory_space<vmem>>, vector<2x1x32xf32>
    %438 = vector.shape_cast %437 : vector<2x1x32xf32> to vector<2x32xf32>
    %c1_353 = arith.constant 1 : index
    %c0_354 = arith.constant 0 : index
    %c0_355 = arith.constant 0 : index
    %c0_356 = arith.constant 0 : index
    %439 = vector.load %arg4[%c1_353, %c0_354, %c0_355, %c0_356] : memref<3x4x32x32xf32, #tpu.memory_space<vmem>>, vector<1x1x32x32xf32>
    %440 = vector.shape_cast %439 : vector<1x1x32x32xf32> to vector<32x32xf32>
    %cst_357 = arith.constant dense<0.000000e+00> : vector<2x32xf32>
    %441 = tpu.matmul %436, %440, %cst_357 {dimension_numbers = #tpu.dot_dimension_numbers<[1], [0], [0], [1], [0, 0, 1, 1], [], []>} : vector<2x32xf32>, vector<32x32xf32>, vector<2x32xf32> -> vector<2x32xf32>
    %c1_358 = arith.constant 1 : index
    %c1_359 = arith.constant 1 : index
    %c0_360 = arith.constant 0 : index
    %c0_361 = arith.constant 0 : index
    %442 = vector.load %arg4[%c1_358, %c1_359, %c0_360, %c0_361] : memref<3x4x32x32xf32, #tpu.memory_space<vmem>>, vector<1x1x32x32xf32>
    %443 = vector.shape_cast %442 : vector<1x1x32x32xf32> to vector<32x32xf32>
    %cst_362 = arith.constant dense<0.000000e+00> : vector<2x32xf32>
    %444 = tpu.matmul %436, %443, %cst_362 {dimension_numbers = #tpu.dot_dimension_numbers<[1], [0], [0], [1], [0, 0, 1, 1], [], []>} : vector<2x32xf32>, vector<32x32xf32>, vector<2x32xf32> -> vector<2x32xf32>
    %c1_363 = arith.constant 1 : index
    %c2_364 = arith.constant 2 : index
    %c0_365 = arith.constant 0 : index
    %c0_366 = arith.constant 0 : index
    %445 = vector.load %arg4[%c1_363, %c2_364, %c0_365, %c0_366] : memref<3x4x32x32xf32, #tpu.memory_space<vmem>>, vector<1x1x32x32xf32>
    %446 = vector.shape_cast %445 : vector<1x1x32x32xf32> to vector<32x32xf32>
    %cst_367 = arith.constant dense<0.000000e+00> : vector<2x32xf32>
    %447 = tpu.matmul %436, %446, %cst_367 {dimension_numbers = #tpu.dot_dimension_numbers<[1], [0], [0], [1], [0, 0, 1, 1], [], []>} : vector<2x32xf32>, vector<32x32xf32>, vector<2x32xf32> -> vector<2x32xf32>
    %c1_368 = arith.constant 1 : index
    %c3_369 = arith.constant 3 : index
    %c0_370 = arith.constant 0 : index
    %c0_371 = arith.constant 0 : index
    %448 = vector.load %arg4[%c1_368, %c3_369, %c0_370, %c0_371] : memref<3x4x32x32xf32, #tpu.memory_space<vmem>>, vector<1x1x32x32xf32>
    %449 = vector.shape_cast %448 : vector<1x1x32x32xf32> to vector<32x32xf32>
    %cst_372 = arith.constant dense<0.000000e+00> : vector<2x32xf32>
    %450 = tpu.matmul %436, %449, %cst_372 {dimension_numbers = #tpu.dot_dimension_numbers<[1], [0], [0], [1], [0, 0, 1, 1], [], []>} : vector<2x32xf32>, vector<32x32xf32>, vector<2x32xf32> -> vector<2x32xf32>
    %c0_373 = arith.constant 0 : index
    %c0_374 = arith.constant 0 : index
    %c0_375 = arith.constant 0 : index
    %451 = vector.load %arg14[%c0_373, %c0_374, %c0_375] : memref<4x16x32xf32, #tpu.memory_space<vmem>>, vector<1x2x32xf32>
    %452 = vector.shape_cast %451 : vector<1x2x32xf32> to vector<2x32xf32>
    %453 = arith.addf %452, %441 : vector<2x32xf32>
    %454 = arith.negf %453 : vector<2x32xf32>
    %455 = math.exp %454 : vector<2x32xf32>
    %cst_376 = arith.constant 1.000000e+00 : f32
    %456 = vector.broadcast %cst_376 : f32 to vector<2x32xf32>
    %457 = arith.addf %456, %455 : vector<2x32xf32>
    %458 = arith.divf %456, %457 : vector<2x32xf32>
    %c1_377 = arith.constant 1 : index
    %c0_378 = arith.constant 0 : index
    %c0_379 = arith.constant 0 : index
    %459 = vector.load %arg14[%c1_377, %c0_378, %c0_379] : memref<4x16x32xf32, #tpu.memory_space<vmem>>, vector<1x2x32xf32>
    %460 = vector.shape_cast %459 : vector<1x2x32xf32> to vector<2x32xf32>
    %461 = arith.addf %460, %444 : vector<2x32xf32>
    %462 = arith.negf %461 : vector<2x32xf32>
    %463 = math.exp %462 : vector<2x32xf32>
    %cst_380 = arith.constant 1.000000e+00 : f32
    %464 = vector.broadcast %cst_380 : f32 to vector<2x32xf32>
    %465 = arith.addf %464, %463 : vector<2x32xf32>
    %466 = arith.divf %464, %465 : vector<2x32xf32>
    %c2_381 = arith.constant 2 : index
    %c0_382 = arith.constant 0 : index
    %c0_383 = arith.constant 0 : index
    %467 = vector.load %arg14[%c2_381, %c0_382, %c0_383] : memref<4x16x32xf32, #tpu.memory_space<vmem>>, vector<1x2x32xf32>
    %468 = vector.shape_cast %467 : vector<1x2x32xf32> to vector<2x32xf32>
    %469 = arith.addf %468, %447 : vector<2x32xf32>
    %470 = math.tanh %469 : vector<2x32xf32>
    %c3_384 = arith.constant 3 : index
    %c0_385 = arith.constant 0 : index
    %c0_386 = arith.constant 0 : index
    %471 = vector.load %arg14[%c3_384, %c0_385, %c0_386] : memref<4x16x32xf32, #tpu.memory_space<vmem>>, vector<1x2x32xf32>
    %472 = vector.shape_cast %471 : vector<1x2x32xf32> to vector<2x32xf32>
    %473 = arith.addf %472, %450 : vector<2x32xf32>
    %474 = arith.negf %473 : vector<2x32xf32>
    %475 = math.exp %474 : vector<2x32xf32>
    %cst_387 = arith.constant 1.000000e+00 : f32
    %476 = vector.broadcast %cst_387 : f32 to vector<2x32xf32>
    %477 = arith.addf %476, %475 : vector<2x32xf32>
    %478 = arith.divf %476, %477 : vector<2x32xf32>
    %479 = arith.mulf %466, %438 : vector<2x32xf32>
    %480 = arith.mulf %458, %470 : vector<2x32xf32>
    %481 = arith.addf %479, %480 : vector<2x32xf32>
    %482 = math.tanh %481 : vector<2x32xf32>
    %483 = arith.mulf %478, %482 : vector<2x32xf32>
    %c0_388 = arith.constant 0 : index
    %c0_389 = arith.constant 0 : index
    %484 = vector.load %arg13[%c0_388, %c0_389] : memref<16x32xf32, #tpu.memory_space<vmem>>, vector<2x32xf32>
    tpu.vector_store %arg13[%c0_388, %c0_389], %483 {strides = array<i32>} : memref<16x32xf32, #tpu.memory_space<vmem>>, vector<2x32xf32>,
    %c1_390 = arith.constant 1 : index
    %c0_391 = arith.constant 0 : index
    %c0_392 = arith.constant 0 : index
    %c0_393 = arith.constant 0 : index
    %485 = vector.load %arg4[%c1_390, %c0_391, %c0_392, %c0_393] : memref<3x4x32x32xf32, #tpu.memory_space<vmem>>, vector<1x1x32x32xf32>
    %486 = vector.shape_cast %485 : vector<1x1x32x32xf32> to vector<32x32xf32>
    %cst_394 = arith.constant dense<0.000000e+00> : vector<2x32xf32>
    %487 = tpu.matmul %483, %486, %cst_394 {dimension_numbers = #tpu.dot_dimension_numbers<[1], [0], [0], [1], [0, 0, 1, 1], [], []>} : vector<2x32xf32>, vector<32x32xf32>, vector<2x32xf32> -> vector<2x32xf32>
    %c1_395 = arith.constant 1 : index
    %c1_396 = arith.constant 1 : index
    %c0_397 = arith.constant 0 : index
    %c0_398 = arith.constant 0 : index
    %488 = vector.load %arg4[%c1_395, %c1_396, %c0_397, %c0_398] : memref<3x4x32x32xf32, #tpu.memory_space<vmem>>, vector<1x1x32x32xf32>
    %489 = vector.shape_cast %488 : vector<1x1x32x32xf32> to vector<32x32xf32>
    %cst_399 = arith.constant dense<0.000000e+00> : vector<2x32xf32>
    %490 = tpu.matmul %483, %489, %cst_399 {dimension_numbers = #tpu.dot_dimension_numbers<[1], [0], [0], [1], [0, 0, 1, 1], [], []>} : vector<2x32xf32>, vector<32x32xf32>, vector<2x32xf32> -> vector<2x32xf32>
    %c1_400 = arith.constant 1 : index
    %c2_401 = arith.constant 2 : index
    %c0_402 = arith.constant 0 : index
    %c0_403 = arith.constant 0 : index
    %491 = vector.load %arg4[%c1_400, %c2_401, %c0_402, %c0_403] : memref<3x4x32x32xf32, #tpu.memory_space<vmem>>, vector<1x1x32x32xf32>
    %492 = vector.shape_cast %491 : vector<1x1x32x32xf32> to vector<32x32xf32>
    %cst_404 = arith.constant dense<0.000000e+00> : vector<2x32xf32>
    %493 = tpu.matmul %483, %492, %cst_404 {dimension_numbers = #tpu.dot_dimension_numbers<[1], [0], [0], [1], [0, 0, 1, 1], [], []>} : vector<2x32xf32>, vector<32x32xf32>, vector<2x32xf32> -> vector<2x32xf32>
    %c1_405 = arith.constant 1 : index
    %c3_406 = arith.constant 3 : index
    %c0_407 = arith.constant 0 : index
    %c0_408 = arith.constant 0 : index
    %494 = vector.load %arg4[%c1_405, %c3_406, %c0_407, %c0_408] : memref<3x4x32x32xf32, #tpu.memory_space<vmem>>, vector<1x1x32x32xf32>
    %495 = vector.shape_cast %494 : vector<1x1x32x32xf32> to vector<32x32xf32>
    %cst_409 = arith.constant dense<0.000000e+00> : vector<2x32xf32>
    %496 = tpu.matmul %483, %495, %cst_409 {dimension_numbers = #tpu.dot_dimension_numbers<[1], [0], [0], [1], [0, 0, 1, 1], [], []>} : vector<2x32xf32>, vector<32x32xf32>, vector<2x32xf32> -> vector<2x32xf32>
    %c0_410 = arith.constant 0 : index
    %c2_411 = arith.constant 2 : index
    %c0_412 = arith.constant 0 : index
    %497 = vector.load %arg14[%c0_410, %c2_411, %c0_412] : memref<4x16x32xf32, #tpu.memory_space<vmem>>, vector<1x2x32xf32>
    %498 = vector.shape_cast %497 : vector<1x2x32xf32> to vector<2x32xf32>
    %499 = arith.addf %498, %487 : vector<2x32xf32>
    %500 = arith.negf %499 : vector<2x32xf32>
    %501 = math.exp %500 : vector<2x32xf32>
    %cst_413 = arith.constant 1.000000e+00 : f32
    %502 = vector.broadcast %cst_413 : f32 to vector<2x32xf32>
    %503 = arith.addf %502, %501 : vector<2x32xf32>
    %504 = arith.divf %502, %503 : vector<2x32xf32>
    %c1_414 = arith.constant 1 : index
    %c2_415 = arith.constant 2 : index
    %c0_416 = arith.constant 0 : index
    %505 = vector.load %arg14[%c1_414, %c2_415, %c0_416] : memref<4x16x32xf32, #tpu.memory_space<vmem>>, vector<1x2x32xf32>
    %506 = vector.shape_cast %505 : vector<1x2x32xf32> to vector<2x32xf32>
    %507 = arith.addf %506, %490 : vector<2x32xf32>
    %508 = arith.negf %507 : vector<2x32xf32>
    %509 = math.exp %508 : vector<2x32xf32>
    %cst_417 = arith.constant 1.000000e+00 : f32
    %510 = vector.broadcast %cst_417 : f32 to vector<2x32xf32>
    %511 = arith.addf %510, %509 : vector<2x32xf32>
    %512 = arith.divf %510, %511 : vector<2x32xf32>
    %c2_418 = arith.constant 2 : index
    %c2_419 = arith.constant 2 : index
    %c0_420 = arith.constant 0 : index
    %513 = vector.load %arg14[%c2_418, %c2_419, %c0_420] : memref<4x16x32xf32, #tpu.memory_space<vmem>>, vector<1x2x32xf32>
    %514 = vector.shape_cast %513 : vector<1x2x32xf32> to vector<2x32xf32>
    %515 = arith.addf %514, %493 : vector<2x32xf32>
    %516 = math.tanh %515 : vector<2x32xf32>
    %c3_421 = arith.constant 3 : index
    %c2_422 = arith.constant 2 : index
    %c0_423 = arith.constant 0 : index
    %517 = vector.load %arg14[%c3_421, %c2_422, %c0_423] : memref<4x16x32xf32, #tpu.memory_space<vmem>>, vector<1x2x32xf32>
    %518 = vector.shape_cast %517 : vector<1x2x32xf32> to vector<2x32xf32>
    %519 = arith.addf %518, %496 : vector<2x32xf32>
    %520 = arith.negf %519 : vector<2x32xf32>
    %521 = math.exp %520 : vector<2x32xf32>
    %cst_424 = arith.constant 1.000000e+00 : f32
    %522 = vector.broadcast %cst_424 : f32 to vector<2x32xf32>
    %523 = arith.addf %522, %521 : vector<2x32xf32>
    %524 = arith.divf %522, %523 : vector<2x32xf32>
    %525 = arith.mulf %512, %481 : vector<2x32xf32>
    %526 = arith.mulf %504, %516 : vector<2x32xf32>
    %527 = arith.addf %525, %526 : vector<2x32xf32>
    %528 = math.tanh %527 : vector<2x32xf32>
    %529 = arith.mulf %524, %528 : vector<2x32xf32>
    %c2_425 = arith.constant 2 : index
    %c0_426 = arith.constant 0 : index
    %530 = vector.load %arg13[%c2_425, %c0_426] : memref<16x32xf32, #tpu.memory_space<vmem>>, vector<2x32xf32>
    tpu.vector_store %arg13[%c2_425, %c0_426], %529 {strides = array<i32>} : memref<16x32xf32, #tpu.memory_space<vmem>>, vector<2x32xf32>,
    %c1_427 = arith.constant 1 : index
    %c0_428 = arith.constant 0 : index
    %c0_429 = arith.constant 0 : index
    %c0_430 = arith.constant 0 : index
    %531 = vector.load %arg4[%c1_427, %c0_428, %c0_429, %c0_430] : memref<3x4x32x32xf32, #tpu.memory_space<vmem>>, vector<1x1x32x32xf32>
    %532 = vector.shape_cast %531 : vector<1x1x32x32xf32> to vector<32x32xf32>
    %cst_431 = arith.constant dense<0.000000e+00> : vector<2x32xf32>
    %533 = tpu.matmul %529, %532, %cst_431 {dimension_numbers = #tpu.dot_dimension_numbers<[1], [0], [0], [1], [0, 0, 1, 1], [], []>} : vector<2x32xf32>, vector<32x32xf32>, vector<2x32xf32> -> vector<2x32xf32>
    %c1_432 = arith.constant 1 : index
    %c1_433 = arith.constant 1 : index
    %c0_434 = arith.constant 0 : index
    %c0_435 = arith.constant 0 : index
    %534 = vector.load %arg4[%c1_432, %c1_433, %c0_434, %c0_435] : memref<3x4x32x32xf32, #tpu.memory_space<vmem>>, vector<1x1x32x32xf32>
    %535 = vector.shape_cast %534 : vector<1x1x32x32xf32> to vector<32x32xf32>
    %cst_436 = arith.constant dense<0.000000e+00> : vector<2x32xf32>
    %536 = tpu.matmul %529, %535, %cst_436 {dimension_numbers = #tpu.dot_dimension_numbers<[1], [0], [0], [1], [0, 0, 1, 1], [], []>} : vector<2x32xf32>, vector<32x32xf32>, vector<2x32xf32> -> vector<2x32xf32>
    %c1_437 = arith.constant 1 : index
    %c2_438 = arith.constant 2 : index
    %c0_439 = arith.constant 0 : index
    %c0_440 = arith.constant 0 : index
    %537 = vector.load %arg4[%c1_437, %c2_438, %c0_439, %c0_440] : memref<3x4x32x32xf32, #tpu.memory_space<vmem>>, vector<1x1x32x32xf32>
    %538 = vector.shape_cast %537 : vector<1x1x32x32xf32> to vector<32x32xf32>
    %cst_441 = arith.constant dense<0.000000e+00> : vector<2x32xf32>
    %539 = tpu.matmul %529, %538, %cst_441 {dimension_numbers = #tpu.dot_dimension_numbers<[1], [0], [0], [1], [0, 0, 1, 1], [], []>} : vector<2x32xf32>, vector<32x32xf32>, vector<2x32xf32> -> vector<2x32xf32>
    %c1_442 = arith.constant 1 : index
    %c3_443 = arith.constant 3 : index
    %c0_444 = arith.constant 0 : index
    %c0_445 = arith.constant 0 : index
    %540 = vector.load %arg4[%c1_442, %c3_443, %c0_444, %c0_445] : memref<3x4x32x32xf32, #tpu.memory_space<vmem>>, vector<1x1x32x32xf32>
    %541 = vector.shape_cast %540 : vector<1x1x32x32xf32> to vector<32x32xf32>
    %cst_446 = arith.constant dense<0.000000e+00> : vector<2x32xf32>
    %542 = tpu.matmul %529, %541, %cst_446 {dimension_numbers = #tpu.dot_dimension_numbers<[1], [0], [0], [1], [0, 0, 1, 1], [], []>} : vector<2x32xf32>, vector<32x32xf32>, vector<2x32xf32> -> vector<2x32xf32>
    %c0_447 = arith.constant 0 : index
    %c4_448 = arith.constant 4 : index
    %c0_449 = arith.constant 0 : index
    %543 = vector.load %arg14[%c0_447, %c4_448, %c0_449] : memref<4x16x32xf32, #tpu.memory_space<vmem>>, vector<1x2x32xf32>
    %544 = vector.shape_cast %543 : vector<1x2x32xf32> to vector<2x32xf32>
    %545 = arith.addf %544, %533 : vector<2x32xf32>
    %546 = arith.negf %545 : vector<2x32xf32>
    %547 = math.exp %546 : vector<2x32xf32>
    %cst_450 = arith.constant 1.000000e+00 : f32
    %548 = vector.broadcast %cst_450 : f32 to vector<2x32xf32>
    %549 = arith.addf %548, %547 : vector<2x32xf32>
    %550 = arith.divf %548, %549 : vector<2x32xf32>
    %c1_451 = arith.constant 1 : index
    %c4_452 = arith.constant 4 : index
    %c0_453 = arith.constant 0 : index
    %551 = vector.load %arg14[%c1_451, %c4_452, %c0_453] : memref<4x16x32xf32, #tpu.memory_space<vmem>>, vector<1x2x32xf32>
    %552 = vector.shape_cast %551 : vector<1x2x32xf32> to vector<2x32xf32>
    %553 = arith.addf %552, %536 : vector<2x32xf32>
    %554 = arith.negf %553 : vector<2x32xf32>
    %555 = math.exp %554 : vector<2x32xf32>
    %cst_454 = arith.constant 1.000000e+00 : f32
    %556 = vector.broadcast %cst_454 : f32 to vector<2x32xf32>
    %557 = arith.addf %556, %555 : vector<2x32xf32>
    %558 = arith.divf %556, %557 : vector<2x32xf32>
    %c2_455 = arith.constant 2 : index
    %c4_456 = arith.constant 4 : index
    %c0_457 = arith.constant 0 : index
    %559 = vector.load %arg14[%c2_455, %c4_456, %c0_457] : memref<4x16x32xf32, #tpu.memory_space<vmem>>, vector<1x2x32xf32>
    %560 = vector.shape_cast %559 : vector<1x2x32xf32> to vector<2x32xf32>
    %561 = arith.addf %560, %539 : vector<2x32xf32>
    %562 = math.tanh %561 : vector<2x32xf32>
    %c3_458 = arith.constant 3 : index
    %c4_459 = arith.constant 4 : index
    %c0_460 = arith.constant 0 : index
    %563 = vector.load %arg14[%c3_458, %c4_459, %c0_460] : memref<4x16x32xf32, #tpu.memory_space<vmem>>, vector<1x2x32xf32>
    %564 = vector.shape_cast %563 : vector<1x2x32xf32> to vector<2x32xf32>
    %565 = arith.addf %564, %542 : vector<2x32xf32>
    %566 = arith.negf %565 : vector<2x32xf32>
    %567 = math.exp %566 : vector<2x32xf32>
    %cst_461 = arith.constant 1.000000e+00 : f32
    %568 = vector.broadcast %cst_461 : f32 to vector<2x32xf32>
    %569 = arith.addf %568, %567 : vector<2x32xf32>
    %570 = arith.divf %568, %569 : vector<2x32xf32>
    %571 = arith.mulf %558, %527 : vector<2x32xf32>
    %572 = arith.mulf %550, %562 : vector<2x32xf32>
    %573 = arith.addf %571, %572 : vector<2x32xf32>
    %574 = math.tanh %573 : vector<2x32xf32>
    %575 = arith.mulf %570, %574 : vector<2x32xf32>
    %c4_462 = arith.constant 4 : index
    %c0_463 = arith.constant 0 : index
    %576 = vector.load %arg13[%c4_462, %c0_463] : memref<16x32xf32, #tpu.memory_space<vmem>>, vector<2x32xf32>
    tpu.vector_store %arg13[%c4_462, %c0_463], %575 {strides = array<i32>} : memref<16x32xf32, #tpu.memory_space<vmem>>, vector<2x32xf32>,
    %c1_464 = arith.constant 1 : index
    %c0_465 = arith.constant 0 : index
    %c0_466 = arith.constant 0 : index
    %c0_467 = arith.constant 0 : index
    %577 = vector.load %arg4[%c1_464, %c0_465, %c0_466, %c0_467] : memref<3x4x32x32xf32, #tpu.memory_space<vmem>>, vector<1x1x32x32xf32>
    %578 = vector.shape_cast %577 : vector<1x1x32x32xf32> to vector<32x32xf32>
    %cst_468 = arith.constant dense<0.000000e+00> : vector<2x32xf32>
    %579 = tpu.matmul %575, %578, %cst_468 {dimension_numbers = #tpu.dot_dimension_numbers<[1], [0], [0], [1], [0, 0, 1, 1], [], []>} : vector<2x32xf32>, vector<32x32xf32>, vector<2x32xf32> -> vector<2x32xf32>
    %c1_469 = arith.constant 1 : index
    %c1_470 = arith.constant 1 : index
    %c0_471 = arith.constant 0 : index
    %c0_472 = arith.constant 0 : index
    %580 = vector.load %arg4[%c1_469, %c1_470, %c0_471, %c0_472] : memref<3x4x32x32xf32, #tpu.memory_space<vmem>>, vector<1x1x32x32xf32>
    %581 = vector.shape_cast %580 : vector<1x1x32x32xf32> to vector<32x32xf32>
    %cst_473 = arith.constant dense<0.000000e+00> : vector<2x32xf32>
    %582 = tpu.matmul %575, %581, %cst_473 {dimension_numbers = #tpu.dot_dimension_numbers<[1], [0], [0], [1], [0, 0, 1, 1], [], []>} : vector<2x32xf32>, vector<32x32xf32>, vector<2x32xf32> -> vector<2x32xf32>
    %c1_474 = arith.constant 1 : index
    %c2_475 = arith.constant 2 : index
    %c0_476 = arith.constant 0 : index
    %c0_477 = arith.constant 0 : index
    %583 = vector.load %arg4[%c1_474, %c2_475, %c0_476, %c0_477] : memref<3x4x32x32xf32, #tpu.memory_space<vmem>>, vector<1x1x32x32xf32>
    %584 = vector.shape_cast %583 : vector<1x1x32x32xf32> to vector<32x32xf32>
    %cst_478 = arith.constant dense<0.000000e+00> : vector<2x32xf32>
    %585 = tpu.matmul %575, %584, %cst_478 {dimension_numbers = #tpu.dot_dimension_numbers<[1], [0], [0], [1], [0, 0, 1, 1], [], []>} : vector<2x32xf32>, vector<32x32xf32>, vector<2x32xf32> -> vector<2x32xf32>
    %c1_479 = arith.constant 1 : index
    %c3_480 = arith.constant 3 : index
    %c0_481 = arith.constant 0 : index
    %c0_482 = arith.constant 0 : index
    %586 = vector.load %arg4[%c1_479, %c3_480, %c0_481, %c0_482] : memref<3x4x32x32xf32, #tpu.memory_space<vmem>>, vector<1x1x32x32xf32>
    %587 = vector.shape_cast %586 : vector<1x1x32x32xf32> to vector<32x32xf32>
    %cst_483 = arith.constant dense<0.000000e+00> : vector<2x32xf32>
    %588 = tpu.matmul %575, %587, %cst_483 {dimension_numbers = #tpu.dot_dimension_numbers<[1], [0], [0], [1], [0, 0, 1, 1], [], []>} : vector<2x32xf32>, vector<32x32xf32>, vector<2x32xf32> -> vector<2x32xf32>
    %c0_484 = arith.constant 0 : index
    %c6_485 = arith.constant 6 : index
    %c0_486 = arith.constant 0 : index
    %589 = vector.load %arg14[%c0_484, %c6_485, %c0_486] : memref<4x16x32xf32, #tpu.memory_space<vmem>>, vector<1x2x32xf32>
    %590 = vector.shape_cast %589 : vector<1x2x32xf32> to vector<2x32xf32>
    %591 = arith.addf %590, %579 : vector<2x32xf32>
    %592 = arith.negf %591 : vector<2x32xf32>
    %593 = math.exp %592 : vector<2x32xf32>
    %cst_487 = arith.constant 1.000000e+00 : f32
    %594 = vector.broadcast %cst_487 : f32 to vector<2x32xf32>
    %595 = arith.addf %594, %593 : vector<2x32xf32>
    %596 = arith.divf %594, %595 : vector<2x32xf32>
    %c1_488 = arith.constant 1 : index
    %c6_489 = arith.constant 6 : index
    %c0_490 = arith.constant 0 : index
    %597 = vector.load %arg14[%c1_488, %c6_489, %c0_490] : memref<4x16x32xf32, #tpu.memory_space<vmem>>, vector<1x2x32xf32>
    %598 = vector.shape_cast %597 : vector<1x2x32xf32> to vector<2x32xf32>
    %599 = arith.addf %598, %582 : vector<2x32xf32>
    %600 = arith.negf %599 : vector<2x32xf32>
    %601 = math.exp %600 : vector<2x32xf32>
    %cst_491 = arith.constant 1.000000e+00 : f32
    %602 = vector.broadcast %cst_491 : f32 to vector<2x32xf32>
    %603 = arith.addf %602, %601 : vector<2x32xf32>
    %604 = arith.divf %602, %603 : vector<2x32xf32>
    %c2_492 = arith.constant 2 : index
    %c6_493 = arith.constant 6 : index
    %c0_494 = arith.constant 0 : index
    %605 = vector.load %arg14[%c2_492, %c6_493, %c0_494] : memref<4x16x32xf32, #tpu.memory_space<vmem>>, vector<1x2x32xf32>
    %606 = vector.shape_cast %605 : vector<1x2x32xf32> to vector<2x32xf32>
    %607 = arith.addf %606, %585 : vector<2x32xf32>
    %608 = math.tanh %607 : vector<2x32xf32>
    %c3_495 = arith.constant 3 : index
    %c6_496 = arith.constant 6 : index
    %c0_497 = arith.constant 0 : index
    %609 = vector.load %arg14[%c3_495, %c6_496, %c0_497] : memref<4x16x32xf32, #tpu.memory_space<vmem>>, vector<1x2x32xf32>
    %610 = vector.shape_cast %609 : vector<1x2x32xf32> to vector<2x32xf32>
    %611 = arith.addf %610, %588 : vector<2x32xf32>
    %612 = arith.negf %611 : vector<2x32xf32>
    %613 = math.exp %612 : vector<2x32xf32>
    %cst_498 = arith.constant 1.000000e+00 : f32
    %614 = vector.broadcast %cst_498 : f32 to vector<2x32xf32>
    %615 = arith.addf %614, %613 : vector<2x32xf32>
    %616 = arith.divf %614, %615 : vector<2x32xf32>
    %617 = arith.mulf %604, %573 : vector<2x32xf32>
    %618 = arith.mulf %596, %608 : vector<2x32xf32>
    %619 = arith.addf %617, %618 : vector<2x32xf32>
    %620 = math.tanh %619 : vector<2x32xf32>
    %621 = arith.mulf %616, %620 : vector<2x32xf32>
    %c6_499 = arith.constant 6 : index
    %c0_500 = arith.constant 0 : index
    %622 = vector.load %arg13[%c6_499, %c0_500] : memref<16x32xf32, #tpu.memory_space<vmem>>, vector<2x32xf32>
    tpu.vector_store %arg13[%c6_499, %c0_500], %621 {strides = array<i32>} : memref<16x32xf32, #tpu.memory_space<vmem>>, vector<2x32xf32>,
    %c1_501 = arith.constant 1 : index
    %c0_502 = arith.constant 0 : index
    %c0_503 = arith.constant 0 : index
    %c0_504 = arith.constant 0 : index
    %623 = vector.load %arg4[%c1_501, %c0_502, %c0_503, %c0_504] : memref<3x4x32x32xf32, #tpu.memory_space<vmem>>, vector<1x1x32x32xf32>
    %624 = vector.shape_cast %623 : vector<1x1x32x32xf32> to vector<32x32xf32>
    %cst_505 = arith.constant dense<0.000000e+00> : vector<2x32xf32>
    %625 = tpu.matmul %621, %624, %cst_505 {dimension_numbers = #tpu.dot_dimension_numbers<[1], [0], [0], [1], [0, 0, 1, 1], [], []>} : vector<2x32xf32>, vector<32x32xf32>, vector<2x32xf32> -> vector<2x32xf32>
    %c1_506 = arith.constant 1 : index
    %c1_507 = arith.constant 1 : index
    %c0_508 = arith.constant 0 : index
    %c0_509 = arith.constant 0 : index
    %626 = vector.load %arg4[%c1_506, %c1_507, %c0_508, %c0_509] : memref<3x4x32x32xf32, #tpu.memory_space<vmem>>, vector<1x1x32x32xf32>
    %627 = vector.shape_cast %626 : vector<1x1x32x32xf32> to vector<32x32xf32>
    %cst_510 = arith.constant dense<0.000000e+00> : vector<2x32xf32>
    %628 = tpu.matmul %621, %627, %cst_510 {dimension_numbers = #tpu.dot_dimension_numbers<[1], [0], [0], [1], [0, 0, 1, 1], [], []>} : vector<2x32xf32>, vector<32x32xf32>, vector<2x32xf32> -> vector<2x32xf32>
    %c1_511 = arith.constant 1 : index
    %c2_512 = arith.constant 2 : index
    %c0_513 = arith.constant 0 : index
    %c0_514 = arith.constant 0 : index
    %629 = vector.load %arg4[%c1_511, %c2_512, %c0_513, %c0_514] : memref<3x4x32x32xf32, #tpu.memory_space<vmem>>, vector<1x1x32x32xf32>
    %630 = vector.shape_cast %629 : vector<1x1x32x32xf32> to vector<32x32xf32>
    %cst_515 = arith.constant dense<0.000000e+00> : vector<2x32xf32>
    %631 = tpu.matmul %621, %630, %cst_515 {dimension_numbers = #tpu.dot_dimension_numbers<[1], [0], [0], [1], [0, 0, 1, 1], [], []>} : vector<2x32xf32>, vector<32x32xf32>, vector<2x32xf32> -> vector<2x32xf32>
    %c1_516 = arith.constant 1 : index
    %c3_517 = arith.constant 3 : index
    %c0_518 = arith.constant 0 : index
    %c0_519 = arith.constant 0 : index
    %632 = vector.load %arg4[%c1_516, %c3_517, %c0_518, %c0_519] : memref<3x4x32x32xf32, #tpu.memory_space<vmem>>, vector<1x1x32x32xf32>
    %633 = vector.shape_cast %632 : vector<1x1x32x32xf32> to vector<32x32xf32>
    %cst_520 = arith.constant dense<0.000000e+00> : vector<2x32xf32>
    %634 = tpu.matmul %621, %633, %cst_520 {dimension_numbers = #tpu.dot_dimension_numbers<[1], [0], [0], [1], [0, 0, 1, 1], [], []>} : vector<2x32xf32>, vector<32x32xf32>, vector<2x32xf32> -> vector<2x32xf32>
    %c0_521 = arith.constant 0 : index
    %c8_522 = arith.constant 8 : index
    %c0_523 = arith.constant 0 : index
    %635 = vector.load %arg14[%c0_521, %c8_522, %c0_523] : memref<4x16x32xf32, #tpu.memory_space<vmem>>, vector<1x2x32xf32>
    %636 = vector.shape_cast %635 : vector<1x2x32xf32> to vector<2x32xf32>
    %637 = arith.addf %636, %625 : vector<2x32xf32>
    %638 = arith.negf %637 : vector<2x32xf32>
    %639 = math.exp %638 : vector<2x32xf32>
    %cst_524 = arith.constant 1.000000e+00 : f32
    %640 = vector.broadcast %cst_524 : f32 to vector<2x32xf32>
    %641 = arith.addf %640, %639 : vector<2x32xf32>
    %642 = arith.divf %640, %641 : vector<2x32xf32>
    %c1_525 = arith.constant 1 : index
    %c8_526 = arith.constant 8 : index
    %c0_527 = arith.constant 0 : index
    %643 = vector.load %arg14[%c1_525, %c8_526, %c0_527] : memref<4x16x32xf32, #tpu.memory_space<vmem>>, vector<1x2x32xf32>
    %644 = vector.shape_cast %643 : vector<1x2x32xf32> to vector<2x32xf32>
    %645 = arith.addf %644, %628 : vector<2x32xf32>
    %646 = arith.negf %645 : vector<2x32xf32>
    %647 = math.exp %646 : vector<2x32xf32>
    %cst_528 = arith.constant 1.000000e+00 : f32
    %648 = vector.broadcast %cst_528 : f32 to vector<2x32xf32>
    %649 = arith.addf %648, %647 : vector<2x32xf32>
    %650 = arith.divf %648, %649 : vector<2x32xf32>
    %c2_529 = arith.constant 2 : index
    %c8_530 = arith.constant 8 : index
    %c0_531 = arith.constant 0 : index
    %651 = vector.load %arg14[%c2_529, %c8_530, %c0_531] : memref<4x16x32xf32, #tpu.memory_space<vmem>>, vector<1x2x32xf32>
    %652 = vector.shape_cast %651 : vector<1x2x32xf32> to vector<2x32xf32>
    %653 = arith.addf %652, %631 : vector<2x32xf32>
    %654 = math.tanh %653 : vector<2x32xf32>
    %c3_532 = arith.constant 3 : index
    %c8_533 = arith.constant 8 : index
    %c0_534 = arith.constant 0 : index
    %655 = vector.load %arg14[%c3_532, %c8_533, %c0_534] : memref<4x16x32xf32, #tpu.memory_space<vmem>>, vector<1x2x32xf32>
    %656 = vector.shape_cast %655 : vector<1x2x32xf32> to vector<2x32xf32>
    %657 = arith.addf %656, %634 : vector<2x32xf32>
    %658 = arith.negf %657 : vector<2x32xf32>
    %659 = math.exp %658 : vector<2x32xf32>
    %cst_535 = arith.constant 1.000000e+00 : f32
    %660 = vector.broadcast %cst_535 : f32 to vector<2x32xf32>
    %661 = arith.addf %660, %659 : vector<2x32xf32>
    %662 = arith.divf %660, %661 : vector<2x32xf32>
    %663 = arith.mulf %650, %619 : vector<2x32xf32>
    %664 = arith.mulf %642, %654 : vector<2x32xf32>
    %665 = arith.addf %663, %664 : vector<2x32xf32>
    %666 = math.tanh %665 : vector<2x32xf32>
    %667 = arith.mulf %662, %666 : vector<2x32xf32>
    %c8_536 = arith.constant 8 : index
    %c0_537 = arith.constant 0 : index
    %668 = vector.load %arg13[%c8_536, %c0_537] : memref<16x32xf32, #tpu.memory_space<vmem>>, vector<2x32xf32>
    tpu.vector_store %arg13[%c8_536, %c0_537], %667 {strides = array<i32>} : memref<16x32xf32, #tpu.memory_space<vmem>>, vector<2x32xf32>,
    %c1_538 = arith.constant 1 : index
    %c0_539 = arith.constant 0 : index
    %c0_540 = arith.constant 0 : index
    %c0_541 = arith.constant 0 : index
    %669 = vector.load %arg4[%c1_538, %c0_539, %c0_540, %c0_541] : memref<3x4x32x32xf32, #tpu.memory_space<vmem>>, vector<1x1x32x32xf32>
    %670 = vector.shape_cast %669 : vector<1x1x32x32xf32> to vector<32x32xf32>
    %cst_542 = arith.constant dense<0.000000e+00> : vector<2x32xf32>
    %671 = tpu.matmul %667, %670, %cst_542 {dimension_numbers = #tpu.dot_dimension_numbers<[1], [0], [0], [1], [0, 0, 1, 1], [], []>} : vector<2x32xf32>, vector<32x32xf32>, vector<2x32xf32> -> vector<2x32xf32>
    %c1_543 = arith.constant 1 : index
    %c1_544 = arith.constant 1 : index
    %c0_545 = arith.constant 0 : index
    %c0_546 = arith.constant 0 : index
    %672 = vector.load %arg4[%c1_543, %c1_544, %c0_545, %c0_546] : memref<3x4x32x32xf32, #tpu.memory_space<vmem>>, vector<1x1x32x32xf32>
    %673 = vector.shape_cast %672 : vector<1x1x32x32xf32> to vector<32x32xf32>
    %cst_547 = arith.constant dense<0.000000e+00> : vector<2x32xf32>
    %674 = tpu.matmul %667, %673, %cst_547 {dimension_numbers = #tpu.dot_dimension_numbers<[1], [0], [0], [1], [0, 0, 1, 1], [], []>} : vector<2x32xf32>, vector<32x32xf32>, vector<2x32xf32> -> vector<2x32xf32>
    %c1_548 = arith.constant 1 : index
    %c2_549 = arith.constant 2 : index
    %c0_550 = arith.constant 0 : index
    %c0_551 = arith.constant 0 : index
    %675 = vector.load %arg4[%c1_548, %c2_549, %c0_550, %c0_551] : memref<3x4x32x32xf32, #tpu.memory_space<vmem>>, vector<1x1x32x32xf32>
    %676 = vector.shape_cast %675 : vector<1x1x32x32xf32> to vector<32x32xf32>
    %cst_552 = arith.constant dense<0.000000e+00> : vector<2x32xf32>
    %677 = tpu.matmul %667, %676, %cst_552 {dimension_numbers = #tpu.dot_dimension_numbers<[1], [0], [0], [1], [0, 0, 1, 1], [], []>} : vector<2x32xf32>, vector<32x32xf32>, vector<2x32xf32> -> vector<2x32xf32>
    %c1_553 = arith.constant 1 : index
    %c3_554 = arith.constant 3 : index
    %c0_555 = arith.constant 0 : index
    %c0_556 = arith.constant 0 : index
    %678 = vector.load %arg4[%c1_553, %c3_554, %c0_555, %c0_556] : memref<3x4x32x32xf32, #tpu.memory_space<vmem>>, vector<1x1x32x32xf32>
    %679 = vector.shape_cast %678 : vector<1x1x32x32xf32> to vector<32x32xf32>
    %cst_557 = arith.constant dense<0.000000e+00> : vector<2x32xf32>
    %680 = tpu.matmul %667, %679, %cst_557 {dimension_numbers = #tpu.dot_dimension_numbers<[1], [0], [0], [1], [0, 0, 1, 1], [], []>} : vector<2x32xf32>, vector<32x32xf32>, vector<2x32xf32> -> vector<2x32xf32>
    %c0_558 = arith.constant 0 : index
    %c10_559 = arith.constant 10 : index
    %c0_560 = arith.constant 0 : index
    %681 = vector.load %arg14[%c0_558, %c10_559, %c0_560] : memref<4x16x32xf32, #tpu.memory_space<vmem>>, vector<1x2x32xf32>
    %682 = vector.shape_cast %681 : vector<1x2x32xf32> to vector<2x32xf32>
    %683 = arith.addf %682, %671 : vector<2x32xf32>
    %684 = arith.negf %683 : vector<2x32xf32>
    %685 = math.exp %684 : vector<2x32xf32>
    %cst_561 = arith.constant 1.000000e+00 : f32
    %686 = vector.broadcast %cst_561 : f32 to vector<2x32xf32>
    %687 = arith.addf %686, %685 : vector<2x32xf32>
    %688 = arith.divf %686, %687 : vector<2x32xf32>
    %c1_562 = arith.constant 1 : index
    %c10_563 = arith.constant 10 : index
    %c0_564 = arith.constant 0 : index
    %689 = vector.load %arg14[%c1_562, %c10_563, %c0_564] : memref<4x16x32xf32, #tpu.memory_space<vmem>>, vector<1x2x32xf32>
    %690 = vector.shape_cast %689 : vector<1x2x32xf32> to vector<2x32xf32>
    %691 = arith.addf %690, %674 : vector<2x32xf32>
    %692 = arith.negf %691 : vector<2x32xf32>
    %693 = math.exp %692 : vector<2x32xf32>
    %cst_565 = arith.constant 1.000000e+00 : f32
    %694 = vector.broadcast %cst_565 : f32 to vector<2x32xf32>
    %695 = arith.addf %694, %693 : vector<2x32xf32>
    %696 = arith.divf %694, %695 : vector<2x32xf32>
    %c2_566 = arith.constant 2 : index
    %c10_567 = arith.constant 10 : index
    %c0_568 = arith.constant 0 : index
    %697 = vector.load %arg14[%c2_566, %c10_567, %c0_568] : memref<4x16x32xf32, #tpu.memory_space<vmem>>, vector<1x2x32xf32>
    %698 = vector.shape_cast %697 : vector<1x2x32xf32> to vector<2x32xf32>
    %699 = arith.addf %698, %677 : vector<2x32xf32>
    %700 = math.tanh %699 : vector<2x32xf32>
    %c3_569 = arith.constant 3 : index
    %c10_570 = arith.constant 10 : index
    %c0_571 = arith.constant 0 : index
    %701 = vector.load %arg14[%c3_569, %c10_570, %c0_571] : memref<4x16x32xf32, #tpu.memory_space<vmem>>, vector<1x2x32xf32>
    %702 = vector.shape_cast %701 : vector<1x2x32xf32> to vector<2x32xf32>
    %703 = arith.addf %702, %680 : vector<2x32xf32>
    %704 = arith.negf %703 : vector<2x32xf32>
    %705 = math.exp %704 : vector<2x32xf32>
    %cst_572 = arith.constant 1.000000e+00 : f32
    %706 = vector.broadcast %cst_572 : f32 to vector<2x32xf32>
    %707 = arith.addf %706, %705 : vector<2x32xf32>
    %708 = arith.divf %706, %707 : vector<2x32xf32>
    %709 = arith.mulf %696, %665 : vector<2x32xf32>
    %710 = arith.mulf %688, %700 : vector<2x32xf32>
    %711 = arith.addf %709, %710 : vector<2x32xf32>
    %712 = math.tanh %711 : vector<2x32xf32>
    %713 = arith.mulf %708, %712 : vector<2x32xf32>
    %c10_573 = arith.constant 10 : index
    %c0_574 = arith.constant 0 : index
    %714 = vector.load %arg13[%c10_573, %c0_574] : memref<16x32xf32, #tpu.memory_space<vmem>>, vector<2x32xf32>
    tpu.vector_store %arg13[%c10_573, %c0_574], %713 {strides = array<i32>} : memref<16x32xf32, #tpu.memory_space<vmem>>, vector<2x32xf32>,
    %c1_575 = arith.constant 1 : index
    %c0_576 = arith.constant 0 : index
    %c0_577 = arith.constant 0 : index
    %c0_578 = arith.constant 0 : index
    %715 = vector.load %arg4[%c1_575, %c0_576, %c0_577, %c0_578] : memref<3x4x32x32xf32, #tpu.memory_space<vmem>>, vector<1x1x32x32xf32>
    %716 = vector.shape_cast %715 : vector<1x1x32x32xf32> to vector<32x32xf32>
    %cst_579 = arith.constant dense<0.000000e+00> : vector<2x32xf32>
    %717 = tpu.matmul %713, %716, %cst_579 {dimension_numbers = #tpu.dot_dimension_numbers<[1], [0], [0], [1], [0, 0, 1, 1], [], []>} : vector<2x32xf32>, vector<32x32xf32>, vector<2x32xf32> -> vector<2x32xf32>
    %c1_580 = arith.constant 1 : index
    %c1_581 = arith.constant 1 : index
    %c0_582 = arith.constant 0 : index
    %c0_583 = arith.constant 0 : index
    %718 = vector.load %arg4[%c1_580, %c1_581, %c0_582, %c0_583] : memref<3x4x32x32xf32, #tpu.memory_space<vmem>>, vector<1x1x32x32xf32>
    %719 = vector.shape_cast %718 : vector<1x1x32x32xf32> to vector<32x32xf32>
    %cst_584 = arith.constant dense<0.000000e+00> : vector<2x32xf32>
    %720 = tpu.matmul %713, %719, %cst_584 {dimension_numbers = #tpu.dot_dimension_numbers<[1], [0], [0], [1], [0, 0, 1, 1], [], []>} : vector<2x32xf32>, vector<32x32xf32>, vector<2x32xf32> -> vector<2x32xf32>
    %c1_585 = arith.constant 1 : index
    %c2_586 = arith.constant 2 : index
    %c0_587 = arith.constant 0 : index
    %c0_588 = arith.constant 0 : index
    %721 = vector.load %arg4[%c1_585, %c2_586, %c0_587, %c0_588] : memref<3x4x32x32xf32, #tpu.memory_space<vmem>>, vector<1x1x32x32xf32>
    %722 = vector.shape_cast %721 : vector<1x1x32x32xf32> to vector<32x32xf32>
    %cst_589 = arith.constant dense<0.000000e+00> : vector<2x32xf32>
    %723 = tpu.matmul %713, %722, %cst_589 {dimension_numbers = #tpu.dot_dimension_numbers<[1], [0], [0], [1], [0, 0, 1, 1], [], []>} : vector<2x32xf32>, vector<32x32xf32>, vector<2x32xf32> -> vector<2x32xf32>
    %c1_590 = arith.constant 1 : index
    %c3_591 = arith.constant 3 : index
    %c0_592 = arith.constant 0 : index
    %c0_593 = arith.constant 0 : index
    %724 = vector.load %arg4[%c1_590, %c3_591, %c0_592, %c0_593] : memref<3x4x32x32xf32, #tpu.memory_space<vmem>>, vector<1x1x32x32xf32>
    %725 = vector.shape_cast %724 : vector<1x1x32x32xf32> to vector<32x32xf32>
    %cst_594 = arith.constant dense<0.000000e+00> : vector<2x32xf32>
    %726 = tpu.matmul %713, %725, %cst_594 {dimension_numbers = #tpu.dot_dimension_numbers<[1], [0], [0], [1], [0, 0, 1, 1], [], []>} : vector<2x32xf32>, vector<32x32xf32>, vector<2x32xf32> -> vector<2x32xf32>
    %c0_595 = arith.constant 0 : index
    %c12_596 = arith.constant 12 : index
    %c0_597 = arith.constant 0 : index
    %727 = vector.load %arg14[%c0_595, %c12_596, %c0_597] : memref<4x16x32xf32, #tpu.memory_space<vmem>>, vector<1x2x32xf32>
    %728 = vector.shape_cast %727 : vector<1x2x32xf32> to vector<2x32xf32>
    %729 = arith.addf %728, %717 : vector<2x32xf32>
    %730 = arith.negf %729 : vector<2x32xf32>
    %731 = math.exp %730 : vector<2x32xf32>
    %cst_598 = arith.constant 1.000000e+00 : f32
    %732 = vector.broadcast %cst_598 : f32 to vector<2x32xf32>
    %733 = arith.addf %732, %731 : vector<2x32xf32>
    %734 = arith.divf %732, %733 : vector<2x32xf32>
    %c1_599 = arith.constant 1 : index
    %c12_600 = arith.constant 12 : index
    %c0_601 = arith.constant 0 : index
    %735 = vector.load %arg14[%c1_599, %c12_600, %c0_601] : memref<4x16x32xf32, #tpu.memory_space<vmem>>, vector<1x2x32xf32>
    %736 = vector.shape_cast %735 : vector<1x2x32xf32> to vector<2x32xf32>
    %737 = arith.addf %736, %720 : vector<2x32xf32>
    %738 = arith.negf %737 : vector<2x32xf32>
    %739 = math.exp %738 : vector<2x32xf32>
    %cst_602 = arith.constant 1.000000e+00 : f32
    %740 = vector.broadcast %cst_602 : f32 to vector<2x32xf32>
    %741 = arith.addf %740, %739 : vector<2x32xf32>
    %742 = arith.divf %740, %741 : vector<2x32xf32>
    %c2_603 = arith.constant 2 : index
    %c12_604 = arith.constant 12 : index
    %c0_605 = arith.constant 0 : index
    %743 = vector.load %arg14[%c2_603, %c12_604, %c0_605] : memref<4x16x32xf32, #tpu.memory_space<vmem>>, vector<1x2x32xf32>
    %744 = vector.shape_cast %743 : vector<1x2x32xf32> to vector<2x32xf32>
    %745 = arith.addf %744, %723 : vector<2x32xf32>
    %746 = math.tanh %745 : vector<2x32xf32>
    %c3_606 = arith.constant 3 : index
    %c12_607 = arith.constant 12 : index
    %c0_608 = arith.constant 0 : index
    %747 = vector.load %arg14[%c3_606, %c12_607, %c0_608] : memref<4x16x32xf32, #tpu.memory_space<vmem>>, vector<1x2x32xf32>
    %748 = vector.shape_cast %747 : vector<1x2x32xf32> to vector<2x32xf32>
    %749 = arith.addf %748, %726 : vector<2x32xf32>
    %750 = arith.negf %749 : vector<2x32xf32>
    %751 = math.exp %750 : vector<2x32xf32>
    %cst_609 = arith.constant 1.000000e+00 : f32
    %752 = vector.broadcast %cst_609 : f32 to vector<2x32xf32>
    %753 = arith.addf %752, %751 : vector<2x32xf32>
    %754 = arith.divf %752, %753 : vector<2x32xf32>
    %755 = arith.mulf %742, %711 : vector<2x32xf32>
    %756 = arith.mulf %734, %746 : vector<2x32xf32>
    %757 = arith.addf %755, %756 : vector<2x32xf32>
    %758 = math.tanh %757 : vector<2x32xf32>
    %759 = arith.mulf %754, %758 : vector<2x32xf32>
    %c12_610 = arith.constant 12 : index
    %c0_611 = arith.constant 0 : index
    %760 = vector.load %arg13[%c12_610, %c0_611] : memref<16x32xf32, #tpu.memory_space<vmem>>, vector<2x32xf32>
    tpu.vector_store %arg13[%c12_610, %c0_611], %759 {strides = array<i32>} : memref<16x32xf32, #tpu.memory_space<vmem>>, vector<2x32xf32>,
    %c1_612 = arith.constant 1 : index
    %c0_613 = arith.constant 0 : index
    %c0_614 = arith.constant 0 : index
    %c0_615 = arith.constant 0 : index
    %761 = vector.load %arg4[%c1_612, %c0_613, %c0_614, %c0_615] : memref<3x4x32x32xf32, #tpu.memory_space<vmem>>, vector<1x1x32x32xf32>
    %762 = vector.shape_cast %761 : vector<1x1x32x32xf32> to vector<32x32xf32>
    %cst_616 = arith.constant dense<0.000000e+00> : vector<2x32xf32>
    %763 = tpu.matmul %759, %762, %cst_616 {dimension_numbers = #tpu.dot_dimension_numbers<[1], [0], [0], [1], [0, 0, 1, 1], [], []>} : vector<2x32xf32>, vector<32x32xf32>, vector<2x32xf32> -> vector<2x32xf32>
    %c1_617 = arith.constant 1 : index
    %c1_618 = arith.constant 1 : index
    %c0_619 = arith.constant 0 : index
    %c0_620 = arith.constant 0 : index
    %764 = vector.load %arg4[%c1_617, %c1_618, %c0_619, %c0_620] : memref<3x4x32x32xf32, #tpu.memory_space<vmem>>, vector<1x1x32x32xf32>
    %765 = vector.shape_cast %764 : vector<1x1x32x32xf32> to vector<32x32xf32>
    %cst_621 = arith.constant dense<0.000000e+00> : vector<2x32xf32>
    %766 = tpu.matmul %759, %765, %cst_621 {dimension_numbers = #tpu.dot_dimension_numbers<[1], [0], [0], [1], [0, 0, 1, 1], [], []>} : vector<2x32xf32>, vector<32x32xf32>, vector<2x32xf32> -> vector<2x32xf32>
    %c1_622 = arith.constant 1 : index
    %c2_623 = arith.constant 2 : index
    %c0_624 = arith.constant 0 : index
    %c0_625 = arith.constant 0 : index
    %767 = vector.load %arg4[%c1_622, %c2_623, %c0_624, %c0_625] : memref<3x4x32x32xf32, #tpu.memory_space<vmem>>, vector<1x1x32x32xf32>
    %768 = vector.shape_cast %767 : vector<1x1x32x32xf32> to vector<32x32xf32>
    %cst_626 = arith.constant dense<0.000000e+00> : vector<2x32xf32>
    %769 = tpu.matmul %759, %768, %cst_626 {dimension_numbers = #tpu.dot_dimension_numbers<[1], [0], [0], [1], [0, 0, 1, 1], [], []>} : vector<2x32xf32>, vector<32x32xf32>, vector<2x32xf32> -> vector<2x32xf32>
    %c1_627 = arith.constant 1 : index
    %c3_628 = arith.constant 3 : index
    %c0_629 = arith.constant 0 : index
    %c0_630 = arith.constant 0 : index
    %770 = vector.load %arg4[%c1_627, %c3_628, %c0_629, %c0_630] : memref<3x4x32x32xf32, #tpu.memory_space<vmem>>, vector<1x1x32x32xf32>
    %771 = vector.shape_cast %770 : vector<1x1x32x32xf32> to vector<32x32xf32>
    %cst_631 = arith.constant dense<0.000000e+00> : vector<2x32xf32>
    %772 = tpu.matmul %759, %771, %cst_631 {dimension_numbers = #tpu.dot_dimension_numbers<[1], [0], [0], [1], [0, 0, 1, 1], [], []>} : vector<2x32xf32>, vector<32x32xf32>, vector<2x32xf32> -> vector<2x32xf32>
    %c0_632 = arith.constant 0 : index
    %c14_633 = arith.constant 14 : index
    %c0_634 = arith.constant 0 : index
    %773 = vector.load %arg14[%c0_632, %c14_633, %c0_634] : memref<4x16x32xf32, #tpu.memory_space<vmem>>, vector<1x2x32xf32>
    %774 = vector.shape_cast %773 : vector<1x2x32xf32> to vector<2x32xf32>
    %775 = arith.addf %774, %763 : vector<2x32xf32>
    %776 = arith.negf %775 : vector<2x32xf32>
    %777 = math.exp %776 : vector<2x32xf32>
    %cst_635 = arith.constant 1.000000e+00 : f32
    %778 = vector.broadcast %cst_635 : f32 to vector<2x32xf32>
    %779 = arith.addf %778, %777 : vector<2x32xf32>
    %780 = arith.divf %778, %779 : vector<2x32xf32>
    %c1_636 = arith.constant 1 : index
    %c14_637 = arith.constant 14 : index
    %c0_638 = arith.constant 0 : index
    %781 = vector.load %arg14[%c1_636, %c14_637, %c0_638] : memref<4x16x32xf32, #tpu.memory_space<vmem>>, vector<1x2x32xf32>
    %782 = vector.shape_cast %781 : vector<1x2x32xf32> to vector<2x32xf32>
    %783 = arith.addf %782, %766 : vector<2x32xf32>
    %784 = arith.negf %783 : vector<2x32xf32>
    %785 = math.exp %784 : vector<2x32xf32>
    %cst_639 = arith.constant 1.000000e+00 : f32
    %786 = vector.broadcast %cst_639 : f32 to vector<2x32xf32>
    %787 = arith.addf %786, %785 : vector<2x32xf32>
    %788 = arith.divf %786, %787 : vector<2x32xf32>
    %c2_640 = arith.constant 2 : index
    %c14_641 = arith.constant 14 : index
    %c0_642 = arith.constant 0 : index
    %789 = vector.load %arg14[%c2_640, %c14_641, %c0_642] : memref<4x16x32xf32, #tpu.memory_space<vmem>>, vector<1x2x32xf32>
    %790 = vector.shape_cast %789 : vector<1x2x32xf32> to vector<2x32xf32>
    %791 = arith.addf %790, %769 : vector<2x32xf32>
    %792 = math.tanh %791 : vector<2x32xf32>
    %c3_643 = arith.constant 3 : index
    %c14_644 = arith.constant 14 : index
    %c0_645 = arith.constant 0 : index
    %793 = vector.load %arg14[%c3_643, %c14_644, %c0_645] : memref<4x16x32xf32, #tpu.memory_space<vmem>>, vector<1x2x32xf32>
    %794 = vector.shape_cast %793 : vector<1x2x32xf32> to vector<2x32xf32>
    %795 = arith.addf %794, %772 : vector<2x32xf32>
    %796 = arith.negf %795 : vector<2x32xf32>
    %797 = math.exp %796 : vector<2x32xf32>
    %cst_646 = arith.constant 1.000000e+00 : f32
    %798 = vector.broadcast %cst_646 : f32 to vector<2x32xf32>
    %799 = arith.addf %798, %797 : vector<2x32xf32>
    %800 = arith.divf %798, %799 : vector<2x32xf32>
    %801 = arith.mulf %788, %757 : vector<2x32xf32>
    %802 = arith.mulf %780, %792 : vector<2x32xf32>
    %803 = arith.addf %801, %802 : vector<2x32xf32>
    %804 = math.tanh %803 : vector<2x32xf32>
    %805 = arith.mulf %800, %804 : vector<2x32xf32>
    %c14_647 = arith.constant 14 : index
    %c0_648 = arith.constant 0 : index
    %806 = vector.load %arg13[%c14_647, %c0_648] : memref<16x32xf32, #tpu.memory_space<vmem>>, vector<2x32xf32>
    tpu.vector_store %arg13[%c14_647, %c0_648], %805 {strides = array<i32>} : memref<16x32xf32, #tpu.memory_space<vmem>>, vector<2x32xf32>,
    %c0_649 = arith.constant 0 : index
    %c1_650 = arith.constant 1 : index
    %c0_651 = arith.constant 0 : index
    %807 = vector.load %arg11[%c0_649, %c1_650, %c0_651] : memref<2x3x32xf32, #tpu.memory_space<vmem>>, vector<2x1x32xf32>
    %808 = vector.shape_cast %807 : vector<2x1x32xf32> to vector<2x32xf32>
    %809 = vector.shape_cast %805 : vector<2x32xf32> to vector<2x1x32xf32>
    tpu.vector_store %arg11[%c0_649, %c1_650, %c0_651], %809 {strides = array<i32>} : memref<2x3x32xf32, #tpu.memory_space<vmem>>, vector<2x1x32xf32>,
    %c0_652 = arith.constant 0 : index
    %c1_653 = arith.constant 1 : index
    %c0_654 = arith.constant 0 : index
    %810 = vector.load %arg12[%c0_652, %c1_653, %c0_654] : memref<2x3x32xf32, #tpu.memory_space<vmem>>, vector<2x1x32xf32>
    %811 = vector.shape_cast %810 : vector<2x1x32xf32> to vector<2x32xf32>
    %812 = vector.shape_cast %803 : vector<2x32xf32> to vector<2x1x32xf32>
    tpu.vector_store %arg12[%c0_652, %c1_653, %c0_654], %812 {strides = array<i32>} : memref<2x3x32xf32, #tpu.memory_space<vmem>>, vector<2x1x32xf32>,
    %c0_655 = arith.constant 0 : index
    %c0_656 = arith.constant 0 : index
    %813 = vector.load %arg13[%c0_655, %c0_656] : memref<16x32xf32, #tpu.memory_space<vmem>>, vector<16x32xf32>
    %c2_657 = arith.constant 2 : index
    %c0_658 = arith.constant 0 : index
    %c0_659 = arith.constant 0 : index
    %814 = vector.load %arg3[%c2_657, %c0_658, %c0_659] : memref<3x32x128xf32, #tpu.memory_space<vmem>>, vector<1x32x128xf32>
    %815 = vector.shape_cast %814 : vector<1x32x128xf32> to vector<32x128xf32>
    %cst_660 = arith.constant dense<0.000000e+00> : vector<16x128xf32>
    %816 = tpu.matmul %813, %815, %cst_660 {dimension_numbers = #tpu.dot_dimension_numbers<[1], [0], [0], [1], [0, 0, 1, 1], [], []>} : vector<16x32xf32>, vector<32x128xf32>, vector<16x128xf32> -> vector<16x128xf32>
    %c2_661 = arith.constant 2 : index
    %c0_662 = arith.constant 0 : index
    %c0_663 = arith.constant 0 : index
    %817 = vector.load %arg5[%c2_661, %c0_662, %c0_663] : memref<3x1x128xf32, #tpu.memory_space<vmem>>, vector<1x1x128xf32>
    %818 = vector.shape_cast %817 : vector<1x1x128xf32> to vector<1x128xf32>
    %819 = vector.broadcast %818 : vector<1x128xf32> to vector<16x128xf32>
    %820 = arith.addf %816, %819 : vector<16x128xf32>
    %821 = vector.extract_strided_slice %820 {offsets = [0, 0], sizes = [16, 32], strides = [1, 1]} : vector<16x128xf32> to vector<16x32xf32>
    %c0_664 = arith.constant 0 : index
    %c0_665 = arith.constant 0 : index
    %c0_666 = arith.constant 0 : index
    %822 = vector.load %arg14[%c0_664, %c0_665, %c0_666] : memref<4x16x32xf32, #tpu.memory_space<vmem>>, vector<1x16x32xf32>
    %823 = vector.shape_cast %822 : vector<1x16x32xf32> to vector<16x32xf32>
    %824 = vector.shape_cast %821 : vector<16x32xf32> to vector<1x16x32xf32>
    tpu.vector_store %arg14[%c0_664, %c0_665, %c0_666], %824 {strides = array<i32>} : memref<4x16x32xf32, #tpu.memory_space<vmem>>, vector<1x16x32xf32>,
    %825 = vector.extract_strided_slice %820 {offsets = [0, 32], sizes = [16, 32], strides = [1, 1]} : vector<16x128xf32> to vector<16x32xf32>
    %c1_667 = arith.constant 1 : index
    %c0_668 = arith.constant 0 : index
    %c0_669 = arith.constant 0 : index
    %826 = vector.load %arg14[%c1_667, %c0_668, %c0_669] : memref<4x16x32xf32, #tpu.memory_space<vmem>>, vector<1x16x32xf32>
    %827 = vector.shape_cast %826 : vector<1x16x32xf32> to vector<16x32xf32>
    %828 = vector.shape_cast %825 : vector<16x32xf32> to vector<1x16x32xf32>
    tpu.vector_store %arg14[%c1_667, %c0_668, %c0_669], %828 {strides = array<i32>} : memref<4x16x32xf32, #tpu.memory_space<vmem>>, vector<1x16x32xf32>,
    %829 = vector.extract_strided_slice %820 {offsets = [0, 64], sizes = [16, 32], strides = [1, 1]} : vector<16x128xf32> to vector<16x32xf32>
    %c2_670 = arith.constant 2 : index
    %c0_671 = arith.constant 0 : index
    %c0_672 = arith.constant 0 : index
    %830 = vector.load %arg14[%c2_670, %c0_671, %c0_672] : memref<4x16x32xf32, #tpu.memory_space<vmem>>, vector<1x16x32xf32>
    %831 = vector.shape_cast %830 : vector<1x16x32xf32> to vector<16x32xf32>
    %832 = vector.shape_cast %829 : vector<16x32xf32> to vector<1x16x32xf32>
    tpu.vector_store %arg14[%c2_670, %c0_671, %c0_672], %832 {strides = array<i32>} : memref<4x16x32xf32, #tpu.memory_space<vmem>>, vector<1x16x32xf32>,
    %833 = vector.extract_strided_slice %820 {offsets = [0, 96], sizes = [16, 32], strides = [1, 1]} : vector<16x128xf32> to vector<16x32xf32>
    %c3_673 = arith.constant 3 : index
    %c0_674 = arith.constant 0 : index
    %c0_675 = arith.constant 0 : index
    %834 = vector.load %arg14[%c3_673, %c0_674, %c0_675] : memref<4x16x32xf32, #tpu.memory_space<vmem>>, vector<1x16x32xf32>
    %835 = vector.shape_cast %834 : vector<1x16x32xf32> to vector<16x32xf32>
    %836 = vector.shape_cast %833 : vector<16x32xf32> to vector<1x16x32xf32>
    tpu.vector_store %arg14[%c3_673, %c0_674, %c0_675], %836 {strides = array<i32>} : memref<4x16x32xf32, #tpu.memory_space<vmem>>, vector<1x16x32xf32>,
    %c0_676 = arith.constant 0 : index
    %c2_677 = arith.constant 2 : index
    %c0_678 = arith.constant 0 : index
    %837 = vector.load %arg8[%c0_676, %c2_677, %c0_678] : memref<2x3x32xf32, #tpu.memory_space<vmem>>, vector<2x1x32xf32>
    %838 = vector.shape_cast %837 : vector<2x1x32xf32> to vector<2x32xf32>
    %c0_679 = arith.constant 0 : index
    %c2_680 = arith.constant 2 : index
    %c0_681 = arith.constant 0 : index
    %839 = vector.load %arg9[%c0_679, %c2_680, %c0_681] : memref<2x3x32xf32, #tpu.memory_space<vmem>>, vector<2x1x32xf32>
    %840 = vector.shape_cast %839 : vector<2x1x32xf32> to vector<2x32xf32>
    %c2_682 = arith.constant 2 : index
    %c0_683 = arith.constant 0 : index
    %c0_684 = arith.constant 0 : index
    %c0_685 = arith.constant 0 : index
    %841 = vector.load %arg4[%c2_682, %c0_683, %c0_684, %c0_685] : memref<3x4x32x32xf32, #tpu.memory_space<vmem>>, vector<1x1x32x32xf32>
    %842 = vector.shape_cast %841 : vector<1x1x32x32xf32> to vector<32x32xf32>
    %cst_686 = arith.constant dense<0.000000e+00> : vector<2x32xf32>
    %843 = tpu.matmul %838, %842, %cst_686 {dimension_numbers = #tpu.dot_dimension_numbers<[1], [0], [0], [1], [0, 0, 1, 1], [], []>} : vector<2x32xf32>, vector<32x32xf32>, vector<2x32xf32> -> vector<2x32xf32>
    %c2_687 = arith.constant 2 : index
    %c1_688 = arith.constant 1 : index
    %c0_689 = arith.constant 0 : index
    %c0_690 = arith.constant 0 : index
    %844 = vector.load %arg4[%c2_687, %c1_688, %c0_689, %c0_690] : memref<3x4x32x32xf32, #tpu.memory_space<vmem>>, vector<1x1x32x32xf32>
    %845 = vector.shape_cast %844 : vector<1x1x32x32xf32> to vector<32x32xf32>
    %cst_691 = arith.constant dense<0.000000e+00> : vector<2x32xf32>
    %846 = tpu.matmul %838, %845, %cst_691 {dimension_numbers = #tpu.dot_dimension_numbers<[1], [0], [0], [1], [0, 0, 1, 1], [], []>} : vector<2x32xf32>, vector<32x32xf32>, vector<2x32xf32> -> vector<2x32xf32>
    %c2_692 = arith.constant 2 : index
    %c2_693 = arith.constant 2 : index
    %c0_694 = arith.constant 0 : index
    %c0_695 = arith.constant 0 : index
    %847 = vector.load %arg4[%c2_692, %c2_693, %c0_694, %c0_695] : memref<3x4x32x32xf32, #tpu.memory_space<vmem>>, vector<1x1x32x32xf32>
    %848 = vector.shape_cast %847 : vector<1x1x32x32xf32> to vector<32x32xf32>
    %cst_696 = arith.constant dense<0.000000e+00> : vector<2x32xf32>
    %849 = tpu.matmul %838, %848, %cst_696 {dimension_numbers = #tpu.dot_dimension_numbers<[1], [0], [0], [1], [0, 0, 1, 1], [], []>} : vector<2x32xf32>, vector<32x32xf32>, vector<2x32xf32> -> vector<2x32xf32>
    %c2_697 = arith.constant 2 : index
    %c3_698 = arith.constant 3 : index
    %c0_699 = arith.constant 0 : index
    %c0_700 = arith.constant 0 : index
    %850 = vector.load %arg4[%c2_697, %c3_698, %c0_699, %c0_700] : memref<3x4x32x32xf32, #tpu.memory_space<vmem>>, vector<1x1x32x32xf32>
    %851 = vector.shape_cast %850 : vector<1x1x32x32xf32> to vector<32x32xf32>
    %cst_701 = arith.constant dense<0.000000e+00> : vector<2x32xf32>
    %852 = tpu.matmul %838, %851, %cst_701 {dimension_numbers = #tpu.dot_dimension_numbers<[1], [0], [0], [1], [0, 0, 1, 1], [], []>} : vector<2x32xf32>, vector<32x32xf32>, vector<2x32xf32> -> vector<2x32xf32>
    %c0_702 = arith.constant 0 : index
    %c0_703 = arith.constant 0 : index
    %c0_704 = arith.constant 0 : index
    %853 = vector.load %arg14[%c0_702, %c0_703, %c0_704] : memref<4x16x32xf32, #tpu.memory_space<vmem>>, vector<1x2x32xf32>
    %854 = vector.shape_cast %853 : vector<1x2x32xf32> to vector<2x32xf32>
    %855 = arith.addf %854, %843 : vector<2x32xf32>
    %856 = arith.negf %855 : vector<2x32xf32>
    %857 = math.exp %856 : vector<2x32xf32>
    %cst_705 = arith.constant 1.000000e+00 : f32
    %858 = vector.broadcast %cst_705 : f32 to vector<2x32xf32>
    %859 = arith.addf %858, %857 : vector<2x32xf32>
    %860 = arith.divf %858, %859 : vector<2x32xf32>
    %c1_706 = arith.constant 1 : index
    %c0_707 = arith.constant 0 : index
    %c0_708 = arith.constant 0 : index
    %861 = vector.load %arg14[%c1_706, %c0_707, %c0_708] : memref<4x16x32xf32, #tpu.memory_space<vmem>>, vector<1x2x32xf32>
    %862 = vector.shape_cast %861 : vector<1x2x32xf32> to vector<2x32xf32>
    %863 = arith.addf %862, %846 : vector<2x32xf32>
    %864 = arith.negf %863 : vector<2x32xf32>
    %865 = math.exp %864 : vector<2x32xf32>
    %cst_709 = arith.constant 1.000000e+00 : f32
    %866 = vector.broadcast %cst_709 : f32 to vector<2x32xf32>
    %867 = arith.addf %866, %865 : vector<2x32xf32>
    %868 = arith.divf %866, %867 : vector<2x32xf32>
    %c2_710 = arith.constant 2 : index
    %c0_711 = arith.constant 0 : index
    %c0_712 = arith.constant 0 : index
    %869 = vector.load %arg14[%c2_710, %c0_711, %c0_712] : memref<4x16x32xf32, #tpu.memory_space<vmem>>, vector<1x2x32xf32>
    %870 = vector.shape_cast %869 : vector<1x2x32xf32> to vector<2x32xf32>
    %871 = arith.addf %870, %849 : vector<2x32xf32>
    %872 = math.tanh %871 : vector<2x32xf32>
    %c3_713 = arith.constant 3 : index
    %c0_714 = arith.constant 0 : index
    %c0_715 = arith.constant 0 : index
    %873 = vector.load %arg14[%c3_713, %c0_714, %c0_715] : memref<4x16x32xf32, #tpu.memory_space<vmem>>, vector<1x2x32xf32>
    %874 = vector.shape_cast %873 : vector<1x2x32xf32> to vector<2x32xf32>
    %875 = arith.addf %874, %852 : vector<2x32xf32>
    %876 = arith.negf %875 : vector<2x32xf32>
    %877 = math.exp %876 : vector<2x32xf32>
    %cst_716 = arith.constant 1.000000e+00 : f32
    %878 = vector.broadcast %cst_716 : f32 to vector<2x32xf32>
    %879 = arith.addf %878, %877 : vector<2x32xf32>
    %880 = arith.divf %878, %879 : vector<2x32xf32>
    %881 = arith.mulf %868, %840 : vector<2x32xf32>
    %882 = arith.mulf %860, %872 : vector<2x32xf32>
    %883 = arith.addf %881, %882 : vector<2x32xf32>
    %884 = math.tanh %883 : vector<2x32xf32>
    %885 = arith.mulf %880, %884 : vector<2x32xf32>
    %c0_717 = arith.constant 0 : index
    %c0_718 = arith.constant 0 : index
    %886 = vector.load %arg13[%c0_717, %c0_718] : memref<16x32xf32, #tpu.memory_space<vmem>>, vector<2x32xf32>
    tpu.vector_store %arg13[%c0_717, %c0_718], %885 {strides = array<i32>} : memref<16x32xf32, #tpu.memory_space<vmem>>, vector<2x32xf32>,
    %c2_719 = arith.constant 2 : index
    %c0_720 = arith.constant 0 : index
    %c0_721 = arith.constant 0 : index
    %c0_722 = arith.constant 0 : index
    %887 = vector.load %arg4[%c2_719, %c0_720, %c0_721, %c0_722] : memref<3x4x32x32xf32, #tpu.memory_space<vmem>>, vector<1x1x32x32xf32>
    %888 = vector.shape_cast %887 : vector<1x1x32x32xf32> to vector<32x32xf32>
    %cst_723 = arith.constant dense<0.000000e+00> : vector<2x32xf32>
    %889 = tpu.matmul %885, %888, %cst_723 {dimension_numbers = #tpu.dot_dimension_numbers<[1], [0], [0], [1], [0, 0, 1, 1], [], []>} : vector<2x32xf32>, vector<32x32xf32>, vector<2x32xf32> -> vector<2x32xf32>
    %c2_724 = arith.constant 2 : index
    %c1_725 = arith.constant 1 : index
    %c0_726 = arith.constant 0 : index
    %c0_727 = arith.constant 0 : index
    %890 = vector.load %arg4[%c2_724, %c1_725, %c0_726, %c0_727] : memref<3x4x32x32xf32, #tpu.memory_space<vmem>>, vector<1x1x32x32xf32>
    %891 = vector.shape_cast %890 : vector<1x1x32x32xf32> to vector<32x32xf32>
    %cst_728 = arith.constant dense<0.000000e+00> : vector<2x32xf32>
    %892 = tpu.matmul %885, %891, %cst_728 {dimension_numbers = #tpu.dot_dimension_numbers<[1], [0], [0], [1], [0, 0, 1, 1], [], []>} : vector<2x32xf32>, vector<32x32xf32>, vector<2x32xf32> -> vector<2x32xf32>
    %c2_729 = arith.constant 2 : index
    %c2_730 = arith.constant 2 : index
    %c0_731 = arith.constant 0 : index
    %c0_732 = arith.constant 0 : index
    %893 = vector.load %arg4[%c2_729, %c2_730, %c0_731, %c0_732] : memref<3x4x32x32xf32, #tpu.memory_space<vmem>>, vector<1x1x32x32xf32>
    %894 = vector.shape_cast %893 : vector<1x1x32x32xf32> to vector<32x32xf32>
    %cst_733 = arith.constant dense<0.000000e+00> : vector<2x32xf32>
    %895 = tpu.matmul %885, %894, %cst_733 {dimension_numbers = #tpu.dot_dimension_numbers<[1], [0], [0], [1], [0, 0, 1, 1], [], []>} : vector<2x32xf32>, vector<32x32xf32>, vector<2x32xf32> -> vector<2x32xf32>
    %c2_734 = arith.constant 2 : index
    %c3_735 = arith.constant 3 : index
    %c0_736 = arith.constant 0 : index
    %c0_737 = arith.constant 0 : index
    %896 = vector.load %arg4[%c2_734, %c3_735, %c0_736, %c0_737] : memref<3x4x32x32xf32, #tpu.memory_space<vmem>>, vector<1x1x32x32xf32>
    %897 = vector.shape_cast %896 : vector<1x1x32x32xf32> to vector<32x32xf32>
    %cst_738 = arith.constant dense<0.000000e+00> : vector<2x32xf32>
    %898 = tpu.matmul %885, %897, %cst_738 {dimension_numbers = #tpu.dot_dimension_numbers<[1], [0], [0], [1], [0, 0, 1, 1], [], []>} : vector<2x32xf32>, vector<32x32xf32>, vector<2x32xf32> -> vector<2x32xf32>
    %c0_739 = arith.constant 0 : index
    %c2_740 = arith.constant 2 : index
    %c0_741 = arith.constant 0 : index
    %899 = vector.load %arg14[%c0_739, %c2_740, %c0_741] : memref<4x16x32xf32, #tpu.memory_space<vmem>>, vector<1x2x32xf32>
    %900 = vector.shape_cast %899 : vector<1x2x32xf32> to vector<2x32xf32>
    %901 = arith.addf %900, %889 : vector<2x32xf32>
    %902 = arith.negf %901 : vector<2x32xf32>
    %903 = math.exp %902 : vector<2x32xf32>
    %cst_742 = arith.constant 1.000000e+00 : f32
    %904 = vector.broadcast %cst_742 : f32 to vector<2x32xf32>
    %905 = arith.addf %904, %903 : vector<2x32xf32>
    %906 = arith.divf %904, %905 : vector<2x32xf32>
    %c1_743 = arith.constant 1 : index
    %c2_744 = arith.constant 2 : index
    %c0_745 = arith.constant 0 : index
    %907 = vector.load %arg14[%c1_743, %c2_744, %c0_745] : memref<4x16x32xf32, #tpu.memory_space<vmem>>, vector<1x2x32xf32>
    %908 = vector.shape_cast %907 : vector<1x2x32xf32> to vector<2x32xf32>
    %909 = arith.addf %908, %892 : vector<2x32xf32>
    %910 = arith.negf %909 : vector<2x32xf32>
    %911 = math.exp %910 : vector<2x32xf32>
    %cst_746 = arith.constant 1.000000e+00 : f32
    %912 = vector.broadcast %cst_746 : f32 to vector<2x32xf32>
    %913 = arith.addf %912, %911 : vector<2x32xf32>
    %914 = arith.divf %912, %913 : vector<2x32xf32>
    %c2_747 = arith.constant 2 : index
    %c2_748 = arith.constant 2 : index
    %c0_749 = arith.constant 0 : index
    %915 = vector.load %arg14[%c2_747, %c2_748, %c0_749] : memref<4x16x32xf32, #tpu.memory_space<vmem>>, vector<1x2x32xf32>
    %916 = vector.shape_cast %915 : vector<1x2x32xf32> to vector<2x32xf32>
    %917 = arith.addf %916, %895 : vector<2x32xf32>
    %918 = math.tanh %917 : vector<2x32xf32>
    %c3_750 = arith.constant 3 : index
    %c2_751 = arith.constant 2 : index
    %c0_752 = arith.constant 0 : index
    %919 = vector.load %arg14[%c3_750, %c2_751, %c0_752] : memref<4x16x32xf32, #tpu.memory_space<vmem>>, vector<1x2x32xf32>
    %920 = vector.shape_cast %919 : vector<1x2x32xf32> to vector<2x32xf32>
    %921 = arith.addf %920, %898 : vector<2x32xf32>
    %922 = arith.negf %921 : vector<2x32xf32>
    %923 = math.exp %922 : vector<2x32xf32>
    %cst_753 = arith.constant 1.000000e+00 : f32
    %924 = vector.broadcast %cst_753 : f32 to vector<2x32xf32>
    %925 = arith.addf %924, %923 : vector<2x32xf32>
    %926 = arith.divf %924, %925 : vector<2x32xf32>
    %927 = arith.mulf %914, %883 : vector<2x32xf32>
    %928 = arith.mulf %906, %918 : vector<2x32xf32>
    %929 = arith.addf %927, %928 : vector<2x32xf32>
    %930 = math.tanh %929 : vector<2x32xf32>
    %931 = arith.mulf %926, %930 : vector<2x32xf32>
    %c2_754 = arith.constant 2 : index
    %c0_755 = arith.constant 0 : index
    %932 = vector.load %arg13[%c2_754, %c0_755] : memref<16x32xf32, #tpu.memory_space<vmem>>, vector<2x32xf32>
    tpu.vector_store %arg13[%c2_754, %c0_755], %931 {strides = array<i32>} : memref<16x32xf32, #tpu.memory_space<vmem>>, vector<2x32xf32>,
    %c2_756 = arith.constant 2 : index
    %c0_757 = arith.constant 0 : index
    %c0_758 = arith.constant 0 : index
    %c0_759 = arith.constant 0 : index
    %933 = vector.load %arg4[%c2_756, %c0_757, %c0_758, %c0_759] : memref<3x4x32x32xf32, #tpu.memory_space<vmem>>, vector<1x1x32x32xf32>
    %934 = vector.shape_cast %933 : vector<1x1x32x32xf32> to vector<32x32xf32>
    %cst_760 = arith.constant dense<0.000000e+00> : vector<2x32xf32>
    %935 = tpu.matmul %931, %934, %cst_760 {dimension_numbers = #tpu.dot_dimension_numbers<[1], [0], [0], [1], [0, 0, 1, 1], [], []>} : vector<2x32xf32>, vector<32x32xf32>, vector<2x32xf32> -> vector<2x32xf32>
    %c2_761 = arith.constant 2 : index
    %c1_762 = arith.constant 1 : index
    %c0_763 = arith.constant 0 : index
    %c0_764 = arith.constant 0 : index
    %936 = vector.load %arg4[%c2_761, %c1_762, %c0_763, %c0_764] : memref<3x4x32x32xf32, #tpu.memory_space<vmem>>, vector<1x1x32x32xf32>
    %937 = vector.shape_cast %936 : vector<1x1x32x32xf32> to vector<32x32xf32>
    %cst_765 = arith.constant dense<0.000000e+00> : vector<2x32xf32>
    %938 = tpu.matmul %931, %937, %cst_765 {dimension_numbers = #tpu.dot_dimension_numbers<[1], [0], [0], [1], [0, 0, 1, 1], [], []>} : vector<2x32xf32>, vector<32x32xf32>, vector<2x32xf32> -> vector<2x32xf32>
    %c2_766 = arith.constant 2 : index
    %c2_767 = arith.constant 2 : index
    %c0_768 = arith.constant 0 : index
    %c0_769 = arith.constant 0 : index
    %939 = vector.load %arg4[%c2_766, %c2_767, %c0_768, %c0_769] : memref<3x4x32x32xf32, #tpu.memory_space<vmem>>, vector<1x1x32x32xf32>
    %940 = vector.shape_cast %939 : vector<1x1x32x32xf32> to vector<32x32xf32>
    %cst_770 = arith.constant dense<0.000000e+00> : vector<2x32xf32>
    %941 = tpu.matmul %931, %940, %cst_770 {dimension_numbers = #tpu.dot_dimension_numbers<[1], [0], [0], [1], [0, 0, 1, 1], [], []>} : vector<2x32xf32>, vector<32x32xf32>, vector<2x32xf32> -> vector<2x32xf32>
    %c2_771 = arith.constant 2 : index
    %c3_772 = arith.constant 3 : index
    %c0_773 = arith.constant 0 : index
    %c0_774 = arith.constant 0 : index
    %942 = vector.load %arg4[%c2_771, %c3_772, %c0_773, %c0_774] : memref<3x4x32x32xf32, #tpu.memory_space<vmem>>, vector<1x1x32x32xf32>
    %943 = vector.shape_cast %942 : vector<1x1x32x32xf32> to vector<32x32xf32>
    %cst_775 = arith.constant dense<0.000000e+00> : vector<2x32xf32>
    %944 = tpu.matmul %931, %943, %cst_775 {dimension_numbers = #tpu.dot_dimension_numbers<[1], [0], [0], [1], [0, 0, 1, 1], [], []>} : vector<2x32xf32>, vector<32x32xf32>, vector<2x32xf32> -> vector<2x32xf32>
    %c0_776 = arith.constant 0 : index
    %c4_777 = arith.constant 4 : index
    %c0_778 = arith.constant 0 : index
    %945 = vector.load %arg14[%c0_776, %c4_777, %c0_778] : memref<4x16x32xf32, #tpu.memory_space<vmem>>, vector<1x2x32xf32>
    %946 = vector.shape_cast %945 : vector<1x2x32xf32> to vector<2x32xf32>
    %947 = arith.addf %946, %935 : vector<2x32xf32>
    %948 = arith.negf %947 : vector<2x32xf32>
    %949 = math.exp %948 : vector<2x32xf32>
    %cst_779 = arith.constant 1.000000e+00 : f32
    %950 = vector.broadcast %cst_779 : f32 to vector<2x32xf32>
    %951 = arith.addf %950, %949 : vector<2x32xf32>
    %952 = arith.divf %950, %951 : vector<2x32xf32>
    %c1_780 = arith.constant 1 : index
    %c4_781 = arith.constant 4 : index
    %c0_782 = arith.constant 0 : index
    %953 = vector.load %arg14[%c1_780, %c4_781, %c0_782] : memref<4x16x32xf32, #tpu.memory_space<vmem>>, vector<1x2x32xf32>
    %954 = vector.shape_cast %953 : vector<1x2x32xf32> to vector<2x32xf32>
    %955 = arith.addf %954, %938 : vector<2x32xf32>
    %956 = arith.negf %955 : vector<2x32xf32>
    %957 = math.exp %956 : vector<2x32xf32>
    %cst_783 = arith.constant 1.000000e+00 : f32
    %958 = vector.broadcast %cst_783 : f32 to vector<2x32xf32>
    %959 = arith.addf %958, %957 : vector<2x32xf32>
    %960 = arith.divf %958, %959 : vector<2x32xf32>
    %c2_784 = arith.constant 2 : index
    %c4_785 = arith.constant 4 : index
    %c0_786 = arith.constant 0 : index
    %961 = vector.load %arg14[%c2_784, %c4_785, %c0_786] : memref<4x16x32xf32, #tpu.memory_space<vmem>>, vector<1x2x32xf32>
    %962 = vector.shape_cast %961 : vector<1x2x32xf32> to vector<2x32xf32>
    %963 = arith.addf %962, %941 : vector<2x32xf32>
    %964 = math.tanh %963 : vector<2x32xf32>
    %c3_787 = arith.constant 3 : index
    %c4_788 = arith.constant 4 : index
    %c0_789 = arith.constant 0 : index
    %965 = vector.load %arg14[%c3_787, %c4_788, %c0_789] : memref<4x16x32xf32, #tpu.memory_space<vmem>>, vector<1x2x32xf32>
    %966 = vector.shape_cast %965 : vector<1x2x32xf32> to vector<2x32xf32>
    %967 = arith.addf %966, %944 : vector<2x32xf32>
    %968 = arith.negf %967 : vector<2x32xf32>
    %969 = math.exp %968 : vector<2x32xf32>
    %cst_790 = arith.constant 1.000000e+00 : f32
    %970 = vector.broadcast %cst_790 : f32 to vector<2x32xf32>
    %971 = arith.addf %970, %969 : vector<2x32xf32>
    %972 = arith.divf %970, %971 : vector<2x32xf32>
    %973 = arith.mulf %960, %929 : vector<2x32xf32>
    %974 = arith.mulf %952, %964 : vector<2x32xf32>
    %975 = arith.addf %973, %974 : vector<2x32xf32>
    %976 = math.tanh %975 : vector<2x32xf32>
    %977 = arith.mulf %972, %976 : vector<2x32xf32>
    %c4_791 = arith.constant 4 : index
    %c0_792 = arith.constant 0 : index
    %978 = vector.load %arg13[%c4_791, %c0_792] : memref<16x32xf32, #tpu.memory_space<vmem>>, vector<2x32xf32>
    tpu.vector_store %arg13[%c4_791, %c0_792], %977 {strides = array<i32>} : memref<16x32xf32, #tpu.memory_space<vmem>>, vector<2x32xf32>,
    %c2_793 = arith.constant 2 : index
    %c0_794 = arith.constant 0 : index
    %c0_795 = arith.constant 0 : index
    %c0_796 = arith.constant 0 : index
    %979 = vector.load %arg4[%c2_793, %c0_794, %c0_795, %c0_796] : memref<3x4x32x32xf32, #tpu.memory_space<vmem>>, vector<1x1x32x32xf32>
    %980 = vector.shape_cast %979 : vector<1x1x32x32xf32> to vector<32x32xf32>
    %cst_797 = arith.constant dense<0.000000e+00> : vector<2x32xf32>
    %981 = tpu.matmul %977, %980, %cst_797 {dimension_numbers = #tpu.dot_dimension_numbers<[1], [0], [0], [1], [0, 0, 1, 1], [], []>} : vector<2x32xf32>, vector<32x32xf32>, vector<2x32xf32> -> vector<2x32xf32>
    %c2_798 = arith.constant 2 : index
    %c1_799 = arith.constant 1 : index
    %c0_800 = arith.constant 0 : index
    %c0_801 = arith.constant 0 : index
    %982 = vector.load %arg4[%c2_798, %c1_799, %c0_800, %c0_801] : memref<3x4x32x32xf32, #tpu.memory_space<vmem>>, vector<1x1x32x32xf32>
    %983 = vector.shape_cast %982 : vector<1x1x32x32xf32> to vector<32x32xf32>
    %cst_802 = arith.constant dense<0.000000e+00> : vector<2x32xf32>
    %984 = tpu.matmul %977, %983, %cst_802 {dimension_numbers = #tpu.dot_dimension_numbers<[1], [0], [0], [1], [0, 0, 1, 1], [], []>} : vector<2x32xf32>, vector<32x32xf32>, vector<2x32xf32> -> vector<2x32xf32>
    %c2_803 = arith.constant 2 : index
    %c2_804 = arith.constant 2 : index
    %c0_805 = arith.constant 0 : index
    %c0_806 = arith.constant 0 : index
    %985 = vector.load %arg4[%c2_803, %c2_804, %c0_805, %c0_806] : memref<3x4x32x32xf32, #tpu.memory_space<vmem>>, vector<1x1x32x32xf32>
    %986 = vector.shape_cast %985 : vector<1x1x32x32xf32> to vector<32x32xf32>
    %cst_807 = arith.constant dense<0.000000e+00> : vector<2x32xf32>
    %987 = tpu.matmul %977, %986, %cst_807 {dimension_numbers = #tpu.dot_dimension_numbers<[1], [0], [0], [1], [0, 0, 1, 1], [], []>} : vector<2x32xf32>, vector<32x32xf32>, vector<2x32xf32> -> vector<2x32xf32>
    %c2_808 = arith.constant 2 : index
    %c3_809 = arith.constant 3 : index
    %c0_810 = arith.constant 0 : index
    %c0_811 = arith.constant 0 : index
    %988 = vector.load %arg4[%c2_808, %c3_809, %c0_810, %c0_811] : memref<3x4x32x32xf32, #tpu.memory_space<vmem>>, vector<1x1x32x32xf32>
    %989 = vector.shape_cast %988 : vector<1x1x32x32xf32> to vector<32x32xf32>
    %cst_812 = arith.constant dense<0.000000e+00> : vector<2x32xf32>
    %990 = tpu.matmul %977, %989, %cst_812 {dimension_numbers = #tpu.dot_dimension_numbers<[1], [0], [0], [1], [0, 0, 1, 1], [], []>} : vector<2x32xf32>, vector<32x32xf32>, vector<2x32xf32> -> vector<2x32xf32>
    %c0_813 = arith.constant 0 : index
    %c6_814 = arith.constant 6 : index
    %c0_815 = arith.constant 0 : index
    %991 = vector.load %arg14[%c0_813, %c6_814, %c0_815] : memref<4x16x32xf32, #tpu.memory_space<vmem>>, vector<1x2x32xf32>
    %992 = vector.shape_cast %991 : vector<1x2x32xf32> to vector<2x32xf32>
    %993 = arith.addf %992, %981 : vector<2x32xf32>
    %994 = arith.negf %993 : vector<2x32xf32>
    %995 = math.exp %994 : vector<2x32xf32>
    %cst_816 = arith.constant 1.000000e+00 : f32
    %996 = vector.broadcast %cst_816 : f32 to vector<2x32xf32>
    %997 = arith.addf %996, %995 : vector<2x32xf32>
    %998 = arith.divf %996, %997 : vector<2x32xf32>
    %c1_817 = arith.constant 1 : index
    %c6_818 = arith.constant 6 : index
    %c0_819 = arith.constant 0 : index
    %999 = vector.load %arg14[%c1_817, %c6_818, %c0_819] : memref<4x16x32xf32, #tpu.memory_space<vmem>>, vector<1x2x32xf32>
    %1000 = vector.shape_cast %999 : vector<1x2x32xf32> to vector<2x32xf32>
    %1001 = arith.addf %1000, %984 : vector<2x32xf32>
    %1002 = arith.negf %1001 : vector<2x32xf32>
    %1003 = math.exp %1002 : vector<2x32xf32>
    %cst_820 = arith.constant 1.000000e+00 : f32
    %1004 = vector.broadcast %cst_820 : f32 to vector<2x32xf32>
    %1005 = arith.addf %1004, %1003 : vector<2x32xf32>
    %1006 = arith.divf %1004, %1005 : vector<2x32xf32>
    %c2_821 = arith.constant 2 : index
    %c6_822 = arith.constant 6 : index
    %c0_823 = arith.constant 0 : index
    %1007 = vector.load %arg14[%c2_821, %c6_822, %c0_823] : memref<4x16x32xf32, #tpu.memory_space<vmem>>, vector<1x2x32xf32>
    %1008 = vector.shape_cast %1007 : vector<1x2x32xf32> to vector<2x32xf32>
    %1009 = arith.addf %1008, %987 : vector<2x32xf32>
    %1010 = math.tanh %1009 : vector<2x32xf32>
    %c3_824 = arith.constant 3 : index
    %c6_825 = arith.constant 6 : index
    %c0_826 = arith.constant 0 : index
    %1011 = vector.load %arg14[%c3_824, %c6_825, %c0_826] : memref<4x16x32xf32, #tpu.memory_space<vmem>>, vector<1x2x32xf32>
    %1012 = vector.shape_cast %1011 : vector<1x2x32xf32> to vector<2x32xf32>
    %1013 = arith.addf %1012, %990 : vector<2x32xf32>
    %1014 = arith.negf %1013 : vector<2x32xf32>
    %1015 = math.exp %1014 : vector<2x32xf32>
    %cst_827 = arith.constant 1.000000e+00 : f32
    %1016 = vector.broadcast %cst_827 : f32 to vector<2x32xf32>
    %1017 = arith.addf %1016, %1015 : vector<2x32xf32>
    %1018 = arith.divf %1016, %1017 : vector<2x32xf32>
    %1019 = arith.mulf %1006, %975 : vector<2x32xf32>
    %1020 = arith.mulf %998, %1010 : vector<2x32xf32>
    %1021 = arith.addf %1019, %1020 : vector<2x32xf32>
    %1022 = math.tanh %1021 : vector<2x32xf32>
    %1023 = arith.mulf %1018, %1022 : vector<2x32xf32>
    %c6_828 = arith.constant 6 : index
    %c0_829 = arith.constant 0 : index
    %1024 = vector.load %arg13[%c6_828, %c0_829] : memref<16x32xf32, #tpu.memory_space<vmem>>, vector<2x32xf32>
    tpu.vector_store %arg13[%c6_828, %c0_829], %1023 {strides = array<i32>} : memref<16x32xf32, #tpu.memory_space<vmem>>, vector<2x32xf32>,
    %c2_830 = arith.constant 2 : index
    %c0_831 = arith.constant 0 : index
    %c0_832 = arith.constant 0 : index
    %c0_833 = arith.constant 0 : index
    %1025 = vector.load %arg4[%c2_830, %c0_831, %c0_832, %c0_833] : memref<3x4x32x32xf32, #tpu.memory_space<vmem>>, vector<1x1x32x32xf32>
    %1026 = vector.shape_cast %1025 : vector<1x1x32x32xf32> to vector<32x32xf32>
    %cst_834 = arith.constant dense<0.000000e+00> : vector<2x32xf32>
    %1027 = tpu.matmul %1023, %1026, %cst_834 {dimension_numbers = #tpu.dot_dimension_numbers<[1], [0], [0], [1], [0, 0, 1, 1], [], []>} : vector<2x32xf32>, vector<32x32xf32>, vector<2x32xf32> -> vector<2x32xf32>
    %c2_835 = arith.constant 2 : index
    %c1_836 = arith.constant 1 : index
    %c0_837 = arith.constant 0 : index
    %c0_838 = arith.constant 0 : index
    %1028 = vector.load %arg4[%c2_835, %c1_836, %c0_837, %c0_838] : memref<3x4x32x32xf32, #tpu.memory_space<vmem>>, vector<1x1x32x32xf32>
    %1029 = vector.shape_cast %1028 : vector<1x1x32x32xf32> to vector<32x32xf32>
    %cst_839 = arith.constant dense<0.000000e+00> : vector<2x32xf32>
    %1030 = tpu.matmul %1023, %1029, %cst_839 {dimension_numbers = #tpu.dot_dimension_numbers<[1], [0], [0], [1], [0, 0, 1, 1], [], []>} : vector<2x32xf32>, vector<32x32xf32>, vector<2x32xf32> -> vector<2x32xf32>
    %c2_840 = arith.constant 2 : index
    %c2_841 = arith.constant 2 : index
    %c0_842 = arith.constant 0 : index
    %c0_843 = arith.constant 0 : index
    %1031 = vector.load %arg4[%c2_840, %c2_841, %c0_842, %c0_843] : memref<3x4x32x32xf32, #tpu.memory_space<vmem>>, vector<1x1x32x32xf32>
    %1032 = vector.shape_cast %1031 : vector<1x1x32x32xf32> to vector<32x32xf32>
    %cst_844 = arith.constant dense<0.000000e+00> : vector<2x32xf32>
    %1033 = tpu.matmul %1023, %1032, %cst_844 {dimension_numbers = #tpu.dot_dimension_numbers<[1], [0], [0], [1], [0, 0, 1, 1], [], []>} : vector<2x32xf32>, vector<32x32xf32>, vector<2x32xf32> -> vector<2x32xf32>
    %c2_845 = arith.constant 2 : index
    %c3_846 = arith.constant 3 : index
    %c0_847 = arith.constant 0 : index
    %c0_848 = arith.constant 0 : index
    %1034 = vector.load %arg4[%c2_845, %c3_846, %c0_847, %c0_848] : memref<3x4x32x32xf32, #tpu.memory_space<vmem>>, vector<1x1x32x32xf32>
    %1035 = vector.shape_cast %1034 : vector<1x1x32x32xf32> to vector<32x32xf32>
    %cst_849 = arith.constant dense<0.000000e+00> : vector<2x32xf32>
    %1036 = tpu.matmul %1023, %1035, %cst_849 {dimension_numbers = #tpu.dot_dimension_numbers<[1], [0], [0], [1], [0, 0, 1, 1], [], []>} : vector<2x32xf32>, vector<32x32xf32>, vector<2x32xf32> -> vector<2x32xf32>
    %c0_850 = arith.constant 0 : index
    %c8_851 = arith.constant 8 : index
    %c0_852 = arith.constant 0 : index
    %1037 = vector.load %arg14[%c0_850, %c8_851, %c0_852] : memref<4x16x32xf32, #tpu.memory_space<vmem>>, vector<1x2x32xf32>
    %1038 = vector.shape_cast %1037 : vector<1x2x32xf32> to vector<2x32xf32>
    %1039 = arith.addf %1038, %1027 : vector<2x32xf32>
    %1040 = arith.negf %1039 : vector<2x32xf32>
    %1041 = math.exp %1040 : vector<2x32xf32>
    %cst_853 = arith.constant 1.000000e+00 : f32
    %1042 = vector.broadcast %cst_853 : f32 to vector<2x32xf32>
    %1043 = arith.addf %1042, %1041 : vector<2x32xf32>
    %1044 = arith.divf %1042, %1043 : vector<2x32xf32>
    %c1_854 = arith.constant 1 : index
    %c8_855 = arith.constant 8 : index
    %c0_856 = arith.constant 0 : index
    %1045 = vector.load %arg14[%c1_854, %c8_855, %c0_856] : memref<4x16x32xf32, #tpu.memory_space<vmem>>, vector<1x2x32xf32>
    %1046 = vector.shape_cast %1045 : vector<1x2x32xf32> to vector<2x32xf32>
    %1047 = arith.addf %1046, %1030 : vector<2x32xf32>
    %1048 = arith.negf %1047 : vector<2x32xf32>
    %1049 = math.exp %1048 : vector<2x32xf32>
    %cst_857 = arith.constant 1.000000e+00 : f32
    %1050 = vector.broadcast %cst_857 : f32 to vector<2x32xf32>
    %1051 = arith.addf %1050, %1049 : vector<2x32xf32>
    %1052 = arith.divf %1050, %1051 : vector<2x32xf32>
    %c2_858 = arith.constant 2 : index
    %c8_859 = arith.constant 8 : index
    %c0_860 = arith.constant 0 : index
    %1053 = vector.load %arg14[%c2_858, %c8_859, %c0_860] : memref<4x16x32xf32, #tpu.memory_space<vmem>>, vector<1x2x32xf32>
    %1054 = vector.shape_cast %1053 : vector<1x2x32xf32> to vector<2x32xf32>
    %1055 = arith.addf %1054, %1033 : vector<2x32xf32>
    %1056 = math.tanh %1055 : vector<2x32xf32>
    %c3_861 = arith.constant 3 : index
    %c8_862 = arith.constant 8 : index
    %c0_863 = arith.constant 0 : index
    %1057 = vector.load %arg14[%c3_861, %c8_862, %c0_863] : memref<4x16x32xf32, #tpu.memory_space<vmem>>, vector<1x2x32xf32>
    %1058 = vector.shape_cast %1057 : vector<1x2x32xf32> to vector<2x32xf32>
    %1059 = arith.addf %1058, %1036 : vector<2x32xf32>
    %1060 = arith.negf %1059 : vector<2x32xf32>
    %1061 = math.exp %1060 : vector<2x32xf32>
    %cst_864 = arith.constant 1.000000e+00 : f32
    %1062 = vector.broadcast %cst_864 : f32 to vector<2x32xf32>
    %1063 = arith.addf %1062, %1061 : vector<2x32xf32>
    %1064 = arith.divf %1062, %1063 : vector<2x32xf32>
    %1065 = arith.mulf %1052, %1021 : vector<2x32xf32>
    %1066 = arith.mulf %1044, %1056 : vector<2x32xf32>
    %1067 = arith.addf %1065, %1066 : vector<2x32xf32>
    %1068 = math.tanh %1067 : vector<2x32xf32>
    %1069 = arith.mulf %1064, %1068 : vector<2x32xf32>
    %c8_865 = arith.constant 8 : index
    %c0_866 = arith.constant 0 : index
    %1070 = vector.load %arg13[%c8_865, %c0_866] : memref<16x32xf32, #tpu.memory_space<vmem>>, vector<2x32xf32>
    tpu.vector_store %arg13[%c8_865, %c0_866], %1069 {strides = array<i32>} : memref<16x32xf32, #tpu.memory_space<vmem>>, vector<2x32xf32>,
    %c2_867 = arith.constant 2 : index
    %c0_868 = arith.constant 0 : index
    %c0_869 = arith.constant 0 : index
    %c0_870 = arith.constant 0 : index
    %1071 = vector.load %arg4[%c2_867, %c0_868, %c0_869, %c0_870] : memref<3x4x32x32xf32, #tpu.memory_space<vmem>>, vector<1x1x32x32xf32>
    %1072 = vector.shape_cast %1071 : vector<1x1x32x32xf32> to vector<32x32xf32>
    %cst_871 = arith.constant dense<0.000000e+00> : vector<2x32xf32>
    %1073 = tpu.matmul %1069, %1072, %cst_871 {dimension_numbers = #tpu.dot_dimension_numbers<[1], [0], [0], [1], [0, 0, 1, 1], [], []>} : vector<2x32xf32>, vector<32x32xf32>, vector<2x32xf32> -> vector<2x32xf32>
    %c2_872 = arith.constant 2 : index
    %c1_873 = arith.constant 1 : index
    %c0_874 = arith.constant 0 : index
    %c0_875 = arith.constant 0 : index
    %1074 = vector.load %arg4[%c2_872, %c1_873, %c0_874, %c0_875] : memref<3x4x32x32xf32, #tpu.memory_space<vmem>>, vector<1x1x32x32xf32>
    %1075 = vector.shape_cast %1074 : vector<1x1x32x32xf32> to vector<32x32xf32>
    %cst_876 = arith.constant dense<0.000000e+00> : vector<2x32xf32>
    %1076 = tpu.matmul %1069, %1075, %cst_876 {dimension_numbers = #tpu.dot_dimension_numbers<[1], [0], [0], [1], [0, 0, 1, 1], [], []>} : vector<2x32xf32>, vector<32x32xf32>, vector<2x32xf32> -> vector<2x32xf32>
    %c2_877 = arith.constant 2 : index
    %c2_878 = arith.constant 2 : index
    %c0_879 = arith.constant 0 : index
    %c0_880 = arith.constant 0 : index
    %1077 = vector.load %arg4[%c2_877, %c2_878, %c0_879, %c0_880] : memref<3x4x32x32xf32, #tpu.memory_space<vmem>>, vector<1x1x32x32xf32>
    %1078 = vector.shape_cast %1077 : vector<1x1x32x32xf32> to vector<32x32xf32>
    %cst_881 = arith.constant dense<0.000000e+00> : vector<2x32xf32>
    %1079 = tpu.matmul %1069, %1078, %cst_881 {dimension_numbers = #tpu.dot_dimension_numbers<[1], [0], [0], [1], [0, 0, 1, 1], [], []>} : vector<2x32xf32>, vector<32x32xf32>, vector<2x32xf32> -> vector<2x32xf32>
    %c2_882 = arith.constant 2 : index
    %c3_883 = arith.constant 3 : index
    %c0_884 = arith.constant 0 : index
    %c0_885 = arith.constant 0 : index
    %1080 = vector.load %arg4[%c2_882, %c3_883, %c0_884, %c0_885] : memref<3x4x32x32xf32, #tpu.memory_space<vmem>>, vector<1x1x32x32xf32>
    %1081 = vector.shape_cast %1080 : vector<1x1x32x32xf32> to vector<32x32xf32>
    %cst_886 = arith.constant dense<0.000000e+00> : vector<2x32xf32>
    %1082 = tpu.matmul %1069, %1081, %cst_886 {dimension_numbers = #tpu.dot_dimension_numbers<[1], [0], [0], [1], [0, 0, 1, 1], [], []>} : vector<2x32xf32>, vector<32x32xf32>, vector<2x32xf32> -> vector<2x32xf32>
    %c0_887 = arith.constant 0 : index
    %c10_888 = arith.constant 10 : index
    %c0_889 = arith.constant 0 : index
    %1083 = vector.load %arg14[%c0_887, %c10_888, %c0_889] : memref<4x16x32xf32, #tpu.memory_space<vmem>>, vector<1x2x32xf32>
    %1084 = vector.shape_cast %1083 : vector<1x2x32xf32> to vector<2x32xf32>
    %1085 = arith.addf %1084, %1073 : vector<2x32xf32>
    %1086 = arith.negf %1085 : vector<2x32xf32>
    %1087 = math.exp %1086 : vector<2x32xf32>
    %cst_890 = arith.constant 1.000000e+00 : f32
    %1088 = vector.broadcast %cst_890 : f32 to vector<2x32xf32>
    %1089 = arith.addf %1088, %1087 : vector<2x32xf32>
    %1090 = arith.divf %1088, %1089 : vector<2x32xf32>
    %c1_891 = arith.constant 1 : index
    %c10_892 = arith.constant 10 : index
    %c0_893 = arith.constant 0 : index
    %1091 = vector.load %arg14[%c1_891, %c10_892, %c0_893] : memref<4x16x32xf32, #tpu.memory_space<vmem>>, vector<1x2x32xf32>
    %1092 = vector.shape_cast %1091 : vector<1x2x32xf32> to vector<2x32xf32>
    %1093 = arith.addf %1092, %1076 : vector<2x32xf32>
    %1094 = arith.negf %1093 : vector<2x32xf32>
    %1095 = math.exp %1094 : vector<2x32xf32>
    %cst_894 = arith.constant 1.000000e+00 : f32
    %1096 = vector.broadcast %cst_894 : f32 to vector<2x32xf32>
    %1097 = arith.addf %1096, %1095 : vector<2x32xf32>
    %1098 = arith.divf %1096, %1097 : vector<2x32xf32>
    %c2_895 = arith.constant 2 : index
    %c10_896 = arith.constant 10 : index
    %c0_897 = arith.constant 0 : index
    %1099 = vector.load %arg14[%c2_895, %c10_896, %c0_897] : memref<4x16x32xf32, #tpu.memory_space<vmem>>, vector<1x2x32xf32>
    %1100 = vector.shape_cast %1099 : vector<1x2x32xf32> to vector<2x32xf32>
    %1101 = arith.addf %1100, %1079 : vector<2x32xf32>
    %1102 = math.tanh %1101 : vector<2x32xf32>
    %c3_898 = arith.constant 3 : index
    %c10_899 = arith.constant 10 : index
    %c0_900 = arith.constant 0 : index
    %1103 = vector.load %arg14[%c3_898, %c10_899, %c0_900] : memref<4x16x32xf32, #tpu.memory_space<vmem>>, vector<1x2x32xf32>
    %1104 = vector.shape_cast %1103 : vector<1x2x32xf32> to vector<2x32xf32>
    %1105 = arith.addf %1104, %1082 : vector<2x32xf32>
    %1106 = arith.negf %1105 : vector<2x32xf32>
    %1107 = math.exp %1106 : vector<2x32xf32>
    %cst_901 = arith.constant 1.000000e+00 : f32
    %1108 = vector.broadcast %cst_901 : f32 to vector<2x32xf32>
    %1109 = arith.addf %1108, %1107 : vector<2x32xf32>
    %1110 = arith.divf %1108, %1109 : vector<2x32xf32>
    %1111 = arith.mulf %1098, %1067 : vector<2x32xf32>
    %1112 = arith.mulf %1090, %1102 : vector<2x32xf32>
    %1113 = arith.addf %1111, %1112 : vector<2x32xf32>
    %1114 = math.tanh %1113 : vector<2x32xf32>
    %1115 = arith.mulf %1110, %1114 : vector<2x32xf32>
    %c10_902 = arith.constant 10 : index
    %c0_903 = arith.constant 0 : index
    %1116 = vector.load %arg13[%c10_902, %c0_903] : memref<16x32xf32, #tpu.memory_space<vmem>>, vector<2x32xf32>
    tpu.vector_store %arg13[%c10_902, %c0_903], %1115 {strides = array<i32>} : memref<16x32xf32, #tpu.memory_space<vmem>>, vector<2x32xf32>,
    %c2_904 = arith.constant 2 : index
    %c0_905 = arith.constant 0 : index
    %c0_906 = arith.constant 0 : index
    %c0_907 = arith.constant 0 : index
    %1117 = vector.load %arg4[%c2_904, %c0_905, %c0_906, %c0_907] : memref<3x4x32x32xf32, #tpu.memory_space<vmem>>, vector<1x1x32x32xf32>
    %1118 = vector.shape_cast %1117 : vector<1x1x32x32xf32> to vector<32x32xf32>
    %cst_908 = arith.constant dense<0.000000e+00> : vector<2x32xf32>
    %1119 = tpu.matmul %1115, %1118, %cst_908 {dimension_numbers = #tpu.dot_dimension_numbers<[1], [0], [0], [1], [0, 0, 1, 1], [], []>} : vector<2x32xf32>, vector<32x32xf32>, vector<2x32xf32> -> vector<2x32xf32>
    %c2_909 = arith.constant 2 : index
    %c1_910 = arith.constant 1 : index
    %c0_911 = arith.constant 0 : index
    %c0_912 = arith.constant 0 : index
    %1120 = vector.load %arg4[%c2_909, %c1_910, %c0_911, %c0_912] : memref<3x4x32x32xf32, #tpu.memory_space<vmem>>, vector<1x1x32x32xf32>
    %1121 = vector.shape_cast %1120 : vector<1x1x32x32xf32> to vector<32x32xf32>
    %cst_913 = arith.constant dense<0.000000e+00> : vector<2x32xf32>
    %1122 = tpu.matmul %1115, %1121, %cst_913 {dimension_numbers = #tpu.dot_dimension_numbers<[1], [0], [0], [1], [0, 0, 1, 1], [], []>} : vector<2x32xf32>, vector<32x32xf32>, vector<2x32xf32> -> vector<2x32xf32>
    %c2_914 = arith.constant 2 : index
    %c2_915 = arith.constant 2 : index
    %c0_916 = arith.constant 0 : index
    %c0_917 = arith.constant 0 : index
    %1123 = vector.load %arg4[%c2_914, %c2_915, %c0_916, %c0_917] : memref<3x4x32x32xf32, #tpu.memory_space<vmem>>, vector<1x1x32x32xf32>
    %1124 = vector.shape_cast %1123 : vector<1x1x32x32xf32> to vector<32x32xf32>
    %cst_918 = arith.constant dense<0.000000e+00> : vector<2x32xf32>
    %1125 = tpu.matmul %1115, %1124, %cst_918 {dimension_numbers = #tpu.dot_dimension_numbers<[1], [0], [0], [1], [0, 0, 1, 1], [], []>} : vector<2x32xf32>, vector<32x32xf32>, vector<2x32xf32> -> vector<2x32xf32>
    %c2_919 = arith.constant 2 : index
    %c3_920 = arith.constant 3 : index
    %c0_921 = arith.constant 0 : index
    %c0_922 = arith.constant 0 : index
    %1126 = vector.load %arg4[%c2_919, %c3_920, %c0_921, %c0_922] : memref<3x4x32x32xf32, #tpu.memory_space<vmem>>, vector<1x1x32x32xf32>
    %1127 = vector.shape_cast %1126 : vector<1x1x32x32xf32> to vector<32x32xf32>
    %cst_923 = arith.constant dense<0.000000e+00> : vector<2x32xf32>
    %1128 = tpu.matmul %1115, %1127, %cst_923 {dimension_numbers = #tpu.dot_dimension_numbers<[1], [0], [0], [1], [0, 0, 1, 1], [], []>} : vector<2x32xf32>, vector<32x32xf32>, vector<2x32xf32> -> vector<2x32xf32>
    %c0_924 = arith.constant 0 : index
    %c12_925 = arith.constant 12 : index
    %c0_926 = arith.constant 0 : index
    %1129 = vector.load %arg14[%c0_924, %c12_925, %c0_926] : memref<4x16x32xf32, #tpu.memory_space<vmem>>, vector<1x2x32xf32>
    %1130 = vector.shape_cast %1129 : vector<1x2x32xf32> to vector<2x32xf32>
    %1131 = arith.addf %1130, %1119 : vector<2x32xf32>
    %1132 = arith.negf %1131 : vector<2x32xf32>
    %1133 = math.exp %1132 : vector<2x32xf32>
    %cst_927 = arith.constant 1.000000e+00 : f32
    %1134 = vector.broadcast %cst_927 : f32 to vector<2x32xf32>
    %1135 = arith.addf %1134, %1133 : vector<2x32xf32>
    %1136 = arith.divf %1134, %1135 : vector<2x32xf32>
    %c1_928 = arith.constant 1 : index
    %c12_929 = arith.constant 12 : index
    %c0_930 = arith.constant 0 : index
    %1137 = vector.load %arg14[%c1_928, %c12_929, %c0_930] : memref<4x16x32xf32, #tpu.memory_space<vmem>>, vector<1x2x32xf32>
    %1138 = vector.shape_cast %1137 : vector<1x2x32xf32> to vector<2x32xf32>
    %1139 = arith.addf %1138, %1122 : vector<2x32xf32>
    %1140 = arith.negf %1139 : vector<2x32xf32>
    %1141 = math.exp %1140 : vector<2x32xf32>
    %cst_931 = arith.constant 1.000000e+00 : f32
    %1142 = vector.broadcast %cst_931 : f32 to vector<2x32xf32>
    %1143 = arith.addf %1142, %1141 : vector<2x32xf32>
    %1144 = arith.divf %1142, %1143 : vector<2x32xf32>
    %c2_932 = arith.constant 2 : index
    %c12_933 = arith.constant 12 : index
    %c0_934 = arith.constant 0 : index
    %1145 = vector.load %arg14[%c2_932, %c12_933, %c0_934] : memref<4x16x32xf32, #tpu.memory_space<vmem>>, vector<1x2x32xf32>
    %1146 = vector.shape_cast %1145 : vector<1x2x32xf32> to vector<2x32xf32>
    %1147 = arith.addf %1146, %1125 : vector<2x32xf32>
    %1148 = math.tanh %1147 : vector<2x32xf32>
    %c3_935 = arith.constant 3 : index
    %c12_936 = arith.constant 12 : index
    %c0_937 = arith.constant 0 : index
    %1149 = vector.load %arg14[%c3_935, %c12_936, %c0_937] : memref<4x16x32xf32, #tpu.memory_space<vmem>>, vector<1x2x32xf32>
    %1150 = vector.shape_cast %1149 : vector<1x2x32xf32> to vector<2x32xf32>
    %1151 = arith.addf %1150, %1128 : vector<2x32xf32>
    %1152 = arith.negf %1151 : vector<2x32xf32>
    %1153 = math.exp %1152 : vector<2x32xf32>
    %cst_938 = arith.constant 1.000000e+00 : f32
    %1154 = vector.broadcast %cst_938 : f32 to vector<2x32xf32>
    %1155 = arith.addf %1154, %1153 : vector<2x32xf32>
    %1156 = arith.divf %1154, %1155 : vector<2x32xf32>
    %1157 = arith.mulf %1144, %1113 : vector<2x32xf32>
    %1158 = arith.mulf %1136, %1148 : vector<2x32xf32>
    %1159 = arith.addf %1157, %1158 : vector<2x32xf32>
    %1160 = math.tanh %1159 : vector<2x32xf32>
    %1161 = arith.mulf %1156, %1160 : vector<2x32xf32>
    %c12_939 = arith.constant 12 : index
    %c0_940 = arith.constant 0 : index
    %1162 = vector.load %arg13[%c12_939, %c0_940] : memref<16x32xf32, #tpu.memory_space<vmem>>, vector<2x32xf32>
    tpu.vector_store %arg13[%c12_939, %c0_940], %1161 {strides = array<i32>} : memref<16x32xf32, #tpu.memory_space<vmem>>, vector<2x32xf32>,
    %c2_941 = arith.constant 2 : index
    %c0_942 = arith.constant 0 : index
    %c0_943 = arith.constant 0 : index
    %c0_944 = arith.constant 0 : index
    %1163 = vector.load %arg4[%c2_941, %c0_942, %c0_943, %c0_944] : memref<3x4x32x32xf32, #tpu.memory_space<vmem>>, vector<1x1x32x32xf32>
    %1164 = vector.shape_cast %1163 : vector<1x1x32x32xf32> to vector<32x32xf32>
    %cst_945 = arith.constant dense<0.000000e+00> : vector<2x32xf32>
    %1165 = tpu.matmul %1161, %1164, %cst_945 {dimension_numbers = #tpu.dot_dimension_numbers<[1], [0], [0], [1], [0, 0, 1, 1], [], []>} : vector<2x32xf32>, vector<32x32xf32>, vector<2x32xf32> -> vector<2x32xf32>
    %c2_946 = arith.constant 2 : index
    %c1_947 = arith.constant 1 : index
    %c0_948 = arith.constant 0 : index
    %c0_949 = arith.constant 0 : index
    %1166 = vector.load %arg4[%c2_946, %c1_947, %c0_948, %c0_949] : memref<3x4x32x32xf32, #tpu.memory_space<vmem>>, vector<1x1x32x32xf32>
    %1167 = vector.shape_cast %1166 : vector<1x1x32x32xf32> to vector<32x32xf32>
    %cst_950 = arith.constant dense<0.000000e+00> : vector<2x32xf32>
    %1168 = tpu.matmul %1161, %1167, %cst_950 {dimension_numbers = #tpu.dot_dimension_numbers<[1], [0], [0], [1], [0, 0, 1, 1], [], []>} : vector<2x32xf32>, vector<32x32xf32>, vector<2x32xf32> -> vector<2x32xf32>
    %c2_951 = arith.constant 2 : index
    %c2_952 = arith.constant 2 : index
    %c0_953 = arith.constant 0 : index
    %c0_954 = arith.constant 0 : index
    %1169 = vector.load %arg4[%c2_951, %c2_952, %c0_953, %c0_954] : memref<3x4x32x32xf32, #tpu.memory_space<vmem>>, vector<1x1x32x32xf32>
    %1170 = vector.shape_cast %1169 : vector<1x1x32x32xf32> to vector<32x32xf32>
    %cst_955 = arith.constant dense<0.000000e+00> : vector<2x32xf32>
    %1171 = tpu.matmul %1161, %1170, %cst_955 {dimension_numbers = #tpu.dot_dimension_numbers<[1], [0], [0], [1], [0, 0, 1, 1], [], []>} : vector<2x32xf32>, vector<32x32xf32>, vector<2x32xf32> -> vector<2x32xf32>
    %c2_956 = arith.constant 2 : index
    %c3_957 = arith.constant 3 : index
    %c0_958 = arith.constant 0 : index
    %c0_959 = arith.constant 0 : index
    %1172 = vector.load %arg4[%c2_956, %c3_957, %c0_958, %c0_959] : memref<3x4x32x32xf32, #tpu.memory_space<vmem>>, vector<1x1x32x32xf32>
    %1173 = vector.shape_cast %1172 : vector<1x1x32x32xf32> to vector<32x32xf32>
    %cst_960 = arith.constant dense<0.000000e+00> : vector<2x32xf32>
    %1174 = tpu.matmul %1161, %1173, %cst_960 {dimension_numbers = #tpu.dot_dimension_numbers<[1], [0], [0], [1], [0, 0, 1, 1], [], []>} : vector<2x32xf32>, vector<32x32xf32>, vector<2x32xf32> -> vector<2x32xf32>
    %c0_961 = arith.constant 0 : index
    %c14_962 = arith.constant 14 : index
    %c0_963 = arith.constant 0 : index
    %1175 = vector.load %arg14[%c0_961, %c14_962, %c0_963] : memref<4x16x32xf32, #tpu.memory_space<vmem>>, vector<1x2x32xf32>
    %1176 = vector.shape_cast %1175 : vector<1x2x32xf32> to vector<2x32xf32>
    %1177 = arith.addf %1176, %1165 : vector<2x32xf32>
    %1178 = arith.negf %1177 : vector<2x32xf32>
    %1179 = math.exp %1178 : vector<2x32xf32>
    %cst_964 = arith.constant 1.000000e+00 : f32
    %1180 = vector.broadcast %cst_964 : f32 to vector<2x32xf32>
    %1181 = arith.addf %1180, %1179 : vector<2x32xf32>
    %1182 = arith.divf %1180, %1181 : vector<2x32xf32>
    %c1_965 = arith.constant 1 : index
    %c14_966 = arith.constant 14 : index
    %c0_967 = arith.constant 0 : index
    %1183 = vector.load %arg14[%c1_965, %c14_966, %c0_967] : memref<4x16x32xf32, #tpu.memory_space<vmem>>, vector<1x2x32xf32>
    %1184 = vector.shape_cast %1183 : vector<1x2x32xf32> to vector<2x32xf32>
    %1185 = arith.addf %1184, %1168 : vector<2x32xf32>
    %1186 = arith.negf %1185 : vector<2x32xf32>
    %1187 = math.exp %1186 : vector<2x32xf32>
    %cst_968 = arith.constant 1.000000e+00 : f32
    %1188 = vector.broadcast %cst_968 : f32 to vector<2x32xf32>
    %1189 = arith.addf %1188, %1187 : vector<2x32xf32>
    %1190 = arith.divf %1188, %1189 : vector<2x32xf32>
    %c2_969 = arith.constant 2 : index
    %c14_970 = arith.constant 14 : index
    %c0_971 = arith.constant 0 : index
    %1191 = vector.load %arg14[%c2_969, %c14_970, %c0_971] : memref<4x16x32xf32, #tpu.memory_space<vmem>>, vector<1x2x32xf32>
    %1192 = vector.shape_cast %1191 : vector<1x2x32xf32> to vector<2x32xf32>
    %1193 = arith.addf %1192, %1171 : vector<2x32xf32>
    %1194 = math.tanh %1193 : vector<2x32xf32>
    %c3_972 = arith.constant 3 : index
    %c14_973 = arith.constant 14 : index
    %c0_974 = arith.constant 0 : index
    %1195 = vector.load %arg14[%c3_972, %c14_973, %c0_974] : memref<4x16x32xf32, #tpu.memory_space<vmem>>, vector<1x2x32xf32>
    %1196 = vector.shape_cast %1195 : vector<1x2x32xf32> to vector<2x32xf32>
    %1197 = arith.addf %1196, %1174 : vector<2x32xf32>
    %1198 = arith.negf %1197 : vector<2x32xf32>
    %1199 = math.exp %1198 : vector<2x32xf32>
    %cst_975 = arith.constant 1.000000e+00 : f32
    %1200 = vector.broadcast %cst_975 : f32 to vector<2x32xf32>
    %1201 = arith.addf %1200, %1199 : vector<2x32xf32>
    %1202 = arith.divf %1200, %1201 : vector<2x32xf32>
    %1203 = arith.mulf %1190, %1159 : vector<2x32xf32>
    %1204 = arith.mulf %1182, %1194 : vector<2x32xf32>
    %1205 = arith.addf %1203, %1204 : vector<2x32xf32>
    %1206 = math.tanh %1205 : vector<2x32xf32>
    %1207 = arith.mulf %1202, %1206 : vector<2x32xf32>
    %c14_976 = arith.constant 14 : index
    %c0_977 = arith.constant 0 : index
    %1208 = vector.load %arg13[%c14_976, %c0_977] : memref<16x32xf32, #tpu.memory_space<vmem>>, vector<2x32xf32>
    tpu.vector_store %arg13[%c14_976, %c0_977], %1207 {strides = array<i32>} : memref<16x32xf32, #tpu.memory_space<vmem>>, vector<2x32xf32>,
    %c0_978 = arith.constant 0 : index
    %c2_979 = arith.constant 2 : index
    %c0_980 = arith.constant 0 : index
    %1209 = vector.load %arg11[%c0_978, %c2_979, %c0_980] : memref<2x3x32xf32, #tpu.memory_space<vmem>>, vector<2x1x32xf32>
    %1210 = vector.shape_cast %1209 : vector<2x1x32xf32> to vector<2x32xf32>
    %1211 = vector.shape_cast %1207 : vector<2x32xf32> to vector<2x1x32xf32>
    tpu.vector_store %arg11[%c0_978, %c2_979, %c0_980], %1211 {strides = array<i32>} : memref<2x3x32xf32, #tpu.memory_space<vmem>>, vector<2x1x32xf32>,
    %c0_981 = arith.constant 0 : index
    %c2_982 = arith.constant 2 : index
    %c0_983 = arith.constant 0 : index
    %1212 = vector.load %arg12[%c0_981, %c2_982, %c0_983] : memref<2x3x32xf32, #tpu.memory_space<vmem>>, vector<2x1x32xf32>
    %1213 = vector.shape_cast %1212 : vector<2x1x32xf32> to vector<2x32xf32>
    %1214 = vector.shape_cast %1205 : vector<2x32xf32> to vector<2x1x32xf32>
    tpu.vector_store %arg12[%c0_981, %c2_982, %c0_983], %1214 {strides = array<i32>} : memref<2x3x32xf32, #tpu.memory_space<vmem>>, vector<2x1x32xf32>,
    %c0_984 = arith.constant 0 : index
    %c0_985 = arith.constant 0 : index
    %1215 = vector.load %arg13[%c0_984, %c0_985] : memref<16x32xf32, #tpu.memory_space<vmem>>, vector<16x32xf32>
    %c0_986 = arith.constant 0 : index
    %c0_987 = arith.constant 0 : index
    %1216 = vector.load %arg6[%c0_986, %c0_987] : memref<32x1xf32, #tpu.memory_space<vmem>>, vector<32x1xf32>
    %cst_988 = arith.constant dense<0.000000e+00> : vector<16x1xf32>
    %1217 = tpu.matmul %1215, %1216, %cst_988 {dimension_numbers = #tpu.dot_dimension_numbers<[1], [0], [0], [1], [0, 0, 1, 1], [], []>} : vector<16x32xf32>, vector<32x1xf32>, vector<16x1xf32> -> vector<16x1xf32>
    %c0_989 = arith.constant 0 : index
    %c0_990 = arith.constant 0 : index
    %1218 = memref.load %arg7[%c0_989, %c0_990] : memref<1x1xf32, #tpu.memory_space<smem>>
    %1219 = vector.broadcast %1218 : f32 to vector<16x1xf32>
    %1220 = arith.addf %1217, %1219 : vector<16x1xf32>
    %1221 = vector.extract_strided_slice %1220 {offsets = [0, 0], sizes = [2, 1], strides = [1, 1]} : vector<16x1xf32> to vector<2x1xf32>
    %c0_991 = arith.constant 0 : index
    %c0_992 = arith.constant 0 : index
    %1222 = vector.load %arg10[%c0_991, %c0_992] : memref<2x8xf32, #tpu.memory_space<vmem>>, vector<2x1xf32>
    tpu.vector_store %arg10[%c0_991, %c0_992], %1221 {strides = array<i32>} : memref<2x8xf32, #tpu.memory_space<vmem>>, vector<2x1xf32>,
    %1223 = vector.extract_strided_slice %1220 {offsets = [2, 0], sizes = [2, 1], strides = [1, 1]} : vector<16x1xf32> to vector<2x1xf32>
    %c0_993 = arith.constant 0 : index
    %c1_994 = arith.constant 1 : index
    %1224 = vector.load %arg10[%c0_993, %c1_994] : memref<2x8xf32, #tpu.memory_space<vmem>>, vector<2x1xf32>
    tpu.vector_store %arg10[%c0_993, %c1_994], %1223 {strides = array<i32>} : memref<2x8xf32, #tpu.memory_space<vmem>>, vector<2x1xf32>,
    %1225 = vector.extract_strided_slice %1220 {offsets = [4, 0], sizes = [2, 1], strides = [1, 1]} : vector<16x1xf32> to vector<2x1xf32>
    %c0_995 = arith.constant 0 : index
    %c2_996 = arith.constant 2 : index
    %1226 = vector.load %arg10[%c0_995, %c2_996] : memref<2x8xf32, #tpu.memory_space<vmem>>, vector<2x1xf32>
    tpu.vector_store %arg10[%c0_995, %c2_996], %1225 {strides = array<i32>} : memref<2x8xf32, #tpu.memory_space<vmem>>, vector<2x1xf32>,
    %1227 = vector.extract_strided_slice %1220 {offsets = [6, 0], sizes = [2, 1], strides = [1, 1]} : vector<16x1xf32> to vector<2x1xf32>
    %c0_997 = arith.constant 0 : index
    %c3_998 = arith.constant 3 : index
    %1228 = vector.load %arg10[%c0_997, %c3_998] : memref<2x8xf32, #tpu.memory_space<vmem>>, vector<2x1xf32>
    tpu.vector_store %arg10[%c0_997, %c3_998], %1227 {strides = array<i32>} : memref<2x8xf32, #tpu.memory_space<vmem>>, vector<2x1xf32>,
    %1229 = vector.extract_strided_slice %1220 {offsets = [8, 0], sizes = [2, 1], strides = [1, 1]} : vector<16x1xf32> to vector<2x1xf32>
    %c0_999 = arith.constant 0 : index
    %c4_1000 = arith.constant 4 : index
    %1230 = vector.load %arg10[%c0_999, %c4_1000] : memref<2x8xf32, #tpu.memory_space<vmem>>, vector<2x1xf32>
    tpu.vector_store %arg10[%c0_999, %c4_1000], %1229 {strides = array<i32>} : memref<2x8xf32, #tpu.memory_space<vmem>>, vector<2x1xf32>,
    %1231 = vector.extract_strided_slice %1220 {offsets = [10, 0], sizes = [2, 1], strides = [1, 1]} : vector<16x1xf32> to vector<2x1xf32>
    %c0_1001 = arith.constant 0 : index
    %c5 = arith.constant 5 : index
    %1232 = vector.load %arg10[%c0_1001, %c5] : memref<2x8xf32, #tpu.memory_space<vmem>>, vector<2x1xf32>
    tpu.vector_store %arg10[%c0_1001, %c5], %1231 {strides = array<i32>} : memref<2x8xf32, #tpu.memory_space<vmem>>, vector<2x1xf32>,
    %1233 = vector.extract_strided_slice %1220 {offsets = [12, 0], sizes = [2, 1], strides = [1, 1]} : vector<16x1xf32> to vector<2x1xf32>
    %c0_1002 = arith.constant 0 : index
    %c6_1003 = arith.constant 6 : index
    %1234 = vector.load %arg10[%c0_1002, %c6_1003] : memref<2x8xf32, #tpu.memory_space<vmem>>, vector<2x1xf32>
    tpu.vector_store %arg10[%c0_1002, %c6_1003], %1233 {strides = array<i32>} : memref<2x8xf32, #tpu.memory_space<vmem>>, vector<2x1xf32>,
    %1235 = vector.extract_strided_slice %1220 {offsets = [14, 0], sizes = [2, 1], strides = [1, 1]} : vector<16x1xf32> to vector<2x1xf32>
    %c0_1004 = arith.constant 0 : index
    %c7 = arith.constant 7 : index
    %1236 = vector.load %arg10[%c0_1004, %c7] : memref<2x8xf32, #tpu.memory_space<vmem>>, vector<2x1xf32>
    tpu.vector_store %arg10[%c0_1004, %c7], %1235 {strides = array<i32>} : memref<2x8xf32, #tpu.memory_space<vmem>>, vector<2x1xf32>,
    return
  }
}

</mosaic_0001>

<bundles_post_ra>
// kernel: autoreg_forward.1
= control target key start
LH: loop header
LB: loop body
LE: loop exit
PB: predicated region body
PF: predicated region fallthrough
CT: control target
= control target key end

     0   :  { %19 = vsyncpa [#allocation6], 0  ;;  %s6416_s0 = inlined_call_operand.vmem [shape: f32[16,1], index: 0, kind: input, shape index: {}]   ;;  %s6417_s1 = inlined_call_operand.vmem [shape: f32[1,32], index: 1, kind: input, shape index: {}]   ;;  %s6418_s2 = inlined_call_operand.vmem [shape: f32[1,32], index: 2, kind: input, shape index: {}]   ;;  %s6419_s3 = inlined_call_operand.hbm [shape: f32[3,32,128], index: 3, kind: input, shape index: {}]   ;;  %s6420_s4 = inlined_call_operand.hbm [shape: f32[3,4,32,32], index: 4, kind: input, shape index: {}]   ;;  %s6421_s5 = inlined_call_operand.vmem [shape: f32[3,1,128], index: 5, kind: input, shape index: {}]   ;;  %s6422_s6 = inlined_call_operand.vmem [shape: f32[32,1], index: 6, kind: input, shape index: {}]   ;;  %s6423_s7 = inlined_call_operand.<no memory space> [shape: f32[1,1], index: 7, kind: input, shape index: {}]   ;;  %s6424_s8 = inlined_call_operand.vmem [shape: f32[2,3,32], index: 8, kind: input, shape index: {}]   ;;  %s6425_s9 = inlined_call_operand.vmem [shape: f32[2,3,32], index: 9, kind: input, shape index: {}]   ;;  %s6426_s10 = inlined_call_operand.hbm [shape: f32[2,8], index: 10, kind: output, shape index: {0}]   ;;  %s6427_s11 = inlined_call_operand.vmem [shape: f32[2,3,32], index: 11, kind: output, shape index: {1}]   ;;  %s6428_s12 = inlined_call_operand.vmem [shape: f32[2,3,32], index: 12, kind: output, shape index: {2}]  }
   0x1   :  { %20 = vsyncpa [#allocation9], 0 }
   0x2   :  { %21 = vsyncpa [#allocation7], 0  ;;  %s32_s23 = sshll.u32 %s6419_s3, 4  ;;  %s5256_s24 = smov [#allocation5]   ;;  %s33_s23 = int_to_ptr.hbm [resolvable:$true] %s32_s23 }
   0x3   :  { %s34_s25 = sshll.u32 %s5256_s24, 4  ;;  %s45_s28 = sshll.u32 %s6420_s4, 4  ;;  %s35_s25 = int_to_ptr.vmem [resolvable:$true] %s34_s25  ;;  %s46_s28 = int_to_ptr.hbm [resolvable:$true] %s45_s28 }
   0x4   :  { %s5257_s29 = smov 128   ;;  %s5258_s30 = smov 8  }
   0x5   :  { %40 = dma.hbm_to_vmem [thread:$0]  %s33_s23, 1536, %s35_s25, [#allocation6], %s5257_s29, %s5257_s29, %s5258_s30  }
   0x6   :  { %s5259_s13 = smov [#allocation8]  }
   0x7   :  { %s47_s14 = sshll.u32 %s5259_s13, 4  ;;  %s48_s14 = int_to_ptr.vmem [resolvable:$true] %s47_s14 }
   0x8   :  { %53 = dma.hbm_to_vmem [thread:$0]  %s46_s28, 6144, %s48_s14, [#allocation9], %s5257_s29, %s5257_s29, %s5258_s30  }
   0x9   :  { %5250 = dma.done.wait [#allocation6], 1536  }
   0xa   :  { %5251 = vsyncadd [#allocation6], 4294965760 }
   0xb   :  { %5252 = dma.done.wait [#allocation9], 6144  }
   0xc   :  { %5253 = vsyncadd [#allocation9], 4294961152  ;;  %v5260_v0 = vmov 0   ;;  %v72_v1 = vld [vmem:[%s6416_s0] sm:$0xff]  ;;  %v104_v2 = vld [vmem:[#allocation5 + $0x18] sm:$0xff]  ;;  %vm180_vm0 = vcmask 1041409  }
   0xd   :  { %4787 = vset.pattern.permute.xlu0 %v5260_v0  ;;  %4788 = vset.pattern.permute.xlu2 %v5260_v0  ;;  %v103_v3 = vld [vmem:[#allocation5 + $0x10] sm:$0xff]  ;;  %v102_v4 = vld [vmem:[#allocation5 + $0x8] sm:$0xff]  ;;  %v101_v5 = vld [vmem:[#allocation5] sm:$0xff]  ;;  %vm96_vm1 = vcmask 261120   ;;  %s5261_s25 = smov 32   ;;  %s5262_s26 = smov 96  }
   0xe   :  { %77 = vperm.xlu0 %4787, %v72_v1   ;;  %127 = vmatpush.msra.mxu0 %v104_v2  ;;  %v5346_v6 = vld [vmem:[#allocation8 + $0x18] sm:$0xff]  ;;  %v5348_v7 = vld [vmem:[#allocation8 + $0x10] sm:$0xff]  ;;  %v5351_v8 = vld [vmem:[#allocation8 + $0x8] sm:$0xff]  ;;  %s5263_s27 = smov 64   ;;  %vm355_vm14 = vcmask 254976   ;;  %s5264_s14 = smov 3  }
   0xf   :  { %196 = vmatpush.msra.mxu1 %v5346_v6  ;;  %v170_v9 = vld [vmem:[%s6424_s8 + $0x4] sm:$0x1]  ;;  %376 = vmatpush.msra.mxu2 %v5346_v6  ;;  %v169_v10 = vld [vmem:[%s6424_s8] sm:$0x1]  ;;  %v5360_v12 = vld [vmem:[#allocation8 + $0x38] sm:$0xff]  ;;  %s5266_s3 = smov 1  }
  0x10   :  { %128 = vmatpush.msra.mxu0 %v103_v3  ;;  %v179_v11 = vrot.slane %v170_v9, 7  ;;  %v5362_v13 = vld [vmem:[#allocation8 + $0x30] sm:$0xff]  ;;  %221 = vmatpush.msra.mxu3 %v5360_v12  ;;  %v5366_v14 = vld [vmem:[#allocation8 + $0x58] sm:$0xff]  ;;  %v5368_v15 = vld [vmem:[#allocation8] sm:$0xff]  ;;  %s5267_s22 = smov 6   ;;  %s4574_s23 = sshll.u32 %s6426_s10, 4  ;;  %s4575_s23 = int_to_ptr.hbm [resolvable:$true] %s4574_s23 }
  0x11   :  { %197 = vmatpush.msra.mxu1 %v5348_v7  ;;  %v5370_v16 = vld [vmem:[#allocation8 + $0x28] sm:$0xff]  ;;  %377 = vmatpush.msra.mxu2 %v5348_v7  ;;  %v5377_v18 = vld [vmem:[#allocation8 + $0x50] sm:$0xff]  ;;  %v5379_v19 = vld [vmem:[#allocation8 + $0x20] sm:$0xff] }
  0x12   :  { %129 = vmatpush.msra.mxu0 %v102_v4  ;;  %v181_v17 = vsel %vm180_vm0, %v179_v11, %v169_v10  ;;  %222 = vmatpush.msra.mxu3 %v5362_v13  ;;  %v5381_v20 = vld [vmem:[#allocation8 + $0x78] sm:$0xff]  ;;  %v5387_v21 = vld [vmem:[#allocation8 + $0x48] sm:$0xff]  ;;  %v5390_v22 = vld [vmem:[#allocation8 + $0x70] sm:$0xff] }
  0x13   :  { %198 = vmatpush.msra.mxu1 %v5351_v8  ;;  %378 = vmatpush.msra.mxu2 %v5351_v8  ;;  %v5396_v23 = vld [vmem:[#allocation8 + $0x68] sm:$0xff]  ;;  %v5401_v24 = vld [vmem:[#allocation8 + $0x60] sm:$0xff]  ;;  %v4789_v25 = vld [vmem:[%s6417_s1] ss:$0 sm:$0xff]  ;;  %s5269_s1 = smov 4  }
  0x14   :  { %130 = vmatpush.msra.mxu0 %v101_v5  ;;  %223 = vmatpush.msra.mxu3 %v5370_v16  ;;  %v4790_v26 = vld [vmem:[%s6418_s2] ss:$0 sm:$0xff]  ;;  %v5428_v31 = vld [vmem:[#allocation8 + $0x40] sm:$0xff]  ;;  %v73_v35 = vld [vmem:[%s6416_s0 + $0x8] sm:$0xff]  ;;  %s5270_s2 = smov 7  }
  0x15   :  { %199 = vmatpush.msra.mxu1 %v5368_v15  ;;  %379 = vmatpush.msra.mxu2 %v5368_v15  ;;  %v5448_v32 = vld [vmem:[%s6421_s5] ss:$0 sm:$0xff]  ;;  %v172_v10 = vld [vmem:[%s6425_s9 + $0x4] sm:$0x1] }
  0x16   :  { %424 = vmatpush.msrb.mxu0 %v5366_v14  ;;  %4595 = vmatmul.msk.f32.vlgmr.msra.gmra.mxu1 %vm96_vm1, %v181_v17 }
  0x17   :  { %224 = vmatpush.msra.mxu3 %v5379_v19  ;;  %271 = vmatpush.msrb.mxu1 %v5381_v20 }
  0x18   :  { %425 = vmatpush.msrb.mxu0 %v5377_v18  ;;  %4596 = vmatmul.msk.f32.vlgmr.msra.gmra.mxu3 %vm96_vm1, %v181_v17 }
  0x19   :  { %246 = vmatpush.msrb.mxu3 %v5366_v14  ;;  %272 = vmatpush.msrb.mxu1 %v5390_v22 }
  0x1a   :  { %426 = vmatpush.msrb.mxu0 %v5387_v21  ;;  %547 = vmatpush.msrb.mxu2 %v5346_v6 }
  0x1b   :  { %247 = vmatpush.msrb.mxu3 %v5377_v18  ;;  %273 = vmatpush.msrb.mxu1 %v5396_v23 }
  0x1c   :  { %548 = vmatpush.msrb.mxu2 %v5348_v7  ;;  %427 = vmatpush.msrb.mxu0 %v5428_v31 }
  0x1d   :  { %248 = vmatpush.msrb.mxu3 %v5387_v21  ;;  %274 = vmatpush.msrb.mxu1 %v5401_v24 }
  0x1e   :  { %4598 = vmatmul.msk.f32.vlgmr.msrb.gmra.mxu1 %vm96_vm1, %v181_v17  ;;  %549 = vmatpush.msrb.mxu2 %v5351_v8 }
  0x1f   :  { %448 = vmatpush.msra.mxu1 %v5381_v20  ;;  %249 = vmatpush.msrb.mxu3 %v5428_v31 }
  0x20   :  { %550 = vmatpush.msrb.mxu2 %v5368_v15  ;;  %4597 = vmatmul.msk.f32.vlgmr.msrb.gmra.mxu3 %vm96_vm1, %v181_v17 }
  0x21   :  { %449 = vmatpush.msra.mxu1 %v5390_v22  ;;  %400 = vmatpush.msra.mxu3 %v5360_v12 }
  0x22   :  { %82 = vperm.xlu2 %4788, %v73_v35  }
  0x23   :  { %450 = vmatpush.msra.mxu1 %v5396_v23  ;;  %401 = vmatpush.msra.mxu3 %v5362_v13 }
  0x25   :  { %451 = vmatpush.msra.mxu1 %v5401_v24  ;;  %402 = vmatpush.msra.mxu3 %v5370_v16 }
  0x27   :  { %619 = vmatpush.msrb.mxu1 %v5381_v20  ;;  %403 = vmatpush.msra.mxu3 %v5379_v19 }
  0x29   :  { %620 = vmatpush.msrb.mxu1 %v5390_v22  ;;  %571 = vmatpush.msrb.mxu3 %v5360_v12 }
  0x2b   :  { %621 = vmatpush.msrb.mxu1 %v5396_v23  ;;  %572 = vmatpush.msrb.mxu3 %v5362_v13 }
  0x2d   :  { %622 = vmatpush.msrb.mxu1 %v5401_v24  ;;  %573 = vmatpush.msrb.mxu3 %v5370_v16 }
  0x2f   :  { %574 = vmatpush.msrb.mxu3 %v5379_v19 }
  0x7c   :  { %v83_v42 = vpop.permute.xlu2 %82 }
  0x7d   :  { %v89_v43 = vmul.f32 %v4789_v25, %v83_v42 }
  0x7f   :  { %v95_v45 = vadd.f32 %v4790_v26, %v89_v43 }
  0x80   :  { %v78_v27 = vpop.permute.xlu0 %77 }
  0x81   :  { %v88_v28 = vmul.f32 %v4789_v25, %v78_v27  ;;  %98 = vst.msk [vmem:[#allocation2 + $0x8] sm:$0xff] %vm96_vm1, %v95_v45 }
  0x83   :  { %v94_v29 = vadd.f32 %v4790_v26, %v88_v28  ;;  %v347_v28 = vrot.slane %v172_v10, 7 }
  0x85   :  { %97 = vst.msk [vmem:[#allocation2] sm:$0xff] %vm96_vm1, %v94_v29 }
  0x88   :  { %v100_v56 = vld [vmem:[#allocation2 + $0x8] sm:$0xff] }
  0x8c   :  { %v99_v30 = vld [vmem:[#allocation2] sm:$0xff] }
  0x8d   :  { %4593 = vmatmul.msk.f32.vlgmr.msra.gmra.mxu0 %vm96_vm1, %v99_v30  ;;  %v171_v30 = vld [vmem:[%s6425_s9] sm:$0x1] }
  0x8e   :  { %595 = vmatpush.msra.mxu0 %v5366_v14 }
  0x90   :  { %596 = vmatpush.msra.mxu0 %v5377_v18 }
  0x92   :  { %597 = vmatpush.msra.mxu0 %v5387_v21 }
  0x93   :  { %v201_v36 = vpop.f32.mrf.mxu1 }
  0x94   :  { %598 = vmatpush.msra.mxu0 %v5428_v31 }
  0x95   :  { %4594 = vmatmul.msk.f32.gmra.mxu0 %vm96_vm1, %v100_v56 }
  0x9b   :  { %v276_v46 = vpop.f32.mrf.mxu1  ;;  %v226_v48 = vpop.f32.mrf.mxu3 }
  0xa3   :  { %v251_v0 = vpop.f32.mrf.mxu3 }
 0x10a   :  { %v132_v33 = vpop.f32.mrf.mxu0 }
 0x10b   :  { %v133_v34 = vadd.f32 %v5448_v32, %v132_v33 }
 0x10d   :  { %138 = vst.msk [vmem:[#allocation3] sm:$0xff] %vm96_vm1, %v133_v34  ;;  %160 = vrot.lane.b32.xlu1 %v133_v34, %s5261_s25  ;;  %142 = vrot.lane.b32.xlu0 %v133_v34, %s5262_s26 }
 0x114   :  { %v279_v37 = vld [vmem:[#allocation3] sm:$0x3] }
 0x115   :  { %151 = vrot.lane.b32.xlu1 %v133_v34, %s5263_s27  ;;  %v280_v38 = vadd.f32 %v279_v37, %v201_v36 }
 0x117   :  { %v4599_v39 = vmul.f32 -1.442695, %v280_v38 }
 0x119   :  { %4794 = vpow2.f32 %v4599_v39 }
 0x11f   :  { %v4795_v44 = vpop.eup %4794 }
 0x120   :  { %v284_v47 = vadd.f32 1.0, %v4795_v44 }
 0x122   :  { %4796 = vrcp.f32 %v284_v47  ;;  %vm290_vm3 = vweird.f32 %v284_v47  ;;  %v296_v27 = vand.u32 2147483648, %v284_v47  ;;  %v294_v33 = vand.u32 2147483647, %v284_v47 }
 0x124   :  { %vm295_vm8 = vcmp.eq.f32.partialorder %v294_v33, 8.507059e+37 }
 0x128   :  { %v4797_v57 = vpop.eup %4796 }
 0x129   :  { %v286_v60 = vmul.f32 %v4797_v57, %v284_v47  ;;  %vm291_vm2 = vweird.f32 %v4797_v57 }
 0x12a   :  { %vm292_vm5 = vmor %vm290_vm3, %vm291_vm2 }
 0x12b   :  { %v287_v63 = vsub.f32 1.0, %v286_v60 }
 0x12d   :  { %v288_v4 = vmul.f32 %v4797_v57, %v287_v63 }
 0x12f   :  { %v289_v25 = vadd.f32 %v4797_v57, %v288_v4 }
 0x131   :  { %v293_v36 = vsel %vm292_vm5, %v4797_v57, %v289_v25  ;;  %v135_v57 = vpop.f32.mrf.mxu0 }
 0x17f   :  { %v161_v40 = vpop.permute.xlu1 %160  ;;  %v143_v41 = vpop.permute.xlu0 %142 }
 0x180   :  { %167 = vst.msk [vmem:[#allocation3 + $0x30] sm:$0xff] %vm96_vm1, %v161_v40  ;;  %v297_v40 = vor.u32 1.1754944e-38, %v296_v27 }
 0x181   :  { %149 = vst.msk [vmem:[#allocation3 + $0x10] sm:$0xff] %vm96_vm1, %v143_v41  ;;  %v348_v41 = vsel %vm180_vm0, %v347_v28, %v171_v30 }
 0x182   :  { %v298_v44 = vsel %vm295_vm8, %v297_v40, %v293_v36 }
 0x187   :  { %v324_v49 = vld [vmem:[#allocation3 + $0x30] sm:$0x3]  ;;  %v152_v50 = vpop.permute.xlu1 %151  ;;  %v501_v60 = vld [vmem:[#allocation3 + $0x32] sm:$0x3] }
 0x188   :  { %v300_v51 = vld [vmem:[#allocation3 + $0x10] sm:$0x3]  ;;  %v325_v52 = vadd.f32 %v324_v49, %v276_v46  ;;  %158 = vst.msk [vmem:[#allocation3 + $0x20] sm:$0xff] %vm96_vm1, %v152_v50 }
 0x189   :  { %v301_v53 = vadd.f32 %v300_v51, %v226_v48 }
 0x18a   :  { %v4601_v54 = vmul.f32 -1.442695, %v325_v52 }
 0x18b   :  { %v4600_v55 = vmul.f32 -1.442695, %v301_v53 }
 0x18c   :  { %4798 = vpow2.f32 %v4601_v54 }
 0x18d   :  { %4800 = vpow2.f32 %v4600_v55 }
 0x18f   :  { %v321_v1 = vld [vmem:[#allocation3 + $0x20] sm:$0x3] }
 0x190   :  { %v322_v2 = vadd.f32 %v321_v1, %v251_v0  ;;  %v456_v0 = vld [vmem:[#allocation3 + $0x2] sm:$0x3] }
 0x192   :  { %v4799_v58 = vpop.eup %4798 }
 0x193   :  { %v4801_v59 = vpop.eup %4800  ;;  %v329_v61 = vadd.f32 1.0, %v4799_v58  ;;  %v136_v58 = vadd.f32 %v5448_v32, %v135_v57 }
 0x194   :  { %v305_v62 = vadd.f32 1.0, %v4801_v59 }
 0x195   :  { %4802 = vrcp.f32 %v329_v61  ;;  %v341_v50 = vand.u32 2147483648, %v329_v61  ;;  %vm335_vm11 = vweird.f32 %v329_v61  ;;  %v339_v51 = vand.u32 2147483647, %v329_v61  ;;  %139 = vst.msk [vmem:[#allocation3 + $0x8] sm:$0xff] %vm96_vm1, %v136_v58  ;;  %144 = vrot.lane.b32.xlu2 %v136_v58, %s5262_s26  ;;  %153 = vrot.lane.b32.xlu1 %v136_v58, %s5263_s27 }
 0x196   :  { %4804 = vrcp.f32 %v305_v62  ;;  %v317_v26 = vand.u32 2147483648, %v305_v62  ;;  %v315_v34 = vand.u32 2147483647, %v305_v62  ;;  %vm311_vm6 = vweird.f32 %v305_v62  ;;  %162 = vrot.lane.b32.xlu0 %v136_v58, %s5261_s25 }
 0x197   :  { %4806 = vtanh.f32 %v322_v2  ;;  %v342_v53 = vor.u32 1.1754944e-38, %v341_v50  ;;  %vm340_vm13 = vcmp.eq.f32.partialorder %v339_v51, 8.507059e+37  ;;  %v477_v2 = vld [vmem:[#allocation3 + $0x12] sm:$0x3] }
 0x198   :  { %v318_v39 = vor.u32 1.1754944e-38, %v317_v26  ;;  %vm316_vm9 = vcmp.eq.f32.partialorder %v315_v34, 8.507059e+37 }
 0x19b   :  { %v4803_v3 = vpop.eup %4802 }
 0x19c   :  { %v4805_v5 = vpop.eup %4804  ;;  %v331_v11 = vmul.f32 %v4803_v3, %v329_v61  ;;  %vm336_vm10 = vweird.f32 %v4803_v3 }
 0x19d   :  { %v307_v9 = vmul.f32 %v4805_v5, %v305_v62  ;;  %vm312_vm4 = vweird.f32 %v4805_v5  ;;  %v4807_v38 = vpop.eup %4806  ;;  %vm337_vm12 = vmor %vm335_vm11, %vm336_vm10 }
 0x19e   :  { %v332_v35 = vsub.f32 1.0, %v331_v11  ;;  %vm313_vm7 = vmor %vm311_vm6, %vm312_vm4  ;;  %v351_v47 = vmul.f32 %v4807_v38, %v298_v44 }
 0x19f   :  { %v308_v17 = vsub.f32 1.0, %v307_v9 }
 0x1a0   :  { %v333_v43 = vmul.f32 %v4803_v3, %v332_v35 }
 0x1a1   :  { %v309_v29 = vmul.f32 %v4805_v5, %v308_v17 }
 0x1a2   :  { %v334_v49 = vadd.f32 %v4803_v3, %v333_v43 }
 0x1a3   :  { %v310_v37 = vadd.f32 %v4805_v5, %v309_v29  ;;  %v498_v29 = vld [vmem:[#allocation3 + $0x22] sm:$0x3] }
 0x1a4   :  { %v338_v52 = vsel %vm337_vm12, %v4803_v3, %v334_v49 }
 0x1a5   :  { %v314_v42 = vsel %vm313_vm7, %v4805_v5, %v310_v37  ;;  %v343_v55 = vsel %vm340_vm13, %v342_v53, %v338_v52 }
 0x1a6   :  { %v319_v45 = vsel %vm316_vm9, %v318_v39, %v314_v42 }
 0x1a7   :  { %v350_v46 = vmul.f32 %v348_v41, %v319_v45 }
 0x1a9   :  { %v5470_v48 = vadd.f32 %v351_v47, %v350_v46 }
 0x1ab   :  { %4808 = vtanh.f32 %v5470_v48 }
 0x1b1   :  { %v4809_v54 = vpop.eup %4808 }
 0x1b2   :  { %v354_v56 = vmul.f32 %v4809_v54, %v343_v55 }
 0x1b4   :  { %356 = vst.msk [vmem:[#allocation2] sm:$0x3] %vm355_vm14, %v354_v56  ;;  %4602 = vmatmul.msk.f32.vlgmr.msra.gmra.mxu2 %vm96_vm1, %v354_v56  ;;  %4603 = vmatmul.msk.f32.vlgmr.msra.gmra.mxu3 %vm96_vm1, %v354_v56 }
 0x1b5   :  { %4604 = vmatmul.msk.f32.vlgmr.msrb.gmra.mxu0 %vm96_vm1, %v354_v56  ;;  %4605 = vmatmul.msk.f32.vlgmr.msra.gmra.mxu1 %vm96_vm1, %v354_v56 }
 0x1b6   :  { %718 = vmatpush.msra.mxu2 %v5346_v6  ;;  %742 = vmatpush.msra.mxu3 %v5360_v12 }
 0x1b7   :  { %766 = vmatpush.msrb.mxu0 %v5366_v14  ;;  %790 = vmatpush.msra.mxu1 %v5381_v20 }
 0x1b8   :  { %719 = vmatpush.msra.mxu2 %v5348_v7  ;;  %743 = vmatpush.msra.mxu3 %v5362_v13 }
 0x1b9   :  { %767 = vmatpush.msrb.mxu0 %v5377_v18  ;;  %791 = vmatpush.msra.mxu1 %v5390_v22 }
 0x1ba   :  { %720 = vmatpush.msra.mxu2 %v5351_v8  ;;  %744 = vmatpush.msra.mxu3 %v5370_v16 }
 0x1bb   :  { %768 = vmatpush.msrb.mxu0 %v5387_v21  ;;  %792 = vmatpush.msra.mxu1 %v5396_v23 }
 0x1bc   :  { %721 = vmatpush.msra.mxu2 %v5368_v15  ;;  %745 = vmatpush.msra.mxu3 %v5379_v19 }
 0x1bd   :  { %769 = vmatpush.msrb.mxu0 %v5428_v31  ;;  %793 = vmatpush.msra.mxu1 %v5401_v24 }
 0x232   :  { %v453_v59 = vpop.f32.mrf.mxu1  ;;  %v429_v27 = vpop.f32.mrf.mxu0 }
 0x233   :  { %v502_v61 = vadd.f32 %v501_v60, %v453_v59  ;;  %v499_v33 = vadd.f32 %v498_v29, %v429_v27 }
 0x235   :  { %v4608_v62 = vmul.f32 -1.442695, %v502_v61 }
 0x237   :  { %4810 = vpow2.f32 %v4608_v62  ;;  %v381_v63 = vpop.f32.mrf.mxu2  ;;  %v405_v1 = vpop.f32.mrf.mxu3 }
 0x238   :  { %v457_v3 = vadd.f32 %v456_v0, %v381_v63  ;;  %v478_v4 = vadd.f32 %v477_v2, %v405_v1 }
 0x23a   :  { %v4606_v32 = vmul.f32 -1.442695, %v457_v3  ;;  %v4607_v5 = vmul.f32 -1.442695, %v478_v4 }
 0x23c   :  { %4812 = vpow2.f32 %v4606_v32 }
 0x23d   :  { %v4811_v9 = vpop.eup %4810  ;;  %4814 = vpow2.f32 %v4607_v5 }
 0x23e   :  { %v506_v10 = vadd.f32 1.0, %v4811_v9 }
 0x240   :  { %4816 = vrcp.f32 %v506_v10  ;;  %v518_v62 = vand.u32 2147483648, %v506_v10  ;;  %vm512_vm10 = vweird.f32 %v506_v10  ;;  %v516_v63 = vand.u32 2147483647, %v506_v10 }
 0x242   :  { %v4813_v11 = vpop.eup %4812  ;;  %v519_v1 = vor.u32 1.1754944e-38, %v518_v62  ;;  %vm517_vm12 = vcmp.eq.f32.partialorder %v516_v63, 8.507059e+37 }
 0x243   :  { %v4815_v17 = vpop.eup %4814  ;;  %v461_v25 = vadd.f32 1.0, %v4813_v11 }
 0x244   :  { %v482_v26 = vadd.f32 1.0, %v4815_v17 }
 0x245   :  { %4818 = vrcp.f32 %v461_v25  ;;  %v473_v39 = vand.u32 2147483648, %v461_v25  ;;  %v471_v42 = vand.u32 2147483647, %v461_v25  ;;  %vm467_vm3 = vweird.f32 %v461_v25 }
 0x246   :  { %4820 = vrcp.f32 %v482_v26  ;;  %v4817_v28 = vpop.eup %4816  ;;  %v494_v43 = vand.u32 2147483648, %v482_v26  ;;  %v492_v45 = vand.u32 2147483647, %v482_v26  ;;  %vm488_vm5 = vweird.f32 %v482_v26 }
 0x247   :  { %v508_v37 = vmul.f32 %v4817_v28, %v506_v10  ;;  %4822 = vtanh.f32 %v499_v33  ;;  %v474_v49 = vor.u32 1.1754944e-38, %v473_v39  ;;  %vm472_vm6 = vcmp.eq.f32.partialorder %v471_v42, 8.507059e+37 }
 0x248   :  { %v495_v52 = vor.u32 1.1754944e-38, %v494_v43  ;;  %vm493_vm8 = vcmp.eq.f32.partialorder %v492_v45, 8.507059e+37  ;;  %vm513_vm9 = vweird.f32 %v4817_v28 }
 0x249   :  { %v509_v46 = vsub.f32 1.0, %v508_v37  ;;  %vm514_vm11 = vmor %vm512_vm10, %vm513_vm9 }
 0x24b   :  { %v4819_v30 = vpop.eup %4818  ;;  %v510_v56 = vmul.f32 %v4817_v28, %v509_v46 }
 0x24c   :  { %v4821_v34 = vpop.eup %4820  ;;  %v463_v35 = vmul.f32 %v4819_v30, %v461_v25  ;;  %vm468_vm15 = vweird.f32 %v4819_v30  ;;  %v669_v25 = vld [vmem:[#allocation3 + $0x24] sm:$0x3] }
 0x24d   :  { %v484_v36 = vmul.f32 %v4821_v34, %v482_v26  ;;  %vm489_vm2 = vweird.f32 %v4821_v34  ;;  %vm469_vm4 = vmor %vm467_vm3, %vm468_vm15  ;;  %v4823_v53 = vpop.eup %4822  ;;  %v511_v61 = vadd.f32 %v4817_v28, %v510_v56 }
 0x24e   :  { %v464_v38 = vsub.f32 1.0, %v463_v35  ;;  %vm490_vm7 = vmor %vm488_vm5, %vm489_vm2 }
 0x24f   :  { %v485_v40 = vsub.f32 1.0, %v484_v36  ;;  %v515_v0 = vsel %vm514_vm11, %v4817_v28, %v511_v61 }
 0x250   :  { %v465_v41 = vmul.f32 %v4819_v30, %v464_v38  ;;  %v520_v3 = vsel %vm517_vm12, %v519_v1, %v515_v0 }
 0x251   :  { %v486_v44 = vmul.f32 %v4821_v34, %v485_v40 }
 0x252   :  { %v466_v47 = vadd.f32 %v4819_v30, %v465_v41 }
 0x253   :  { %v487_v50 = vadd.f32 %v4821_v34, %v486_v44 }
 0x254   :  { %v470_v51 = vsel %vm469_vm4, %v4819_v30, %v466_v47 }
 0x255   :  { %v475_v54 = vsel %vm472_vm6, %v474_v49, %v470_v51  ;;  %v491_v55 = vsel %vm490_vm7, %v4821_v34, %v487_v50 }
 0x256   :  { %v523_v57 = vmul.f32 %v4823_v53, %v475_v54  ;;  %v496_v58 = vsel %vm493_vm8, %v495_v52, %v491_v55 }
 0x257   :  { %v522_v59 = vmul.f32 %v496_v58, %v5470_v48  ;;  %v145_v48 = vpop.permute.xlu2 %144 }
 0x258   :  { %150 = vst.msk [vmem:[#allocation3 + $0x18] sm:$0xff] %vm96_vm1, %v145_v48 }
 0x259   :  { %v5500_v60 = vadd.f32 %v523_v57, %v522_v59 }
 0x25b   :  { %4824 = vtanh.f32 %v5500_v60 }
 0x261   :  { %v4825_v2 = vpop.eup %4824 }
 0x262   :  { %v526_v4 = vmul.f32 %v4825_v2, %v520_v3  ;;  %v843_v2 = vld [vmem:[#allocation3 + $0x36] sm:$0x3] }
 0x264   :  { %527 = vst.msk [vmem:[#allocation2 + $0x2] sm:$0x3] %vm355_vm14, %v526_v4  ;;  %4609 = vmatmul.msk.f32.vlgmr.msrb.gmra.mxu2 %vm96_vm1, %v526_v4  ;;  %4610 = vmatmul.msk.f32.vlgmr.msrb.gmra.mxu3 %vm96_vm1, %v526_v4 }
 0x265   :  { %4611 = vmatmul.msk.f32.vlgmr.msra.gmra.mxu0 %vm96_vm1, %v526_v4  ;;  %4612 = vmatmul.msk.f32.vlgmr.msrb.gmra.mxu1 %vm96_vm1, %v526_v4 }
 0x266   :  { %889 = vmatpush.msrb.mxu2 %v5346_v6  ;;  %913 = vmatpush.msrb.mxu3 %v5360_v12  ;;  %v154_v6 = vpop.permute.xlu1 %153  ;;  %v672_v12 = vld [vmem:[#allocation3 + $0x34] sm:$0x3] }
 0x267   :  { %937 = vmatpush.msra.mxu0 %v5366_v14  ;;  %961 = vmatpush.msrb.mxu1 %v5381_v20  ;;  %159 = vst.msk [vmem:[#allocation3 + $0x28] sm:$0xff] %vm96_vm1, %v154_v6  ;;  %v648_v20 = vld [vmem:[#allocation3 + $0x14] sm:$0x3]  ;;  %v798_v6 = vld [vmem:[#allocation3 + $0x6] sm:$0x3] }
 0x268   :  { %890 = vmatpush.msrb.mxu2 %v5348_v7  ;;  %914 = vmatpush.msrb.mxu3 %v5362_v13  ;;  %v163_v7 = vpop.permute.xlu0 %162 }
 0x269   :  { %938 = vmatpush.msra.mxu0 %v5377_v18  ;;  %962 = vmatpush.msrb.mxu1 %v5390_v22  ;;  %168 = vst.msk [vmem:[#allocation3 + $0x38] sm:$0xff] %vm96_vm1, %v163_v7  ;;  %v627_v18 = vld [vmem:[#allocation3 + $0x4] sm:$0x3] }
 0x26a   :  { %891 = vmatpush.msrb.mxu2 %v5351_v8  ;;  %915 = vmatpush.msrb.mxu3 %v5370_v16 }
 0x26b   :  { %939 = vmatpush.msra.mxu0 %v5387_v21  ;;  %963 = vmatpush.msrb.mxu1 %v5396_v23 }
 0x26c   :  { %892 = vmatpush.msrb.mxu2 %v5368_v15  ;;  %916 = vmatpush.msrb.mxu3 %v5379_v19 }
 0x26d   :  { %940 = vmatpush.msra.mxu0 %v5428_v31  ;;  %964 = vmatpush.msrb.mxu1 %v5401_v24 }
 0x2e2   :  { %v624_v8 = vpop.f32.mrf.mxu1  ;;  %v600_v11 = vpop.f32.mrf.mxu0 }
 0x2e3   :  { %v673_v13 = vadd.f32 %v672_v12, %v624_v8  ;;  %v670_v27 = vadd.f32 %v669_v25, %v600_v11  ;;  %v819_v8 = vld [vmem:[#allocation3 + $0x16] sm:$0x3] }
 0x2e5   :  { %v4615_v14 = vmul.f32 -1.442695, %v673_v13 }
 0x2e7   :  { %4826 = vpow2.f32 %v4615_v14  ;;  %v552_v16 = vpop.f32.mrf.mxu2  ;;  %v576_v15 = vpop.f32.mrf.mxu3 }
 0x2e8   :  { %v628_v19 = vadd.f32 %v627_v18, %v552_v16  ;;  %v649_v21 = vadd.f32 %v648_v20, %v576_v15 }
 0x2ea   :  { %v4613_v22 = vmul.f32 -1.442695, %v628_v19  ;;  %v4614_v23 = vmul.f32 -1.442695, %v649_v21 }
 0x2ec   :  { %4828 = vpow2.f32 %v4613_v22 }
 0x2ed   :  { %v4827_v24 = vpop.eup %4826  ;;  %4830 = vpow2.f32 %v4614_v23 }
 0x2ee   :  { %v677_v31 = vadd.f32 1.0, %v4827_v24 }
 0x2f0   :  { %4832 = vrcp.f32 %v677_v31  ;;  %v689_v58 = vand.u32 2147483648, %v677_v31  ;;  %vm683_vm9 = vweird.f32 %v677_v31  ;;  %v687_v59 = vand.u32 2147483647, %v677_v31 }
 0x2f2   :  { %v4829_v32 = vpop.eup %4828  ;;  %v690_v62 = vor.u32 1.1754944e-38, %v689_v58  ;;  %vm688_vm11 = vcmp.eq.f32.partialorder %v687_v59, 8.507059e+37  ;;  %v1014_v59 = vld [vmem:[#allocation3 + $0x38] sm:$0x3] }
 0x2f3   :  { %v4831_v5 = vpop.eup %4830  ;;  %v632_v9 = vadd.f32 1.0, %v4829_v32 }
 0x2f4   :  { %v653_v10 = vadd.f32 1.0, %v4831_v5 }
 0x2f5   :  { %4834 = vrcp.f32 %v632_v9  ;;  %v644_v35 = vand.u32 2147483648, %v632_v9  ;;  %v642_v38 = vand.u32 2147483647, %v632_v9  ;;  %vm638_vm2 = vweird.f32 %v632_v9 }
 0x2f6   :  { %4836 = vrcp.f32 %v653_v10  ;;  %v4833_v17 = vpop.eup %4832  ;;  %v665_v39 = vand.u32 2147483648, %v653_v10  ;;  %v663_v41 = vand.u32 2147483647, %v653_v10  ;;  %vm659_vm4 = vweird.f32 %v653_v10 }
 0x2f7   :  { %v679_v33 = vmul.f32 %v4833_v17, %v677_v31  ;;  %4838 = vtanh.f32 %v670_v27  ;;  %v645_v44 = vor.u32 1.1754944e-38, %v644_v35  ;;  %vm643_vm5 = vcmp.eq.f32.partialorder %v642_v38, 8.507059e+37  ;;  %v840_v31 = vld [vmem:[#allocation3 + $0x26] sm:$0x3] }
 0x2f8   :  { %v666_v47 = vor.u32 1.1754944e-38, %v665_v39  ;;  %vm664_vm7 = vcmp.eq.f32.partialorder %v663_v41, 8.507059e+37  ;;  %vm684_vm8 = vweird.f32 %v4833_v17 }
 0x2f9   :  { %v680_v42 = vsub.f32 1.0, %v679_v33  ;;  %vm685_vm10 = vmor %vm683_vm9, %vm684_vm8 }
 0x2fb   :  { %v4835_v26 = vpop.eup %4834  ;;  %v681_v52 = vmul.f32 %v4833_v17, %v680_v42 }
 0x2fc   :  { %v4837_v28 = vpop.eup %4836  ;;  %v634_v29 = vmul.f32 %v4835_v26, %v632_v9  ;;  %vm639_vm13 = vweird.f32 %v4835_v26 }
 0x2fd   :  { %v655_v30 = vmul.f32 %v4837_v28, %v653_v10  ;;  %vm660_vm15 = vweird.f32 %v4837_v28  ;;  %vm640_vm3 = vmor %vm638_vm2, %vm639_vm13  ;;  %v4839_v49 = vpop.eup %4838  ;;  %v682_v57 = vadd.f32 %v4833_v17, %v681_v52 }
 0x2fe   :  { %v635_v34 = vsub.f32 1.0, %v634_v29  ;;  %vm661_vm6 = vmor %vm659_vm4, %vm660_vm15 }
 0x2ff   :  { %v656_v36 = vsub.f32 1.0, %v655_v30  ;;  %v686_v61 = vsel %vm685_vm10, %v4833_v17, %v682_v57 }
 0x300   :  { %v636_v37 = vmul.f32 %v4835_v26, %v635_v34  ;;  %v691_v0 = vsel %vm688_vm11, %v690_v62, %v686_v61 }
 0x301   :  { %v657_v40 = vmul.f32 %v4837_v28, %v656_v36 }
 0x302   :  { %v637_v43 = vadd.f32 %v4835_v26, %v636_v37 }
 0x303   :  { %v658_v45 = vadd.f32 %v4837_v28, %v657_v40 }
 0x304   :  { %v641_v46 = vsel %vm640_vm3, %v4835_v26, %v637_v43 }
 0x305   :  { %v646_v50 = vsel %vm643_vm5, %v645_v44, %v641_v46  ;;  %v662_v51 = vsel %vm661_vm6, %v4837_v28, %v658_v45 }
 0x306   :  { %v694_v53 = vmul.f32 %v4839_v49, %v646_v50  ;;  %v667_v54 = vsel %vm664_vm7, %v666_v47, %v662_v51 }
 0x307   :  { %v693_v55 = vmul.f32 %v667_v54, %v5500_v60 }
 0x309   :  { %v5528_v56 = vadd.f32 %v694_v53, %v693_v55 }
 0x30b   :  { %4840 = vtanh.f32 %v5528_v56 }
 0x311   :  { %v4841_v63 = vpop.eup %4840 }
 0x312   :  { %v697_v1 = vmul.f32 %v4841_v63, %v691_v0  ;;  %v969_v63 = vld [vmem:[#allocation3 + $0x8] sm:$0x3]  ;;  %v990_v0 = vld [vmem:[#allocation3 + $0x18] sm:$0x3] }
 0x314   :  { %698 = vst.msk [vmem:[#allocation2 + $0x4] sm:$0x3] %vm355_vm14, %v697_v1  ;;  %4616 = vmatmul.msk.f32.vlgmr.msra.gmra.mxu2 %vm96_vm1, %v697_v1  ;;  %4617 = vmatmul.msk.f32.vlgmr.msra.gmra.mxu3 %vm96_vm1, %v697_v1 }
 0x315   :  { %4618 = vmatmul.msk.f32.vlgmr.msrb.gmra.mxu0 %vm96_vm1, %v697_v1  ;;  %4619 = vmatmul.msk.f32.vlgmr.msra.gmra.mxu1 %vm96_vm1, %v697_v1 }
 0x392   :  { %v795_v60 = vpop.f32.mrf.mxu1  ;;  %v771_v23 = vpop.f32.mrf.mxu0 }
 0x393   :  { %v844_v3 = vadd.f32 %v843_v2, %v795_v60  ;;  %v841_v5 = vadd.f32 %v840_v31, %v771_v23  ;;  %v5545_v2 = vld [vmem:[#allocation8 + $0x18] sm:$0xff]  ;;  %v5579_v23 = vld [vmem:[#allocation8 + $0x20] sm:$0xff] }
 0x394   :  { %1060 = vmatpush.msra.mxu2 %v5545_v2  ;;  %v5585_v31 = vld [vmem:[#allocation8 + $0x60] sm:$0xff] }
 0x395   :  { %v4622_v4 = vmul.f32 -1.442695, %v844_v3  ;;  %v5547_v3 = vld [vmem:[#allocation8 + $0x38] sm:$0xff] }
 0x396   :  { %1084 = vmatpush.msra.mxu3 %v5547_v3 }
 0x397   :  { %4842 = vpow2.f32 %v4622_v4  ;;  %v723_v48 = vpop.f32.mrf.mxu2  ;;  %v747_v7 = vpop.f32.mrf.mxu3  ;;  %v5549_v4 = vld [vmem:[#allocation8 + $0x58] sm:$0xff] }
 0x398   :  { %v799_v12 = vadd.f32 %v798_v6, %v723_v48  ;;  %v820_v13 = vadd.f32 %v819_v8, %v747_v7  ;;  %v5553_v7 = vld [vmem:[#allocation8 + $0x78] sm:$0xff]  ;;  %v5555_v8 = vld [vmem:[#allocation8 + $0x10] sm:$0xff]  ;;  %1108 = vmatpush.msrb.mxu0 %v5549_v4 }
 0x399   :  { %1132 = vmatpush.msra.mxu1 %v5553_v7  ;;  %1061 = vmatpush.msra.mxu2 %v5555_v8 }
 0x39a   :  { %v4620_v14 = vmul.f32 -1.442695, %v799_v12  ;;  %v4621_v16 = vmul.f32 -1.442695, %v820_v13  ;;  %v5557_v12 = vld [vmem:[#allocation8 + $0x30] sm:$0xff] }
 0x39b   :  { %v5561_v13 = vld [vmem:[#allocation8 + $0x50] sm:$0xff]  ;;  %1085 = vmatpush.msra.mxu3 %v5557_v12 }
 0x39c   :  { %4844 = vpow2.f32 %v4620_v14  ;;  %v5563_v14 = vld [vmem:[#allocation8 + $0x70] sm:$0xff]  ;;  %1109 = vmatpush.msrb.mxu0 %v5561_v13 }
 0x39d   :  { %v4843_v18 = vpop.eup %4842  ;;  %4846 = vpow2.f32 %v4621_v16  ;;  %v5565_v16 = vld [vmem:[#allocation8 + $0x8] sm:$0xff]  ;;  %1133 = vmatpush.msra.mxu1 %v5563_v14 }
 0x39e   :  { %v848_v15 = vadd.f32 1.0, %v4843_v18  ;;  %1062 = vmatpush.msra.mxu2 %v5565_v16 }
 0x3a0   :  { %4848 = vrcp.f32 %v848_v15  ;;  %v860_v51 = vand.u32 2147483648, %v848_v15  ;;  %vm854_vm8 = vweird.f32 %v848_v15  ;;  %v858_v52 = vand.u32 2147483647, %v848_v15 }
 0x3a2   :  { %v4845_v20 = vpop.eup %4844  ;;  %v861_v54 = vor.u32 1.1754944e-38, %v860_v51  ;;  %vm859_vm10 = vcmp.eq.f32.partialorder %v858_v52, 8.507059e+37 }
 0x3a3   :  { %v4847_v19 = vpop.eup %4846  ;;  %v803_v21 = vadd.f32 1.0, %v4845_v20  ;;  %v5569_v20 = vld [vmem:[#allocation8 + $0x28] sm:$0xff] }
 0x3a4   :  { %v824_v22 = vadd.f32 1.0, %v4847_v19  ;;  %v5571_v19 = vld [vmem:[#allocation8 + $0x48] sm:$0xff]  ;;  %1086 = vmatpush.msra.mxu3 %v5569_v20 }
 0x3a5   :  { %4850 = vrcp.f32 %v803_v21  ;;  %v815_v26 = vand.u32 2147483648, %v803_v21  ;;  %v813_v29 = vand.u32 2147483647, %v803_v21  ;;  %vm809_vm15 = vweird.f32 %v803_v21  ;;  %1110 = vmatpush.msrb.mxu0 %v5571_v19 }
 0x3a6   :  { %4852 = vrcp.f32 %v824_v22  ;;  %v4849_v24 = vpop.eup %4848  ;;  %v836_v30 = vand.u32 2147483648, %v824_v22  ;;  %v834_v34 = vand.u32 2147483647, %v824_v22  ;;  %vm830_vm3 = vweird.f32 %v824_v22  ;;  %1087 = vmatpush.msra.mxu3 %v5579_v23 }
 0x3a7   :  { %v850_v17 = vmul.f32 %v4849_v24, %v848_v15  ;;  %4854 = vtanh.f32 %v841_v5  ;;  %v816_v37 = vor.u32 1.1754944e-38, %v815_v26  ;;  %vm814_vm4 = vcmp.eq.f32.partialorder %v813_v29, 8.507059e+37 }
 0x3a8   :  { %v837_v40 = vor.u32 1.1754944e-38, %v836_v30  ;;  %vm835_vm6 = vcmp.eq.f32.partialorder %v834_v34, 8.507059e+37  ;;  %vm855_vm7 = vweird.f32 %v4849_v24 }
 0x3a9   :  { %v851_v35 = vsub.f32 1.0, %v850_v17  ;;  %vm856_vm9 = vmor %vm854_vm8, %vm855_vm7 }
 0x3ab   :  { %v4851_v32 = vpop.eup %4850  ;;  %v852_v44 = vmul.f32 %v4849_v24, %v851_v35 }
 0x3ac   :  { %v4853_v9 = vpop.eup %4852  ;;  %v805_v10 = vmul.f32 %v4851_v32, %v803_v21  ;;  %vm810_vm12 = vweird.f32 %v4851_v32  ;;  %v5575_v21 = vld [vmem:[#allocation8 + $0x68] sm:$0xff] }
 0x3ad   :  { %v826_v11 = vmul.f32 %v4853_v9, %v824_v22  ;;  %vm831_vm13 = vweird.f32 %v4853_v9  ;;  %vm811_vm2 = vmor %vm809_vm15, %vm810_vm12  ;;  %v4855_v41 = vpop.eup %4854  ;;  %v853_v50 = vadd.f32 %v4849_v24, %v852_v44  ;;  %v5577_v22 = vld [vmem:[#allocation8] sm:$0xff]  ;;  %1134 = vmatpush.msra.mxu1 %v5575_v21 }
 0x3ae   :  { %v806_v25 = vsub.f32 1.0, %v805_v10  ;;  %vm832_vm5 = vmor %vm830_vm3, %vm831_vm13  ;;  %1063 = vmatpush.msra.mxu2 %v5577_v22 }
 0x3af   :  { %v827_v27 = vsub.f32 1.0, %v826_v11  ;;  %v857_v53 = vsel %vm856_vm9, %v4849_v24, %v853_v50  ;;  %v5583_v24 = vld [vmem:[#allocation8 + $0x40] sm:$0xff]  ;;  %1135 = vmatpush.msra.mxu1 %v5585_v31 }
 0x3b0   :  { %v807_v28 = vmul.f32 %v4851_v32, %v806_v25  ;;  %v862_v57 = vsel %vm859_vm10, %v861_v54, %v857_v53  ;;  %1111 = vmatpush.msrb.mxu0 %v5583_v24 }
 0x3b1   :  { %v828_v33 = vmul.f32 %v4853_v9, %v827_v27  ;;  %v1011_v27 = vld [vmem:[#allocation3 + $0x28] sm:$0x3] }
 0x3b2   :  { %v808_v36 = vadd.f32 %v4851_v32, %v807_v28 }
 0x3b3   :  { %v829_v38 = vadd.f32 %v4853_v9, %v828_v33 }
 0x3b4   :  { %v812_v39 = vsel %vm811_vm2, %v4851_v32, %v808_v36 }
 0x3b5   :  { %v817_v42 = vsel %vm814_vm4, %v816_v37, %v812_v39  ;;  %v833_v43 = vsel %vm832_vm5, %v4853_v9, %v829_v38 }
 0x3b6   :  { %v865_v45 = vmul.f32 %v4855_v41, %v817_v42  ;;  %v838_v46 = vsel %vm835_vm6, %v837_v40, %v833_v43 }
 0x3b7   :  { %v864_v47 = vmul.f32 %v838_v46, %v5528_v56 }
 0x3b9   :  { %v5537_v49 = vadd.f32 %v865_v45, %v864_v47 }
 0x3bb   :  { %4856 = vtanh.f32 %v5537_v49 }
 0x3c1   :  { %v4857_v55 = vpop.eup %4856 }
 0x3c2   :  { %v868_v58 = vmul.f32 %v4857_v55, %v862_v57 }
 0x3c4   :  { %869 = vst.msk [vmem:[#allocation2 + $0x6] sm:$0x3] %vm355_vm14, %v868_v58  ;;  %4623 = vmatmul.msk.f32.vlgmr.msrb.gmra.mxu2 %vm96_vm1, %v868_v58  ;;  %4624 = vmatmul.msk.f32.vlgmr.msrb.gmra.mxu3 %vm96_vm1, %v868_v58 }
 0x3c5   :  { %4625 = vmatmul.msk.f32.vlgmr.msra.gmra.mxu0 %vm96_vm1, %v868_v58  ;;  %4626 = vmatmul.msk.f32.vlgmr.msrb.gmra.mxu1 %vm96_vm1, %v868_v58 }
 0x3c6   :  { %1231 = vmatpush.msrb.mxu2 %v5545_v2  ;;  %1255 = vmatpush.msrb.mxu3 %v5547_v3 }
 0x3c7   :  { %1279 = vmatpush.msra.mxu0 %v5549_v4  ;;  %1303 = vmatpush.msrb.mxu1 %v5553_v7 }
 0x3c8   :  { %1232 = vmatpush.msrb.mxu2 %v5555_v8  ;;  %1256 = vmatpush.msrb.mxu3 %v5557_v12 }
 0x3c9   :  { %1280 = vmatpush.msra.mxu0 %v5561_v13  ;;  %1304 = vmatpush.msrb.mxu1 %v5563_v14 }
 0x3ca   :  { %1233 = vmatpush.msrb.mxu2 %v5565_v16  ;;  %1257 = vmatpush.msrb.mxu3 %v5569_v20 }
 0x3cb   :  { %1281 = vmatpush.msra.mxu0 %v5571_v19  ;;  %1305 = vmatpush.msrb.mxu1 %v5575_v21 }
 0x3cc   :  { %1234 = vmatpush.msrb.mxu2 %v5577_v22  ;;  %1258 = vmatpush.msrb.mxu3 %v5579_v23 }
 0x3cd   :  { %1282 = vmatpush.msra.mxu0 %v5583_v24  ;;  %1306 = vmatpush.msrb.mxu1 %v5585_v31 }
 0x442   :  { %v966_v56 = vpop.f32.mrf.mxu1  ;;  %v942_v25 = vpop.f32.mrf.mxu0 }
 0x443   :  { %v1015_v61 = vadd.f32 %v1014_v59, %v966_v56  ;;  %v1012_v29 = vadd.f32 %v1011_v27, %v942_v25 }
 0x445   :  { %v4629_v62 = vmul.f32 -1.442695, %v1015_v61 }
 0x447   :  { %4858 = vpow2.f32 %v4629_v62  ;;  %v894_v1 = vpop.f32.mrf.mxu2  ;;  %v918_v60 = vpop.f32.mrf.mxu3 }
 0x448   :  { %v970_v48 = vadd.f32 %v969_v63, %v894_v1  ;;  %v991_v6 = vadd.f32 %v990_v0, %v918_v60 }
 0x44a   :  { %v4627_v18 = vmul.f32 -1.442695, %v970_v48  ;;  %v4628_v15 = vmul.f32 -1.442695, %v991_v6 }
 0x44c   :  { %4860 = vpow2.f32 %v4627_v18 }
 0x44d   :  { %v4859_v32 = vpop.eup %4858  ;;  %4862 = vpow2.f32 %v4628_v15 }
 0x44e   :  { %v5593_v5 = vadd.f32 1.0, %v4859_v32 }
 0x450   :  { %4864 = vrcp.f32 %v5593_v5  ;;  %v1031_v62 = vand.u32 2147483648, %v5593_v5  ;;  %vm1025_vm7 = vweird.f32 %v5593_v5  ;;  %v1029_v63 = vand.u32 2147483647, %v5593_v5 }
 0x452   :  { %v4861_v9 = vpop.eup %4860  ;;  %v1032_v1 = vor.u32 1.1754944e-38, %v1031_v62  ;;  %vm1030_vm9 = vcmp.eq.f32.partialorder %v1029_v63, 8.507059e+37  ;;  %v1356_v63 = vld [vmem:[#allocation3 + $0x3c] sm:$0x3] }
 0x453   :  { %v4863_v10 = vpop.eup %4862  ;;  %v974_v11 = vadd.f32 1.0, %v4861_v9 }
 0x454   :  { %v995_v17 = vadd.f32 1.0, %v4863_v10 }
 0x455   :  { %4866 = vrcp.f32 %v974_v11  ;;  %v986_v37 = vand.u32 2147483648, %v974_v11  ;;  %v984_v40 = vand.u32 2147483647, %v974_v11  ;;  %vm980_vm13 = vweird.f32 %v974_v11 }
 0x456   :  { %4868 = vrcp.f32 %v995_v17  ;;  %v4865_v26 = vpop.eup %4864  ;;  %v1007_v41 = vand.u32 2147483648, %v995_v17  ;;  %v1005_v43 = vand.u32 2147483647, %v995_v17  ;;  %vm1001_vm2 = vweird.f32 %v995_v17 }
 0x457   :  { %v1021_v35 = vmul.f32 %v4865_v26, %v5593_v5  ;;  %4870 = vtanh.f32 %v1012_v29  ;;  %v987_v46 = vor.u32 1.1754944e-38, %v986_v37  ;;  %vm985_vm3 = vcmp.eq.f32.partialorder %v984_v40, 8.507059e+37  ;;  %v1182_v5 = vld [vmem:[#allocation3 + $0x2a] sm:$0x3] }
 0x458   :  { %v1008_v51 = vor.u32 1.1754944e-38, %v1007_v41  ;;  %vm1006_vm5 = vcmp.eq.f32.partialorder %v1005_v43, 8.507059e+37  ;;  %vm1026_vm6 = vweird.f32 %v4865_v26 }
 0x459   :  { %v1022_v44 = vsub.f32 1.0, %v1021_v35  ;;  %vm1027_vm8 = vmor %vm1025_vm7, %vm1026_vm6 }
 0x45b   :  { %v4867_v28 = vpop.eup %4866  ;;  %v1023_v55 = vmul.f32 %v4865_v26, %v1022_v44 }
 0x45c   :  { %v4869_v30 = vpop.eup %4868  ;;  %v976_v33 = vmul.f32 %v4867_v28, %v974_v11  ;;  %vm981_vm11 = vweird.f32 %v4867_v28 }
 0x45d   :  { %v997_v34 = vmul.f32 %v4869_v30, %v995_v17  ;;  %vm1002_vm12 = vweird.f32 %v4869_v30  ;;  %vm982_vm15 = vmor %vm980_vm13, %vm981_vm11  ;;  %v4871_v52 = vpop.eup %4870  ;;  %v1024_v61 = vadd.f32 %v4865_v26, %v1023_v55 }
 0x45e   :  { %v977_v36 = vsub.f32 1.0, %v976_v33  ;;  %vm1003_vm4 = vmor %vm1001_vm2, %vm1002_vm12 }
 0x45f   :  { %v998_v38 = vsub.f32 1.0, %v997_v34  ;;  %v1028_v0 = vsel %vm1027_vm8, %v4865_v26, %v1024_v61 }
 0x460   :  { %v978_v39 = vmul.f32 %v4867_v28, %v977_v36  ;;  %v1033_v48 = vsel %vm1030_vm9, %v1032_v1, %v1028_v0 }
 0x461   :  { %v999_v42 = vmul.f32 %v4869_v30, %v998_v38 }
 0x462   :  { %v979_v45 = vadd.f32 %v4867_v28, %v978_v39 }
 0x463   :  { %v1000_v47 = vadd.f32 %v4869_v30, %v999_v42 }
 0x464   :  { %v983_v50 = vsel %vm982_vm15, %v4867_v28, %v979_v45 }
 0x465   :  { %v988_v53 = vsel %vm985_vm3, %v987_v46, %v983_v50  ;;  %v1004_v54 = vsel %vm1003_vm4, %v4869_v30, %v1000_v47 }
 0x466   :  { %v1036_v57 = vmul.f32 %v4871_v52, %v988_v53  ;;  %v1009_v58 = vsel %vm1006_vm5, %v1008_v51, %v1004_v54 }
 0x467   :  { %v1035_v56 = vmul.f32 %v1009_v58, %v5537_v49 }
 0x469   :  { %v5614_v59 = vadd.f32 %v1036_v57, %v1035_v56 }
 0x46b   :  { %4872 = vtanh.f32 %v5614_v59 }
 0x471   :  { %v4873_v60 = vpop.eup %4872 }
 0x472   :  { %v1039_v6 = vmul.f32 %v4873_v60, %v1033_v48  ;;  %v1311_v48 = vld [vmem:[#allocation3 + $0xc] sm:$0x3] }
 0x474   :  { %1040 = vst.msk [vmem:[#allocation2 + $0x8] sm:$0x3] %vm355_vm14, %v1039_v6  ;;  %4630 = vmatmul.msk.f32.vlgmr.msra.gmra.mxu2 %vm96_vm1, %v1039_v6  ;;  %4631 = vmatmul.msk.f32.vlgmr.msra.gmra.mxu3 %vm96_vm1, %v1039_v6 }
 0x475   :  { %4632 = vmatmul.msk.f32.vlgmr.msrb.gmra.mxu0 %vm96_vm1, %v1039_v6  ;;  %4633 = vmatmul.msk.f32.vlgmr.msra.gmra.mxu1 %vm96_vm1, %v1039_v6 }
 0x476   :  { %1402 = vmatpush.msra.mxu2 %v5545_v2  ;;  %1426 = vmatpush.msra.mxu3 %v5547_v3  ;;  %v1185_v2 = vld [vmem:[#allocation3 + $0x3a] sm:$0x3] }
 0x477   :  { %1450 = vmatpush.msrb.mxu0 %v5549_v4  ;;  %1474 = vmatpush.msra.mxu1 %v5553_v7 }
 0x478   :  { %1403 = vmatpush.msra.mxu2 %v5555_v8  ;;  %1427 = vmatpush.msra.mxu3 %v5557_v12  ;;  %v1140_v8 = vld [vmem:[#allocation3 + $0xa] sm:$0x3] }
 0x479   :  { %1451 = vmatpush.msrb.mxu0 %v5561_v13  ;;  %1475 = vmatpush.msra.mxu1 %v5563_v14  ;;  %v1161_v13 = vld [vmem:[#allocation3 + $0x1a] sm:$0x3] }
 0x47a   :  { %1404 = vmatpush.msra.mxu2 %v5565_v16  ;;  %1428 = vmatpush.msra.mxu3 %v5569_v20 }
 0x47b   :  { %1452 = vmatpush.msrb.mxu0 %v5571_v19  ;;  %1476 = vmatpush.msra.mxu1 %v5575_v21 }
 0x47c   :  { %1405 = vmatpush.msra.mxu2 %v5577_v22  ;;  %1429 = vmatpush.msra.mxu3 %v5579_v23 }
 0x47d   :  { %1453 = vmatpush.msrb.mxu0 %v5583_v24  ;;  %1477 = vmatpush.msra.mxu1 %v5585_v31 }
 0x4f2   :  { %v1137_v49 = vpop.f32.mrf.mxu1  ;;  %v1113_v31 = vpop.f32.mrf.mxu0 }
 0x4f3   :  { %v1186_v3 = vadd.f32 %v1185_v2, %v1137_v49  ;;  %v1183_v10 = vadd.f32 %v1182_v5, %v1113_v31  ;;  %v1332_v49 = vld [vmem:[#allocation3 + $0x1c] sm:$0x3] }
 0x4f5   :  { %v4636_v4 = vmul.f32 -1.442695, %v1186_v3 }
 0x4f7   :  { %4874 = vpow2.f32 %v4636_v4  ;;  %v1065_v7 = vpop.f32.mrf.mxu2  ;;  %v1089_v12 = vpop.f32.mrf.mxu3 }
 0x4f8   :  { %v1141_v14 = vadd.f32 %v1140_v8, %v1065_v7  ;;  %v1162_v16 = vadd.f32 %v1161_v13, %v1089_v12 }
 0x4fa   :  { %v4634_v18 = vmul.f32 -1.442695, %v1141_v14  ;;  %v4635_v15 = vmul.f32 -1.442695, %v1162_v16 }
 0x4fc   :  { %4876 = vpow2.f32 %v4634_v18 }
 0x4fd   :  { %v4875_v20 = vpop.eup %4874  ;;  %4878 = vpow2.f32 %v4635_v15  ;;  %v1571_v15 = vld [vmem:[#allocation5 + $0x38] sm:$0xff] }
 0x4fe   :  { %v1190_v19 = vadd.f32 1.0, %v4875_v20  ;;  %v1570_v20 = vld [vmem:[#allocation5 + $0x30] sm:$0xff] }
 0x500   :  { %4880 = vrcp.f32 %v1190_v19  ;;  %v1202_v54 = vand.u32 2147483648, %v1190_v19  ;;  %vm1196_vm6 = vweird.f32 %v1190_v19  ;;  %v1200_v55 = vand.u32 2147483647, %v1190_v19 }
 0x502   :  { %v4877_v21 = vpop.eup %4876  ;;  %v1203_v58 = vor.u32 1.1754944e-38, %v1202_v54  ;;  %vm1201_vm8 = vcmp.eq.f32.partialorder %v1200_v55, 8.507059e+37 }
 0x503   :  { %v4879_v22 = vpop.eup %4878  ;;  %v1145_v23 = vadd.f32 1.0, %v4877_v21 }
 0x504   :  { %v1166_v24 = vadd.f32 1.0, %v4879_v22  ;;  %v1568_v22 = vld [vmem:[#allocation5 + $0x20] sm:$0xff] }
 0x505   :  { %4882 = vrcp.f32 %v1145_v23  ;;  %v1157_v28 = vand.u32 2147483648, %v1145_v23  ;;  %v1155_v33 = vand.u32 2147483647, %v1145_v23  ;;  %vm1151_vm12 = vweird.f32 %v1145_v23 }
 0x506   :  { %4884 = vrcp.f32 %v1166_v24  ;;  %v4881_v32 = vpop.eup %4880  ;;  %v1178_v34 = vand.u32 2147483648, %v1166_v24  ;;  %v1176_v36 = vand.u32 2147483647, %v1166_v24  ;;  %vm1172_vm15 = vweird.f32 %v1166_v24 }
 0x507   :  { %v1192_v26 = vmul.f32 %v4881_v32, %v1190_v19  ;;  %4886 = vtanh.f32 %v1183_v10  ;;  %v1158_v39 = vor.u32 1.1754944e-38, %v1157_v28  ;;  %vm1156_vm2 = vcmp.eq.f32.partialorder %v1155_v33, 8.507059e+37  ;;  %v1569_v19 = vld [vmem:[#allocation5 + $0x28] sm:$0xff]  ;;  %v5655_v10 = vld [vmem:[#allocation8 + $0x98] sm:$0xff]  ;;  %v5668_v33 = vld [vmem:[#allocation8 + $0xb0] sm:$0xff] }
 0x508   :  { %v1179_v42 = vor.u32 1.1754944e-38, %v1178_v34  ;;  %vm1177_vm4 = vcmp.eq.f32.partialorder %v1176_v36, 8.507059e+37  ;;  %vm1197_vm5 = vweird.f32 %v4881_v32  ;;  %v5664_v28 = vld [vmem:[#allocation8 + $0xb8] sm:$0xff] }
 0x509   :  { %v1193_v37 = vsub.f32 1.0, %v1192_v26  ;;  %vm1198_vm7 = vmor %vm1196_vm6, %vm1197_vm5 }
 0x50b   :  { %v4883_v9 = vpop.eup %4882  ;;  %v1194_v46 = vmul.f32 %v4881_v32, %v1193_v37  ;;  %v5670_v37 = vld [vmem:[#allocation8 + $0x80] sm:$0xff] }
 0x50c   :  { %v4885_v11 = vpop.eup %4884  ;;  %v1147_v17 = vmul.f32 %v4883_v9, %v1145_v23  ;;  %vm1152_vm10 = vweird.f32 %v4883_v9 }
 0x50d   :  { %v1168_v25 = vmul.f32 %v4885_v11, %v1166_v24  ;;  %vm1173_vm11 = vweird.f32 %v4885_v11  ;;  %vm1153_vm13 = vmor %vm1151_vm12, %vm1152_vm10  ;;  %v4887_v43 = vpop.eup %4886  ;;  %v1195_v53 = vadd.f32 %v4881_v32, %v1194_v46  ;;  %v1353_v24 = vld [vmem:[#allocation3 + $0x2c] sm:$0x3] }
 0x50e   :  { %v1148_v27 = vsub.f32 1.0, %v1147_v17  ;;  %vm1174_vm3 = vmor %vm1172_vm15, %vm1173_vm11 }
 0x50f   :  { %v1169_v29 = vsub.f32 1.0, %v1168_v25  ;;  %v1199_v57 = vsel %vm1198_vm7, %v4881_v32, %v1195_v53 }
 0x510   :  { %v1149_v30 = vmul.f32 %v4883_v9, %v1148_v27  ;;  %v1204_v61 = vsel %vm1201_vm8, %v1203_v58, %v1199_v57  ;;  %v5662_v27 = vld [vmem:[#allocation8 + $0x88] sm:$0xff] }
 0x511   :  { %v1170_v35 = vmul.f32 %v4885_v11, %v1169_v29 }
 0x512   :  { %v1150_v38 = vadd.f32 %v4883_v9, %v1149_v30 }
 0x513   :  { %v1171_v40 = vadd.f32 %v4885_v11, %v1170_v35 }
 0x514   :  { %v1154_v41 = vsel %vm1153_vm13, %v4883_v9, %v1150_v38  ;;  %v5672_v38 = vld [vmem:[#allocation8 + $0xa8] sm:$0xff] }
 0x515   :  { %v1159_v44 = vsel %vm1156_vm2, %v1158_v39, %v1154_v41  ;;  %v1175_v45 = vsel %vm1174_vm3, %v4885_v11, %v1171_v40  ;;  %v5657_v11 = vld [vmem:[#allocation8 + $0x90] sm:$0xff] }
 0x516   :  { %v1207_v47 = vmul.f32 %v4887_v43, %v1159_v44  ;;  %v1180_v50 = vsel %vm1177_vm4, %v1179_v42, %v1175_v45  ;;  %v5676_v43 = vld [vmem:[#allocation8 + $0xa0] sm:$0xff] }
 0x517   :  { %v1206_v51 = vmul.f32 %v1180_v50, %v5614_v59 }
 0x519   :  { %v5642_v52 = vadd.f32 %v1207_v47, %v1206_v51 }
 0x51b   :  { %4888 = vtanh.f32 %v5642_v52 }
 0x521   :  { %v4889_v56 = vpop.eup %4888 }
 0x522   :  { %v1210_v62 = vmul.f32 %v4889_v56, %v1204_v61 }
 0x524   :  { %1211 = vst.msk [vmem:[#allocation2 + $0xa] sm:$0x3] %vm355_vm14, %v1210_v62  ;;  %4637 = vmatmul.msk.f32.vlgmr.msrb.gmra.mxu2 %vm96_vm1, %v1210_v62  ;;  %4638 = vmatmul.msk.f32.vlgmr.msrb.gmra.mxu3 %vm96_vm1, %v1210_v62 }
 0x525   :  { %4639 = vmatmul.msk.f32.vlgmr.msra.gmra.mxu0 %vm96_vm1, %v1210_v62  ;;  %4640 = vmatmul.msk.f32.vlgmr.msrb.gmra.mxu1 %vm96_vm1, %v1210_v62 }
 0x526   :  { %1595 = vmatpush.msrb.mxu2 %v1571_v15  ;;  %1661 = vmatpush.msrb.mxu3 %v5655_v10 }
 0x527   :  { %1686 = vmatpush.msra.mxu0 %v5664_v28 }
 0x528   :  { %1596 = vmatpush.msrb.mxu2 %v1570_v20  ;;  %1662 = vmatpush.msrb.mxu3 %v5657_v11  ;;  %v1527_v20 = vld [vmem:[#allocation3 + $0x3e] sm:$0x3] }
 0x529   :  { %1687 = vmatpush.msra.mxu0 %v5668_v33 }
 0x52a   :  { %1597 = vmatpush.msrb.mxu2 %v1569_v19  ;;  %1663 = vmatpush.msrb.mxu3 %v5662_v27 }
 0x52b   :  { %1688 = vmatpush.msra.mxu0 %v5672_v38 }
 0x52c   :  { %1598 = vmatpush.msrb.mxu2 %v1568_v22  ;;  %1664 = vmatpush.msrb.mxu3 %v5670_v37 }
 0x52d   :  { %1689 = vmatpush.msra.mxu0 %v5676_v43 }
 0x5a2   :  { %v1308_v59 = vpop.f32.mrf.mxu1  ;;  %v1284_v21 = vpop.f32.mrf.mxu0 }
 0x5a3   :  { %v1357_v0 = vadd.f32 %v1356_v63, %v1308_v59  ;;  %v1354_v32 = vadd.f32 %v1353_v24, %v1284_v21 }
 0x5a5   :  { %v4643_v1 = vmul.f32 -1.442695, %v1357_v0 }
 0x5a7   :  { %4890 = vpow2.f32 %v4643_v1  ;;  %v1236_v60 = vpop.f32.mrf.mxu2  ;;  %v1260_v6 = vpop.f32.mrf.mxu3 }
 0x5a8   :  { %v1312_v2 = vadd.f32 %v1311_v48, %v1236_v60  ;;  %v1333_v3 = vadd.f32 %v1332_v49, %v1260_v6  ;;  %v1635_v48 = vld [vmem:[%s6424_s8 + $0x5] sm:$0x1]  ;;  %v1634_v49 = vld [vmem:[%s6424_s8 + $0x1] sm:$0x1] }
 0x5a9   :  { %v1645_v6 = vrot.slane %v1635_v48, 7 }
 0x5aa   :  { %v4641_v4 = vmul.f32 -1.442695, %v1312_v2  ;;  %v4642_v7 = vmul.f32 -1.442695, %v1333_v3  ;;  %v1565_v3 = vld [vmem:[#allocation2] sm:$0xff] }
 0x5ab   :  { %v1646_v2 = vsel %vm180_vm0, %v1645_v6, %v1634_v49 }
 0x5ac   :  { %4892 = vpow2.f32 %v4641_v4  ;;  %v5716_v4 = vld [vmem:[#allocation8 + $0xf8] sm:$0xff] }
 0x5ad   :  { %v4891_v8 = vpop.eup %4890  ;;  %4894 = vpow2.f32 %v4642_v7  ;;  %v5719_v7 = vld [vmem:[#allocation8 + $0xf0] sm:$0xff] }
 0x5ae   :  { %v5650_v12 = vadd.f32 1.0, %v4891_v8  ;;  %v5722_v8 = vld [vmem:[#allocation8 + $0xe8] sm:$0xff] }
 0x5b0   :  { %4896 = vrcp.f32 %v5650_v12  ;;  %v1373_v62 = vand.u32 2147483648, %v5650_v12  ;;  %vm1367_vm5 = vweird.f32 %v5650_v12  ;;  %v1371_v59 = vand.u32 2147483647, %v5650_v12 }
 0x5b2   :  { %v4893_v13 = vpop.eup %4892  ;;  %v1374_v0 = vor.u32 1.1754944e-38, %v1373_v62  ;;  %vm1372_vm7 = vcmp.eq.f32.partialorder %v1371_v59, 8.507059e+37 }
 0x5b3   :  { %v4895_v14 = vpop.eup %4894  ;;  %v1316_v16 = vadd.f32 1.0, %v4893_v13  ;;  %v5727_v13 = vld [vmem:[#allocation8 + $0xd8] sm:$0xff] }
 0x5b4   :  { %v1337_v18 = vadd.f32 1.0, %v4895_v14  ;;  %1711 = vmatpush.msrb.mxu1 %v5727_v13  ;;  %v5732_v14 = vld [vmem:[#allocation8 + $0xd0] sm:$0xff] }
 0x5b5   :  { %4898 = vrcp.f32 %v1316_v16  ;;  %v1328_v29 = vand.u32 2147483648, %v1316_v16  ;;  %v1326_v35 = vand.u32 2147483647, %v1316_v16  ;;  %vm1322_vm11 = vweird.f32 %v1316_v16 }
 0x5b6   :  { %4900 = vrcp.f32 %v1337_v18  ;;  %v5653_v23 = vpop.eup %4896  ;;  %v1349_v36 = vand.u32 2147483648, %v1337_v18  ;;  %v1347_v40 = vand.u32 2147483647, %v1337_v18  ;;  %vm1343_vm13 = vweird.f32 %v1337_v18  ;;  %1712 = vmatpush.msrb.mxu1 %v5732_v14 }
 0x5b7   :  { %v1363_v25 = vmul.f32 %v5653_v23, %v5650_v12  ;;  %4902 = vtanh.f32 %v1354_v32  ;;  %v1329_v44 = vor.u32 1.1754944e-38, %v1328_v29  ;;  %vm1327_vm15 = vcmp.eq.f32.partialorder %v1326_v35, 8.507059e+37  ;;  %v5725_v12 = vld [vmem:[#allocation8 + $0xe0] sm:$0xff] }
 0x5b8   :  { %v1350_v47 = vor.u32 1.1754944e-38, %v1349_v36  ;;  %vm1348_vm3 = vcmp.eq.f32.partialorder %v1347_v40, 8.507059e+37  ;;  %vm1368_vm4 = vweird.f32 %v5653_v23 }
 0x5b9   :  { %v1364_v41 = vsub.f32 1.0, %v1363_v25  ;;  %vm1369_vm6 = vmor %vm1367_vm5, %vm1368_vm4 }
 0x5bb   :  { %v4899_v31 = vpop.eup %4898  ;;  %v1365_v54 = vmul.f32 %v5653_v23, %v1364_v41 }
 0x5bc   :  { %v4901_v5 = vpop.eup %4900  ;;  %v1318_v9 = vmul.f32 %v4899_v31, %v1316_v16  ;;  %vm1323_vm9 = vweird.f32 %v4899_v31  ;;  %v5737_v16 = vld [vmem:[#allocation8 + $0xc8] sm:$0xff] }
 0x5bd   :  { %v1339_v17 = vmul.f32 %v4901_v5, %v1337_v18  ;;  %vm1344_vm10 = vweird.f32 %v4901_v5  ;;  %vm1324_vm12 = vmor %vm1322_vm11, %vm1323_vm9  ;;  %v4903_v50 = vpop.eup %4902  ;;  %v1366_v61 = vadd.f32 %v5653_v23, %v1365_v54  ;;  %1713 = vmatpush.msrb.mxu1 %v5737_v16  ;;  %v5742_v18 = vld [vmem:[#allocation8 + $0xc0] sm:$0xff] }
 0x5be   :  { %v1319_v26 = vsub.f32 1.0, %v1318_v9  ;;  %vm1345_vm2 = vmor %vm1343_vm13, %vm1344_vm10 }
 0x5bf   :  { %v1340_v30 = vsub.f32 1.0, %v1339_v17  ;;  %v1370_v63 = vsel %vm1369_vm6, %v5653_v23, %v1366_v61  ;;  %1714 = vmatpush.msrb.mxu1 %v5742_v18  ;;  %v1482_v23 = vld [vmem:[#allocation3 + $0xe] sm:$0x3] }
 0x5c0   :  { %v1320_v34 = vmul.f32 %v4899_v31, %v1319_v26  ;;  %v1375_v1 = vsel %vm1372_vm7, %v1374_v0, %v1370_v63  ;;  %v5769_v26 = vld [vmem:[%s6421_s5 + $0x1] ss:$0 sm:$0xff] }
 0x5c1   :  { %v1341_v39 = vmul.f32 %v4901_v5, %v1340_v30 }
 0x5c2   :  { %v1321_v42 = vadd.f32 %v4899_v31, %v1320_v34 }
 0x5c3   :  { %v1342_v45 = vadd.f32 %v4901_v5, %v1341_v39 }
 0x5c4   :  { %v1325_v46 = vsel %vm1324_vm12, %v4899_v31, %v1321_v42  ;;  %v1503_v31 = vld [vmem:[#allocation3 + $0x1e] sm:$0x3] }
 0x5c5   :  { %v1330_v51 = vsel %vm1327_vm15, %v1329_v44, %v1325_v46  ;;  %v1346_v53 = vsel %vm1345_vm2, %v4901_v5, %v1342_v45  ;;  %v1524_v44 = vld [vmem:[#allocation3 + $0x2e] sm:$0x3] }
 0x5c6   :  { %v1378_v55 = vmul.f32 %v4903_v50, %v1330_v51  ;;  %v1351_v57 = vsel %vm1348_vm3, %v1350_v47, %v1346_v53  ;;  %vm1557_vm3 = vcmask 253952  }
 0x5c7   :  { %v1377_v58 = vmul.f32 %v1351_v57, %v5642_v52 }
 0x5c9   :  { %v5684_v56 = vadd.f32 %v1378_v55, %v1377_v58 }
 0x5cb   :  { %4904 = vtanh.f32 %v5684_v56 }
 0x5d1   :  { %v4905_v52 = vpop.eup %4904 }
 0x5d2   :  { %v1381_v60 = vmul.f32 %v4905_v52, %v1375_v1 }
 0x5d4   :  { %1382 = vst.msk [vmem:[#allocation2 + $0xc] sm:$0x3] %vm355_vm14, %v1381_v60  ;;  %4644 = vmatmul.msk.f32.vlgmr.msra.gmra.mxu2 %vm96_vm1, %v1381_v60  ;;  %4645 = vmatmul.msk.f32.vlgmr.msra.gmra.mxu3 %vm96_vm1, %v1381_v60 }
 0x5d5   :  { %4646 = vmatmul.msk.f32.vlgmr.msrb.gmra.mxu0 %vm96_vm1, %v1381_v60  ;;  %4647 = vmatmul.msk.f32.vlgmr.msra.gmra.mxu1 %vm96_vm1, %v1381_v60 }
 0x5d6   :  { %1840 = vmatpush.msrb.mxu0 %v5655_v10  ;;  %1736 = vmatpush.msra.mxu3 %v5716_v4 }
 0x5d7   :  { %1888 = vmatpush.msra.mxu2 %v5727_v13  ;;  %1864 = vmatpush.msra.mxu1 %v5664_v28 }
 0x5d8   :  { %1841 = vmatpush.msrb.mxu0 %v5657_v11  ;;  %1737 = vmatpush.msra.mxu3 %v5719_v7 }
 0x5d9   :  { %1889 = vmatpush.msra.mxu2 %v5732_v14  ;;  %1865 = vmatpush.msra.mxu1 %v5668_v33 }
 0x5da   :  { %1842 = vmatpush.msrb.mxu0 %v5662_v27  ;;  %1738 = vmatpush.msra.mxu3 %v5722_v8 }
 0x5db   :  { %1890 = vmatpush.msra.mxu2 %v5737_v16  ;;  %1866 = vmatpush.msra.mxu1 %v5672_v38 }
 0x5dc   :  { %4652 = vmatmul.msk.f32.vlgmr.msrb.gmra.mxu2 %vm96_vm1, %v1565_v3  ;;  %4654 = vmatmul.msk.f32.vlgmr.msrb.gmra.mxu3 %vm96_vm1, %v1646_v2 }
 0x5dd   :  { %4655 = vmatmul.msk.f32.vlgmr.msra.gmra.mxu0 %vm96_vm1, %v1646_v2  ;;  %1739 = vmatpush.msra.mxu3 %v5725_v12 }
 0x5de   :  { %1843 = vmatpush.msrb.mxu0 %v5670_v37  ;;  %4656 = vmatmul.msk.f32.vlgmr.msrb.gmra.mxu1 %vm96_vm1, %v1646_v2 }
 0x5df   :  { %1912 = vmatpush.msrb.mxu3 %v5716_v4  ;;  %1891 = vmatpush.msra.mxu2 %v5742_v18 }
 0x5e0   :  { %2011 = vmatpush.msra.mxu0 %v5655_v10  ;;  %1867 = vmatpush.msra.mxu1 %v5676_v43 }
 0x5e1   :  { %1913 = vmatpush.msrb.mxu3 %v5719_v7  ;;  %2059 = vmatpush.msrb.mxu2 %v5727_v13 }
 0x5e2   :  { %2012 = vmatpush.msra.mxu0 %v5657_v11  ;;  %2035 = vmatpush.msrb.mxu1 %v5664_v28 }
 0x5e3   :  { %1914 = vmatpush.msrb.mxu3 %v5722_v8  ;;  %2060 = vmatpush.msrb.mxu2 %v5732_v14 }
 0x5e4   :  { %2013 = vmatpush.msra.mxu0 %v5662_v27  ;;  %4657 = vmatmul.msk.f32.vlgmr.msra.gmra.mxu3 %vm96_vm1, %v1646_v2 }
 0x5e5   :  { %1915 = vmatpush.msrb.mxu3 %v5725_v12  ;;  %2061 = vmatpush.msrb.mxu2 %v5737_v16 }
 0x5e6   :  { %2014 = vmatpush.msra.mxu0 %v5670_v37  ;;  %2036 = vmatpush.msrb.mxu1 %v5668_v33 }
 0x5e7   :  { %2083 = vmatpush.msra.mxu3 %v5716_v4  ;;  %2062 = vmatpush.msrb.mxu2 %v5742_v18 }
 0x5e8   :  { %2037 = vmatpush.msrb.mxu1 %v5672_v38 }
 0x5e9   :  { %2084 = vmatpush.msra.mxu3 %v5719_v7 }
 0x5ea   :  { %2038 = vmatpush.msrb.mxu1 %v5676_v43 }
 0x5eb   :  { %2085 = vmatpush.msra.mxu3 %v5722_v8 }
 0x5ed   :  { %2086 = vmatpush.msra.mxu3 %v5725_v12 }
 0x652   :  { %v1479_v15 = vpop.f32.mrf.mxu1  ;;  %v1455_v41 = vpop.f32.mrf.mxu0 }
 0x653   :  { %v1528_v19 = vadd.f32 %v1527_v20, %v1479_v15  ;;  %v1525_v46 = vadd.f32 %v1524_v44, %v1455_v41 }
 0x655   :  { %v4650_v21 = vmul.f32 -1.442695, %v1528_v19 }
 0x657   :  { %4906 = vpow2.f32 %v4650_v21  ;;  %v1407_v22 = vpop.f32.mrf.mxu2  ;;  %v1431_v24 = vpop.f32.mrf.mxu3 }
 0x658   :  { %v1483_v32 = vadd.f32 %v1482_v23, %v1407_v22  ;;  %v1504_v5 = vadd.f32 %v1503_v31, %v1431_v24 }
 0x65a   :  { %v4648_v9 = vmul.f32 -1.442695, %v1483_v32  ;;  %v4649_v17 = vmul.f32 -1.442695, %v1504_v5  ;;  %v1691_v41 = vpop.f32.mrf.mxu0 }
 0x65c   :  { %4908 = vpow2.f32 %v4648_v9 }
 0x65d   :  { %v4907_v25 = vpop.eup %4906  ;;  %4910 = vpow2.f32 %v4649_v17 }
 0x65e   :  { %v5771_v30 = vadd.f32 1.0, %v4907_v25 }
 0x65f   :  { %v1600_v29 = vpop.f32.mrf.mxu2 }
 0x660   :  { %v1601_v34 = vadd.f32 %v5769_v26, %v1600_v29  ;;  %4912 = vrcp.f32 %v5771_v30  ;;  %v1544_v24 = vand.u32 2147483648, %v5771_v30  ;;  %vm1538_vm5 = vweird.f32 %v5771_v30 }
 0x661   :  { %v1542_v32 = vand.u32 2147483647, %v5771_v30 }
 0x662   :  { %v4909_v35 = vpop.eup %4908  ;;  %1606 = vst.msk [vmem:[#allocation3] sm:$0xff] %vm96_vm1, %v1601_v34  ;;  %1618 = vrot.lane.b32.xlu1 %v1601_v34, %s5263_s27  ;;  %1626 = vrot.lane.b32.xlu0 %v1601_v34, %s5261_s25  ;;  %v1545_v5 = vor.u32 1.1754944e-38, %v1544_v24 }
 0x663   :  { %v4911_v36 = vpop.eup %4910  ;;  %v1487_v39 = vadd.f32 1.0, %v4909_v35  ;;  %1610 = vrot.lane.b32.xlu2 %v1601_v34, %s5262_s26  ;;  %vm1543_vm7 = vcmp.eq.f32.partialorder %v1542_v32, 8.507059e+37  ;;  %v1666_v34 = vpop.f32.mrf.mxu3 }
 0x664   :  { %v1508_v40 = vadd.f32 1.0, %v4911_v36 }
 0x665   :  { %4914 = vrcp.f32 %v1487_v39  ;;  %v1499_v55 = vand.u32 2147483648, %v1487_v39  ;;  %v1497_v61 = vand.u32 2147483647, %v1487_v39  ;;  %vm1493_vm10 = vweird.f32 %v1487_v39 }
 0x666   :  { %4916 = vrcp.f32 %v1508_v40  ;;  %v4913_v42 = vpop.eup %4912  ;;  %v1520_v62 = vand.u32 2147483648, %v1508_v40  ;;  %v1518_v63 = vand.u32 2147483647, %v1508_v40  ;;  %vm1514_vm12 = vweird.f32 %v1508_v40 }
 0x667   :  { %v1534_v53 = vmul.f32 %v4913_v42, %v5771_v30  ;;  %4918 = vtanh.f32 %v1525_v46  ;;  %v1500_v1 = vor.u32 1.1754944e-38, %v1499_v55  ;;  %vm1498_vm13 = vcmp.eq.f32.partialorder %v1497_v61, 8.507059e+37 }
 0x668   :  { %v1521_v6 = vor.u32 1.1754944e-38, %v1520_v62  ;;  %vm1519_vm2 = vcmp.eq.f32.partialorder %v1518_v63, 8.507059e+37  ;;  %vm1539_vm4 = vweird.f32 %v4913_v42 }
 0x669   :  { %v1535_v0 = vsub.f32 1.0, %v1534_v53  ;;  %vm1540_vm6 = vmor %vm1538_vm5, %vm1539_vm4  ;;  %v1744_v35 = vld [vmem:[#allocation3] sm:$0x3] }
 0x66a   :  { %v1745_v36 = vadd.f32 %v1744_v35, %v1666_v34 }
 0x66b   :  { %v4915_v45 = vpop.eup %4914  ;;  %v1536_v15 = vmul.f32 %v4913_v42, %v1535_v0  ;;  %v1741_v62 = vpop.f32.mrf.mxu3 }
 0x66c   :  { %v4917_v47 = vpop.eup %4916  ;;  %v1489_v50 = vmul.f32 %v4915_v45, %v1487_v39  ;;  %vm1494_vm8 = vweird.f32 %v4915_v45  ;;  %v1716_v0 = vpop.f32.mrf.mxu1 }
 0x66d   :  { %v1510_v51 = vmul.f32 %v4917_v47, %v1508_v40  ;;  %vm1515_vm9 = vweird.f32 %v4917_v47  ;;  %vm1495_vm11 = vmor %vm1493_vm10, %vm1494_vm8  ;;  %v4919_v49 = vpop.eup %4918  ;;  %v1537_v23 = vadd.f32 %v4913_v42, %v1536_v15  ;;  %v4658_v40 = vmul.f32 -1.442695, %v1745_v36 }
 0x66e   :  { %v1490_v54 = vsub.f32 1.0, %v1489_v50  ;;  %vm1516_vm15 = vmor %vm1514_vm12, %vm1515_vm9 }
 0x66f   :  { %v1511_v57 = vsub.f32 1.0, %v1510_v51 }
 0x670   :  { %v1491_v58 = vmul.f32 %v4915_v45, %v1490_v54 }
 0x671   :  { %v1512_v59 = vmul.f32 %v4917_v47, %v1511_v57 }
 0x672   :  { %v1492_v52 = vadd.f32 %v4915_v45, %v1491_v58 }
 0x673   :  { %v1513_v60 = vadd.f32 %v4917_v47, %v1512_v59 }
 0x674   :  { %v1496_v48 = vsel %vm1495_vm11, %v4915_v45, %v1492_v52 }
 0x675   :  { %v1501_v2 = vsel %vm1498_vm13, %v1500_v1, %v1496_v48  ;;  %v1517_v3 = vsel %vm1516_vm15, %v4917_v47, %v1513_v60 }
 0x676   :  { %v1549_v20 = vmul.f32 %v4919_v49, %v1501_v2  ;;  %v1522_v19 = vsel %vm1519_vm2, %v1521_v6, %v1517_v3  ;;  %v1637_v3 = vld [vmem:[%s6425_s9 + $0x5] sm:$0x1] }
 0x677   :  { %v1548_v21 = vmul.f32 %v1522_v19, %v5684_v56  ;;  %v1541_v56 = vsel %vm1540_vm6, %v4913_v42, %v1537_v23  ;;  %v1812_v32 = vrot.slane %v1637_v3, 7 }
 0x678   :  { %v1546_v17 = vsel %vm1543_vm7, %v1545_v5, %v1541_v56  ;;  %v1636_v56 = vld [vmem:[%s6425_s9 + $0x1] sm:$0x1] }
 0x679   :  { %v1550_v22 = vadd.f32 %v1549_v20, %v1548_v21  ;;  %v1813_v36 = vsel %vm180_vm0, %v1812_v32, %v1636_v56 }
 0x67b   :  { %4920 = vtanh.f32 %v1550_v22  ;;  %v1561_v31 = vrot.slane %v1550_v22, 1  ;;  %1563 = vst.msk [vmem:[%s6428_s12] sm:$0x1] %vm1557_vm3, %v1550_v22 }
 0x67c   :  { %4922 = vpow2.f32 %v4658_v40 }
 0x67d   :  { %1564 = vst.msk [vmem:[%s6428_s12 + $0x4] sm:$0x1] %vm1557_vm3, %v1561_v31 }
 0x681   :  { %v4921_v9 = vpop.eup %4920 }
 0x682   :  { %v1552_v25 = vmul.f32 %v4921_v9, %v1546_v17  ;;  %v4923_v46 = vpop.eup %4922 }
 0x683   :  { %v1749_v47 = vadd.f32 1.0, %v4923_v46 }
 0x684   :  { %1553 = vst.msk [vmem:[#allocation2 + $0xe] sm:$0x3] %vm355_vm14, %v1552_v25  ;;  %v1555_v29 = vrot.slane %v1552_v25, 1 }
 0x685   :  { %1558 = vst.msk [vmem:[%s6427_s11] sm:$0x1] %vm1557_vm3, %v1552_v25  ;;  %vm1755_vm10 = vweird.f32 %v1749_v47  ;;  %v1761_v21 = vand.u32 2147483648, %v1749_v47  ;;  %v1759_v23 = vand.u32 2147483647, %v1749_v47 }
 0x686   :  { %1559 = vst.msk [vmem:[%s6427_s11 + $0x4] sm:$0x1] %vm1557_vm3, %v1555_v29 }
 0x687   :  { %vm1760_vm15 = vcmp.eq.f32.partialorder %v1759_v23, 8.507059e+37 }
 0x68b   :  { %v1566_v30 = vld [vmem:[#allocation2 + $0x8] sm:$0xff] }
 0x68c   :  { %4653 = vmatmul.msk.f32.gmra.mxu2 %vm96_vm1, %v1566_v30  ;;  %v1762_v30 = vor.u32 1.1754944e-38, %v1761_v21 }
 0x6bd   :  { %v1611_v39 = vpop.permute.xlu2 %1610 }
 0x6be   :  { %1616 = vst.msk [vmem:[#allocation3 + $0x10] sm:$0xff] %vm96_vm1, %v1611_v39 }
 0x6c5   :  { %v1765_v42 = vld [vmem:[#allocation3 + $0x10] sm:$0x3] }
 0x6c6   :  { %v1766_v44 = vadd.f32 %v1765_v42, %v1691_v41 }
 0x6c8   :  { %v4659_v45 = vmul.f32 -1.442695, %v1766_v44 }
 0x6ca   :  { %4924 = vpow2.f32 %v4659_v45 }
 0x6cb   :  { %4926 = vrcp.f32 %v1749_v47 }
 0x6d0   :  { %v4925_v50 = vpop.eup %4924 }
 0x6d1   :  { %v1770_v51 = vadd.f32 1.0, %v4925_v50  ;;  %v4927_v55 = vpop.eup %4926 }
 0x6d2   :  { %v1751_v58 = vmul.f32 %v4927_v55, %v1749_v47  ;;  %vm1756_vm8 = vweird.f32 %v4927_v55 }
 0x6d3   :  { %4928 = vrcp.f32 %v1770_v51  ;;  %v1782_v19 = vand.u32 2147483648, %v1770_v51  ;;  %vm1776_vm11 = vweird.f32 %v1770_v51  ;;  %vm5808_vm12 = vmor %vm1755_vm10, %vm1756_vm8  ;;  %v1780_v24 = vand.u32 2147483647, %v1770_v51 }
 0x6d4   :  { %v1619_v53 = vpop.permute.xlu1 %1618  ;;  %v1627_v54 = vpop.permute.xlu0 %1626  ;;  %v1752_v59 = vsub.f32 1.0, %v1751_v58 }
 0x6d5   :  { %1624 = vst.msk [vmem:[#allocation3 + $0x20] sm:$0xff] %vm96_vm1, %v1619_v53  ;;  %v1783_v29 = vor.u32 1.1754944e-38, %v1782_v19  ;;  %vm1781_vm2 = vcmp.eq.f32.partialorder %v1780_v24, 8.507059e+37 }
 0x6d6   :  { %1632 = vst.msk [vmem:[#allocation3 + $0x30] sm:$0xff] %vm96_vm1, %v1627_v54  ;;  %v1753_v2 = vmul.f32 %v4927_v55, %v1752_v59 }
 0x6d8   :  { %v1754_v15 = vadd.f32 %v4927_v55, %v1753_v2 }
 0x6d9   :  { %v4929_v57 = vpop.eup %4928 }
 0x6da   :  { %v1772_v61 = vmul.f32 %v4929_v57, %v1770_v51  ;;  %vm1777_vm9 = vweird.f32 %v4929_v57  ;;  %v1758_v5 = vsel %vm5808_vm12, %v4927_v55, %v1754_v15 }
 0x6db   :  { %vm1778_vm13 = vmor %vm1776_vm11, %vm1777_vm9  ;;  %v1763_v34 = vsel %vm1760_vm15, %v1762_v30, %v1758_v5 }
 0x6dc   :  { %v1773_v63 = vsub.f32 1.0, %v1772_v61  ;;  %v1786_v52 = vld [vmem:[#allocation3 + $0x20] sm:$0x3] }
 0x6dd   :  { %v1789_v1 = vld [vmem:[#allocation3 + $0x30] sm:$0x3]  ;;  %v1787_v48 = vadd.f32 %v1786_v52, %v1716_v0 }
 0x6de   :  { %v1790_v60 = vadd.f32 %v1789_v1, %v1741_v62  ;;  %v1774_v49 = vmul.f32 %v4929_v57, %v1773_v63  ;;  %v1965_v63 = vld [vmem:[#allocation3 + $0x32] sm:$0x3] }
 0x6e0   :  { %v4660_v6 = vmul.f32 -1.442695, %v1790_v60  ;;  %v1775_v20 = vadd.f32 %v4929_v57, %v1774_v49 }
 0x6e2   :  { %4930 = vpow2.f32 %v4660_v6  ;;  %v1779_v9 = vsel %vm1778_vm13, %v4929_v57, %v1775_v20  ;;  %v1962_v20 = vld [vmem:[#allocation3 + $0x22] sm:$0x3] }
 0x6e3   :  { %4932 = vtanh.f32 %v1787_v48  ;;  %v1784_v35 = vsel %vm1781_vm2, %v1783_v29, %v1779_v9 }
 0x6e4   :  { %v1815_v40 = vmul.f32 %v1813_v36, %v1784_v35 }
 0x6e8   :  { %v4931_v31 = vpop.eup %4930 }
 0x6e9   :  { %v1794_v17 = vadd.f32 1.0, %v4931_v31  ;;  %v4933_v25 = vpop.eup %4932 }
 0x6ea   :  { %v1816_v39 = vmul.f32 %v4933_v25, %v1763_v34 }
 0x6eb   :  { %4934 = vrcp.f32 %v1794_v17  ;;  %v1806_v46 = vand.u32 2147483648, %v1794_v17  ;;  %v1804_v50 = vand.u32 2147483647, %v1794_v17  ;;  %vm1800_vm5 = vweird.f32 %v1794_v17 }
 0x6ec   :  { %v5818_v42 = vadd.f32 %v1816_v39, %v1815_v40 }
 0x6ed   :  { %v1807_v53 = vor.u32 1.1754944e-38, %v1806_v46  ;;  %vm1805_vm7 = vcmp.eq.f32.partialorder %v1804_v50, 8.507059e+37 }
 0x6ee   :  { %4936 = vtanh.f32 %v5818_v42 }
 0x6f1   :  { %v4935_v41 = vpop.eup %4934 }
 0x6f2   :  { %v1796_v44 = vmul.f32 %v4935_v41, %v1794_v17  ;;  %vm1801_vm4 = vweird.f32 %v4935_v41 }
 0x6f3   :  { %vm1802_vm6 = vmor %vm1800_vm5, %vm1801_vm4 }
 0x6f4   :  { %v1797_v45 = vsub.f32 1.0, %v1796_v44  ;;  %v4937_v55 = vpop.eup %4936 }
 0x6f6   :  { %v1798_v47 = vmul.f32 %v4935_v41, %v1797_v45 }
 0x6f8   :  { %v1799_v51 = vadd.f32 %v4935_v41, %v1798_v47 }
 0x6fa   :  { %v1803_v54 = vsel %vm1802_vm6, %v4935_v41, %v1799_v51 }
 0x6fb   :  { %v1808_v57 = vsel %vm1805_vm7, %v1807_v53, %v1803_v54 }
 0x6fc   :  { %v1819_v58 = vmul.f32 %v4937_v55, %v1808_v57 }
 0x6fe   :  { %1820 = vst.msk [vmem:[#allocation2] sm:$0x3] %vm355_vm14, %v1819_v58  ;;  %4661 = vmatmul.msk.f32.vlgmr.msrb.gmra.mxu0 %vm96_vm1, %v1819_v58  ;;  %4662 = vmatmul.msk.f32.vlgmr.msra.gmra.mxu1 %vm96_vm1, %v1819_v58 }
 0x6ff   :  { %4663 = vmatmul.msk.f32.vlgmr.msra.gmra.mxu2 %vm96_vm1, %v1819_v58  ;;  %4664 = vmatmul.msk.f32.vlgmr.msrb.gmra.mxu3 %vm96_vm1, %v1819_v58 }
 0x700   :  { %2182 = vmatpush.msrb.mxu0 %v5655_v10  ;;  %2206 = vmatpush.msra.mxu1 %v5664_v28 }
 0x701   :  { %2230 = vmatpush.msra.mxu2 %v5727_v13  ;;  %2254 = vmatpush.msrb.mxu3 %v5716_v4 }
 0x702   :  { %2183 = vmatpush.msrb.mxu0 %v5657_v11  ;;  %2207 = vmatpush.msra.mxu1 %v5668_v33  ;;  %v1920_v33 = vld [vmem:[#allocation3 + $0x2] sm:$0x3] }
 0x703   :  { %2231 = vmatpush.msra.mxu2 %v5732_v14  ;;  %2255 = vmatpush.msrb.mxu3 %v5719_v7 }
 0x704   :  { %2184 = vmatpush.msrb.mxu0 %v5662_v27  ;;  %2208 = vmatpush.msra.mxu1 %v5672_v38  ;;  %v1941_v38 = vld [vmem:[#allocation3 + $0x12] sm:$0x3] }
 0x705   :  { %2232 = vmatpush.msra.mxu2 %v5737_v16  ;;  %2256 = vmatpush.msrb.mxu3 %v5722_v8 }
 0x706   :  { %2185 = vmatpush.msrb.mxu0 %v5670_v37  ;;  %2209 = vmatpush.msra.mxu1 %v5676_v43 }
 0x707   :  { %2233 = vmatpush.msra.mxu2 %v5742_v18  ;;  %2257 = vmatpush.msrb.mxu3 %v5725_v12 }
 0x70f   :  { %v1603_v10 = vpop.f32.mrf.mxu2 }
 0x710   :  { %v1604_v11 = vadd.f32 %v5769_v26, %v1603_v10 }
 0x712   :  { %1607 = vst.msk [vmem:[#allocation3 + $0x8] sm:$0xff] %vm96_vm1, %v1604_v11  ;;  %1620 = vrot.lane.b32.xlu1 %v1604_v11, %s5263_s27  ;;  %1628 = vrot.lane.b32.xlu0 %v1604_v11, %s5261_s25 }
 0x713   :  { %1612 = vrot.lane.b32.xlu2 %v1604_v11, %s5262_s26 }
 0x76d   :  { %v1613_v27 = vpop.permute.xlu2 %1612 }
 0x76e   :  { %1617 = vst.msk [vmem:[#allocation3 + $0x18] sm:$0xff] %vm96_vm1, %v1613_v27 }
 0x77b   :  { %v1845_v28 = vpop.f32.mrf.mxu0  ;;  %v1869_v37 = vpop.f32.mrf.mxu1 }
 0x77c   :  { %v1921_v43 = vadd.f32 %v1920_v33, %v1845_v28  ;;  %v1942_v61 = vadd.f32 %v1941_v38, %v1869_v37 }
 0x77e   :  { %v4665_v62 = vmul.f32 -1.442695, %v1921_v43  ;;  %v4666_v59 = vmul.f32 -1.442695, %v1942_v61  ;;  %v2091_v43 = vld [vmem:[#allocation3 + $0x4] sm:$0x3] }
 0x780   :  { %4938 = vpow2.f32 %v4665_v62  ;;  %v2112_v62 = vld [vmem:[#allocation3 + $0x14] sm:$0x3] }
 0x781   :  { %4940 = vpow2.f32 %v4666_v59 }
 0x782   :  { %v1917_v26 = vpop.f32.mrf.mxu3  ;;  %v1893_v3 = vpop.f32.mrf.mxu2 }
 0x783   :  { %v1966_v0 = vadd.f32 %v1965_v63, %v1917_v26  ;;  %v1963_v22 = vadd.f32 %v1962_v20, %v1893_v3 }
 0x784   :  { %v1621_v52 = vpop.permute.xlu1 %1620  ;;  %v1629_v1 = vpop.permute.xlu0 %1628 }
 0x785   :  { %1625 = vst.msk [vmem:[#allocation3 + $0x28] sm:$0xff] %vm96_vm1, %v1621_v52  ;;  %v4667_v60 = vmul.f32 -1.442695, %v1966_v0 }
 0x786   :  { %1633 = vst.msk [vmem:[#allocation3 + $0x38] sm:$0xff] %vm96_vm1, %v1629_v1  ;;  %v4939_v48 = vpop.eup %4938 }
 0x787   :  { %v4941_v6 = vpop.eup %4940  ;;  %v1925_v49 = vadd.f32 1.0, %v4939_v48  ;;  %4942 = vpow2.f32 %v4667_v60  ;;  %v2133_v60 = vld [vmem:[#allocation3 + $0x24] sm:$0x3] }
 0x788   :  { %v1946_v2 = vadd.f32 1.0, %v4941_v6 }
 0x789   :  { %4944 = vrcp.f32 %v1925_v49  ;;  %v1937_v5 = vand.u32 2147483648, %v1925_v49  ;;  %v1935_v25 = vand.u32 2147483647, %v1925_v49  ;;  %vm1931_vm10 = vweird.f32 %v1925_v49 }
 0x78a   :  { %4946 = vrcp.f32 %v1946_v2  ;;  %v1958_v9 = vand.u32 2147483648, %v1946_v2  ;;  %v1956_v30 = vand.u32 2147483647, %v1946_v2  ;;  %vm1952_vm11 = vweird.f32 %v1946_v2 }
 0x78b   :  { %v1938_v36 = vor.u32 1.1754944e-38, %v1937_v5  ;;  %vm1936_vm15 = vcmp.eq.f32.partialorder %v1935_v25, 8.507059e+37 }
 0x78c   :  { %v1959_v41 = vor.u32 1.1754944e-38, %v1958_v9  ;;  %vm1957_vm2 = vcmp.eq.f32.partialorder %v1956_v30, 8.507059e+37 }
 0x78d   :  { %v4943_v15 = vpop.eup %4942 }
 0x78e   :  { %v1970_v19 = vadd.f32 1.0, %v4943_v15 }
 0x78f   :  { %v4945_v21 = vpop.eup %4944 }
 0x790   :  { %v4947_v23 = vpop.eup %4946  ;;  %v1927_v24 = vmul.f32 %v4945_v21, %v1925_v49  ;;  %4948 = vrcp.f32 %v1970_v19  ;;  %vm1932_vm8 = vweird.f32 %v4945_v21  ;;  %v1982_v10 = vand.u32 2147483648, %v1970_v19 }
 0x791   :  { %v1948_v31 = vmul.f32 %v4947_v23, %v1946_v2  ;;  %4950 = vtanh.f32 %v1963_v22  ;;  %vm1953_vm9 = vweird.f32 %v4947_v23  ;;  %vm1933_vm12 = vmor %vm1931_vm10, %vm1932_vm8  ;;  %vm1976_vm5 = vweird.f32 %v1970_v19 }
 0x792   :  { %v1928_v32 = vsub.f32 1.0, %v1927_v24  ;;  %vm1954_vm13 = vmor %vm1952_vm11, %vm1953_vm9  ;;  %v1980_v11 = vand.u32 2147483647, %v1970_v19  ;;  %v1983_v28 = vor.u32 1.1754944e-38, %v1982_v10 }
 0x793   :  { %v1949_v56 = vsub.f32 1.0, %v1948_v31 }
 0x794   :  { %v1929_v17 = vmul.f32 %v4945_v21, %v1928_v32  ;;  %vm1981_vm7 = vcmp.eq.f32.partialorder %v1980_v11, 8.507059e+37  ;;  %v2262_v11 = vld [vmem:[#allocation3 + $0x6] sm:$0x3] }
 0x795   :  { %v1950_v29 = vmul.f32 %v4947_v23, %v1949_v56 }
 0x796   :  { %v4949_v34 = vpop.eup %4948  ;;  %v1930_v35 = vadd.f32 %v4945_v21, %v1929_v17 }
 0x797   :  { %v1951_v39 = vadd.f32 %v4947_v23, %v1950_v29  ;;  %v1972_v40 = vmul.f32 %v4949_v34, %v1970_v19  ;;  %v4951_v45 = vpop.eup %4950  ;;  %vm1977_vm4 = vweird.f32 %v4949_v34 }
 0x798   :  { %v1934_v44 = vsel %vm1933_vm12, %v4945_v21, %v1930_v35  ;;  %vm1978_vm6 = vmor %vm1976_vm5, %vm1977_vm4 }
 0x799   :  { %v1939_v46 = vsel %vm1936_vm15, %v1938_v36, %v1934_v44  ;;  %v1955_v47 = vsel %vm1954_vm13, %v4947_v23, %v1951_v39  ;;  %v1973_v50 = vsub.f32 1.0, %v1972_v40 }
 0x79a   :  { %v1960_v51 = vsel %vm1957_vm2, %v1959_v41, %v1955_v47  ;;  %v1987_v53 = vmul.f32 %v4951_v45, %v1939_v46 }
 0x79b   :  { %v1986_v54 = vmul.f32 %v1960_v51, %v5818_v42  ;;  %v1974_v55 = vmul.f32 %v4949_v34, %v1973_v50 }
 0x79d   :  { %v5851_v57 = vadd.f32 %v1987_v53, %v1986_v54  ;;  %v1975_v58 = vadd.f32 %v4949_v34, %v1974_v55 }
 0x79f   :  { %4952 = vtanh.f32 %v5851_v57  ;;  %v1979_v27 = vsel %vm1978_vm6, %v4949_v34, %v1975_v58 }
 0x7a0   :  { %v1984_v37 = vsel %vm1981_vm7, %v1983_v28, %v1979_v27  ;;  %v2283_v28 = vld [vmem:[#allocation3 + $0x16] sm:$0x3] }
 0x7a5   :  { %v4953_v33 = vpop.eup %4952 }
 0x7a6   :  { %v1990_v38 = vmul.f32 %v4953_v33, %v1984_v37 }
 0x7a8   :  { %1991 = vst.msk [vmem:[#allocation2 + $0x2] sm:$0x3] %vm355_vm14, %v1990_v38  ;;  %4668 = vmatmul.msk.f32.vlgmr.msra.gmra.mxu0 %vm96_vm1, %v1990_v38  ;;  %4669 = vmatmul.msk.f32.vlgmr.msrb.gmra.mxu1 %vm96_vm1, %v1990_v38 }
 0x7a9   :  { %4670 = vmatmul.msk.f32.vlgmr.msrb.gmra.mxu2 %vm96_vm1, %v1990_v38  ;;  %4671 = vmatmul.msk.f32.vlgmr.msra.gmra.mxu3 %vm96_vm1, %v1990_v38 }
 0x7aa   :  { %2401 = vmatpush.msrb.mxu2 %v5727_v13  ;;  %2425 = vmatpush.msra.mxu3 %v5716_v4 }
 0x7ac   :  { %2402 = vmatpush.msrb.mxu2 %v5732_v14  ;;  %2426 = vmatpush.msra.mxu3 %v5719_v7  ;;  %v2136_v7 = vld [vmem:[#allocation3 + $0x34] sm:$0x3] }
 0x7ae   :  { %2403 = vmatpush.msrb.mxu2 %v5737_v16  ;;  %2427 = vmatpush.msra.mxu3 %v5722_v8 }
 0x7b0   :  { %2404 = vmatpush.msrb.mxu2 %v5742_v18  ;;  %2428 = vmatpush.msra.mxu3 %v5725_v12 }
 0x825   :  { %v2016_v42 = vpop.f32.mrf.mxu0  ;;  %v2040_v61 = vpop.f32.mrf.mxu1 }
 0x826   :  { %v2092_v59 = vadd.f32 %v2091_v43, %v2016_v42  ;;  %v2113_v13 = vadd.f32 %v2112_v62, %v2040_v61  ;;  %v5876_v43 = vld [vmem:[#allocation8 + $0x98] sm:$0xff]  ;;  %v5880_v62 = vld [vmem:[#allocation8 + $0x90] sm:$0xff] }
 0x827   :  { %v5878_v61 = vld [vmem:[#allocation8 + $0xb8] sm:$0xff]  ;;  %2353 = vmatpush.msra.mxu0 %v5876_v43 }
 0x828   :  { %v4672_v26 = vmul.f32 -1.442695, %v2092_v59  ;;  %v4673_v4 = vmul.f32 -1.442695, %v2113_v13  ;;  %2377 = vmatpush.msrb.mxu1 %v5878_v61  ;;  %v5884_v59 = vld [vmem:[#allocation8 + $0xb0] sm:$0xff]  ;;  %v5886_v13 = vld [vmem:[#allocation8 + $0x88] sm:$0xff] }
 0x829   :  { %2354 = vmatpush.msra.mxu0 %v5880_v62 }
 0x82a   :  { %4954 = vpow2.f32 %v4672_v26  ;;  %v5888_v26 = vld [vmem:[#allocation8 + $0xa8] sm:$0xff]  ;;  %2378 = vmatpush.msrb.mxu1 %v5884_v59 }
 0x82b   :  { %4956 = vpow2.f32 %v4673_v4  ;;  %2355 = vmatpush.msra.mxu0 %v5886_v13 }
 0x82c   :  { %v2088_v14 = vpop.f32.mrf.mxu3  ;;  %v2064_v12 = vpop.f32.mrf.mxu2  ;;  %2379 = vmatpush.msrb.mxu1 %v5888_v26 }
 0x82d   :  { %v2137_v63 = vadd.f32 %v2136_v7, %v2088_v14  ;;  %v2134_v49 = vadd.f32 %v2133_v60, %v2064_v12  ;;  %v2307_v14 = vld [vmem:[#allocation3 + $0x36] sm:$0x3] }
 0x82f   :  { %v4674_v16 = vmul.f32 -1.442695, %v2137_v63  ;;  %v5892_v63 = vld [vmem:[#allocation8 + $0x80] sm:$0xff] }
 0x830   :  { %v4955_v0 = vpop.eup %4954  ;;  %2356 = vmatpush.msra.mxu0 %v5892_v63 }
 0x831   :  { %v4957_v8 = vpop.eup %4956  ;;  %v2096_v52 = vadd.f32 1.0, %v4955_v0  ;;  %4958 = vpow2.f32 %v4674_v16  ;;  %v5894_v16 = vld [vmem:[#allocation8 + $0xa0] sm:$0xff] }
 0x832   :  { %v2117_v18 = vadd.f32 1.0, %v4957_v8  ;;  %2380 = vmatpush.msrb.mxu1 %v5894_v16 }
 0x833   :  { %4960 = vrcp.f32 %v2096_v52  ;;  %v2108_v21 = vand.u32 2147483648, %v2096_v52  ;;  %v2106_v24 = vand.u32 2147483647, %v2096_v52  ;;  %vm2102_vm10 = vweird.f32 %v2096_v52 }
 0x834   :  { %4962 = vrcp.f32 %v2117_v18  ;;  %v2129_v22 = vand.u32 2147483648, %v2117_v18  ;;  %v2127_v32 = vand.u32 2147483647, %v2117_v18  ;;  %vm2123_vm11 = vweird.f32 %v2117_v18 }
 0x835   :  { %v2109_v9 = vor.u32 1.1754944e-38, %v2108_v21  ;;  %vm2107_vm15 = vcmp.eq.f32.partialorder %v2106_v24, 8.507059e+37 }
 0x836   :  { %v2130_v29 = vor.u32 1.1754944e-38, %v2129_v22  ;;  %vm2128_vm2 = vcmp.eq.f32.partialorder %v2127_v32, 8.507059e+37 }
 0x837   :  { %v4959_v1 = vpop.eup %4958 }
 0x838   :  { %v2141_v48 = vadd.f32 1.0, %v4959_v1 }
 0x839   :  { %v4961_v6 = vpop.eup %4960 }
 0x83a   :  { %v4963_v2 = vpop.eup %4962  ;;  %v2098_v3 = vmul.f32 %v4961_v6, %v2096_v52  ;;  %4964 = vrcp.f32 %v2141_v48  ;;  %vm2103_vm8 = vweird.f32 %v4961_v6  ;;  %v2153_v50 = vand.u32 2147483648, %v2141_v48 }
 0x83b   :  { %v2119_v15 = vmul.f32 %v4963_v2, %v2117_v18  ;;  %4966 = vtanh.f32 %v2134_v49  ;;  %vm2124_vm9 = vweird.f32 %v4963_v2  ;;  %vm2104_vm12 = vmor %vm2102_vm10, %vm2103_vm8  ;;  %vm2147_vm5 = vweird.f32 %v2141_v48 }
 0x83c   :  { %v2099_v20 = vsub.f32 1.0, %v2098_v3  ;;  %vm2125_vm13 = vmor %vm2123_vm11, %vm2124_vm9  ;;  %v2151_v51 = vand.u32 2147483647, %v2141_v48  ;;  %v2154_v54 = vor.u32 1.1754944e-38, %v2153_v50 }
 0x83d   :  { %v2120_v19 = vsub.f32 1.0, %v2119_v15 }
 0x83e   :  { %v2100_v23 = vmul.f32 %v4961_v6, %v2099_v20  ;;  %vm2152_vm7 = vcmp.eq.f32.partialorder %v2151_v51, 8.507059e+37 }
 0x83f   :  { %v2121_v31 = vmul.f32 %v4963_v2, %v2120_v19 }
 0x840   :  { %v4965_v56 = vpop.eup %4964  ;;  %v2101_v5 = vadd.f32 %v4961_v6, %v2100_v23 }
 0x841   :  { %v2122_v17 = vadd.f32 %v4963_v2, %v2121_v31  ;;  %v2143_v25 = vmul.f32 %v4965_v56, %v2141_v48  ;;  %v4967_v34 = vpop.eup %4966  ;;  %vm2148_vm4 = vweird.f32 %v4965_v56  ;;  %v2304_v48 = vld [vmem:[#allocation3 + $0x26] sm:$0x3] }
 0x842   :  { %v2105_v30 = vsel %vm2104_vm12, %v4961_v6, %v2101_v5  ;;  %vm2149_vm6 = vmor %vm2147_vm5, %vm2148_vm4 }
 0x843   :  { %v2110_v35 = vsel %vm2107_vm15, %v2109_v9, %v2105_v30  ;;  %v2126_v36 = vsel %vm2125_vm13, %v4963_v2, %v2122_v17  ;;  %v2144_v39 = vsub.f32 1.0, %v2143_v25 }
 0x844   :  { %v2131_v40 = vsel %vm2128_vm2, %v2130_v29, %v2126_v36  ;;  %v2158_v41 = vmul.f32 %v4967_v34, %v2110_v35 }
 0x845   :  { %v2157_v44 = vmul.f32 %v2131_v40, %v5851_v57  ;;  %v2145_v45 = vmul.f32 %v4965_v56, %v2144_v39 }
 0x847   :  { %v5868_v46 = vadd.f32 %v2158_v41, %v2157_v44  ;;  %v2146_v47 = vadd.f32 %v4965_v56, %v2145_v45 }
 0x849   :  { %4968 = vtanh.f32 %v5868_v46  ;;  %v2150_v53 = vsel %vm2149_vm6, %v4965_v56, %v2146_v47 }
 0x84a   :  { %v2155_v58 = vsel %vm2152_vm7, %v2154_v54, %v2150_v53 }
 0x84f   :  { %v4969_v55 = vpop.eup %4968 }
 0x850   :  { %v2161_v10 = vmul.f32 %v4969_v55, %v2155_v58 }
 0x852   :  { %2162 = vst.msk [vmem:[#allocation2 + $0x4] sm:$0x3] %vm355_vm14, %v2161_v10  ;;  %4675 = vmatmul.msk.f32.vlgmr.msrb.gmra.mxu0 %vm96_vm1, %v2161_v10  ;;  %4676 = vmatmul.msk.f32.vlgmr.msra.gmra.mxu1 %vm96_vm1, %v2161_v10 }
 0x853   :  { %4677 = vmatmul.msk.f32.vlgmr.msra.gmra.mxu2 %vm96_vm1, %v2161_v10  ;;  %4678 = vmatmul.msk.f32.vlgmr.msrb.gmra.mxu3 %vm96_vm1, %v2161_v10 }
 0x854   :  { %2524 = vmatpush.msrb.mxu0 %v5876_v43  ;;  %2548 = vmatpush.msra.mxu1 %v5878_v61 }
 0x856   :  { %2525 = vmatpush.msrb.mxu0 %v5880_v62  ;;  %2549 = vmatpush.msra.mxu1 %v5884_v59 }
 0x858   :  { %2526 = vmatpush.msrb.mxu0 %v5886_v13  ;;  %2550 = vmatpush.msra.mxu1 %v5888_v26 }
 0x85a   :  { %2527 = vmatpush.msrb.mxu0 %v5892_v63  ;;  %2551 = vmatpush.msra.mxu1 %v5894_v16 }
 0x8cf   :  { %v2187_v57 = vpop.f32.mrf.mxu0  ;;  %v2211_v27 = vpop.f32.mrf.mxu1 }
 0x8d0   :  { %v2263_v33 = vadd.f32 %v2262_v11, %v2187_v57  ;;  %v2284_v37 = vadd.f32 %v2283_v28, %v2211_v27  ;;  %v2433_v27 = vld [vmem:[#allocation3 + $0x8] sm:$0x3] }
 0x8d2   :  { %v4679_v38 = vmul.f32 -1.442695, %v2263_v33  ;;  %v4680_v42 = vmul.f32 -1.442695, %v2284_v37  ;;  %v2454_v33 = vld [vmem:[#allocation3 + $0x18] sm:$0x3] }
 0x8d4   :  { %4970 = vpow2.f32 %v4679_v38 }
 0x8d5   :  { %4972 = vpow2.f32 %v4680_v42 }
 0x8d6   :  { %v2259_v4 = vpop.f32.mrf.mxu3  ;;  %v2235_v1 = vpop.f32.mrf.mxu2 }
 0x8d7   :  { %v2308_v7 = vadd.f32 %v2307_v14, %v2259_v4  ;;  %v2305_v2 = vadd.f32 %v2304_v48, %v2235_v1  ;;  %v5925_v14 = vld [vmem:[#allocation8 + $0xd8] sm:$0xff]  ;;  %v5941_v48 = vld [vmem:[#allocation8 + $0xc0] sm:$0xff] }
 0x8d8   :  { %2572 = vmatpush.msra.mxu2 %v5925_v14  ;;  %v2478_v1 = vld [vmem:[#allocation3 + $0x38] sm:$0x3] }
 0x8d9   :  { %v4681_v0 = vmul.f32 -1.442695, %v2308_v7  ;;  %v5927_v7 = vld [vmem:[#allocation8 + $0xf8] sm:$0xff] }
 0x8da   :  { %v4971_v8 = vpop.eup %4970  ;;  %2596 = vmatpush.msrb.mxu3 %v5927_v7 }
 0x8db   :  { %v4973_v52 = vpop.eup %4972  ;;  %v2267_v18 = vadd.f32 1.0, %v4971_v8  ;;  %4974 = vpow2.f32 %v4681_v0  ;;  %v5929_v0 = vld [vmem:[#allocation8 + $0xd0] sm:$0xff] }
 0x8dc   :  { %v2288_v12 = vadd.f32 1.0, %v4973_v52  ;;  %v5933_v8 = vld [vmem:[#allocation8 + $0xf0] sm:$0xff]  ;;  %v5935_v52 = vld [vmem:[#allocation8 + $0xc8] sm:$0xff]  ;;  %2573 = vmatpush.msra.mxu2 %v5929_v0 }
 0x8dd   :  { %4976 = vrcp.f32 %v2267_v18  ;;  %v2279_v22 = vand.u32 2147483648, %v2267_v18  ;;  %v2277_v31 = vand.u32 2147483647, %v2267_v18  ;;  %vm2273_vm10 = vweird.f32 %v2267_v18  ;;  %2597 = vmatpush.msrb.mxu3 %v5933_v8 }
 0x8de   :  { %4978 = vrcp.f32 %v2288_v12  ;;  %v2300_v23 = vand.u32 2147483648, %v2288_v12  ;;  %v2298_v56 = vand.u32 2147483647, %v2288_v12  ;;  %vm2294_vm11 = vweird.f32 %v2288_v12  ;;  %2574 = vmatpush.msra.mxu2 %v5935_v52 }
 0x8df   :  { %v2280_v17 = vor.u32 1.1754944e-38, %v2279_v22  ;;  %vm2278_vm15 = vcmp.eq.f32.partialorder %v2277_v31, 8.507059e+37  ;;  %v2475_v22 = vld [vmem:[#allocation3 + $0x28] sm:$0x3] }
 0x8e0   :  { %v2301_v30 = vor.u32 1.1754944e-38, %v2300_v23  ;;  %vm2299_vm2 = vcmp.eq.f32.partialorder %v2298_v56, 8.507059e+37  ;;  %2575 = vmatpush.msra.mxu2 %v5941_v48 }
 0x8e1   :  { %v4975_v60 = vpop.eup %4974 }
 0x8e2   :  { %v2312_v6 = vadd.f32 1.0, %v4975_v60 }
 0x8e3   :  { %v4977_v49 = vpop.eup %4976 }
 0x8e4   :  { %v4979_v3 = vpop.eup %4978  ;;  %v2269_v15 = vmul.f32 %v4977_v49, %v2267_v18  ;;  %4980 = vrcp.f32 %v2312_v6  ;;  %vm2274_vm8 = vweird.f32 %v4977_v49  ;;  %v2324_v53 = vand.u32 2147483648, %v2312_v6  ;;  %v5937_v18 = vld [vmem:[#allocation8 + $0xe8] sm:$0xff] }
 0x8e5   :  { %v2290_v20 = vmul.f32 %v4979_v3, %v2288_v12  ;;  %4982 = vtanh.f32 %v2305_v2  ;;  %vm2295_vm9 = vweird.f32 %v4979_v3  ;;  %vm2275_vm12 = vmor %vm2273_vm10, %vm2274_vm8  ;;  %vm2318_vm5 = vweird.f32 %v2312_v6  ;;  %2598 = vmatpush.msrb.mxu3 %v5937_v18 }
 0x8e6   :  { %v2270_v19 = vsub.f32 1.0, %v2269_v15  ;;  %vm2296_vm13 = vmor %vm2294_vm11, %vm2295_vm9  ;;  %v2322_v54 = vand.u32 2147483647, %v2312_v6  ;;  %v2325_v58 = vor.u32 1.1754944e-38, %v2324_v53 }
 0x8e7   :  { %v2291_v21 = vsub.f32 1.0, %v2290_v20 }
 0x8e8   :  { %v2271_v24 = vmul.f32 %v4977_v49, %v2270_v19  ;;  %vm2323_vm7 = vcmp.eq.f32.partialorder %v2322_v54, 8.507059e+37 }
 0x8e9   :  { %v2292_v32 = vmul.f32 %v4979_v3, %v2291_v21 }
 0x8ea   :  { %v4981_v5 = vpop.eup %4980  ;;  %v2272_v9 = vadd.f32 %v4977_v49, %v2271_v24 }
 0x8eb   :  { %v2293_v25 = vadd.f32 %v4979_v3, %v2292_v32  ;;  %v2314_v29 = vmul.f32 %v4981_v5, %v2312_v6  ;;  %v4983_v35 = vpop.eup %4982  ;;  %vm2319_vm4 = vweird.f32 %v4981_v5  ;;  %v5943_v6 = vld [vmem:[#allocation8 + $0xe0] sm:$0xff] }
 0x8ec   :  { %v2276_v34 = vsel %vm2275_vm12, %v4977_v49, %v2272_v9  ;;  %vm2320_vm6 = vmor %vm2318_vm5, %vm2319_vm4  ;;  %2599 = vmatpush.msrb.mxu3 %v5943_v6 }
 0x8ed   :  { %v2281_v36 = vsel %vm2278_vm15, %v2280_v17, %v2276_v34  ;;  %v2297_v39 = vsel %vm2296_vm13, %v4979_v3, %v2293_v25  ;;  %v2315_v40 = vsub.f32 1.0, %v2314_v29 }
 0x8ee   :  { %v2302_v41 = vsel %vm2299_vm2, %v2301_v30, %v2297_v39  ;;  %v2329_v44 = vmul.f32 %v4983_v35, %v2281_v36 }
 0x8ef   :  { %v2328_v45 = vmul.f32 %v2302_v41, %v5868_v46  ;;  %v2316_v47 = vmul.f32 %v4981_v5, %v2315_v40 }
 0x8f1   :  { %v5909_v50 = vadd.f32 %v2329_v44, %v2328_v45  ;;  %v2317_v51 = vadd.f32 %v4981_v5, %v2316_v47 }
 0x8f3   :  { %4984 = vtanh.f32 %v5909_v50  ;;  %v2321_v55 = vsel %vm2320_vm6, %v4981_v5, %v2317_v51 }
 0x8f4   :  { %v2326_v57 = vsel %vm2323_vm7, %v2325_v58, %v2321_v55 }
 0x8f9   :  { %v4985_v10 = vpop.eup %4984 }
 0x8fa   :  { %v2332_v11 = vmul.f32 %v4985_v10, %v2326_v57 }
 0x8fc   :  { %2333 = vst.msk [vmem:[#allocation2 + $0x6] sm:$0x3] %vm355_vm14, %v2332_v11  ;;  %4682 = vmatmul.msk.f32.vlgmr.msra.gmra.mxu0 %vm96_vm1, %v2332_v11  ;;  %4683 = vmatmul.msk.f32.vlgmr.msrb.gmra.mxu1 %vm96_vm1, %v2332_v11 }
 0x8fd   :  { %4684 = vmatmul.msk.f32.vlgmr.msrb.gmra.mxu2 %vm96_vm1, %v2332_v11  ;;  %4685 = vmatmul.msk.f32.vlgmr.msra.gmra.mxu3 %vm96_vm1, %v2332_v11 }
 0x8fe   :  { %2695 = vmatpush.msra.mxu0 %v5876_v43  ;;  %2719 = vmatpush.msrb.mxu1 %v5878_v61 }
 0x8ff   :  { %2743 = vmatpush.msrb.mxu2 %v5925_v14  ;;  %2767 = vmatpush.msra.mxu3 %v5927_v7 }
 0x900   :  { %2696 = vmatpush.msra.mxu0 %v5880_v62  ;;  %2720 = vmatpush.msrb.mxu1 %v5884_v59 }
 0x901   :  { %2744 = vmatpush.msrb.mxu2 %v5929_v0  ;;  %2768 = vmatpush.msra.mxu3 %v5933_v8 }
 0x902   :  { %2697 = vmatpush.msra.mxu0 %v5886_v13  ;;  %2721 = vmatpush.msrb.mxu1 %v5888_v26 }
 0x903   :  { %2745 = vmatpush.msrb.mxu2 %v5935_v52  ;;  %2769 = vmatpush.msra.mxu3 %v5937_v18 }
 0x904   :  { %2698 = vmatpush.msra.mxu0 %v5892_v63  ;;  %2722 = vmatpush.msrb.mxu1 %v5894_v16 }
 0x905   :  { %2746 = vmatpush.msrb.mxu2 %v5941_v48  ;;  %2770 = vmatpush.msra.mxu3 %v5943_v6 }
 0x979   :  { %v2358_v46 = vpop.f32.mrf.mxu0  ;;  %v2382_v28 = vpop.f32.mrf.mxu1 }
 0x97a   :  { %v2434_v37 = vadd.f32 %v2433_v27, %v2358_v46  ;;  %v2455_v38 = vadd.f32 %v2454_v33, %v2382_v28 }
 0x97c   :  { %v4686_v42 = vmul.f32 -1.442695, %v2434_v37  ;;  %v4687_v4 = vmul.f32 -1.442695, %v2455_v38 }
 0x97e   :  { %4986 = vpow2.f32 %v4686_v42 }
 0x97f   :  { %4988 = vpow2.f32 %v4687_v4 }
 0x980   :  { %v2430_v12 = vpop.f32.mrf.mxu3  ;;  %v2406_v19 = vpop.f32.mrf.mxu2 }
 0x981   :  { %v2479_v60 = vadd.f32 %v2478_v1, %v2430_v12  ;;  %v2476_v31 = vadd.f32 %v2475_v22, %v2406_v19 }
 0x983   :  { %v4688_v49 = vmul.f32 -1.442695, %v2479_v60 }
 0x984   :  { %v4987_v2 = vpop.eup %4986 }
 0x985   :  { %v4989_v3 = vpop.eup %4988  ;;  %v2438_v15 = vadd.f32 1.0, %v4987_v2  ;;  %4990 = vpow2.f32 %v4688_v49  ;;  %v2646_v49 = vld [vmem:[#allocation3 + $0x2a] sm:$0x3] }
 0x986   :  { %v2459_v20 = vadd.f32 1.0, %v4989_v3 }
 0x987   :  { %4992 = vrcp.f32 %v2438_v15  ;;  %v2450_v25 = vand.u32 2147483648, %v2438_v15  ;;  %v2448_v34 = vand.u32 2147483647, %v2438_v15  ;;  %vm2444_vm10 = vweird.f32 %v2438_v15 }
 0x988   :  { %4994 = vrcp.f32 %v2459_v20  ;;  %v2471_v29 = vand.u32 2147483648, %v2459_v20  ;;  %v2469_v36 = vand.u32 2147483647, %v2459_v20  ;;  %vm2465_vm11 = vweird.f32 %v2459_v20 }
 0x989   :  { %v2451_v41 = vor.u32 1.1754944e-38, %v2450_v25  ;;  %vm2449_vm15 = vcmp.eq.f32.partialorder %v2448_v34, 8.507059e+37 }
 0x98a   :  { %v2472_v47 = vor.u32 1.1754944e-38, %v2471_v29  ;;  %vm2470_vm2 = vcmp.eq.f32.partialorder %v2469_v36, 8.507059e+37 }
 0x98b   :  { %v4991_v21 = vpop.eup %4990 }
 0x98c   :  { %v2483_v23 = vadd.f32 1.0, %v4991_v21 }
 0x98d   :  { %v4993_v24 = vpop.eup %4992 }
 0x98e   :  { %v4995_v32 = vpop.eup %4994  ;;  %v2440_v56 = vmul.f32 %v4993_v24, %v2438_v15  ;;  %4996 = vrcp.f32 %v2483_v23  ;;  %vm2445_vm8 = vweird.f32 %v4993_v24  ;;  %v2495_v33 = vand.u32 2147483648, %v2483_v23 }
 0x98f   :  { %v2461_v5 = vmul.f32 %v4995_v32, %v2459_v20  ;;  %4998 = vtanh.f32 %v2476_v31  ;;  %vm2466_vm9 = vweird.f32 %v4995_v32  ;;  %vm2446_vm12 = vmor %vm2444_vm10, %vm2445_vm8  ;;  %vm2489_vm5 = vweird.f32 %v2483_v23 }
 0x990   :  { %v2441_v9 = vsub.f32 1.0, %v2440_v56  ;;  %vm2467_vm13 = vmor %vm2465_vm11, %vm2466_vm9  ;;  %v2493_v37 = vand.u32 2147483647, %v2483_v23  ;;  %v2496_v42 = vor.u32 1.1754944e-38, %v2495_v33 }
 0x991   :  { %v2462_v17 = vsub.f32 1.0, %v2461_v5 }
 0x992   :  { %v2442_v30 = vmul.f32 %v4993_v24, %v2441_v9  ;;  %vm2494_vm7 = vcmp.eq.f32.partialorder %v2493_v37, 8.507059e+37  ;;  %v2775_v37 = vld [vmem:[#allocation3 + $0xc] sm:$0x3] }
 0x993   :  { %v2463_v35 = vmul.f32 %v4995_v32, %v2462_v17 }
 0x994   :  { %v4997_v39 = vpop.eup %4996  ;;  %v2443_v40 = vadd.f32 %v4993_v24, %v2442_v30 }
 0x995   :  { %v2464_v44 = vadd.f32 %v4995_v32, %v2463_v35  ;;  %v2485_v45 = vmul.f32 %v4997_v39, %v2483_v23  ;;  %v4999_v53 = vpop.eup %4998  ;;  %vm2490_vm4 = vweird.f32 %v4997_v39 }
 0x996   :  { %v2447_v51 = vsel %vm2446_vm12, %v4993_v24, %v2443_v40  ;;  %vm2491_vm6 = vmor %vm2489_vm5, %vm2490_vm4 }
 0x997   :  { %v2452_v54 = vsel %vm2449_vm15, %v2451_v41, %v2447_v51  ;;  %v2468_v55 = vsel %vm2467_vm13, %v4995_v32, %v2464_v44  ;;  %v2486_v58 = vsub.f32 1.0, %v2485_v45 }
 0x998   :  { %v2473_v10 = vsel %vm2470_vm2, %v2472_v47, %v2468_v55  ;;  %v2500_v57 = vmul.f32 %v4999_v53, %v2452_v54 }
 0x999   :  { %v2499_v11 = vmul.f32 %v2473_v10, %v5909_v50  ;;  %v2487_v46 = vmul.f32 %v4997_v39, %v2486_v58 }
 0x99b   :  { %v5958_v27 = vadd.f32 %v2500_v57, %v2499_v11  ;;  %v2488_v28 = vadd.f32 %v4997_v39, %v2487_v46 }
 0x99d   :  { %5000 = vtanh.f32 %v5958_v27  ;;  %v2492_v38 = vsel %vm2491_vm6, %v4997_v39, %v2488_v28 }
 0x99e   :  { %v2497_v12 = vsel %vm2494_vm7, %v2496_v42, %v2492_v38  ;;  %v2796_v42 = vld [vmem:[#allocation3 + $0x1c] sm:$0x3] }
 0x9a3   :  { %v5001_v4 = vpop.eup %5000 }
 0x9a4   :  { %v2503_v1 = vmul.f32 %v5001_v4, %v2497_v12 }
 0x9a6   :  { %2504 = vst.msk [vmem:[#allocation2 + $0x8] sm:$0x3] %vm355_vm14, %v2503_v1  ;;  %4689 = vmatmul.msk.f32.vlgmr.msrb.gmra.mxu0 %vm96_vm1, %v2503_v1  ;;  %4690 = vmatmul.msk.f32.vlgmr.msra.gmra.mxu1 %vm96_vm1, %v2503_v1 }
 0x9a7   :  { %4691 = vmatmul.msk.f32.vlgmr.msra.gmra.mxu2 %vm96_vm1, %v2503_v1  ;;  %4692 = vmatmul.msk.f32.vlgmr.msrb.gmra.mxu3 %vm96_vm1, %v2503_v1 }
 0x9a8   :  { %2866 = vmatpush.msrb.mxu0 %v5876_v43  ;;  %2890 = vmatpush.msra.mxu1 %v5878_v61  ;;  %v2604_v61 = vld [vmem:[#allocation3 + $0xa] sm:$0x3] }
 0x9a9   :  { %2914 = vmatpush.msra.mxu2 %v5925_v14  ;;  %2938 = vmatpush.msrb.mxu3 %v5927_v7 }
 0x9aa   :  { %2867 = vmatpush.msrb.mxu0 %v5880_v62  ;;  %2891 = vmatpush.msra.mxu1 %v5884_v59  ;;  %v2625_v59 = vld [vmem:[#allocation3 + $0x1a] sm:$0x3] }
 0x9ab   :  { %2915 = vmatpush.msra.mxu2 %v5929_v0  ;;  %2939 = vmatpush.msrb.mxu3 %v5933_v8  ;;  %v2649_v0 = vld [vmem:[#allocation3 + $0x3a] sm:$0x3] }
 0x9ac   :  { %2868 = vmatpush.msrb.mxu0 %v5886_v13  ;;  %2892 = vmatpush.msra.mxu1 %v5888_v26 }
 0x9ad   :  { %2916 = vmatpush.msra.mxu2 %v5935_v52  ;;  %2940 = vmatpush.msrb.mxu3 %v5937_v18 }
 0x9ae   :  { %2869 = vmatpush.msrb.mxu0 %v5892_v63  ;;  %2893 = vmatpush.msra.mxu1 %v5894_v16 }
 0x9af   :  { %2917 = vmatpush.msra.mxu2 %v5941_v48  ;;  %2941 = vmatpush.msrb.mxu3 %v5943_v6 }
 0xa23   :  { %v2529_v43 = vpop.f32.mrf.mxu0  ;;  %v2553_v62 = vpop.f32.mrf.mxu1 }
 0xa24   :  { %v2605_v50 = vadd.f32 %v2604_v61, %v2529_v43  ;;  %v2626_v13 = vadd.f32 %v2625_v59, %v2553_v62  ;;  %v2820_v62 = vld [vmem:[#allocation3 + $0x3c] sm:$0x3] }
 0xa26   :  { %v4693_v14 = vmul.f32 -1.442695, %v2605_v50  ;;  %v4694_v26 = vmul.f32 -1.442695, %v2626_v13 }
 0xa28   :  { %5002 = vpow2.f32 %v4693_v14 }
 0xa29   :  { %5004 = vpow2.f32 %v4694_v26 }
 0xa2a   :  { %v2601_v7 = vpop.f32.mrf.mxu3  ;;  %v2577_v48 = vpop.f32.mrf.mxu2 }
 0xa2b   :  { %v2650_v8 = vadd.f32 %v2649_v0, %v2601_v7  ;;  %v2647_v15 = vadd.f32 %v2646_v49, %v2577_v48  ;;  %v3034_v0 = vld [vmem:[#allocation5 + $0x58] sm:$0xff] }
 0xa2d   :  { %v4695_v63 = vmul.f32 -1.442695, %v2650_v8  ;;  %v3033_v8 = vld [vmem:[#allocation5 + $0x50] sm:$0xff] }
 0xa2e   :  { %v5003_v52 = vpop.eup %5002 }
 0xa2f   :  { %v5005_v16 = vpop.eup %5004  ;;  %v2609_v18 = vadd.f32 1.0, %v5003_v52  ;;  %5006 = vpow2.f32 %v4695_v63  ;;  %v3032_v63 = vld [vmem:[#allocation5 + $0x48] sm:$0xff] }
 0xa30   :  { %v2630_v60 = vadd.f32 1.0, %v5005_v16 }
 0xa31   :  { %5008 = vrcp.f32 %v2609_v18  ;;  %v2621_v24 = vand.u32 2147483648, %v2609_v18  ;;  %v2619_v56 = vand.u32 2147483647, %v2609_v18  ;;  %vm2615_vm10 = vweird.f32 %v2609_v18 }
 0xa32   :  { %5010 = vrcp.f32 %v2630_v60  ;;  %v2642_v31 = vand.u32 2147483648, %v2630_v60  ;;  %v2640_v9 = vand.u32 2147483647, %v2630_v60  ;;  %vm2636_vm11 = vweird.f32 %v2630_v60 }
 0xa33   :  { %v2622_v29 = vor.u32 1.1754944e-38, %v2621_v24  ;;  %vm2620_vm15 = vcmp.eq.f32.partialorder %v2619_v56, 8.507059e+37 }
 0xa34   :  { %v2643_v35 = vor.u32 1.1754944e-38, %v2642_v31  ;;  %vm2641_vm2 = vcmp.eq.f32.partialorder %v2640_v9, 8.507059e+37 }
 0xa35   :  { %v5007_v6 = vpop.eup %5006 }
 0xa36   :  { %v2654_v2 = vadd.f32 1.0, %v5007_v6 }
 0xa37   :  { %v5009_v3 = vpop.eup %5008 }
 0xa38   :  { %v5011_v20 = vpop.eup %5010  ;;  %v2611_v19 = vmul.f32 %v5009_v3, %v2609_v18  ;;  %5012 = vrcp.f32 %v2654_v2  ;;  %vm2616_vm8 = vweird.f32 %v5009_v3  ;;  %v2666_v58 = vand.u32 2147483648, %v2654_v2  ;;  %v3031_v18 = vld [vmem:[#allocation5 + $0x40] sm:$0xff] }
 0xa39   :  { %v2632_v21 = vmul.f32 %v5011_v20, %v2630_v60  ;;  %5014 = vtanh.f32 %v2647_v15  ;;  %vm2637_vm9 = vweird.f32 %v5011_v20  ;;  %vm2617_vm12 = vmor %vm2615_vm10, %vm2616_vm8  ;;  %vm2660_vm5 = vweird.f32 %v2654_v2  ;;  %v2817_v60 = vld [vmem:[#allocation3 + $0x2c] sm:$0x3]  ;;  %v6001_v15 = vld [vmem:[#allocation8 + $0x118] sm:$0xff] }
 0xa3a   :  { %v2612_v22 = vsub.f32 1.0, %v2611_v19  ;;  %vm2638_vm13 = vmor %vm2636_vm11, %vm2637_vm9  ;;  %v2664_v10 = vand.u32 2147483647, %v2654_v2  ;;  %v2667_v11 = vor.u32 1.1754944e-38, %v2666_v58 }
 0xa3b   :  { %v2633_v23 = vsub.f32 1.0, %v2632_v21 }
 0xa3c   :  { %v2613_v32 = vmul.f32 %v5009_v3, %v2612_v22  ;;  %vm2665_vm7 = vcmp.eq.f32.partialorder %v2664_v10, 8.507059e+37  ;;  %v6007_v22 = vld [vmem:[#allocation8 + $0x108] sm:$0xff] }
 0xa3d   :  { %v2634_v5 = vmul.f32 %v5011_v20, %v2633_v23  ;;  %v6009_v23 = vld [vmem:[#allocation8 + $0x138] sm:$0xff] }
 0xa3e   :  { %v5013_v17 = vpop.eup %5012  ;;  %v2614_v25 = vadd.f32 %v5009_v3, %v2613_v32  ;;  %v6014_v32 = vld [vmem:[#allocation8 + $0x130] sm:$0xff] }
 0xa3f   :  { %v2635_v30 = vadd.f32 %v5011_v20, %v2634_v5  ;;  %v2656_v34 = vmul.f32 %v5013_v17, %v2654_v2  ;;  %v5015_v39 = vpop.eup %5014  ;;  %vm2661_vm4 = vweird.f32 %v5013_v17 }
 0xa40   :  { %v2618_v36 = vsel %vm2617_vm12, %v5009_v3, %v2614_v25  ;;  %vm2662_vm6 = vmor %vm2660_vm5, %vm2661_vm4  ;;  %v6020_v25 = vld [vmem:[#allocation8 + $0x128] sm:$0xff] }
 0xa41   :  { %v2623_v40 = vsel %vm2620_vm15, %v2622_v29, %v2618_v36  ;;  %v2639_v41 = vsel %vm2638_vm13, %v5011_v20, %v2635_v30  ;;  %v2657_v44 = vsub.f32 1.0, %v2656_v34  ;;  %v6003_v20 = vld [vmem:[#allocation8 + $0x110] sm:$0xff]  ;;  %v6022_v29 = vld [vmem:[#allocation8 + $0x158] sm:$0xff] }
 0xa42   :  { %v2644_v45 = vsel %vm2641_vm2, %v2643_v35, %v2639_v41  ;;  %v2671_v47 = vmul.f32 %v5015_v39, %v2623_v40  ;;  %v6027_v35 = vld [vmem:[#allocation8 + $0x150] sm:$0xff]  ;;  %v6030_v40 = vld [vmem:[#allocation8 + $0x120] sm:$0xff] }
 0xa43   :  { %v2670_v51 = vmul.f32 %v2644_v45, %v5958_v27  ;;  %v2658_v53 = vmul.f32 %v5013_v17, %v2657_v44 }
 0xa45   :  { %v5983_v54 = vadd.f32 %v2671_v47, %v2670_v51  ;;  %v2659_v55 = vadd.f32 %v5013_v17, %v2658_v53  ;;  %v6038_v47 = vld [vmem:[#allocation8 + $0x148] sm:$0xff] }
 0xa47   :  { %5016 = vtanh.f32 %v5983_v54  ;;  %v2663_v57 = vsel %vm2662_vm6, %v5013_v17, %v2659_v55  ;;  %v6018_v17 = vld [vmem:[#allocation8 + $0x100] sm:$0xff] }
 0xa48   :  { %v2668_v28 = vsel %vm2665_vm7, %v2667_v11, %v2663_v57 }
 0xa4d   :  { %v5017_v46 = vpop.eup %5016 }
 0xa4e   :  { %v2674_v33 = vmul.f32 %v5017_v46, %v2668_v28 }
 0xa50   :  { %2675 = vst.msk [vmem:[#allocation2 + $0xa] sm:$0x3] %vm355_vm14, %v2674_v33  ;;  %4696 = vmatmul.msk.f32.vlgmr.msra.gmra.mxu0 %vm96_vm1, %v2674_v33  ;;  %4697 = vmatmul.msk.f32.vlgmr.msrb.gmra.mxu1 %vm96_vm1, %v2674_v33 }
 0xa51   :  { %4698 = vmatmul.msk.f32.vlgmr.msrb.gmra.mxu2 %vm96_vm1, %v2674_v33  ;;  %4699 = vmatmul.msk.f32.vlgmr.msra.gmra.mxu3 %vm96_vm1, %v2674_v33 }
 0xa52   :  { %3058 = vmatpush.msra.mxu0 %v3034_v0  ;;  %3124 = vmatpush.msrb.mxu1 %v6001_v15  ;;  %v6089_v0 = vld [vmem:[#allocation8 + $0x168] sm:$0xff] }
 0xa53   :  { %3149 = vmatpush.msrb.mxu2 %v6009_v23  ;;  %3174 = vmatpush.msra.mxu3 %v6022_v29 }
 0xa54   :  { %3059 = vmatpush.msra.mxu0 %v3033_v8  ;;  %3125 = vmatpush.msrb.mxu1 %v6003_v20  ;;  %v6095_v8 = vld [vmem:[#allocation8 + $0x160] sm:$0xff] }
 0xa55   :  { %3150 = vmatpush.msrb.mxu2 %v6014_v32  ;;  %3175 = vmatpush.msra.mxu3 %v6027_v35 }
 0xa56   :  { %3060 = vmatpush.msra.mxu0 %v3032_v63  ;;  %3126 = vmatpush.msrb.mxu1 %v6007_v22 }
 0xa57   :  { %3151 = vmatpush.msrb.mxu2 %v6020_v25  ;;  %3176 = vmatpush.msra.mxu3 %v6038_v47 }
 0xa58   :  { %3061 = vmatpush.msra.mxu0 %v3031_v18  ;;  %3127 = vmatpush.msrb.mxu1 %v6018_v17  ;;  %v2967_v18 = vld [vmem:[#allocation3 + $0x1e] sm:$0x3] }
 0xa59   :  { %3152 = vmatpush.msrb.mxu2 %v6030_v40 }
 0xacd   :  { %v2700_v27 = vpop.f32.mrf.mxu0  ;;  %v2724_v38 = vpop.f32.mrf.mxu1 }
 0xace   :  { %v2776_v4 = vadd.f32 %v2775_v37, %v2700_v27  ;;  %v2797_v12 = vadd.f32 %v2796_v42, %v2724_v38 }
 0xad0   :  { %v4700_v1 = vmul.f32 -1.442695, %v2776_v4  ;;  %v4701_v43 = vmul.f32 -1.442695, %v2797_v12 }
 0xad2   :  { %5018 = vpow2.f32 %v4700_v1 }
 0xad3   :  { %5020 = vpow2.f32 %v4701_v43 }
 0xad4   :  { %v2772_v61 = vpop.f32.mrf.mxu3  ;;  %v2748_v52 = vpop.f32.mrf.mxu2 }
 0xad5   :  { %v2821_v59 = vadd.f32 %v2820_v62, %v2772_v61  ;;  %v2818_v49 = vadd.f32 %v2817_v60, %v2748_v52  ;;  %v3098_v61 = vld [vmem:[%s6424_s8 + $0x6] sm:$0x1]  ;;  %v2946_v52 = vld [vmem:[#allocation3 + $0xe] sm:$0x3] }
 0xad6   :  { %v3108_v62 = vrot.slane %v3098_v61, 7 }
 0xad7   :  { %v4702_v50 = vmul.f32 -1.442695, %v2821_v59  ;;  %v3097_v59 = vld [vmem:[%s6424_s8 + $0x2] sm:$0x1]  ;;  %s5265_s8 = smov 2  }
 0xad8   :  { %v5019_v13 = vpop.eup %5018 }
 0xad9   :  { %v5021_v14 = vpop.eup %5020  ;;  %v5991_v26 = vadd.f32 1.0, %v5019_v13  ;;  %5022 = vpow2.f32 %v4702_v50  ;;  %v3109_v50 = vsel %vm180_vm0, %v3108_v62, %v3097_v59  ;;  %v3028_v13 = vld [vmem:[#allocation2] sm:$0xff] }
 0xada   :  { %v5993_v7 = vadd.f32 1.0, %v5021_v14  ;;  %v6077_v14 = vld [vmem:[#allocation8 + $0x178] sm:$0xff] }
 0xadb   :  { %5024 = vrcp.f32 %v5991_v26  ;;  %v2792_v31 = vand.u32 2147483648, %v5991_v26  ;;  %v2790_v9 = vand.u32 2147483647, %v5991_v26  ;;  %vm2786_vm10 = vweird.f32 %v5991_v26 }
 0xadc   :  { %5026 = vrcp.f32 %v5993_v7  ;;  %v2813_v56 = vand.u32 2147483648, %v5993_v7  ;;  %v2811_v34 = vand.u32 2147483647, %v5993_v7  ;;  %vm2807_vm11 = vweird.f32 %v5993_v7 }
 0xadd   :  { %v2793_v41 = vor.u32 1.1754944e-38, %v2792_v31  ;;  %vm2791_vm15 = vcmp.eq.f32.partialorder %v2790_v9, 8.507059e+37 }
 0xade   :  { %v2814_v51 = vor.u32 1.1754944e-38, %v2813_v56  ;;  %vm2812_vm2 = vcmp.eq.f32.partialorder %v2811_v34, 8.507059e+37 }
 0xadf   :  { %v5023_v16 = vpop.eup %5022 }
 0xae0   :  { %v5997_v48 = vadd.f32 1.0, %v5023_v16 }
 0xae1   :  { %v5025_v6 = vpop.eup %5024 }
 0xae2   :  { %v5027_v2 = vpop.eup %5026  ;;  %v2782_v3 = vmul.f32 %v5025_v6, %v5991_v26  ;;  %5028 = vrcp.f32 %v5997_v48  ;;  %vm2787_vm8 = vweird.f32 %v5025_v6  ;;  %v2837_v38 = vand.u32 2147483648, %v5997_v48  ;;  %v6079_v26 = vld [vmem:[#allocation8 + $0x140] sm:$0xff] }
 0xae3   :  { %v2803_v19 = vmul.f32 %v5027_v2, %v5993_v7  ;;  %5030 = vtanh.f32 %v2818_v49  ;;  %vm2808_vm9 = vweird.f32 %v5027_v2  ;;  %vm2788_vm12 = vmor %vm2786_vm10, %vm2787_vm8  ;;  %vm2831_vm5 = vweird.f32 %v5997_v48  ;;  %3177 = vmatpush.msra.mxu3 %v6079_v26  ;;  %v6084_v7 = vld [vmem:[#allocation8 + $0x170] sm:$0xff] }
 0xae4   :  { %v2783_v21 = vsub.f32 1.0, %v2782_v3  ;;  %vm2809_vm13 = vmor %vm2807_vm11, %vm2808_vm9  ;;  %v2835_v42 = vand.u32 2147483647, %v5997_v48  ;;  %v2838_v12 = vor.u32 1.1754944e-38, %v2837_v38 }
 0xae5   :  { %v2804_v24 = vsub.f32 1.0, %v2803_v19  ;;  %v2991_v19 = vld [vmem:[#allocation3 + $0x3e] sm:$0x3] }
 0xae6   :  { %v2784_v5 = vmul.f32 %v5025_v6, %v2783_v21  ;;  %vm2836_vm7 = vcmp.eq.f32.partialorder %v2835_v42, 8.507059e+37 }
 0xae7   :  { %v2805_v30 = vmul.f32 %v5027_v2, %v2804_v24 }
 0xae8   :  { %v5029_v36 = vpop.eup %5028  ;;  %v2785_v39 = vadd.f32 %v5025_v6, %v2784_v5 }
 0xae9   :  { %v2806_v44 = vadd.f32 %v5027_v2, %v2805_v30  ;;  %v2827_v45 = vmul.f32 %v5029_v36, %v5997_v48  ;;  %v5031_v55 = vpop.eup %5030  ;;  %vm2832_vm4 = vweird.f32 %v5029_v36 }
 0xaea   :  { %v2789_v53 = vsel %vm2788_vm12, %v5025_v6, %v2785_v39  ;;  %vm2833_vm6 = vmor %vm2831_vm5, %vm2832_vm4 }
 0xaeb   :  { %v2794_v58 = vsel %vm2791_vm15, %v2793_v41, %v2789_v53  ;;  %v2810_v10 = vsel %vm2809_vm13, %v5027_v2, %v2806_v44  ;;  %v2828_v57 = vsub.f32 1.0, %v2827_v45  ;;  %v6118_v2 = vld [vmem:[%s6421_s5 + $0x2] ss:$0 sm:$0xff]  ;;  %v2988_v41 = vld [vmem:[#allocation3 + $0x2e] sm:$0x3] }
 0xaec   :  { %v2815_v11 = vsel %vm2812_vm2, %v2814_v51, %v2810_v10  ;;  %v2842_v46 = vmul.f32 %v5031_v55, %v2794_v58 }
 0xaed   :  { %v2841_v28 = vmul.f32 %v2815_v11, %v5983_v54  ;;  %v2829_v33 = vmul.f32 %v5029_v36, %v2828_v57 }
 0xaef   :  { %v6045_v27 = vadd.f32 %v2842_v46, %v2841_v28  ;;  %v2830_v37 = vadd.f32 %v5029_v36, %v2829_v33 }
 0xaf1   :  { %5032 = vtanh.f32 %v6045_v27  ;;  %v2834_v4 = vsel %vm2833_vm6, %v5029_v36, %v2830_v37 }
 0xaf2   :  { %v2839_v43 = vsel %vm2836_vm7, %v2838_v12, %v2834_v4 }
 0xaf7   :  { %v5033_v1 = vpop.eup %5032 }
 0xaf8   :  { %v2845_v54 = vmul.f32 %v5033_v1, %v2839_v43 }
 0xafa   :  { %2846 = vst.msk [vmem:[#allocation2 + $0xc] sm:$0x3] %vm355_vm14, %v2845_v54  ;;  %4703 = vmatmul.msk.f32.vlgmr.msrb.gmra.mxu0 %vm96_vm1, %v2845_v54  ;;  %4704 = vmatmul.msk.f32.vlgmr.msra.gmra.mxu1 %vm96_vm1, %v2845_v54 }
 0xafb   :  { %4705 = vmatmul.msk.f32.vlgmr.msra.gmra.mxu2 %vm96_vm1, %v2845_v54  ;;  %4706 = vmatmul.msk.f32.vlgmr.msrb.gmra.mxu3 %vm96_vm1, %v2845_v54 }
 0xafc   :  { %3303 = vmatpush.msra.mxu2 %v6001_v15  ;;  %3351 = vmatpush.msrb.mxu0 %v6022_v29 }
 0xafd   :  { %3199 = vmatpush.msra.mxu1 %v6077_v14  ;;  %3327 = vmatpush.msrb.mxu3 %v6009_v23 }
 0xafe   :  { %3304 = vmatpush.msra.mxu2 %v6003_v20  ;;  %3352 = vmatpush.msrb.mxu0 %v6027_v35 }
 0xaff   :  { %3200 = vmatpush.msra.mxu1 %v6084_v7  ;;  %3328 = vmatpush.msrb.mxu3 %v6014_v32 }
 0xb00   :  { %3305 = vmatpush.msra.mxu2 %v6007_v22  ;;  %3353 = vmatpush.msrb.mxu0 %v6038_v47 }
 0xb01   :  { %3201 = vmatpush.msra.mxu1 %v6089_v0  ;;  %3329 = vmatpush.msrb.mxu3 %v6020_v25 }
 0xb02   :  { %4711 = vmatmul.msk.f32.vlgmr.msra.gmra.mxu0 %vm96_vm1, %v3028_v13  ;;  %4713 = vmatmul.msk.f32.vlgmr.msrb.gmra.mxu1 %vm96_vm1, %v3109_v50 }
 0xb03   :  { %4714 = vmatmul.msk.f32.vlgmr.msrb.gmra.mxu2 %vm96_vm1, %v3109_v50  ;;  %4715 = vmatmul.msk.f32.vlgmr.msra.gmra.mxu3 %vm96_vm1, %v3109_v50 }
 0xb04   :  { %3306 = vmatpush.msra.mxu2 %v6018_v17  ;;  %3354 = vmatpush.msrb.mxu0 %v6079_v26 }
 0xb05   :  { %3202 = vmatpush.msra.mxu1 %v6095_v8  ;;  %3330 = vmatpush.msrb.mxu3 %v6030_v40 }
 0xb06   :  { %3474 = vmatpush.msrb.mxu2 %v6001_v15  ;;  %3522 = vmatpush.msra.mxu0 %v6022_v29 }
 0xb07   :  { %3375 = vmatpush.msrb.mxu1 %v6077_v14  ;;  %3498 = vmatpush.msra.mxu3 %v6009_v23 }
 0xb08   :  { %3475 = vmatpush.msrb.mxu2 %v6003_v20  ;;  %3523 = vmatpush.msra.mxu0 %v6027_v35 }
 0xb09   :  { %3376 = vmatpush.msrb.mxu1 %v6084_v7  ;;  %3499 = vmatpush.msra.mxu3 %v6014_v32 }
 0xb0a   :  { %3476 = vmatpush.msrb.mxu2 %v6007_v22  ;;  %3524 = vmatpush.msra.mxu0 %v6038_v47 }
 0xb0b   :  { %4716 = vmatmul.msk.f32.vlgmr.msra.gmra.mxu1 %vm96_vm1, %v3109_v50  ;;  %3500 = vmatpush.msra.mxu3 %v6020_v25 }
 0xb0c   :  { %3477 = vmatpush.msrb.mxu2 %v6018_v17  ;;  %3525 = vmatpush.msra.mxu0 %v6079_v26 }
 0xb0d   :  { %3377 = vmatpush.msrb.mxu1 %v6089_v0  ;;  %3501 = vmatpush.msra.mxu3 %v6030_v40 }
 0xb0f   :  { %3378 = vmatpush.msrb.mxu1 %v6095_v8 }
 0xb11   :  { %3546 = vmatpush.msra.mxu1 %v6077_v14 }
 0xb13   :  { %3547 = vmatpush.msra.mxu1 %v6084_v7 }
 0xb15   :  { %3548 = vmatpush.msra.mxu1 %v6089_v0 }
 0xb17   :  { %3549 = vmatpush.msra.mxu1 %v6095_v8 }
 0xb77   :  { %v2871_v63 = vpop.f32.mrf.mxu0  ;;  %v2895_v16 = vpop.f32.mrf.mxu1 }
 0xb78   :  { %v2947_v60 = vadd.f32 %v2946_v52, %v2871_v63  ;;  %v2968_v48 = vadd.f32 %v2967_v18, %v2895_v16 }
 0xb7a   :  { %v4707_v6 = vmul.f32 -1.442695, %v2947_v60  ;;  %v4708_v49 = vmul.f32 -1.442695, %v2968_v48 }
 0xb7c   :  { %5034 = vpow2.f32 %v4707_v6 }
 0xb7d   :  { %5036 = vpow2.f32 %v4708_v49 }
 0xb7e   :  { %v2943_v3 = vpop.f32.mrf.mxu3  ;;  %v2919_v36 = vpop.f32.mrf.mxu2 }
 0xb7f   :  { %v2992_v21 = vadd.f32 %v2991_v19, %v2943_v3  ;;  %v3063_v24 = vpop.f32.mrf.mxu0  ;;  %v2989_v51 = vadd.f32 %v2988_v41, %v2919_v36 }
 0xb80   :  { %v3064_v31 = vadd.f32 %v6118_v2, %v3063_v24 }
 0xb81   :  { %v4709_v56 = vmul.f32 -1.442695, %v2992_v21 }
 0xb82   :  { %v5035_v5 = vpop.eup %5034  ;;  %3069 = vst.msk [vmem:[#allocation3] sm:$0xff] %vm96_vm1, %v3064_v31  ;;  %3081 = vrot.lane.b32.xlu1 %v3064_v31, %s5263_s27  ;;  %3089 = vrot.lane.b32.xlu0 %v3064_v31, %s5261_s25 }
 0xb83   :  { %v5037_v9 = vpop.eup %5036  ;;  %v2951_v30 = vadd.f32 1.0, %v5035_v5  ;;  %5038 = vpow2.f32 %v4709_v56  ;;  %3073 = vrot.lane.b32.xlu2 %v3064_v31, %s5262_s26 }
 0xb84   :  { %v2972_v34 = vadd.f32 1.0, %v5037_v9  ;;  %v3129_v9 = vpop.f32.mrf.mxu1 }
 0xb85   :  { %5040 = vrcp.f32 %v2951_v30  ;;  %v2963_v11 = vand.u32 2147483648, %v2951_v30  ;;  %v2961_v33 = vand.u32 2147483647, %v2951_v30  ;;  %vm2957_vm10 = vweird.f32 %v2951_v30 }
 0xb86   :  { %5042 = vrcp.f32 %v2972_v34  ;;  %v2984_v46 = vand.u32 2147483648, %v2972_v34  ;;  %v2982_v38 = vand.u32 2147483647, %v2972_v34  ;;  %vm2978_vm11 = vweird.f32 %v2972_v34  ;;  %v3154_v41 = vpop.f32.mrf.mxu2 }
 0xb87   :  { %v2964_v12 = vor.u32 1.1754944e-38, %v2963_v11  ;;  %vm2962_vm15 = vcmp.eq.f32.partialorder %v2961_v33, 8.507059e+37 }
 0xb88   :  { %v2985_v54 = vor.u32 1.1754944e-38, %v2984_v46  ;;  %vm2983_vm2 = vcmp.eq.f32.partialorder %v2982_v38, 8.507059e+37 }
 0xb89   :  { %v5039_v39 = vpop.eup %5038 }
 0xb8a   :  { %v2996_v44 = vadd.f32 1.0, %v5039_v39 }
 0xb8b   :  { %v5041_v45 = vpop.eup %5040 }
 0xb8c   :  { %v5043_v53 = vpop.eup %5042  ;;  %v2953_v55 = vmul.f32 %v5041_v45, %v2951_v30  ;;  %5044 = vrcp.f32 %v2996_v44  ;;  %vm2958_vm8 = vweird.f32 %v5041_v45  ;;  %v3008_v49 = vand.u32 2147483648, %v2996_v44  ;;  %v3207_v30 = vld [vmem:[#allocation3] sm:$0x3]  ;;  %v3204_v38 = vpop.f32.mrf.mxu1 }
 0xb8d   :  { %v2974_v58 = vmul.f32 %v5043_v53, %v2972_v34  ;;  %5046 = vtanh.f32 %v2989_v51  ;;  %vm2979_vm9 = vweird.f32 %v5043_v53  ;;  %vm2959_vm12 = vmor %vm2957_vm10, %vm2958_vm8  ;;  %vm3002_vm5 = vweird.f32 %v2996_v44 }
 0xb8e   :  { %v2954_v10 = vsub.f32 1.0, %v2953_v55  ;;  %vm2980_vm13 = vmor %vm2978_vm11, %vm2979_vm9  ;;  %v3006_v3 = vand.u32 2147483647, %v2996_v44  ;;  %v3009_v19 = vor.u32 1.1754944e-38, %v3008_v49  ;;  %v3208_v34 = vadd.f32 %v3207_v30, %v3129_v9 }
 0xb8f   :  { %v2975_v57 = vsub.f32 1.0, %v2974_v58 }
 0xb90   :  { %v2955_v28 = vmul.f32 %v5041_v45, %v2954_v10  ;;  %vm3007_vm7 = vcmp.eq.f32.partialorder %v3006_v3, 8.507059e+37  ;;  %v4717_v39 = vmul.f32 -1.442695, %v3208_v34 }
 0xb91   :  { %v2976_v37 = vmul.f32 %v5043_v53, %v2975_v57 }
 0xb92   :  { %v5045_v42 = vpop.eup %5044  ;;  %v2956_v4 = vadd.f32 %v5041_v45, %v2955_v28 }
 0xb93   :  { %v2977_v1 = vadd.f32 %v5043_v53, %v2976_v37  ;;  %v2998_v43 = vmul.f32 %v5045_v42, %v2996_v44  ;;  %v5047_v62 = vpop.eup %5046  ;;  %vm3003_vm4 = vweird.f32 %v5045_v42 }
 0xb94   :  { %v2960_v61 = vsel %vm2959_vm12, %v5041_v45, %v2956_v4  ;;  %vm3004_vm6 = vmor %vm3002_vm5, %vm3003_vm4 }
 0xb95   :  { %v2965_v59 = vsel %vm2962_vm15, %v2964_v12, %v2960_v61  ;;  %v2981_v50 = vsel %vm2980_vm13, %v5043_v53, %v2977_v1  ;;  %v2999_v13 = vsub.f32 1.0, %v2998_v43  ;;  %v3179_v12 = vpop.f32.mrf.mxu3 }
 0xb96   :  { %v2986_v63 = vsel %vm2983_vm2, %v2985_v54, %v2981_v50  ;;  %v3013_v52 = vmul.f32 %v5047_v62, %v2965_v59 }
 0xb97   :  { %v3012_v16 = vmul.f32 %v2986_v63, %v6045_v27  ;;  %v3000_v18 = vmul.f32 %v5045_v42, %v2999_v13  ;;  %v3100_v13 = vld [vmem:[%s6425_s9 + $0x6] sm:$0x1] }
 0xb98   :  { %v3275_v3 = vrot.slane %v3100_v13, 7 }
 0xb99   :  { %v3014_v60 = vadd.f32 %v3013_v52, %v3012_v16  ;;  %v3001_v48 = vadd.f32 %v5045_v42, %v3000_v18 }
 0xb9b   :  { %5048 = vtanh.f32 %v3014_v60  ;;  %v3024_v6 = vrot.slane %v3014_v60, 1  ;;  %3026 = vst.msk [vmem:[%s6428_s12 + $0x1] sm:$0x1] %vm1557_vm3, %v3014_v60  ;;  %v3005_v27 = vsel %vm3004_vm6, %v5045_v42, %v3001_v48 }
 0xb9c   :  { %v3010_v24 = vsel %vm3007_vm7, %v3009_v19, %v3005_v27  ;;  %5050 = vpow2.f32 %v4717_v39  ;;  %v3099_v27 = vld [vmem:[%s6425_s9 + $0x2] sm:$0x1]  ;;  %s5271_s9 = smov [#allocation10]  }
 0xb9d   :  { %3027 = vst.msk [vmem:[%s6428_s12 + $0x5] sm:$0x1] %vm1557_vm3, %v3024_v6  ;;  %v3276_v34 = vsel %vm180_vm0, %v3275_v3, %v3099_v27 }
 0xba1   :  { %v5049_v21 = vpop.eup %5048 }
 0xba2   :  { %v3016_v31 = vmul.f32 %v5049_v21, %v3010_v24  ;;  %v5051_v53 = vpop.eup %5050 }
 0xba3   :  { %v3212_v55 = vadd.f32 1.0, %v5051_v53 }
 0xba4   :  { %3017 = vst.msk [vmem:[#allocation2 + $0xe] sm:$0x3] %vm355_vm14, %v3016_v31  ;;  %v3019_v56 = vrot.slane %v3016_v31, 1 }
 0xba5   :  { %3021 = vst.msk [vmem:[%s6427_s11 + $0x1] sm:$0x1] %vm1557_vm3, %v3016_v31  ;;  %vm3218_vm10 = vweird.f32 %v3212_v55  ;;  %v3224_v18 = vand.u32 2147483648, %v3212_v55  ;;  %v3222_v48 = vand.u32 2147483647, %v3212_v55 }
 0xba6   :  { %3022 = vst.msk [vmem:[%s6427_s11 + $0x5] sm:$0x1] %vm1557_vm3, %v3019_v56 }
 0xba7   :  { %vm3223_vm15 = vcmp.eq.f32.partialorder %v3222_v48, 8.507059e+37 }
 0xbab   :  { %v3029_v5 = vld [vmem:[#allocation2 + $0x8] sm:$0xff] }
 0xbac   :  { %4712 = vmatmul.msk.f32.gmra.mxu0 %vm96_vm1, %v3029_v5  ;;  %v3225_v5 = vor.u32 1.1754944e-38, %v3224_v18 }
 0xbdd   :  { %v3074_v36 = vpop.permute.xlu2 %3073 }
 0xbde   :  { %3079 = vst.msk [vmem:[#allocation3 + $0x10] sm:$0xff] %vm96_vm1, %v3074_v36 }
 0xbe5   :  { %v3228_v44 = vld [vmem:[#allocation3 + $0x10] sm:$0x3] }
 0xbe6   :  { %v3229_v45 = vadd.f32 %v3228_v44, %v3154_v41 }
 0xbe8   :  { %v4718_v51 = vmul.f32 -1.442695, %v3229_v45 }
 0xbea   :  { %5052 = vpow2.f32 %v4718_v51 }
 0xbeb   :  { %5054 = vrcp.f32 %v3212_v55 }
 0xbf0   :  { %v5053_v58 = vpop.eup %5052 }
 0xbf1   :  { %v3233_v10 = vadd.f32 1.0, %v5053_v58  ;;  %v5055_v46 = vpop.eup %5054 }
 0xbf2   :  { %v3214_v33 = vmul.f32 %v5055_v46, %v3212_v55  ;;  %vm3219_vm8 = vweird.f32 %v5055_v46 }
 0xbf3   :  { %5056 = vrcp.f32 %v3233_v10  ;;  %v3245_v16 = vand.u32 2147483648, %v3233_v10  ;;  %vm3239_vm11 = vweird.f32 %v3233_v10  ;;  %vm6150_vm12 = vmor %vm3218_vm10, %vm3219_vm8  ;;  %v3243_v6 = vand.u32 2147483647, %v3233_v10 }
 0xbf4   :  { %v3082_v57 = vpop.permute.xlu1 %3081  ;;  %v3090_v11 = vpop.permute.xlu0 %3089  ;;  %v3215_v42 = vsub.f32 1.0, %v3214_v33 }
 0xbf5   :  { %3087 = vst.msk [vmem:[#allocation3 + $0x20] sm:$0xff] %vm96_vm1, %v3082_v57  ;;  %v3246_v56 = vor.u32 1.1754944e-38, %v3245_v16  ;;  %vm3244_vm2 = vcmp.eq.f32.partialorder %v3243_v6, 8.507059e+37 }
 0xbf6   :  { %3095 = vst.msk [vmem:[#allocation3 + $0x30] sm:$0xff] %vm96_vm1, %v3090_v11  ;;  %v3216_v50 = vmul.f32 %v5055_v46, %v3215_v42 }
 0xbf8   :  { %v3217_v63 = vadd.f32 %v5055_v46, %v3216_v50 }
 0xbf9   :  { %v5057_v28 = vpop.eup %5056 }
 0xbfa   :  { %v3235_v37 = vmul.f32 %v5057_v28, %v3233_v10  ;;  %vm3240_vm9 = vweird.f32 %v5057_v28  ;;  %v3221_v19 = vsel %vm6150_vm12, %v5055_v46, %v3217_v63 }
 0xbfb   :  { %vm3241_vm13 = vmor %vm3239_vm11, %vm3240_vm9  ;;  %v3226_v9 = vsel %vm3223_vm15, %v3225_v5, %v3221_v19 }
 0xbfc   :  { %v3236_v4 = vsub.f32 1.0, %v3235_v37  ;;  %v3249_v1 = vld [vmem:[#allocation3 + $0x20] sm:$0x3] }
 0xbfd   :  { %v3252_v43 = vld [vmem:[#allocation3 + $0x30] sm:$0x3]  ;;  %v3250_v61 = vadd.f32 %v3249_v1, %v3179_v12 }
 0xbfe   :  { %v3253_v54 = vadd.f32 %v3252_v43, %v3204_v38  ;;  %v3237_v59 = vmul.f32 %v5057_v28, %v3236_v4  ;;  %v3404_v38 = vld [vmem:[#allocation3 + $0x12] sm:$0x3] }
 0xc00   :  { %v4719_v62 = vmul.f32 -1.442695, %v3253_v54  ;;  %v3238_v52 = vadd.f32 %v5057_v28, %v3237_v59 }
 0xc02   :  { %5058 = vpow2.f32 %v4719_v62  ;;  %v3242_v21 = vsel %vm3241_vm13, %v5057_v28, %v3238_v52  ;;  %v3425_v52 = vld [vmem:[#allocation3 + $0x22] sm:$0x3] }
 0xc03   :  { %5060 = vtanh.f32 %v3250_v61  ;;  %v3247_v30 = vsel %vm3244_vm2, %v3246_v56, %v3242_v21 }
 0xc04   :  { %v3278_v39 = vmul.f32 %v3276_v34, %v3247_v30 }
 0xc08   :  { %v5059_v49 = vpop.eup %5058 }
 0xc09   :  { %v3257_v24 = vadd.f32 1.0, %v5059_v49  ;;  %v5061_v31 = vpop.eup %5060 }
 0xc0a   :  { %v3279_v36 = vmul.f32 %v5061_v31, %v3226_v9 }
 0xc0b   :  { %5062 = vrcp.f32 %v3257_v24  ;;  %v3269_v53 = vand.u32 2147483648, %v3257_v24  ;;  %v3267_v58 = vand.u32 2147483647, %v3257_v24  ;;  %vm3263_vm5 = vweird.f32 %v3257_v24 }
 0xc0c   :  { %v6160_v44 = vadd.f32 %v3279_v36, %v3278_v39 }
 0xc0d   :  { %v3270_v57 = vor.u32 1.1754944e-38, %v3269_v53  ;;  %vm3268_vm7 = vcmp.eq.f32.partialorder %v3267_v58, 8.507059e+37 }
 0xc0e   :  { %5064 = vtanh.f32 %v6160_v44 }
 0xc11   :  { %v5063_v41 = vpop.eup %5062 }
 0xc12   :  { %v3259_v45 = vmul.f32 %v5063_v41, %v3257_v24  ;;  %vm3264_vm4 = vweird.f32 %v5063_v41 }
 0xc13   :  { %vm3265_vm6 = vmor %vm3263_vm5, %vm3264_vm4 }
 0xc14   :  { %v3260_v51 = vsub.f32 1.0, %v3259_v45  ;;  %v5065_v46 = vpop.eup %5064 }
 0xc16   :  { %v3261_v55 = vmul.f32 %v5063_v41, %v3260_v51 }
 0xc18   :  { %v3262_v10 = vadd.f32 %v5063_v41, %v3261_v55 }
 0xc1a   :  { %v3266_v11 = vsel %vm3265_vm6, %v5063_v41, %v3262_v10 }
 0xc1b   :  { %v3271_v28 = vsel %vm3268_vm7, %v3270_v57, %v3266_v11 }
 0xc1c   :  { %v3282_v33 = vmul.f32 %v5065_v46, %v3271_v28 }
 0xc1e   :  { %3283 = vst.msk [vmem:[#allocation2] sm:$0x3] %vm355_vm14, %v3282_v33  ;;  %4720 = vmatmul.msk.f32.vlgmr.msra.gmra.mxu2 %vm96_vm1, %v3282_v33  ;;  %4721 = vmatmul.msk.f32.vlgmr.msrb.gmra.mxu3 %vm96_vm1, %v3282_v33 }
 0xc1f   :  { %4722 = vmatmul.msk.f32.vlgmr.msrb.gmra.mxu0 %vm96_vm1, %v3282_v33  ;;  %4723 = vmatmul.msk.f32.vlgmr.msrb.gmra.mxu1 %vm96_vm1, %v3282_v33 }
 0xc20   :  { %3645 = vmatpush.msra.mxu2 %v6001_v15  ;;  %3669 = vmatpush.msrb.mxu3 %v6009_v23 }
 0xc21   :  { %3693 = vmatpush.msrb.mxu0 %v6022_v29  ;;  %3717 = vmatpush.msrb.mxu1 %v6077_v14 }
 0xc22   :  { %3646 = vmatpush.msra.mxu2 %v6003_v20  ;;  %3670 = vmatpush.msrb.mxu3 %v6014_v32  ;;  %v3428_v32 = vld [vmem:[#allocation3 + $0x32] sm:$0x3] }
 0xc23   :  { %3694 = vmatpush.msrb.mxu0 %v6027_v35  ;;  %3718 = vmatpush.msrb.mxu1 %v6084_v7 }
 0xc24   :  { %3647 = vmatpush.msra.mxu2 %v6007_v22  ;;  %3671 = vmatpush.msrb.mxu3 %v6020_v25 }
 0xc25   :  { %3695 = vmatpush.msrb.mxu0 %v6038_v47  ;;  %3719 = vmatpush.msrb.mxu1 %v6089_v0 }
 0xc26   :  { %3648 = vmatpush.msra.mxu2 %v6018_v17  ;;  %3672 = vmatpush.msrb.mxu3 %v6030_v40 }
 0xc27   :  { %3696 = vmatpush.msrb.mxu0 %v6079_v26  ;;  %3720 = vmatpush.msrb.mxu1 %v6095_v8 }
 0xc29   :  { %v3066_v15 = vpop.f32.mrf.mxu0 }
 0xc2a   :  { %v3067_v20 = vadd.f32 %v6118_v2, %v3066_v15  ;;  %v3383_v2 = vld [vmem:[#allocation3 + $0x2] sm:$0x3] }
 0xc2c   :  { %3070 = vst.msk [vmem:[#allocation3 + $0x8] sm:$0xff] %vm96_vm1, %v3067_v20  ;;  %3083 = vrot.lane.b32.xlu1 %v3067_v20, %s5263_s27  ;;  %3091 = vrot.lane.b32.xlu0 %v3067_v20, %s5261_s25  ;;  %s4572_s25 = sshll.u32 %s5271_s9, 4  ;;  %s4573_s25 = int_to_ptr.vmem [resolvable:$true] %s4572_s25 }
 0xc2d   :  { %3075 = vrot.lane.b32.xlu2 %v3067_v20, %s5262_s26 }
 0xc87   :  { %v3076_v22 = vpop.permute.xlu2 %3075 }
 0xc88   :  { %3080 = vst.msk [vmem:[#allocation3 + $0x18] sm:$0xff] %vm96_vm1, %v3076_v22 }
 0xc9c   :  { %v3380_v23 = vpop.f32.mrf.mxu1  ;;  %v3356_v13 = vpop.f32.mrf.mxu0 }
 0xc9d   :  { %v3429_v17 = vadd.f32 %v3428_v32, %v3380_v23  ;;  %v3426_v18 = vadd.f32 %v3425_v52, %v3356_v13 }
 0xc9e   :  { %v3084_v25 = vpop.permute.xlu1 %3083  ;;  %v3092_v35 = vpop.permute.xlu0 %3091 }
 0xc9f   :  { %v4726_v40 = vmul.f32 -1.442695, %v3429_v17  ;;  %3088 = vst.msk [vmem:[#allocation3 + $0x28] sm:$0xff] %vm96_vm1, %v3084_v25  ;;  %v3599_v17 = vld [vmem:[#allocation3 + $0x34] sm:$0x3] }
 0xca0   :  { %3096 = vst.msk [vmem:[#allocation3 + $0x38] sm:$0xff] %vm96_vm1, %v3092_v35 }
 0xca1   :  { %5066 = vpow2.f32 %v4726_v40  ;;  %v3308_v47 = vpop.f32.mrf.mxu2  ;;  %v3332_v37 = vpop.f32.mrf.mxu3 }
 0xca2   :  { %v3384_v42 = vadd.f32 %v3383_v2, %v3308_v47  ;;  %v3405_v4 = vadd.f32 %v3404_v38, %v3332_v37  ;;  %v3554_v47 = vld [vmem:[#allocation3 + $0x4] sm:$0x3]  ;;  %v3575_v37 = vld [vmem:[#allocation3 + $0x14] sm:$0x3] }
 0xca4   :  { %v4724_v12 = vmul.f32 -1.442695, %v3384_v42  ;;  %v4725_v1 = vmul.f32 -1.442695, %v3405_v4 }
 0xca6   :  { %5068 = vpow2.f32 %v4724_v12 }
 0xca7   :  { %v5067_v43 = vpop.eup %5066  ;;  %5070 = vpow2.f32 %v4725_v1 }
 0xca8   :  { %v3433_v54 = vadd.f32 1.0, %v5067_v43 }
 0xcaa   :  { %5072 = vrcp.f32 %v3433_v54  ;;  %v3445_v28 = vand.u32 2147483648, %v3433_v54  ;;  %vm3439_vm4 = vweird.f32 %v3433_v54  ;;  %v3443_v33 = vand.u32 2147483647, %v3433_v54 }
 0xcac   :  { %v5069_v61 = vpop.eup %5068  ;;  %v3446_v20 = vor.u32 1.1754944e-38, %v3445_v28  ;;  %vm3444_vm6 = vcmp.eq.f32.partialorder %v3443_v33, 8.507059e+37 }
 0xcad   :  { %v5071_v62 = vpop.eup %5070  ;;  %v3388_v59 = vadd.f32 1.0, %v5069_v61  ;;  %v3596_v61 = vld [vmem:[#allocation3 + $0x24] sm:$0x3] }
 0xcae   :  { %v3409_v50 = vadd.f32 1.0, %v5071_v62 }
 0xcaf   :  { %5074 = vrcp.f32 %v3388_v59  ;;  %v3400_v27 = vand.u32 2147483648, %v3388_v59  ;;  %v3398_v24 = vand.u32 2147483647, %v3388_v59  ;;  %vm3394_vm9 = vweird.f32 %v3388_v59 }
 0xcb0   :  { %5076 = vrcp.f32 %v3409_v50  ;;  %v5073_v63 = vpop.eup %5072  ;;  %v3421_v31 = vand.u32 2147483648, %v3409_v50  ;;  %v3419_v5 = vand.u32 2147483647, %v3409_v50  ;;  %vm3415_vm11 = vweird.f32 %v3409_v50 }
 0xcb1   :  { %v3435_v49 = vmul.f32 %v5073_v63, %v3433_v54  ;;  %5078 = vtanh.f32 %v3426_v18  ;;  %v3401_v34 = vor.u32 1.1754944e-38, %v3400_v27  ;;  %vm3399_vm12 = vcmp.eq.f32.partialorder %v3398_v24, 8.507059e+37 }
 0xcb2   :  { %v3422_v41 = vor.u32 1.1754944e-38, %v3421_v31  ;;  %vm3420_vm15 = vcmp.eq.f32.partialorder %v3419_v5, 8.507059e+37  ;;  %vm3440_vm2 = vweird.f32 %v5073_v63 }
 0xcb3   :  { %v3436_v9 = vsub.f32 1.0, %v3435_v49  ;;  %vm3441_vm5 = vmor %vm3439_vm4, %vm3440_vm2 }
 0xcb5   :  { %v5075_v16 = vpop.eup %5074  ;;  %v3437_v55 = vmul.f32 %v5073_v63, %v3436_v9 }
 0xcb6   :  { %v5077_v60 = vpop.eup %5076  ;;  %v3390_v48 = vmul.f32 %v5075_v16, %v3388_v59  ;;  %vm3395_vm0 = vweird.f32 %v5075_v16 }
 0xcb7   :  { %v3411_v6 = vmul.f32 %v5077_v60, %v3409_v50  ;;  %vm3416_vm8 = vweird.f32 %v5077_v60  ;;  %vm3396_vm10 = vmor %vm3394_vm9, %vm3395_vm0  ;;  %v5079_v45 = vpop.eup %5078  ;;  %v3438_v46 = vadd.f32 %v5073_v63, %v3437_v55 }
 0xcb8   :  { %v3391_v3 = vsub.f32 1.0, %v3390_v48  ;;  %vm3417_vm13 = vmor %vm3415_vm11, %vm3416_vm8 }
 0xcb9   :  { %v3412_v19 = vsub.f32 1.0, %v3411_v6  ;;  %v3442_v15 = vsel %vm3441_vm5, %v5073_v63, %v3438_v46 }
 0xcba   :  { %v3392_v21 = vmul.f32 %v5075_v16, %v3391_v3  ;;  %v3447_v23 = vsel %vm3444_vm6, %v3446_v20, %v3442_v15  ;;  %v3770_v15 = vld [vmem:[#allocation3 + $0x36] sm:$0x3] }
 0xcbb   :  { %v3413_v56 = vmul.f32 %v5077_v60, %v3412_v19 }
 0xcbc   :  { %v3393_v30 = vadd.f32 %v5075_v16, %v3392_v21 }
 0xcbd   :  { %v3414_v36 = vadd.f32 %v5077_v60, %v3413_v56 }
 0xcbe   :  { %v3397_v39 = vsel %vm3396_vm10, %v5075_v16, %v3393_v30 }
 0xcbf   :  { %v3402_v51 = vsel %vm3399_vm12, %v3401_v34, %v3397_v39  ;;  %v3418_v53 = vsel %vm3417_vm13, %v5077_v60, %v3414_v36 }
 0xcc0   :  { %v3450_v58 = vmul.f32 %v5079_v45, %v3402_v51  ;;  %v3423_v10 = vsel %vm3420_vm15, %v3422_v41, %v3418_v53 }
 0xcc1   :  { %v3449_v57 = vmul.f32 %v3423_v10, %v6160_v44 }
 0xcc3   :  { %v6193_v11 = vadd.f32 %v3450_v58, %v3449_v57 }
 0xcc5   :  { %5080 = vtanh.f32 %v6193_v11 }
 0xccb   :  { %v5081_v22 = vpop.eup %5080 }
 0xccc   :  { %v3453_v32 = vmul.f32 %v5081_v22, %v3447_v23  ;;  %v3725_v23 = vld [vmem:[#allocation3 + $0x6] sm:$0x3] }
 0xcce   :  { %3454 = vst.msk [vmem:[#allocation2 + $0x2] sm:$0x3] %vm355_vm14, %v3453_v32  ;;  %4727 = vmatmul.msk.f32.vlgmr.msrb.gmra.mxu2 %vm96_vm1, %v3453_v32  ;;  %4728 = vmatmul.msk.f32.vlgmr.msra.gmra.mxu3 %vm96_vm1, %v3453_v32 }
 0xccf   :  { %4729 = vmatmul.msk.f32.vlgmr.msra.gmra.mxu0 %vm96_vm1, %v3453_v32  ;;  %4730 = vmatmul.msk.f32.vlgmr.msra.gmra.mxu1 %vm96_vm1, %v3453_v32  ;;  %v3746_v32 = vld [vmem:[#allocation3 + $0x16] sm:$0x3] }
 0xcd0   :  { %3864 = vmatpush.msra.mxu0 %v6022_v29  ;;  %3888 = vmatpush.msra.mxu1 %v6077_v14 }
 0xcd2   :  { %3889 = vmatpush.msra.mxu1 %v6084_v7 }
 0xcd4   :  { %3890 = vmatpush.msra.mxu1 %v6089_v0 }
 0xcd6   :  { %3891 = vmatpush.msra.mxu1 %v6095_v8 }
 0xd4c   :  { %v3551_v44 = vpop.f32.mrf.mxu1  ;;  %v3527_v43 = vpop.f32.mrf.mxu0 }
 0xd4d   :  { %v3600_v25 = vadd.f32 %v3599_v17, %v3551_v44  ;;  %v3597_v59 = vadd.f32 %v3596_v61, %v3527_v43 }
 0xd4f   :  { %v4733_v35 = vmul.f32 -1.442695, %v3600_v25  ;;  %v6215_v25 = vld [vmem:[#allocation8 + $0x118] sm:$0xff] }
 0xd50   :  { %3816 = vmatpush.msrb.mxu2 %v6215_v25 }
 0xd51   :  { %5082 = vpow2.f32 %v4733_v35  ;;  %v3479_v40 = vpop.f32.mrf.mxu2  ;;  %v3503_v2 = vpop.f32.mrf.mxu3  ;;  %v6217_v35 = vld [vmem:[#allocation8 + $0x138] sm:$0xff] }
 0xd52   :  { %v3555_v38 = vadd.f32 %v3554_v47, %v3479_v40  ;;  %v3576_v42 = vadd.f32 %v3575_v37, %v3503_v2  ;;  %v6219_v40 = vld [vmem:[#allocation8 + $0x110] sm:$0xff]  ;;  %3840 = vmatpush.msra.mxu3 %v6217_v35 }
 0xd53   :  { %v6223_v37 = vld [vmem:[#allocation8 + $0x130] sm:$0xff]  ;;  %3817 = vmatpush.msrb.mxu2 %v6219_v40 }
 0xd54   :  { %v4731_v29 = vmul.f32 -1.442695, %v3555_v38  ;;  %v4732_v4 = vmul.f32 -1.442695, %v3576_v42  ;;  %v6225_v38 = vld [vmem:[#allocation8 + $0x150] sm:$0xff]  ;;  %v6228_v42 = vld [vmem:[#allocation8 + $0x108] sm:$0xff]  ;;  %3841 = vmatpush.msra.mxu3 %v6223_v37 }
 0xd55   :  { %3865 = vmatpush.msra.mxu0 %v6225_v38  ;;  %3818 = vmatpush.msrb.mxu2 %v6228_v42 }
 0xd56   :  { %5084 = vpow2.f32 %v4731_v29  ;;  %v6230_v29 = vld [vmem:[#allocation8 + $0x128] sm:$0xff] }
 0xd57   :  { %v5083_v14 = vpop.eup %5082  ;;  %5086 = vpow2.f32 %v4732_v4  ;;  %v6232_v4 = vld [vmem:[#allocation8 + $0x148] sm:$0xff]  ;;  %3842 = vmatpush.msra.mxu3 %v6230_v29 }
 0xd58   :  { %v3604_v7 = vadd.f32 1.0, %v5083_v14  ;;  %3866 = vmatpush.msra.mxu0 %v6232_v4 }
 0xd5a   :  { %5088 = vrcp.f32 %v3604_v7  ;;  %v3616_v55 = vand.u32 2147483648, %v3604_v7  ;;  %vm3610_vm2 = vweird.f32 %v3604_v7  ;;  %v3614_v58 = vand.u32 2147483647, %v3604_v7  ;;  %3867 = vmatpush.msra.mxu0 %v6079_v26 }
 0xd5c   :  { %v5085_v0 = vpop.eup %5084  ;;  %v3617_v57 = vor.u32 1.1754944e-38, %v3616_v55  ;;  %vm3615_vm5 = vcmp.eq.f32.partialorder %v3614_v58, 8.507059e+37 }
 0xd5d   :  { %v5087_v12 = vpop.eup %5086  ;;  %v3559_v8 = vadd.f32 1.0, %v5085_v0  ;;  %v6237_v0 = vld [vmem:[#allocation8 + $0x100] sm:$0xff] }
 0xd5e   :  { %v3580_v1 = vadd.f32 1.0, %v5087_v12  ;;  %v6239_v12 = vld [vmem:[#allocation8 + $0x120] sm:$0xff]  ;;  %3819 = vmatpush.msrb.mxu2 %v6237_v0 }
 0xd5f   :  { %5090 = vrcp.f32 %v3559_v8  ;;  %v3571_v18 = vand.u32 2147483648, %v3559_v8  ;;  %v3569_v6 = vand.u32 2147483647, %v3559_v8  ;;  %vm3565_vm8 = vweird.f32 %v3559_v8  ;;  %3843 = vmatpush.msra.mxu3 %v6239_v12 }
 0xd60   :  { %5092 = vrcp.f32 %v3580_v1  ;;  %v5089_v54 = vpop.eup %5088  ;;  %v3592_v49 = vand.u32 2147483648, %v3580_v1  ;;  %v3590_v27 = vand.u32 2147483647, %v3580_v1  ;;  %vm3586_vm10 = vweird.f32 %v3580_v1 }
 0xd61   :  { %v3606_v52 = vmul.f32 %v5089_v54, %v3604_v7  ;;  %5094 = vtanh.f32 %v3597_v59  ;;  %v3572_v24 = vor.u32 1.1754944e-38, %v3571_v18  ;;  %vm3570_vm11 = vcmp.eq.f32.partialorder %v3569_v6, 8.507059e+37 }
 0xd62   :  { %v3593_v5 = vor.u32 1.1754944e-38, %v3592_v49  ;;  %vm3591_vm13 = vcmp.eq.f32.partialorder %v3590_v27, 8.507059e+37  ;;  %vm3611_vm15 = vweird.f32 %v5089_v54 }
 0xd63   :  { %v3607_v19 = vsub.f32 1.0, %v3606_v52  ;;  %vm3612_vm4 = vmor %vm3610_vm2, %vm3611_vm15 }
 0xd65   :  { %v5091_v62 = vpop.eup %5090  ;;  %v3608_v36 = vmul.f32 %v5089_v54, %v3607_v19 }
 0xd66   :  { %v5093_v50 = vpop.eup %5092  ;;  %v3561_v13 = vmul.f32 %v5091_v62, %v3559_v8  ;;  %vm3566_vm7 = vweird.f32 %v5091_v62 }
 0xd67   :  { %v3582_v63 = vmul.f32 %v5093_v50, %v3580_v1  ;;  %vm3587_vm0 = vweird.f32 %v5093_v50  ;;  %vm3567_vm9 = vmor %vm3565_vm8, %vm3566_vm7  ;;  %v5095_v9 = vpop.eup %5094  ;;  %v3609_v53 = vadd.f32 %v5089_v54, %v3608_v36 }
 0xd68   :  { %v3562_v16 = vsub.f32 1.0, %v3561_v13  ;;  %vm3588_vm12 = vmor %vm3586_vm10, %vm3587_vm0 }
 0xd69   :  { %v3583_v60 = vsub.f32 1.0, %v3582_v63  ;;  %v3613_v10 = vsel %vm3612_vm4, %v5089_v54, %v3609_v53 }
 0xd6a   :  { %v3563_v48 = vmul.f32 %v5091_v62, %v3562_v16  ;;  %v3618_v28 = vsel %vm3615_vm5, %v3617_v57, %v3613_v10 }
 0xd6b   :  { %v3584_v3 = vmul.f32 %v5093_v50, %v3583_v60 }
 0xd6c   :  { %v3564_v21 = vadd.f32 %v5091_v62, %v3563_v48 }
 0xd6d   :  { %v3585_v31 = vadd.f32 %v5093_v50, %v3584_v3 }
 0xd6e   :  { %v3568_v56 = vsel %vm3567_vm9, %v5091_v62, %v3564_v21 }
 0xd6f   :  { %v3573_v30 = vsel %vm3570_vm11, %v3572_v24, %v3568_v56  ;;  %v3589_v34 = vsel %vm3588_vm12, %v5093_v50, %v3585_v31  ;;  %v3767_v50 = vld [vmem:[#allocation3 + $0x26] sm:$0x3] }
 0xd70   :  { %v3621_v39 = vmul.f32 %v5095_v9, %v3573_v30  ;;  %v3594_v41 = vsel %vm3591_vm13, %v3593_v5, %v3589_v34 }
 0xd71   :  { %v3620_v45 = vmul.f32 %v3594_v41, %v6193_v11 }
 0xd73   :  { %v6207_v51 = vadd.f32 %v3621_v39, %v3620_v45 }
 0xd75   :  { %5096 = vtanh.f32 %v6207_v51 }
 0xd7b   :  { %v5097_v46 = vpop.eup %5096 }
 0xd7c   :  { %v3624_v33 = vmul.f32 %v5097_v46, %v3618_v28 }
 0xd7e   :  { %3625 = vst.msk [vmem:[#allocation2 + $0x4] sm:$0x3] %vm355_vm14, %v3624_v33  ;;  %4734 = vmatmul.msk.f32.vlgmr.msra.gmra.mxu2 %vm96_vm1, %v3624_v33  ;;  %4735 = vmatmul.msk.f32.vlgmr.msrb.gmra.mxu3 %vm96_vm1, %v3624_v33 }
 0xd7f   :  { %4736 = vmatmul.msk.f32.vlgmr.msrb.gmra.mxu0 %vm96_vm1, %v3624_v33  ;;  %4737 = vmatmul.msk.f32.vlgmr.msrb.gmra.mxu1 %vm96_vm1, %v3624_v33 }
 0xd80   :  { %3987 = vmatpush.msra.mxu2 %v6215_v25  ;;  %4011 = vmatpush.msrb.mxu3 %v6217_v35 }
 0xd82   :  { %3988 = vmatpush.msra.mxu2 %v6219_v40  ;;  %4012 = vmatpush.msrb.mxu3 %v6223_v37 }
 0xd84   :  { %3989 = vmatpush.msra.mxu2 %v6228_v42  ;;  %4013 = vmatpush.msrb.mxu3 %v6230_v29 }
 0xd86   :  { %3990 = vmatpush.msra.mxu2 %v6237_v0  ;;  %4014 = vmatpush.msrb.mxu3 %v6239_v12 }
 0xdfc   :  { %v3722_v11 = vpop.f32.mrf.mxu1  ;;  %v3698_v62 = vpop.f32.mrf.mxu0 }
 0xdfd   :  { %v3771_v20 = vadd.f32 %v3770_v15, %v3722_v11  ;;  %v3768_v63 = vadd.f32 %v3767_v50, %v3698_v62  ;;  %v6292_v50 = vld [vmem:[#allocation8 + $0x160] sm:$0xff] }
 0xdff   :  { %v4740_v22 = vmul.f32 -1.442695, %v3771_v20 }
 0xe01   :  { %5098 = vpow2.f32 %v4740_v22  ;;  %v3650_v44 = vpop.f32.mrf.mxu2  ;;  %v3674_v17 = vpop.f32.mrf.mxu3 }
 0xe02   :  { %v3726_v47 = vadd.f32 %v3725_v23, %v3650_v44  ;;  %v3747_v2 = vadd.f32 %v3746_v32, %v3674_v17  ;;  %v3941_v23 = vld [vmem:[#allocation3 + $0x38] sm:$0x3]  ;;  %v3896_v17 = vld [vmem:[#allocation3 + $0x8] sm:$0x3] }
 0xe04   :  { %v4738_v14 = vmul.f32 -1.442695, %v3726_v47  ;;  %v4739_v7 = vmul.f32 -1.442695, %v3747_v2  ;;  %v3917_v47 = vld [vmem:[#allocation3 + $0x18] sm:$0x3] }
 0xe06   :  { %5100 = vpow2.f32 %v4738_v14 }
 0xe07   :  { %v5099_v8 = vpop.eup %5098  ;;  %5102 = vpow2.f32 %v4739_v7  ;;  %v6278_v7 = vld [vmem:[#allocation8 + $0x158] sm:$0xff] }
 0xe08   :  { %v6248_v1 = vadd.f32 1.0, %v5099_v8  ;;  %v6280_v8 = vld [vmem:[#allocation8 + $0x178] sm:$0xff]  ;;  %4035 = vmatpush.msrb.mxu0 %v6278_v7 }
 0xe09   :  { %4059 = vmatpush.msrb.mxu1 %v6280_v8 }
 0xe0a   :  { %5104 = vrcp.f32 %v6248_v1  ;;  %v3787_v46 = vand.u32 2147483648, %v6248_v1  ;;  %vm3781_vm15 = vweird.f32 %v6248_v1  ;;  %v3785_v28 = vand.u32 2147483647, %v6248_v1  ;;  %4036 = vmatpush.msrb.mxu0 %v6225_v38 }
 0xe0c   :  { %v5101_v43 = vpop.eup %5100  ;;  %v3788_v11 = vor.u32 1.1754944e-38, %v3787_v46  ;;  %vm3786_vm4 = vcmp.eq.f32.partialorder %v3785_v28, 8.507059e+37  ;;  %4037 = vmatpush.msrb.mxu0 %v6232_v4 }
 0xe0d   :  { %v5103_v54 = vpop.eup %5102  ;;  %v3730_v61 = vadd.f32 1.0, %v5101_v43 }
 0xe0e   :  { %v3751_v26 = vadd.f32 1.0, %v5103_v54 }
 0xe0f   :  { %5106 = vrcp.f32 %v3730_v61  ;;  %v3742_v6 = vand.u32 2147483648, %v3730_v61  ;;  %v3740_v27 = vand.u32 2147483647, %v3730_v61  ;;  %vm3736_vm0 = vweird.f32 %v3730_v61 }
 0xe10   :  { %5108 = vrcp.f32 %v3751_v26  ;;  %v5105_v59 = vpop.eup %5104  ;;  %v3763_v19 = vand.u32 2147483648, %v3751_v26  ;;  %v3761_v24 = vand.u32 2147483647, %v3751_v26  ;;  %vm3757_vm9 = vweird.f32 %v3751_v26 }
 0xe11   :  { %v3777_v60 = vmul.f32 %v5105_v59, %v6248_v1  ;;  %5110 = vtanh.f32 %v3768_v63  ;;  %v3743_v5 = vor.u32 1.1754944e-38, %v3742_v6  ;;  %vm3741_vm10 = vcmp.eq.f32.partialorder %v3740_v27, 8.507059e+37  ;;  %v6282_v1 = vld [vmem:[#allocation8 + $0x170] sm:$0xff] }
 0xe12   :  { %v3764_v34 = vor.u32 1.1754944e-38, %v3763_v19  ;;  %vm3762_vm12 = vcmp.eq.f32.partialorder %v3761_v24, 8.507059e+37  ;;  %vm3782_vm13 = vweird.f32 %v5105_v59  ;;  %4060 = vmatpush.msrb.mxu1 %v6282_v1 }
 0xe13   :  { %v3778_v31 = vsub.f32 1.0, %v3777_v60  ;;  %vm3783_vm2 = vmor %vm3781_vm15, %vm3782_vm13 }
 0xe15   :  { %v5107_v13 = vpop.eup %5106  ;;  %v3779_v45 = vmul.f32 %v5105_v59, %v3778_v31 }
 0xe16   :  { %v5109_v52 = vpop.eup %5108  ;;  %v3732_v16 = vmul.f32 %v5107_v13, %v3730_v61  ;;  %vm3737_vm6 = vweird.f32 %v5107_v13  ;;  %v6286_v61 = vld [vmem:[#allocation8 + $0x168] sm:$0xff] }
 0xe17   :  { %v3753_v18 = vmul.f32 %v5109_v52, %v3751_v26  ;;  %vm3758_vm7 = vweird.f32 %v5109_v52  ;;  %vm3738_vm8 = vmor %vm3736_vm0, %vm3737_vm6  ;;  %v5111_v36 = vpop.eup %5110  ;;  %v3780_v57 = vadd.f32 %v5105_v59, %v3779_v45  ;;  %4061 = vmatpush.msrb.mxu1 %v6286_v61 }
 0xe18   :  { %v3733_v48 = vsub.f32 1.0, %v3732_v16  ;;  %vm3759_vm11 = vmor %vm3757_vm9, %vm3758_vm7 }
 0xe19   :  { %v3754_v49 = vsub.f32 1.0, %v3753_v18  ;;  %v3784_v33 = vsel %vm3783_vm2, %v5105_v59, %v3780_v57  ;;  %v6290_v59 = vld [vmem:[#allocation8 + $0x140] sm:$0xff]  ;;  %4062 = vmatpush.msrb.mxu1 %v6292_v50 }
 0xe1a   :  { %v3734_v3 = vmul.f32 %v5107_v13, %v3733_v48  ;;  %v3789_v20 = vsel %vm3786_vm4, %v3788_v11, %v3784_v33  ;;  %4038 = vmatpush.msrb.mxu0 %v6290_v59 }
 0xe1b   :  { %v3755_v21 = vmul.f32 %v5109_v52, %v3754_v49  ;;  %v3938_v49 = vld [vmem:[#allocation3 + $0x28] sm:$0x3] }
 0xe1c   :  { %v3735_v56 = vadd.f32 %v5107_v13, %v3734_v3 }
 0xe1d   :  { %v3756_v9 = vadd.f32 %v5109_v52, %v3755_v21 }
 0xe1e   :  { %v3739_v30 = vsel %vm3738_vm8, %v5107_v13, %v3735_v56 }
 0xe1f   :  { %v3744_v39 = vsel %vm3741_vm10, %v3743_v5, %v3739_v30  ;;  %v3760_v41 = vsel %vm3759_vm11, %v5109_v52, %v3756_v9 }
 0xe20   :  { %v3792_v53 = vmul.f32 %v5111_v36, %v3744_v39  ;;  %v3765_v55 = vsel %vm3762_vm12, %v3764_v34, %v3760_v41 }
 0xe21   :  { %v3791_v58 = vmul.f32 %v3765_v55, %v6207_v51 }
 0xe23   :  { %v6259_v10 = vadd.f32 %v3792_v53, %v3791_v58 }
 0xe25   :  { %5112 = vtanh.f32 %v6259_v10 }
 0xe2b   :  { %v5113_v15 = vpop.eup %5112 }
 0xe2c   :  { %v3795_v22 = vmul.f32 %v5113_v15, %v3789_v20 }
 0xe2e   :  { %3796 = vst.msk [vmem:[#allocation2 + $0x6] sm:$0x3] %vm355_vm14, %v3795_v22  ;;  %4741 = vmatmul.msk.f32.vlgmr.msrb.gmra.mxu2 %vm96_vm1, %v3795_v22  ;;  %4742 = vmatmul.msk.f32.vlgmr.msra.gmra.mxu3 %vm96_vm1, %v3795_v22 }
 0xe2f   :  { %4743 = vmatmul.msk.f32.vlgmr.msra.gmra.mxu0 %vm96_vm1, %v3795_v22  ;;  %4744 = vmatmul.msk.f32.vlgmr.msra.gmra.mxu1 %vm96_vm1, %v3795_v22 }
 0xe30   :  { %4158 = vmatpush.msrb.mxu2 %v6215_v25  ;;  %4182 = vmatpush.msra.mxu3 %v6217_v35 }
 0xe31   :  { %4206 = vmatpush.msra.mxu0 %v6278_v7  ;;  %4230 = vmatpush.msra.mxu1 %v6280_v8 }
 0xe32   :  { %4159 = vmatpush.msrb.mxu2 %v6219_v40  ;;  %4183 = vmatpush.msra.mxu3 %v6223_v37 }
 0xe33   :  { %4207 = vmatpush.msra.mxu0 %v6225_v38  ;;  %4231 = vmatpush.msra.mxu1 %v6282_v1 }
 0xe34   :  { %4160 = vmatpush.msrb.mxu2 %v6228_v42  ;;  %4184 = vmatpush.msra.mxu3 %v6230_v29 }
 0xe35   :  { %4208 = vmatpush.msra.mxu0 %v6232_v4  ;;  %4232 = vmatpush.msra.mxu1 %v6286_v61 }
 0xe36   :  { %4161 = vmatpush.msrb.mxu2 %v6237_v0  ;;  %4185 = vmatpush.msra.mxu3 %v6239_v12 }
 0xe37   :  { %4209 = vmatpush.msra.mxu0 %v6290_v59  ;;  %4233 = vmatpush.msra.mxu1 %v6292_v50 }
 0xeac   :  { %v3893_v51 = vpop.f32.mrf.mxu1  ;;  %v3869_v48 = vpop.f32.mrf.mxu0 }
 0xead   :  { %v3942_v32 = vadd.f32 %v3941_v23, %v3893_v51  ;;  %v3939_v27 = vadd.f32 %v3938_v49, %v3869_v48 }
 0xeaf   :  { %v4747_v44 = vmul.f32 -1.442695, %v3942_v32 }
 0xeb1   :  { %5114 = vpow2.f32 %v4747_v44  ;;  %v3821_v2 = vpop.f32.mrf.mxu2  ;;  %v3845_v14 = vpop.f32.mrf.mxu3 }
 0xeb2   :  { %v3897_v43 = vadd.f32 %v3896_v17, %v3821_v2  ;;  %v3918_v54 = vadd.f32 %v3917_v47, %v3845_v14 }
 0xeb4   :  { %v4745_v26 = vmul.f32 -1.442695, %v3897_v43  ;;  %v4746_v62 = vmul.f32 -1.442695, %v3918_v54 }
 0xeb6   :  { %5116 = vpow2.f32 %v4745_v26 }
 0xeb7   :  { %v5115_v13 = vpop.eup %5114  ;;  %5118 = vpow2.f32 %v4746_v62 }
 0xeb8   :  { %v6300_v63 = vadd.f32 1.0, %v5115_v13 }
 0xeba   :  { %5120 = vrcp.f32 %v6300_v63  ;;  %v3958_v44 = vand.u32 2147483648, %v6300_v63  ;;  %vm3952_vm13 = vweird.f32 %v6300_v63  ;;  %v3956_v17 = vand.u32 2147483647, %v6300_v63 }
 0xebc   :  { %v5117_v52 = vpop.eup %5116  ;;  %v3959_v2 = vor.u32 1.1754944e-38, %v3958_v44  ;;  %vm3957_vm2 = vcmp.eq.f32.partialorder %v3956_v17, 8.507059e+37  ;;  %v4283_v17 = vld [vmem:[#allocation3 + $0x3c] sm:$0x3] }
 0xebd   :  { %v5119_v16 = vpop.eup %5118  ;;  %v3901_v18 = vadd.f32 1.0, %v5117_v52 }
 0xebe   :  { %v3922_v60 = vadd.f32 1.0, %v5119_v16 }
 0xebf   :  { %5122 = vrcp.f32 %v3901_v18  ;;  %v3913_v5 = vand.u32 2147483648, %v3901_v18  ;;  %v3911_v34 = vand.u32 2147483647, %v3901_v18  ;;  %vm3907_vm7 = vweird.f32 %v3901_v18 }
 0xec0   :  { %5124 = vrcp.f32 %v3922_v60  ;;  %v5121_v6 = vpop.eup %5120  ;;  %v3934_v36 = vand.u32 2147483648, %v3922_v60  ;;  %v3932_v41 = vand.u32 2147483647, %v3922_v60  ;;  %vm3928_vm8 = vweird.f32 %v3922_v60 }
 0xec1   :  { %v3948_v31 = vmul.f32 %v5121_v6, %v6300_v63  ;;  %5126 = vtanh.f32 %v3939_v27  ;;  %v3914_v55 = vor.u32 1.1754944e-38, %v3913_v5  ;;  %vm3912_vm9 = vcmp.eq.f32.partialorder %v3911_v34, 8.507059e+37  ;;  %v4109_v63 = vld [vmem:[#allocation3 + $0x2a] sm:$0x3] }
 0xec2   :  { %v3935_v46 = vor.u32 1.1754944e-38, %v3934_v36  ;;  %vm3933_vm11 = vcmp.eq.f32.partialorder %v3932_v41, 8.507059e+37  ;;  %vm3953_vm12 = vweird.f32 %v5121_v6 }
 0xec3   :  { %v3949_v45 = vsub.f32 1.0, %v3948_v31  ;;  %vm3954_vm15 = vmor %vm3952_vm13, %vm3953_vm12 }
 0xec5   :  { %v5123_v3 = vpop.eup %5122  ;;  %v3950_v15 = vmul.f32 %v5121_v6, %v3949_v45 }
 0xec6   :  { %v5125_v19 = vpop.eup %5124  ;;  %v3903_v21 = vmul.f32 %v5123_v3, %v3901_v18  ;;  %vm3908_vm5 = vweird.f32 %v5123_v3 }
 0xec7   :  { %v3924_v24 = vmul.f32 %v5125_v19, %v3922_v60  ;;  %vm3929_vm6 = vweird.f32 %v5125_v19  ;;  %vm3909_vm0 = vmor %vm3907_vm7, %vm3908_vm5  ;;  %v5127_v28 = vpop.eup %5126  ;;  %v3951_v32 = vadd.f32 %v5121_v6, %v3950_v15 }
 0xec8   :  { %v3904_v56 = vsub.f32 1.0, %v3903_v21  ;;  %vm3930_vm10 = vmor %vm3928_vm8, %vm3929_vm6 }
 0xec9   :  { %v3925_v9 = vsub.f32 1.0, %v3924_v24  ;;  %v3955_v47 = vsel %vm3954_vm15, %v5121_v6, %v3951_v32 }
 0xeca   :  { %v3905_v30 = vmul.f32 %v5123_v3, %v3904_v56  ;;  %v3960_v43 = vsel %vm3957_vm2, %v3959_v2, %v3955_v47 }
 0xecb   :  { %v3926_v39 = vmul.f32 %v5125_v19, %v3925_v9 }
 0xecc   :  { %v3906_v53 = vadd.f32 %v5123_v3, %v3905_v30 }
 0xecd   :  { %v3927_v58 = vadd.f32 %v5125_v19, %v3926_v39 }
 0xece   :  { %v3910_v57 = vsel %vm3909_vm0, %v5123_v3, %v3906_v53 }
 0xecf   :  { %v3915_v33 = vsel %vm3912_vm9, %v3914_v55, %v3910_v57  ;;  %v3931_v11 = vsel %vm3930_vm10, %v5125_v19, %v3927_v58 }
 0xed0   :  { %v3963_v20 = vmul.f32 %v5127_v28, %v3915_v33  ;;  %v3936_v22 = vsel %vm3933_vm11, %v3935_v46, %v3931_v11 }
 0xed1   :  { %v3962_v51 = vmul.f32 %v3936_v22, %v6259_v10  ;;  %v4088_v10 = vld [vmem:[#allocation3 + $0x1a] sm:$0x3] }
 0xed3   :  { %v6311_v23 = vadd.f32 %v3963_v20, %v3962_v51 }
 0xed5   :  { %5128 = vtanh.f32 %v6311_v23 }
 0xedb   :  { %v5129_v14 = vpop.eup %5128 }
 0xedc   :  { %v3966_v54 = vmul.f32 %v5129_v14, %v3960_v43  ;;  %v4238_v43 = vld [vmem:[#allocation3 + $0xc] sm:$0x3] }
 0xede   :  { %4748 = vmatmul.msk.f32.vlgmr.msra.gmra.mxu2 %vm96_vm1, %v3966_v54  ;;  %3967 = vst.msk [vmem:[#allocation2 + $0x8] sm:$0x3] %vm355_vm14, %v3966_v54  ;;  %4749 = vmatmul.msk.f32.vlgmr.msrb.gmra.mxu3 %vm96_vm1, %v3966_v54 }
 0xedf   :  { %4750 = vmatmul.msk.f32.vlgmr.msrb.gmra.mxu0 %vm96_vm1, %v3966_v54  ;;  %4751 = vmatmul.msk.f32.vlgmr.msrb.gmra.mxu1 %vm96_vm1, %v3966_v54 }
 0xee0   :  { %4329 = vmatpush.msra.mxu2 %v6215_v25  ;;  %4353 = vmatpush.msrb.mxu3 %v6217_v35  ;;  %v4112_v35 = vld [vmem:[#allocation3 + $0x3a] sm:$0x3] }
 0xee1   :  { %4377 = vmatpush.msrb.mxu0 %v6278_v7  ;;  %4401 = vmatpush.msrb.mxu1 %v6280_v8 }
 0xee2   :  { %4330 = vmatpush.msra.mxu2 %v6219_v40  ;;  %4354 = vmatpush.msrb.mxu3 %v6223_v37 }
 0xee3   :  { %4378 = vmatpush.msrb.mxu0 %v6225_v38  ;;  %4402 = vmatpush.msrb.mxu1 %v6282_v1 }
 0xee4   :  { %4331 = vmatpush.msra.mxu2 %v6228_v42  ;;  %4355 = vmatpush.msrb.mxu3 %v6230_v29  ;;  %v4067_v42 = vld [vmem:[#allocation3 + $0xa] sm:$0x3] }
 0xee5   :  { %4379 = vmatpush.msrb.mxu0 %v6232_v4  ;;  %4403 = vmatpush.msrb.mxu1 %v6286_v61 }
 0xee6   :  { %4332 = vmatpush.msra.mxu2 %v6237_v0  ;;  %4356 = vmatpush.msrb.mxu3 %v6239_v12 }
 0xee7   :  { %4380 = vmatpush.msrb.mxu0 %v6290_v59  ;;  %4404 = vmatpush.msrb.mxu1 %v6292_v50 }
 0xf5c   :  { %v4064_v25 = vpop.f32.mrf.mxu1  ;;  %v4040_v50 = vpop.f32.mrf.mxu0 }
 0xf5d   :  { %v4113_v40 = vadd.f32 %v4112_v35, %v4064_v25  ;;  %v4110_v16 = vadd.f32 %v4109_v63, %v4040_v50  ;;  %v4259_v25 = vld [vmem:[#allocation3 + $0x1c] sm:$0x3] }
 0xf5f   :  { %v4754_v37 = vmul.f32 -1.442695, %v4113_v40 }
 0xf61   :  { %5130 = vpow2.f32 %v4754_v37  ;;  %v3992_v38 = vpop.f32.mrf.mxu2  ;;  %v4016_v29 = vpop.f32.mrf.mxu3 }
 0xf62   :  { %v4068_v4 = vadd.f32 %v4067_v42, %v3992_v38  ;;  %v4089_v7 = vadd.f32 %v4088_v10, %v4016_v29 }
 0xf64   :  { %v4752_v8 = vmul.f32 -1.442695, %v4068_v4  ;;  %v4753_v1 = vmul.f32 -1.442695, %v4089_v7 }
 0xf66   :  { %5132 = vpow2.f32 %v4752_v8 }
 0xf67   :  { %v5131_v0 = vpop.eup %5130  ;;  %5134 = vpow2.f32 %v4753_v1  ;;  %v4496_v1 = vld [vmem:[%s6422_s6 + $0x18] sm:$0xff] }
 0xf68   :  { %v4117_v12 = vadd.f32 1.0, %v5131_v0  ;;  %v4495_v0 = vld [vmem:[%s6422_s6 + $0x10] sm:$0xff] }
 0xf6a   :  { %5136 = vrcp.f32 %v4117_v12  ;;  %v4129_v11 = vand.u32 2147483648, %v4117_v12  ;;  %vm4123_vm12 = vweird.f32 %v4117_v12  ;;  %v4127_v15 = vand.u32 2147483647, %v4117_v12 }
 0xf6c   :  { %v5133_v61 = vpop.eup %5132  ;;  %v4130_v22 = vor.u32 1.1754944e-38, %v4129_v11  ;;  %vm4128_vm15 = vcmp.eq.f32.partialorder %v4127_v15, 8.507059e+37 }
 0xf6d   :  { %v5135_v26 = vpop.eup %5134  ;;  %v4072_v62 = vadd.f32 1.0, %v5133_v61 }
 0xf6e   :  { %v4093_v59 = vadd.f32 1.0, %v5135_v26  ;;  %v4493_v26 = vld [vmem:[%s6422_s6] sm:$0xff] }
 0xf6f   :  { %5138 = vrcp.f32 %v4072_v62  ;;  %v4084_v3 = vand.u32 2147483648, %v4072_v62  ;;  %v4082_v21 = vand.u32 2147483647, %v4072_v62  ;;  %vm4078_vm6 = vweird.f32 %v4072_v62 }
 0xf70   :  { %5140 = vrcp.f32 %v4093_v59  ;;  %v5137_v13 = vpop.eup %5136  ;;  %v4105_v24 = vand.u32 2147483648, %v4093_v59  ;;  %v4103_v56 = vand.u32 2147483647, %v4093_v59  ;;  %vm4099_vm0 = vweird.f32 %v4093_v59 }
 0xf71   :  { %v4119_v6 = vmul.f32 %v5137_v13, %v4117_v12  ;;  %5142 = vtanh.f32 %v4110_v16  ;;  %v4085_v30 = vor.u32 1.1754944e-38, %v4084_v3  ;;  %vm4083_vm8 = vcmp.eq.f32.partialorder %v4082_v21, 8.507059e+37  ;;  %v4494_v12 = vld [vmem:[%s6422_s6 + $0x8] sm:$0xff] }
 0xf72   :  { %v4106_v39 = vor.u32 1.1754944e-38, %v4105_v24  ;;  %vm4104_vm10 = vcmp.eq.f32.partialorder %v4103_v56, 8.507059e+37  ;;  %vm4124_vm11 = vweird.f32 %v5137_v13 }
 0xf73   :  { %v4120_v5 = vsub.f32 1.0, %v4119_v6  ;;  %vm4125_vm13 = vmor %vm4123_vm12, %vm4124_vm11 }
 0xf75   :  { %v5139_v52 = vpop.eup %5138  ;;  %v4121_v55 = vmul.f32 %v5137_v13, %v4120_v5 }
 0xf76   :  { %v5141_v18 = vpop.eup %5140  ;;  %v4074_v60 = vmul.f32 %v5139_v52, %v4072_v62  ;;  %vm4079_vm4 = vweird.f32 %v5139_v52 }
 0xf77   :  { %v4095_v48 = vmul.f32 %v5141_v18, %v4093_v59  ;;  %vm4100_vm5 = vweird.f32 %v5141_v18  ;;  %vm4080_vm7 = vmor %vm4078_vm6, %vm4079_vm4  ;;  %v5143_v41 = vpop.eup %5142  ;;  %v4122_v33 = vadd.f32 %v5137_v13, %v4121_v55  ;;  %v4280_v59 = vld [vmem:[#allocation3 + $0x2c] sm:$0x3] }
 0xf78   :  { %v4075_v49 = vsub.f32 1.0, %v4074_v60  ;;  %vm4101_vm9 = vmor %vm4099_vm0, %vm4100_vm5 }
 0xf79   :  { %v4096_v27 = vsub.f32 1.0, %v4095_v48  ;;  %v4126_v20 = vsel %vm4125_vm13, %v5137_v13, %v4122_v33 }
 0xf7a   :  { %v4076_v19 = vmul.f32 %v5139_v52, %v4075_v49  ;;  %v4131_v32 = vsel %vm4128_vm15, %v4130_v22, %v4126_v20  ;;  %vm4528_vm15 = vcmask 1024  }
 0xf7b   :  { %v4097_v31 = vmul.f32 %v5141_v18, %v4096_v27 }
 0xf7c   :  { %v4077_v9 = vadd.f32 %v5139_v52, %v4076_v19 }
 0xf7d   :  { %v4098_v34 = vadd.f32 %v5141_v18, %v4097_v31 }
 0xf7e   :  { %v4081_v36 = vsel %vm4080_vm7, %v5139_v52, %v4077_v9 }
 0xf7f   :  { %v4086_v45 = vsel %vm4083_vm8, %v4085_v30, %v4081_v36  ;;  %v4102_v53 = vsel %vm4101_vm9, %v5141_v18, %v4098_v34 }
 0xf80   :  { %v4134_v58 = vmul.f32 %v5143_v41, %v4086_v45  ;;  %v4107_v57 = vsel %vm4104_vm10, %v4106_v39, %v4102_v53 }
 0xf81   :  { %v4133_v46 = vmul.f32 %v4107_v57, %v6311_v23 }
 0xf83   :  { %v6339_v28 = vadd.f32 %v4134_v58, %v4133_v46 }
 0xf85   :  { %5144 = vtanh.f32 %v6339_v28 }
 0xf8b   :  { %v5145_v51 = vpop.eup %5144 }
 0xf8c   :  { %v4137_v44 = vmul.f32 %v5145_v51, %v4131_v32 }
 0xf8e   :  { %4755 = vmatmul.msk.f32.vlgmr.msrb.gmra.mxu2 %vm96_vm1, %v4137_v44  ;;  %4138 = vst.msk [vmem:[#allocation2 + $0xa] sm:$0x3] %vm355_vm14, %v4137_v44  ;;  %4756 = vmatmul.msk.f32.vlgmr.msra.gmra.mxu3 %vm96_vm1, %v4137_v44 }
 0xf8f   :  { %4757 = vmatmul.msk.f32.vlgmr.msra.gmra.mxu0 %vm96_vm1, %v4137_v44  ;;  %4758 = vmatmul.msk.f32.vlgmr.msra.gmra.mxu1 %vm96_vm1, %v4137_v44  ;;  %v4454_v44 = vld [vmem:[#allocation3 + $0x3e] sm:$0x3] }
 0xf90   :  { %4517 = vmatpush.msrb.mxu2 %v4496_v1 }
 0xf92   :  { %4518 = vmatpush.msrb.mxu2 %v4495_v0 }
 0xf94   :  { %4519 = vmatpush.msrb.mxu2 %v4494_v12 }
 0xf96   :  { %4520 = vmatpush.msrb.mxu2 %v4493_v26 }
0x100c   :  { %v4235_v23 = vpop.f32.mrf.mxu1  ;;  %v4211_v61 = vpop.f32.mrf.mxu0 }
0x100d   :  { %v4284_v47 = vadd.f32 %v4283_v17, %v4235_v23  ;;  %v4281_v13 = vadd.f32 %v4280_v59, %v4211_v61  ;;  %v4451_v61 = vld [vmem:[#allocation3 + $0x2e] sm:$0x3] }
0x100f   :  { %v4761_v2 = vmul.f32 -1.442695, %v4284_v47 }
0x1011   :  { %5146 = vpow2.f32 %v4761_v2  ;;  %v4163_v14 = vpop.f32.mrf.mxu2  ;;  %v4187_v54 = vpop.f32.mrf.mxu3  ;;  %v4409_v2 = vld [vmem:[#allocation3 + $0xe] sm:$0x3] }
0x1012   :  { %v4239_v35 = vadd.f32 %v4238_v43, %v4163_v14  ;;  %v4260_v40 = vadd.f32 %v4259_v25, %v4187_v54  ;;  %v4430_v43 = vld [vmem:[#allocation3 + $0x1e] sm:$0x3] }
0x1014   :  { %v4759_v37 = vmul.f32 -1.442695, %v4239_v35  ;;  %v4760_v38 = vmul.f32 -1.442695, %v4260_v40 }
0x1016   :  { %5148 = vpow2.f32 %v4759_v37 }
0x1017   :  { %v5147_v42 = vpop.eup %5146  ;;  %5150 = vpow2.f32 %v4760_v38  ;;  %v4498_v38 = vstv %s6423_s7 }
0x1018   :  { %v6347_v29 = vadd.f32 1.0, %v5147_v42 }
0x101a   :  { %5152 = vrcp.f32 %v6347_v29  ;;  %v4300_v46 = vand.u32 2147483648, %v6347_v29  ;;  %vm4294_vm11 = vweird.f32 %v6347_v29  ;;  %v4298_v33 = vand.u32 2147483647, %v6347_v29 }
0x101c   :  { %v5149_v10 = vpop.eup %5148  ;;  %v4301_v15 = vor.u32 1.1754944e-38, %v4300_v46  ;;  %vm4299_vm13 = vcmp.eq.f32.partialorder %v4298_v33, 8.507059e+37 }
0x101d   :  { %v5151_v4 = vpop.eup %5150  ;;  %v4243_v7 = vadd.f32 1.0, %v5149_v10 }
0x101e   :  { %v4264_v8 = vadd.f32 1.0, %v5151_v4 }
0x101f   :  { %5154 = vrcp.f32 %v4243_v7  ;;  %v4255_v48 = vand.u32 2147483648, %v4243_v7  ;;  %v4253_v3 = vand.u32 2147483647, %v4243_v7  ;;  %vm4249_vm5 = vweird.f32 %v4243_v7 }
0x1020   :  { %5156 = vrcp.f32 %v4264_v8  ;;  %v5153_v62 = vpop.eup %5152  ;;  %v4276_v27 = vand.u32 2147483648, %v4264_v8  ;;  %v4274_v21 = vand.u32 2147483647, %v4264_v8  ;;  %vm4270_vm7 = vweird.f32 %v4264_v8 }
0x1021   :  { %v4290_v18 = vmul.f32 %v5153_v62, %v6347_v29  ;;  %5158 = vtanh.f32 %v4281_v13  ;;  %v4256_v56 = vor.u32 1.1754944e-38, %v4255_v48  ;;  %vm4254_vm0 = vcmp.eq.f32.partialorder %v4253_v3, 8.507059e+37 }
0x1022   :  { %v4277_v30 = vor.u32 1.1754944e-38, %v4276_v27  ;;  %vm4275_vm9 = vcmp.eq.f32.partialorder %v4274_v21, 8.507059e+37  ;;  %vm4295_vm10 = vweird.f32 %v5153_v62 }
0x1023   :  { %v4291_v24 = vsub.f32 1.0, %v4290_v18  ;;  %vm4296_vm12 = vmor %vm4294_vm11, %vm4295_vm10 }
0x1025   :  { %v5155_v50 = vpop.eup %5154  ;;  %v4292_v41 = vmul.f32 %v5153_v62, %v4291_v24 }
0x1026   :  { %v5157_v63 = vpop.eup %5156  ;;  %v4245_v52 = vmul.f32 %v5155_v50, %v4243_v7  ;;  %vm4250_vm2 = vweird.f32 %v5155_v50 }
0x1027   :  { %v4266_v16 = vmul.f32 %v5157_v63, %v4264_v8  ;;  %vm4271_vm4 = vweird.f32 %v5157_v63  ;;  %vm4251_vm6 = vmor %vm4249_vm5, %vm4250_vm2  ;;  %v5159_v34 = vpop.eup %5158  ;;  %v4293_v57 = vadd.f32 %v5153_v62, %v4292_v41 }
0x1028   :  { %v4246_v60 = vsub.f32 1.0, %v4245_v52  ;;  %vm4272_vm8 = vmor %vm4270_vm7, %vm4271_vm4 }
0x1029   :  { %v4267_v6 = vsub.f32 1.0, %v4266_v16  ;;  %v4297_v11 = vsel %vm4296_vm12, %v5153_v62, %v4293_v57 }
0x102a   :  { %v4247_v49 = vmul.f32 %v5155_v50, %v4246_v60  ;;  %v4302_v22 = vsel %vm4299_vm13, %v4301_v15, %v4297_v11 }
0x102b   :  { %v4268_v19 = vmul.f32 %v5157_v63, %v4267_v6 }
0x102c   :  { %v4248_v31 = vadd.f32 %v5155_v50, %v4247_v49 }
0x102d   :  { %v4269_v5 = vadd.f32 %v5157_v63, %v4268_v19 }
0x102e   :  { %v4252_v9 = vsel %vm4251_vm6, %v5155_v50, %v4248_v31 }
0x102f   :  { %v4257_v36 = vsel %vm4254_vm0, %v4256_v56, %v4252_v9  ;;  %v4273_v39 = vsel %vm4272_vm8, %v5157_v63, %v4269_v5 }
0x1030   :  { %v4305_v45 = vmul.f32 %v5159_v34, %v4257_v36  ;;  %v4278_v53 = vsel %vm4275_vm9, %v4277_v30, %v4273_v39 }
0x1031   :  { %v4304_v55 = vmul.f32 %v4278_v53, %v6339_v28  ;;  %v4491_v28 = vld [vmem:[#allocation2] sm:$0xff] }
0x1033   :  { %v6364_v58 = vadd.f32 %v4305_v45, %v4304_v55 }
0x1035   :  { %5160 = vtanh.f32 %v6364_v58 }
0x103b   :  { %v5161_v20 = vpop.eup %5160 }
0x103c   :  { %v4308_v51 = vmul.f32 %v5161_v20, %v4302_v22 }
0x103e   :  { %4762 = vmatmul.msk.f32.vlgmr.msra.gmra.mxu2 %vm96_vm1, %v4308_v51  ;;  %4309 = vst.msk [vmem:[#allocation2 + $0xc] sm:$0x3] %vm355_vm14, %v4308_v51  ;;  %4763 = vmatmul.msk.f32.vlgmr.msrb.gmra.mxu3 %vm96_vm1, %v4308_v51 }
0x103f   :  { %4764 = vmatmul.msk.f32.vlgmr.msrb.gmra.mxu0 %vm96_vm1, %v4308_v51  ;;  %4765 = vmatmul.msk.f32.vlgmr.msrb.gmra.mxu1 %vm96_vm1, %v4308_v51 }
0x1046   :  { %4769 = vmatmul.msk.f32.vlgmr.msrb.gmra.mxu2 %vm96_vm1, %v4491_v28 }
0x10bc   :  { %v4406_v32 = vpop.f32.mrf.mxu1  ;;  %v4382_v0 = vpop.f32.mrf.mxu0 }
0x10bd   :  { %v4455_v23 = vadd.f32 %v4454_v44, %v4406_v32  ;;  %v4452_v62 = vadd.f32 %v4451_v61, %v4382_v0 }
0x10bf   :  { %v4768_v17 = vmul.f32 -1.442695, %v4455_v23 }
0x10c1   :  { %5162 = vpow2.f32 %v4768_v17  ;;  %v4334_v47 = vpop.f32.mrf.mxu2  ;;  %v4358_v14 = vpop.f32.mrf.mxu3 }
0x10c2   :  { %v4410_v54 = vadd.f32 %v4409_v2, %v4334_v47  ;;  %v4431_v25 = vadd.f32 %v4430_v43, %v4358_v14 }
0x10c4   :  { %v4766_v35 = vmul.f32 -1.442695, %v4410_v54  ;;  %v4767_v40 = vmul.f32 -1.442695, %v4431_v25 }
0x10c6   :  { %5164 = vpow2.f32 %v4766_v35 }
0x10c7   :  { %v5163_v37 = vpop.eup %5162  ;;  %5166 = vpow2.f32 %v4767_v40 }
0x10c8   :  { %v6379_v29 = vadd.f32 1.0, %v5163_v37 }
0x10c9   :  { %v4522_v42 = vpop.f32.mrf.mxu2 }
0x10ca   :  { %v4523_v10 = vadd.f32 %v4522_v42, %v4498_v38  ;;  %5168 = vrcp.f32 %v6379_v29  ;;  %v4471_v55 = vand.u32 2147483648, %v6379_v29  ;;  %vm4465_vm11 = vweird.f32 %v6379_v29 }
0x10cb   :  { %v4469_v46 = vand.u32 2147483647, %v6379_v29 }
0x10cc   :  { %v5165_v4 = vpop.eup %5164  ;;  %4541 = vrot.lane.b32.xlu1 %v4523_v10, %s5264_s14  ;;  %4536 = vrot.lane.b32.xlu0 %v4523_v10, %s5265_s8  ;;  %4529 = vst.msk [vmem:[#allocation10] sm:$0x3] %vm4528_vm15, %v4523_v10  ;;  %v4472_v33 = vor.u32 1.1754944e-38, %v4471_v55  ;;  %vm4534_vm15 = vcmask 11274  }
0x10cd   :  { %v5167_v7 = vpop.eup %5166  ;;  %v4414_v8 = vadd.f32 1.0, %v5165_v4  ;;  %4531 = vrot.lane.b32.xlu2 %v4523_v10, %s5266_s3  ;;  %vm4470_vm13 = vcmp.eq.f32.partialorder %v4469_v46, 8.507059e+37 }
0x10ce   :  { %v4435_v1 = vadd.f32 1.0, %v5167_v7 }
0x10cf   :  { %5170 = vrcp.f32 %v4414_v8  ;;  %v4426_v16 = vand.u32 2147483648, %v4414_v8  ;;  %v4424_v48 = vand.u32 2147483647, %v4414_v8  ;;  %vm4420_vm5 = vweird.f32 %v4414_v8 }
0x10d0   :  { %5172 = vrcp.f32 %v4435_v1  ;;  %v5169_v12 = vpop.eup %5168  ;;  %v4447_v6 = vand.u32 2147483648, %v4435_v1  ;;  %v4445_v3 = vand.u32 2147483647, %v4435_v1  ;;  %vm4441_vm7 = vweird.f32 %v4435_v1 }
0x10d1   :  { %v4461_v63 = vmul.f32 %v5169_v12, %v6379_v29  ;;  %5174 = vtanh.f32 %v4452_v62  ;;  %v4427_v21 = vor.u32 1.1754944e-38, %v4426_v16  ;;  %vm4425_vm0 = vcmp.eq.f32.partialorder %v4424_v48, 8.507059e+37 }
0x10d2   :  { %v4448_v56 = vor.u32 1.1754944e-38, %v4447_v6  ;;  %vm4446_vm9 = vcmp.eq.f32.partialorder %v4445_v3, 8.507059e+37  ;;  %vm4466_vm10 = vweird.f32 %v5169_v12 }
0x10d3   :  { %v4462_v27 = vsub.f32 1.0, %v4461_v63  ;;  %vm4467_vm12 = vmor %vm4465_vm11, %vm4466_vm10 }
0x10d5   :  { %v5171_v26 = vpop.eup %5170  ;;  %v4463_v34 = vmul.f32 %v5169_v12, %v4462_v27 }
0x10d6   :  { %v5173_v59 = vpop.eup %5172  ;;  %v4416_v50 = vmul.f32 %v5171_v26, %v4414_v8  ;;  %vm4421_vm2 = vweird.f32 %v5171_v26 }
0x10d7   :  { %v4437_v13 = vmul.f32 %v5173_v59, %v4435_v1  ;;  %vm4442_vm4 = vweird.f32 %v5173_v59  ;;  %vm4422_vm6 = vmor %vm4420_vm5, %vm4421_vm2  ;;  %v5175_v5 = vpop.eup %5174  ;;  %v4464_v53 = vadd.f32 %v5169_v12, %v4463_v34  ;;  %vm4539_vm2 = vcmask 21524  }
0x10d8   :  { %v4417_v52 = vsub.f32 1.0, %v4416_v50  ;;  %vm4443_vm8 = vmor %vm4441_vm7, %vm4442_vm4  ;;  %vm4544_vm4 = vcmask 31774   ;;  %vm4565_vm5 = vcmask 64574  }
0x10d9   :  { %v4438_v18 = vsub.f32 1.0, %v4437_v13 }
0x10da   :  { %v4418_v60 = vmul.f32 %v5171_v26, %v4417_v52 }
0x10db   :  { %v4439_v49 = vmul.f32 %v5173_v59, %v4438_v18 }
0x10dc   :  { %v4419_v19 = vadd.f32 %v5171_v26, %v4418_v60 }
0x10dd   :  { %v4440_v24 = vadd.f32 %v5173_v59, %v4439_v49 }
0x10de   :  { %v4423_v31 = vsel %vm4422_vm6, %v5171_v26, %v4419_v19 }
0x10df   :  { %v4428_v9 = vsel %vm4425_vm0, %v4427_v21, %v4423_v31  ;;  %v4444_v30 = vsel %vm4443_vm8, %v5173_v59, %v4440_v24 }
0x10e0   :  { %v4476_v36 = vmul.f32 %v5175_v5, %v4428_v9  ;;  %v4449_v39 = vsel %vm4446_vm9, %v4448_v56, %v4444_v30 }
0x10e1   :  { %v4475_v41 = vmul.f32 %v4449_v39, %v6364_v58  ;;  %v4468_v58 = vsel %vm4467_vm12, %v5169_v12, %v4464_v53 }
0x10e2   :  { %v4473_v15 = vsel %vm4470_vm13, %v4472_v33, %v4468_v58 }
0x10e3   :  { %v4477_v45 = vadd.f32 %v4476_v36, %v4475_v41 }
0x10e5   :  { %5176 = vtanh.f32 %v4477_v45  ;;  %v4487_v57 = vrot.slane %v4477_v45, 1  ;;  %4489 = vst.msk [vmem:[%s6428_s12 + $0x2] sm:$0x1] %vm1557_vm3, %v4477_v45 }
0x10e7   :  { %4490 = vst.msk [vmem:[%s6428_s12 + $0x6] sm:$0x1] %vm1557_vm3, %v4487_v57 }
0x10eb   :  { %v5177_v11 = vpop.eup %5176 }
0x10ec   :  { %v4479_v20 = vmul.f32 %v5177_v11, %v4473_v15 }
0x10ee   :  { %v4482_v22 = vrot.slane %v4479_v20, 1  ;;  %4484 = vst.msk [vmem:[%s6427_s11 + $0x2] sm:$0x1] %vm1557_vm3, %v4479_v20 }
0x10ef   :  { %4480 = vst.msk [vmem:[#allocation2 + $0xe] sm:$0x3] %vm355_vm14, %v4479_v20  ;;  %vm4555_vm14 = vcmask 44074  }
0x10f0   :  { %4485 = vst.msk [vmem:[%s6427_s11 + $0x6] sm:$0x1] %vm1557_vm3, %v4482_v22  ;;  %s5268_s11 = smov 5   ;;  %vm4560_vm3 = vcmask 54324  }
0x10f6   :  { %v4492_v51 = vld [vmem:[#allocation2 + $0x8] sm:$0xff] }
0x10f7   :  { %4770 = vmatmul.msk.f32.gmra.mxu2 %vm96_vm1, %v4492_v51  ;;  %vm4550_vm1 = vcmask 33824  }
0x1127   :  { %v4532_v28 = vpop.permute.xlu2 %4531 }
0x1128   :  { %4535 = vst.msk [vmem:[#allocation10 - $0x2] sm:$0xc] %vm4534_vm15, %v4532_v28 }
0x113e   :  { %v4542_v32 = vpop.permute.xlu1 %4541  ;;  %v4537_v44 = vpop.permute.xlu0 %4536 }
0x113f   :  { %4540 = vst.msk [vmem:[#allocation10 - $0x4] sm:$0x30] %vm4539_vm2, %v4537_v44 }
0x1140   :  { %4545 = vst.msk [vmem:[#allocation10 - $0x6] sm:$0xc0] %vm4544_vm4, %v4542_v32 }
0x117a   :  { %v4525_v23 = vpop.f32.mrf.mxu2 }
0x117b   :  { %v4526_v17 = vadd.f32 %v4525_v23, %v4498_v38 }
0x117d   :  { %4557 = vrot.lane.b32.xlu1 %v4526_v17, %s5267_s22  ;;  %4552 = vrot.lane.b32.xlu0 %v4526_v17, %s5268_s11 }
0x117e   :  { %4547 = vrot.lane.b32.xlu2 %v4526_v17, %s5269_s1 }
0x1186   :  { %4562 = vrot.lane.b32.xlu2 %v4526_v17, %s5270_s2 }
0x11d8   :  { %v4548_v47 = vpop.permute.xlu2 %4547 }
0x11d9   :  { %4551 = vst.msk [vmem:[#allocation10] sm:$0x3] %vm4550_vm1, %v4548_v47 }
0x11e0   :  { %v4563_v43 = vpop.permute.xlu2 %4562 }
0x11ef   :  { %v4558_v2 = vpop.permute.xlu1 %4557  ;;  %v4553_v14 = vpop.permute.xlu0 %4552 }
0x11f0   :  { %4556 = vst.msk [vmem:[#allocation10 - $0x2] sm:$0xc] %vm4555_vm14, %v4553_v14 }
0x11f1   :  { %4561 = vst.msk [vmem:[#allocation10 - $0x4] sm:$0x30] %vm4560_vm3, %v4558_v2 }
0x11f2   :  { %4566 = vst.msk [vmem:[#allocation10 - $0x6] sm:$0xc0] %vm4565_vm5, %v4563_v43 }
0x11f3   :  { %4577 = dma.vmem_to_hbm [thread:$0]  %s4573_s25, 32, %s4575_s23, [#allocation7]  }
0x11f4   :  { %5254 = dma.done.wait [#allocation7], 32  }
0x11f5   :  { %5255 = vsyncadd [#allocation7], 4294967264 }
0x11f6   :  { %4590 = vsyncpa [#allocation6], 1 }
0x11f7   :  { %4591 = vsyncpa [#allocation9], 1 }
0x11f8   :  { %4592 = vsyncpa [#allocation7], 1 }

</bundles_post_ra>
